<compile_context>
chip_gen: v5e
topology: v5e:2x2
jax: 0.10.0
libtpu: 0.0.40
codegen_flags: <defaults>
</compile_context>

<pallas_src>
import functools
import math

import jax
import jax.numpy as jnp
from jax import lax
from jax.experimental import pallas as pl
from jax.experimental.pallas import tpu as pltpu

_LOG2PI = math.log(2.0 * math.pi)


# ---------------------------------------------------------------------------
# Pallas kernels
# ---------------------------------------------------------------------------

def _mm_bias_kernel(x_ref, w_ref, b_ref, o_ref, *, relu):
    """out = x @ w + b (optional ReLU).  w / b have constant index_maps -> resident in VMEM."""
    y = jnp.dot(x_ref[...], w_ref[...], preferred_element_type=jnp.float32) + b_ref[...]
    if relu:
        y = jnp.maximum(y, 0.0)
    o_ref[...] = y.astype(o_ref.dtype)


def _encoder_head_kernel(h_ref, wmu_ref, bmu_ref, wlv_ref, blv_ref, eps_ref,
                         wdec_ref, bdec_ref, hdec_ref, logq_ref, logpz_ref):
    """Fused: fc_mu, fc_log_var, reparameterization, log q(z|x), log p(z), decoder fc."""
    h = h_ref[...]                                                  # (bb, 3136)
    mu = jnp.dot(h, wmu_ref[...], preferred_element_type=jnp.float32) + bmu_ref[...]
    lv = jnp.dot(h, wlv_ref[...], preferred_element_type=jnp.float32) + blv_ref[...]
    eps = eps_ref[...]
    z = mu + jnp.exp(0.5 * lv) * eps                                # reparameterization

    q_terms = -0.5 * (lv + (z - mu) ** 2 / jnp.exp(lv) + _LOG2PI)   # (bb, zd)
    p_terms = -0.5 * (z * z + _LOG2PI)                              # (bb, zd)

    # Lane-dense per-sample reductions: (1, zd) . (bb, zd)^T -> (1, bb) on the MXU
    # (avoids (bb, 1) masked partial stores).
    ones = jnp.ones((1, q_terms.shape[1]), jnp.float32)
    nt = (((1,), (1,)), ((), ()))
    logq_ref[...] = lax.dot_general(ones, q_terms, nt, preferred_element_type=jnp.float32)
    logpz_ref[...] = lax.dot_general(ones, p_terms, nt, preferred_element_type=jnp.float32)

    hdec_ref[...] = (jnp.dot(z, wdec_ref[...], preferred_element_type=jnp.float32)
                     + bdec_ref[...]).astype(hdec_ref.dtype)


def _deconv2_kernel(p_ref, w_ref, b_ref, o_ref):
    """Final transposed conv (single output channel) as a lane-dense (1, 784) matvec per sample."""
    p = p_ref[0]                                                    # (K, P) = (512, 784)
    logits = jnp.dot(w_ref[...], p, preferred_element_type=jnp.float32) + b_ref[...]  # (1, P)
    o_ref[...] = logits[None].astype(o_ref.dtype)                   # (1, 1, P)


def _bce_nelbo_kernel(logits_ref, x_ref, logq_ref, logpz_ref, out_ref):
    """Fused BCE-with-logits + per-sample pixel sum + NELBO combine, lane-dense (1, bb) output."""
    l = logits_ref[...]                                             # (bb, P)
    x = x_ref[...]
    bce = jnp.maximum(l, 0.0) - l * x + jnp.log(1.0 + jnp.exp(-jnp.abs(l)))
    ones = jnp.ones((1, l.shape[1]), jnp.float32)
    nt = (((1,), (1,)), ((), ()))
    log_px = -lax.dot_general(ones, bce, nt, preferred_element_type=jnp.float32)  # (1, bb)
    out_ref[...] = logq_ref[...] - logpz_ref[...] - log_px


# ---------------------------------------------------------------------------
# pallas_call wrappers
# ---------------------------------------------------------------------------

_PAR = pltpu.CompilerParams(dimension_semantics=("parallel",))


def _pick_tile(m, preferred, multiple):
    """Largest preferred tile dividing m that respects the layout multiple, else the full dim."""
    for t in preferred:
        if t % multiple == 0 and m % t == 0:
            return t
    return m  # full-array block is always legal


def _matmul_bias(x, wmat, b, relu):
    """Tiled (M, K) @ (K, N) + b with resident weights; grid pipelined over M tiles."""
    m, k = x.shape
    n = wmat.shape[1]
    tm = _pick_tile(m, (1024, 512, 256, 128), 8)
    return pl.pallas_call(
        functools.partial(_mm_bias_kernel, relu=relu),
        out_shape=jax.ShapeDtypeStruct((m, n), jnp.float32),
        grid=(m // tm,),
        in_specs=[pl.BlockSpec((tm, k), lambda i: (i, 0)),
                  pl.BlockSpec((k, n), lambda i: (0, 0)),
                  pl.BlockSpec((1, n), lambda i: (0, 0))],
        out_specs=pl.BlockSpec((tm, n), lambda i: (i, 0)),
        compiler_params=_PAR,
    )(x, wmat, b)


def _encoder_head(h, eps, p):
    b, f = h.shape
    zd = eps.shape[1]
    bb = _pick_tile(b, (512, 256, 128), 128)   # 128-multiple: lane-dense (1, bb) outputs
    return pl.pallas_call(
        _encoder_head_kernel,
        out_shape=(jax.ShapeDtypeStruct((b, f), jnp.float32),
                   jax.ShapeDtypeStruct((1, b), jnp.float32),
                   jax.ShapeDtypeStruct((1, b), jnp.float32)),
        grid=(b // bb,),
        in_specs=[pl.BlockSpec((bb, f), lambda i: (i, 0)),
                  pl.BlockSpec((f, zd), lambda i: (0, 0)),
                  pl.BlockSpec((1, zd), lambda i: (0, 0)),
                  pl.BlockSpec((f, zd), lambda i: (0, 0)),
                  pl.BlockSpec((1, zd), lambda i: (0, 0)),
                  pl.BlockSpec((bb, zd), lambda i: (i, 0)),
                  pl.BlockSpec((zd, f), lambda i: (0, 0)),
                  pl.BlockSpec((1, f), lambda i: (0, 0))],
        out_specs=(pl.BlockSpec((bb, f), lambda i: (i, 0)),
                   pl.BlockSpec((1, bb), lambda i: (0, i)),
                   pl.BlockSpec((1, bb), lambda i: (0, i))),
        compiler_params=_PAR,
    )(h,
      p["fc_mu_w"].T, p["fc_mu_b"][None, :],
      p["fc_lv_w"].T, p["fc_lv_b"][None, :],
      eps,
      p["dec_fc_w"].T, p["dec_fc_b"][None, :])


def _deconv2(patches_t, wmat, bias):
    b, k, pix = patches_t.shape
    out = pl.pallas_call(
        _deconv2_kernel,
        out_shape=jax.ShapeDtypeStruct((b, 1, pix), jnp.float32),
        grid=(b,),
        in_specs=[pl.BlockSpec((1, k, pix), lambda bi: (bi, 0, 0)),
                  pl.BlockSpec((1, k), lambda bi: (0, 0)),
                  pl.BlockSpec((1, 1), lambda bi: (0, 0))],
        out_specs=pl.BlockSpec((1, 1, pix), lambda bi: (bi, 0, 0)),
        compiler_params=_PAR,
    )(patches_t, wmat.reshape(1, k), bias.reshape(1, 1).astype(jnp.float32))
    return out.reshape(b, pix)


def _bce_nelbo(logits, x_flat, logq, logpz):
    b, pix = logits.shape
    bb = _pick_tile(b, (512, 256, 128), 128)
    nelbo = pl.pallas_call(
        _bce_nelbo_kernel,
        out_shape=jax.ShapeDtypeStruct((1, b), jnp.float32),
        grid=(b // bb,),
        in_specs=[pl.BlockSpec((bb, pix), lambda i: (i, 0)),
                  pl.BlockSpec((bb, pix), lambda i: (i, 0)),
                  pl.BlockSpec((1, bb), lambda i: (0, i)),
                  pl.BlockSpec((1, bb), lambda i: (0, i))],
        out_specs=pl.BlockSpec((1, bb), lambda i: (0, i)),
        compiler_params=_PAR,
    )(logits, x_flat, logq, logpz)
    return nelbo[0]


# ---------------------------------------------------------------------------
# Layout helpers (pure data movement, done in the JAX wrapper)
# ---------------------------------------------------------------------------

def _im2col(x, k, stride, pad, lhs_dilation=1):
    """NHWC im2col.  Returns (B, OH, OW, k*k*C) with feature order (kh, kw, c)."""
    b, h, w, c = x.shape
    if lhs_dilation != 1:
        hd = (h - 1) * lhs_dilation + 1
        wd = (w - 1) * lhs_dilation + 1
        x = jnp.zeros((b, hd, wd, c), x.dtype).at[:, ::lhs_dilation, ::lhs_dilation, :].set(x)
        h, w = hd, wd
    x = jnp.pad(x, ((0, 0), (pad, pad), (pad, pad), (0, 0)))
    hp, wp = h + 2 * pad, w + 2 * pad
    oh = (hp - k) // stride + 1
    ow = (wp - k) // stride + 1
    cols = []
    for kh in range(k):
        for kw in range(k):
            cols.append(x[:, kh:kh + stride * oh:stride, kw:kw + stride * ow:stride, :])
    return jnp.concatenate(cols, axis=-1), oh, ow


def _conv_w_to_mat(w):
    # Conv2d weight (C_out, C_in, kH, kW) -> (kH*kW*C_in, C_out), feature order (kh, kw, ci)
    co, ci, kh, kw = w.shape
    return jnp.transpose(w, (2, 3, 1, 0)).reshape(kh * kw * ci, co)


def _convt_w_to_mat(w):
    # ConvTranspose2d weight (C_in, C_out, kH, kW): equivalent direct conv on the zero-dilated
    # input uses the spatially flipped kernel: Wmat[(kh,kw,ci), co] = w[ci, co, K-1-kh, K-1-kw]
    ci, co, kh, kw = w.shape
    wf = jnp.flip(w, axis=(2, 3))
    return jnp.transpose(wf, (2, 3, 0, 1)).reshape(kh * kw * ci, co)


# ---------------------------------------------------------------------------
# Full VAE forward (NELBO)
# ---------------------------------------------------------------------------

def vae_nelbo_pallas(x, params, eps):
    """Per-sample NELBO (B,) for the VAE forward pass, Pallas kernels for all dense compute."""
    x = x.astype(jnp.float32)
    b = x.shape[0]

    # ----- Encoder convolutions (im2col layout + Pallas matmul kernels) -----
    x_nhwc = jnp.transpose(x, (0, 2, 3, 1))                        # (B, 28, 28, 1)
    p1, oh1, ow1 = _im2col(x_nhwc, 4, 2, 1)                        # (B, 14, 14, 16)
    h1 = _matmul_bias(p1.reshape(b * oh1 * ow1, -1),
                      _conv_w_to_mat(params["conv1_w"]),
                      params["conv1_b"][None, :], relu=True)
    h1 = h1.reshape(b, oh1, ow1, -1)                               # (B, 14, 14, 32)

    p2, oh2, ow2 = _im2col(h1, 4, 2, 1)                            # (B, 7, 7, 512)
    h2 = _matmul_bias(p2.reshape(b * oh2 * ow2, -1),
                      _conv_w_to_mat(params["conv2_w"]),
                      params["conv2_b"][None, :], relu=True)
    # PyTorch flattens NCHW, so reorder channels-major before the fully connected head.
    h2 = h2.reshape(b, oh2, ow2, -1).transpose(0, 3, 1, 2).reshape(b, -1)   # (B, 3136)

    # ----- Fused encoder head + reparameterization + log densities + decoder fc -----
    hdec, logq, logpz = _encoder_head(h2, eps.astype(jnp.float32), params)

    # ----- Decoder transposed convolutions -----
    hd = hdec.reshape(b, 64, 7, 7).transpose(0, 2, 3, 1)           # NHWC (B, 7, 7, 64)
    pd1, ohd1, owd1 = _im2col(hd, 4, 1, 2, lhs_dilation=2)         # (B, 14, 14, 1024)
    d1 = _matmul_bias(pd1.reshape(b * ohd1 * owd1, -1),
                      _convt_w_to_mat(params["deconv1_w"]),
                      params["deconv1_b"][None, :], relu=True)
    d1 = d1.reshape(b, ohd1, owd1, -1)                             # (B, 14, 14, 32)

    pd2, ohd2, owd2 = _im2col(d1, 4, 1, 2, lhs_dilation=2)         # (B, 28, 28, 512)
    pd2_t = pd2.reshape(b, ohd2 * owd2, -1).transpose(0, 2, 1)     # (B, 512, 784)
    logits = _deconv2(pd2_t, _convt_w_to_mat(params["deconv2_w"]),
                      params["deconv2_b"])                         # (B, 784)

    # ----- BCE with logits + NELBO (fused kernel, lane-dense output) -----
    x_flat = x.reshape(b, -1)
    return _bce_nelbo(logits, x_flat, logq, logpz)                 # (B,)


def vae_forward_pallas(x, params, eps, reduction="mean"):
    nelbo = vae_nelbo_pallas(x, params, eps)
    return jnp.sum(nelbo) if reduction == "sum" else jnp.mean(nelbo)


# ---------------------------------------------------------------------------
# Pure-JAX reference mirroring the PyTorch computational graph
# ---------------------------------------------------------------------------

def vae_forward_ref(x, params, eps):
    x = x.astype(jnp.float32)
    b = x.shape[0]
    dn = ("NCHW", "OIHW", "NCHW")

    h = lax.conv_general_dilated(x, params["conv1_w"], (2, 2), [(1, 1), (1, 1)],
                                 dimension_numbers=dn)
    h = jax.nn.relu(h + params["conv1_b"][None, :, None, None])
    h = lax.conv_general_dilated(h, params["conv2_w"], (2, 2), [(1, 1), (1, 1)],
                                 dimension_numbers=dn)
    h = jax.nn.relu(h + params["conv2_b"][None, :, None, None])
    hf = h.reshape(b, -1)

    mu = hf @ params["fc_mu_w"].T + params["fc_mu_b"]
    lv = hf @ params["fc_lv_w"].T + params["fc_lv_b"]
    z = mu + jnp.exp(0.5 * lv) * eps
    log_q = jnp.sum(-0.5 * (lv + (z - mu) ** 2 / jnp.exp(lv) + _LOG2PI), axis=1)
    log_pz = -0.5 * jnp.sum(z ** 2 + _LOG2PI, axis=1)

    hd = (z @ params["dec_fc_w"].T + params["dec_fc_b"]).reshape(b, 64, 7, 7)

    def conv_t(inp, w_t, bias):
        wk = jnp.transpose(jnp.flip(w_t, axis=(2, 3)), (1, 0, 2, 3))   # (C_out, C_in, kh, kw)
        y = lax.conv_general_dilated(inp, wk, (1, 1), [(2, 2), (2, 2)],
                                     lhs_dilation=(2, 2), dimension_numbers=dn)
        return y + bias[None, :, None, None]

    d1 = jax.nn.relu(conv_t(hd, params["deconv1_w"], params["deconv1_b"]))
    logits = conv_t(d1, params["deconv2_w"], params["deconv2_b"])

    lf = logits.reshape(b, -1)
    xf = x.reshape(b, -1)
    bce = jnp.maximum(lf, 0.0) - lf * xf + jnp.log(1.0 + jnp.exp(-jnp.abs(lf)))
    log_px = -jnp.sum(bce, axis=1)
    return log_q - log_pz - log_px


# ---------------------------------------------------------------------------
# Test
# ---------------------------------------------------------------------------

if __name__ == "__main__":
    B, z_dim = 2, 32
    key = jax.random.PRNGKey(0)
    ks = jax.random.split(key, 16)

    def rnd(k, shape, scale):
        return scale * jax.random.normal(k, shape, dtype=jnp.float32)

    params = {
        "conv1_w": rnd(ks[0], (32, 1, 4, 4), 0.1),   "conv1_b": rnd(ks[1], (32,), 0.1),
        "conv2_w": rnd(ks[2], (64, 32, 4, 4), 0.05), "conv2_b": rnd(ks[3], (64,), 0.1),
        "fc_mu_w": rnd(ks[4], (z_dim, 64 * 7 * 7), 0.01), "fc_mu_b": rnd(ks[5], (z_dim,), 0.1),
        "fc_lv_w": rnd(ks[6], (z_dim, 64 * 7 * 7), 0.01), "fc_lv_b": rnd(ks[7], (z_dim,), 0.1),
        "dec_fc_w": rnd(ks[8], (64 * 7 * 7, z_dim), 0.05),
        "dec_fc_b": rnd(ks[9], (64 * 7 * 7,), 0.1),
        "deconv1_w": rnd(ks[10], (64, 32, 4, 4), 0.05), "deconv1_b": rnd(ks[11], (32,), 0.1),
        "deconv2_w": rnd(ks[12], (32, 1, 4, 4), 0.05),  "deconv2_b": rnd(ks[13], (1,), 0.1),
    }
    x = (jax.random.uniform(ks[14], (B, 1, 28, 28)) > 0.5).astype(jnp.float32)
    # TODO(synk): Encoder.reparameterization draws eps with torch.randn_like at run time and the
    # sample() paths use torch.bernoulli / flow sampling; here eps is an explicit input instead.
    eps = jax.random.normal(ks[15], (B, z_dim), dtype=jnp.float32)

    nelbo_fn = jax.jit(vae_nelbo_pallas)
    nelbo_k = jax.block_until_ready(nelbo_fn(x, params, eps))

    nelbo_r = vae_forward_ref(x, params, eps)
    assert nelbo_k.shape == (B,)
    assert jnp.allclose(nelbo_k, nelbo_r, rtol=1e-2, atol=2.0), (nelbo_k, nelbo_r)
    assert jnp.allclose(jnp.mean(nelbo_k), jnp.mean(nelbo_r), rtol=1e-2, atol=2.0)

    print("KERNEL_OK")
</pallas_src>

<mosaic_0001>
module attributes {stable_mosaic.version = 11 : i64} {
  func.func @_mm_bias_kernel(%arg0: i32, %arg1: memref<392x16xf32, #tpu.memory_space<vmem>>, %arg2: memref<16x32xf32, #tpu.memory_space<vmem>>, %arg3: memref<1x32xf32, #tpu.memory_space<vmem>>, %arg4: memref<392x32xf32, #tpu.memory_space<vmem>>) attributes {dimension_semantics = [#tpu.dimension_semantics<parallel>], iteration_bounds = array<i64: 1>, scalar_prefetch = 0 : i64, scratch_operands = 0 : i64, tpu.core_type = #tpu.core_type<tc>, window_params = [{transform_indices = @transform_0, window_bounds = array<i64: 392, 16>}, {pipeline_mode = #tpu.pipeline_mode<synchronous>, transform_indices = @transform_1, window_bounds = array<i64: 16, 32>}, {pipeline_mode = #tpu.pipeline_mode<synchronous>, transform_indices = @transform_2, window_bounds = array<i64: 1, 32>}, {transform_indices = @transform_3, window_bounds = array<i64: 392, 32>}]} {
    %c0 = arith.constant 0 : index
    %c0_0 = arith.constant 0 : index
    %0 = vector.load %arg1[%c0, %c0_0] : memref<392x16xf32, #tpu.memory_space<vmem>>, vector<392x16xf32>
    %c0_1 = arith.constant 0 : index
    %c0_2 = arith.constant 0 : index
    %1 = vector.load %arg2[%c0_1, %c0_2] : memref<16x32xf32, #tpu.memory_space<vmem>>, vector<16x32xf32>
    %cst = arith.constant dense<0.000000e+00> : vector<392x32xf32>
    %2 = tpu.matmul %0, %1, %cst {dimension_numbers = #tpu.dot_dimension_numbers<[1], [0], [0], [1], [0, 0, 1, 1], [], []>} : vector<392x16xf32>, vector<16x32xf32>, vector<392x32xf32> -> vector<392x32xf32>
    %c0_3 = arith.constant 0 : index
    %c0_4 = arith.constant 0 : index
    %3 = vector.load %arg3[%c0_3, %c0_4] : memref<1x32xf32, #tpu.memory_space<vmem>>, vector<1x32xf32>
    %4 = vector.broadcast %3 : vector<1x32xf32> to vector<392x32xf32>
    %5 = arith.addf %2, %4 : vector<392x32xf32>
    %cst_5 = arith.constant 0.000000e+00 : f32
    %6 = vector.broadcast %cst_5 : f32 to vector<392x32xf32>
    %7 = arith.maximumf %5, %6 : vector<392x32xf32>
    %c0_6 = arith.constant 0 : index
    %c0_7 = arith.constant 0 : index
    %8 = vector.load %arg4[%c0_6, %c0_7] : memref<392x32xf32, #tpu.memory_space<vmem>>, vector<392x32xf32>
    tpu.vector_store %arg4[%c0_6, %c0_7], %7 {strides = array<i32>} : memref<392x32xf32, #tpu.memory_space<vmem>>, vector<392x32xf32>,
    return
  }
  func.func @transform_0(%arg0: i32) -> (i32, i32) {
    %c0_i32 = arith.constant 0 : i32
    %c0_i32_0 = arith.constant 0 : i32
    return %arg0, %c0_i32 : i32, i32
  }
  func.func @transform_1(%arg0: i32) -> (i32, i32) {
    %c0_i32 = arith.constant 0 : i32
    %c0_i32_0 = arith.constant 0 : i32
    %c0_i32_1 = arith.constant 0 : i32
    return %c0_i32, %c0_i32_0 : i32, i32
  }
  func.func @transform_2(%arg0: i32) -> (i32, i32) {
    %c0_i32 = arith.constant 0 : i32
    %c0_i32_0 = arith.constant 0 : i32
    %c0_i32_1 = arith.constant 0 : i32
    return %c0_i32, %c0_i32_0 : i32, i32
  }
  func.func @transform_3(%arg0: i32) -> (i32, i32) {
    %c0_i32 = arith.constant 0 : i32
    %c0_i32_0 = arith.constant 0 : i32
    return %arg0, %c0_i32 : i32, i32
  }
}

module attributes {stable_mosaic.version = 11 : i64} {
  func.func @_mm_bias_kernel(%arg0: i32, %arg1: memref<98x512xf32, #tpu.memory_space<vmem>>, %arg2: memref<512x64xf32, #tpu.memory_space<vmem>>, %arg3: memref<1x64xf32, #tpu.memory_space<vmem>>, %arg4: memref<98x64xf32, #tpu.memory_space<vmem>>) attributes {dimension_semantics = [#tpu.dimension_semantics<parallel>], iteration_bounds = array<i64: 1>, scalar_prefetch = 0 : i64, scratch_operands = 0 : i64, tpu.core_type = #tpu.core_type<tc>, window_params = [{transform_indices = @transform_0, window_bounds = array<i64: 98, 512>}, {pipeline_mode = #tpu.pipeline_mode<synchronous>, transform_indices = @transform_1, window_bounds = array<i64: 512, 64>}, {pipeline_mode = #tpu.pipeline_mode<synchronous>, transform_indices = @transform_2, window_bounds = array<i64: 1, 64>}, {transform_indices = @transform_3, window_bounds = array<i64: 98, 64>}]} {
    %c0 = arith.constant 0 : index
    %c0_0 = arith.constant 0 : index
    %0 = vector.load %arg1[%c0, %c0_0] : memref<98x512xf32, #tpu.memory_space<vmem>>, vector<98x512xf32>
    %c0_1 = arith.constant 0 : index
    %c0_2 = arith.constant 0 : index
    %1 = vector.load %arg2[%c0_1, %c0_2] : memref<512x64xf32, #tpu.memory_space<vmem>>, vector<512x64xf32>
    %cst = arith.constant dense<0.000000e+00> : vector<98x64xf32>
    %2 = tpu.matmul %0, %1, %cst {dimension_numbers = #tpu.dot_dimension_numbers<[1], [0], [0], [1], [0, 0, 1, 1], [], []>} : vector<98x512xf32>, vector<512x64xf32>, vector<98x64xf32> -> vector<98x64xf32>
    %c0_3 = arith.constant 0 : index
    %c0_4 = arith.constant 0 : index
    %3 = vector.load %arg3[%c0_3, %c0_4] : memref<1x64xf32, #tpu.memory_space<vmem>>, vector<1x64xf32>
    %4 = vector.broadcast %3 : vector<1x64xf32> to vector<98x64xf32>
    %5 = arith.addf %2, %4 : vector<98x64xf32>
    %cst_5 = arith.constant 0.000000e+00 : f32
    %6 = vector.broadcast %cst_5 : f32 to vector<98x64xf32>
    %7 = arith.maximumf %5, %6 : vector<98x64xf32>
    %c0_6 = arith.constant 0 : index
    %c0_7 = arith.constant 0 : index
    %8 = vector.load %arg4[%c0_6, %c0_7] : memref<98x64xf32, #tpu.memory_space<vmem>>, vector<98x64xf32>
    tpu.vector_store %arg4[%c0_6, %c0_7], %7 {strides = array<i32>} : memref<98x64xf32, #tpu.memory_space<vmem>>, vector<98x64xf32>,
    return
  }
  func.func @transform_0(%arg0: i32) -> (i32, i32) {
    %c0_i32 = arith.constant 0 : i32
    %c0_i32_0 = arith.constant 0 : i32
    return %arg0, %c0_i32 : i32, i32
  }
  func.func @transform_1(%arg0: i32) -> (i32, i32) {
    %c0_i32 = arith.constant 0 : i32
    %c0_i32_0 = arith.constant 0 : i32
    %c0_i32_1 = arith.constant 0 : i32
    return %c0_i32, %c0_i32_0 : i32, i32
  }
  func.func @transform_2(%arg0: i32) -> (i32, i32) {
    %c0_i32 = arith.constant 0 : i32
    %c0_i32_0 = arith.constant 0 : i32
    %c0_i32_1 = arith.constant 0 : i32
    return %c0_i32, %c0_i32_0 : i32, i32
  }
  func.func @transform_3(%arg0: i32) -> (i32, i32) {
    %c0_i32 = arith.constant 0 : i32
    %c0_i32_0 = arith.constant 0 : i32
    return %arg0, %c0_i32 : i32, i32
  }
}

module attributes {stable_mosaic.version = 11 : i64} {
  func.func @_encoder_head_kernel(%arg0: i32, %arg1: memref<2x3136xf32, #tpu.memory_space<vmem>>, %arg2: memref<3136x32xf32, #tpu.memory_space<vmem>>, %arg3: memref<1x32xf32, #tpu.memory_space<vmem>>, %arg4: memref<3136x32xf32, #tpu.memory_space<vmem>>, %arg5: memref<1x32xf32, #tpu.memory_space<vmem>>, %arg6: memref<2x32xf32, #tpu.memory_space<vmem>>, %arg7: memref<32x3136xf32, #tpu.memory_space<vmem>>, %arg8: memref<1x3136xf32, #tpu.memory_space<vmem>>, %arg9: memref<2x3136xf32, #tpu.memory_space<vmem>>, %arg10: memref<1x2xf32, #tpu.memory_space<vmem>>, %arg11: memref<1x2xf32, #tpu.memory_space<vmem>>) attributes {dimension_semantics = [#tpu.dimension_semantics<parallel>], iteration_bounds = array<i64: 1>, scalar_prefetch = 0 : i64, scratch_operands = 0 : i64, tpu.core_type = #tpu.core_type<tc>, window_params = [{transform_indices = @transform_0, window_bounds = array<i64: 2, 3136>}, {pipeline_mode = #tpu.pipeline_mode<synchronous>, transform_indices = @transform_1, window_bounds = array<i64: 3136, 32>}, {pipeline_mode = #tpu.pipeline_mode<synchronous>, transform_indices = @transform_2, window_bounds = array<i64: 1, 32>}, {pipeline_mode = #tpu.pipeline_mode<synchronous>, transform_indices = @transform_3, window_bounds = array<i64: 3136, 32>}, {pipeline_mode = #tpu.pipeline_mode<synchronous>, transform_indices = @transform_4, window_bounds = array<i64: 1, 32>}, {transform_indices = @transform_5, window_bounds = array<i64: 2, 32>}, {pipeline_mode = #tpu.pipeline_mode<synchronous>, transform_indices = @transform_6, window_bounds = array<i64: 32, 3136>}, {pipeline_mode = #tpu.pipeline_mode<synchronous>, transform_indices = @transform_7, window_bounds = array<i64: 1, 3136>}, {transform_indices = @transform_8, window_bounds = array<i64: 2, 3136>}, {transform_indices = @transform_9, window_bounds = array<i64: 1, 2>}, {transform_indices = @transform_10, window_bounds = array<i64: 1, 2>}]} {
    %c0 = arith.constant 0 : index
    %c0_0 = arith.constant 0 : index
    %0 = vector.load %arg1[%c0, %c0_0] : memref<2x3136xf32, #tpu.memory_space<vmem>>, vector<2x3136xf32>
    %c0_1 = arith.constant 0 : index
    %c0_2 = arith.constant 0 : index
    %1 = vector.load %arg2[%c0_1, %c0_2] : memref<3136x32xf32, #tpu.memory_space<vmem>>, vector<3136x32xf32>
    %cst = arith.constant dense<0.000000e+00> : vector<2x32xf32>
    %2 = tpu.matmul %0, %1, %cst {dimension_numbers = #tpu.dot_dimension_numbers<[1], [0], [0], [1], [0, 0, 1, 1], [], []>} : vector<2x3136xf32>, vector<3136x32xf32>, vector<2x32xf32> -> vector<2x32xf32>
    %c0_3 = arith.constant 0 : index
    %c0_4 = arith.constant 0 : index
    %3 = vector.load %arg3[%c0_3, %c0_4] : memref<1x32xf32, #tpu.memory_space<vmem>>, vector<1x32xf32>
    %4 = vector.broadcast %3 : vector<1x32xf32> to vector<2x32xf32>
    %5 = arith.addf %2, %4 : vector<2x32xf32>
    %c0_5 = arith.constant 0 : index
    %c0_6 = arith.constant 0 : index
    %6 = vector.load %arg4[%c0_5, %c0_6] : memref<3136x32xf32, #tpu.memory_space<vmem>>, vector<3136x32xf32>
    %cst_7 = arith.constant dense<0.000000e+00> : vector<2x32xf32>
    %7 = tpu.matmul %0, %6, %cst_7 {dimension_numbers = #tpu.dot_dimension_numbers<[1], [0], [0], [1], [0, 0, 1, 1], [], []>} : vector<2x3136xf32>, vector<3136x32xf32>, vector<2x32xf32> -> vector<2x32xf32>
    %c0_8 = arith.constant 0 : index
    %c0_9 = arith.constant 0 : index
    %8 = vector.load %arg5[%c0_8, %c0_9] : memref<1x32xf32, #tpu.memory_space<vmem>>, vector<1x32xf32>
    %9 = vector.broadcast %8 : vector<1x32xf32> to vector<2x32xf32>
    %10 = arith.addf %7, %9 : vector<2x32xf32>
    %c0_10 = arith.constant 0 : index
    %c0_11 = arith.constant 0 : index
    %11 = vector.load %arg6[%c0_10, %c0_11] : memref<2x32xf32, #tpu.memory_space<vmem>>, vector<2x32xf32>
    %cst_12 = arith.constant 5.000000e-01 : f32
    %12 = vector.broadcast %cst_12 : f32 to vector<2x32xf32>
    %13 = arith.mulf %12, %10 : vector<2x32xf32>
    %14 = math.exp %13 : vector<2x32xf32>
    %15 = arith.mulf %14, %11 : vector<2x32xf32>
    %16 = arith.addf %5, %15 : vector<2x32xf32>
    %17 = arith.subf %16, %5 : vector<2x32xf32>
    %18 = arith.mulf %17, %17 : vector<2x32xf32>
    %19 = math.exp %10 : vector<2x32xf32>
    %20 = arith.divf %18, %19 : vector<2x32xf32>
    %21 = arith.addf %10, %20 : vector<2x32xf32>
    %cst_13 = arith.constant 1.83787704 : f32
    %22 = vector.broadcast %cst_13 : f32 to vector<2x32xf32>
    %23 = arith.addf %21, %22 : vector<2x32xf32>
    %cst_14 = arith.constant -5.000000e-01 : f32
    %24 = vector.broadcast %cst_14 : f32 to vector<2x32xf32>
    %25 = arith.mulf %24, %23 : vector<2x32xf32>
    %26 = arith.mulf %16, %16 : vector<2x32xf32>
    %cst_15 = arith.constant 1.83787704 : f32
    %27 = vector.broadcast %cst_15 : f32 to vector<2x32xf32>
    %28 = arith.addf %26, %27 : vector<2x32xf32>
    %cst_16 = arith.constant -5.000000e-01 : f32
    %29 = vector.broadcast %cst_16 : f32 to vector<2x32xf32>
    %30 = arith.mulf %29, %28 : vector<2x32xf32>
    %cst_17 = arith.constant 1.000000e+00 : f32
    %31 = vector.broadcast %cst_17 : f32 to vector<1x32xf32>
    %cst_18 = arith.constant dense<0.000000e+00> : vector<1x2xf32>
    %32 = tpu.matmul %31, %25, %cst_18 {dimension_numbers = #tpu.dot_dimension_numbers<[1], [1], [0], [0], [0, 0, 1, 0], [], []>} : vector<1x32xf32>, vector<2x32xf32>, vector<1x2xf32> -> vector<1x2xf32>
    %c0_19 = arith.constant 0 : index
    %c0_20 = arith.constant 0 : index
    %33 = vector.load %arg10[%c0_19, %c0_20] : memref<1x2xf32, #tpu.memory_space<vmem>>, vector<1x2xf32>
    tpu.vector_store %arg10[%c0_19, %c0_20], %32 {strides = array<i32>} : memref<1x2xf32, #tpu.memory_space<vmem>>, vector<1x2xf32>,
    %cst_21 = arith.constant dense<0.000000e+00> : vector<1x2xf32>
    %34 = tpu.matmul %31, %30, %cst_21 {dimension_numbers = #tpu.dot_dimension_numbers<[1], [1], [0], [0], [0, 0, 1, 0], [], []>} : vector<1x32xf32>, vector<2x32xf32>, vector<1x2xf32> -> vector<1x2xf32>
    %c0_22 = arith.constant 0 : index
    %c0_23 = arith.constant 0 : index
    %35 = vector.load %arg11[%c0_22, %c0_23] : memref<1x2xf32, #tpu.memory_space<vmem>>, vector<1x2xf32>
    tpu.vector_store %arg11[%c0_22, %c0_23], %34 {strides = array<i32>} : memref<1x2xf32, #tpu.memory_space<vmem>>, vector<1x2xf32>,
    %c0_24 = arith.constant 0 : index
    %c0_25 = arith.constant 0 : index
    %36 = vector.load %arg7[%c0_24, %c0_25] : memref<32x3136xf32, #tpu.memory_space<vmem>>, vector<32x3136xf32>
    %cst_26 = arith.constant dense<0.000000e+00> : vector<2x3136xf32>
    %37 = tpu.matmul %16, %36, %cst_26 {dimension_numbers = #tpu.dot_dimension_numbers<[1], [0], [0], [1], [0, 0, 1, 1], [], []>} : vector<2x32xf32>, vector<32x3136xf32>, vector<2x3136xf32> -> vector<2x3136xf32>
    %c0_27 = arith.constant 0 : index
    %c0_28 = arith.constant 0 : index
    %38 = vector.load %arg8[%c0_27, %c0_28] : memref<1x3136xf32, #tpu.memory_space<vmem>>, vector<1x3136xf32>
    %39 = vector.broadcast %38 : vector<1x3136xf32> to vector<2x3136xf32>
    %40 = arith.addf %37, %39 : vector<2x3136xf32>
    %c0_29 = arith.constant 0 : index
    %c0_30 = arith.constant 0 : index
    %41 = vector.load %arg9[%c0_29, %c0_30] : memref<2x3136xf32, #tpu.memory_space<vmem>>, vector<2x3136xf32>
    tpu.vector_store %arg9[%c0_29, %c0_30], %40 {strides = array<i32>} : memref<2x3136xf32, #tpu.memory_space<vmem>>, vector<2x3136xf32>,
    return
  }
  func.func @transform_0(%arg0: i32) -> (i32, i32) {
    %c0_i32 = arith.constant 0 : i32
    %c0_i32_0 = arith.constant 0 : i32
    return %arg0, %c0_i32 : i32, i32
  }
  func.func @transform_1(%arg0: i32) -> (i32, i32) {
    %c0_i32 = arith.constant 0 : i32
    %c0_i32_0 = arith.constant 0 : i32
    %c0_i32_1 = arith.constant 0 : i32
    return %c0_i32, %c0_i32_0 : i32, i32
  }
  func.func @transform_2(%arg0: i32) -> (i32, i32) {
    %c0_i32 = arith.constant 0 : i32
    %c0_i32_0 = arith.constant 0 : i32
    %c0_i32_1 = arith.constant 0 : i32
    return %c0_i32, %c0_i32_0 : i32, i32
  }
  func.func @transform_3(%arg0: i32) -> (i32, i32) {
    %c0_i32 = arith.constant 0 : i32
    %c0_i32_0 = arith.constant 0 : i32
    %c0_i32_1 = arith.constant 0 : i32
    return %c0_i32, %c0_i32_0 : i32, i32
  }
  func.func @transform_4(%arg0: i32) -> (i32, i32) {
    %c0_i32 = arith.constant 0 : i32
    %c0_i32_0 = arith.constant 0 : i32
    %c0_i32_1 = arith.constant 0 : i32
    return %c0_i32, %c0_i32_0 : i32, i32
  }
  func.func @transform_5(%arg0: i32) -> (i32, i32) {
    %c0_i32 = arith.constant 0 : i32
    %c0_i32_0 = arith.constant 0 : i32
    return %arg0, %c0_i32 : i32, i32
  }
  func.func @transform_6(%arg0: i32) -> (i32, i32) {
    %c0_i32 = arith.constant 0 : i32
    %c0_i32_0 = arith.constant 0 : i32
    %c0_i32_1 = arith.constant 0 : i32
    return %c0_i32, %c0_i32_0 : i32, i32
  }
  func.func @transform_7(%arg0: i32) -> (i32, i32) {
    %c0_i32 = arith.constant 0 : i32
    %c0_i32_0 = arith.constant 0 : i32
    %c0_i32_1 = arith.constant 0 : i32
    return %c0_i32, %c0_i32_0 : i32, i32
  }
  func.func @transform_8(%arg0: i32) -> (i32, i32) {
    %c0_i32 = arith.constant 0 : i32
    %c0_i32_0 = arith.constant 0 : i32
    return %arg0, %c0_i32 : i32, i32
  }
  func.func @transform_9(%arg0: i32) -> (i32, i32) {
    %c0_i32 = arith.constant 0 : i32
    %c0_i32_0 = arith.constant 0 : i32
    return %c0_i32, %arg0 : i32, i32
  }
  func.func @transform_10(%arg0: i32) -> (i32, i32) {
    %c0_i32 = arith.constant 0 : i32
    %c0_i32_0 = arith.constant 0 : i32
    return %c0_i32, %arg0 : i32, i32
  }
}

module attributes {stable_mosaic.version = 11 : i64} {
  func.func @_mm_bias_kernel(%arg0: i32, %arg1: memref<392x1024xf32, #tpu.memory_space<vmem>>, %arg2: memref<1024x32xf32, #tpu.memory_space<vmem>>, %arg3: memref<1x32xf32, #tpu.memory_space<vmem>>, %arg4: memref<392x32xf32, #tpu.memory_space<vmem>>) attributes {dimension_semantics = [#tpu.dimension_semantics<parallel>], iteration_bounds = array<i64: 1>, scalar_prefetch = 0 : i64, scratch_operands = 0 : i64, tpu.core_type = #tpu.core_type<tc>, window_params = [{transform_indices = @transform_0, window_bounds = array<i64: 392, 1024>}, {pipeline_mode = #tpu.pipeline_mode<synchronous>, transform_indices = @transform_1, window_bounds = array<i64: 1024, 32>}, {pipeline_mode = #tpu.pipeline_mode<synchronous>, transform_indices = @transform_2, window_bounds = array<i64: 1, 32>}, {transform_indices = @transform_3, window_bounds = array<i64: 392, 32>}]} {
    %c0 = arith.constant 0 : index
    %c0_0 = arith.constant 0 : index
    %0 = vector.load %arg1[%c0, %c0_0] : memref<392x1024xf32, #tpu.memory_space<vmem>>, vector<392x1024xf32>
    %c0_1 = arith.constant 0 : index
    %c0_2 = arith.constant 0 : index
    %1 = vector.load %arg2[%c0_1, %c0_2] : memref<1024x32xf32, #tpu.memory_space<vmem>>, vector<1024x32xf32>
    %cst = arith.constant dense<0.000000e+00> : vector<392x32xf32>
    %2 = tpu.matmul %0, %1, %cst {dimension_numbers = #tpu.dot_dimension_numbers<[1], [0], [0], [1], [0, 0, 1, 1], [], []>} : vector<392x1024xf32>, vector<1024x32xf32>, vector<392x32xf32> -> vector<392x32xf32>
    %c0_3 = arith.constant 0 : index
    %c0_4 = arith.constant 0 : index
    %3 = vector.load %arg3[%c0_3, %c0_4] : memref<1x32xf32, #tpu.memory_space<vmem>>, vector<1x32xf32>
    %4 = vector.broadcast %3 : vector<1x32xf32> to vector<392x32xf32>
    %5 = arith.addf %2, %4 : vector<392x32xf32>
    %cst_5 = arith.constant 0.000000e+00 : f32
    %6 = vector.broadcast %cst_5 : f32 to vector<392x32xf32>
    %7 = arith.maximumf %5, %6 : vector<392x32xf32>
    %c0_6 = arith.constant 0 : index
    %c0_7 = arith.constant 0 : index
    %8 = vector.load %arg4[%c0_6, %c0_7] : memref<392x32xf32, #tpu.memory_space<vmem>>, vector<392x32xf32>
    tpu.vector_store %arg4[%c0_6, %c0_7], %7 {strides = array<i32>} : memref<392x32xf32, #tpu.memory_space<vmem>>, vector<392x32xf32>,
    return
  }
  func.func @transform_0(%arg0: i32) -> (i32, i32) {
    %c0_i32 = arith.constant 0 : i32
    %c0_i32_0 = arith.constant 0 : i32
    return %arg0, %c0_i32 : i32, i32
  }
  func.func @transform_1(%arg0: i32) -> (i32, i32) {
    %c0_i32 = arith.constant 0 : i32
    %c0_i32_0 = arith.constant 0 : i32
    %c0_i32_1 = arith.constant 0 : i32
    return %c0_i32, %c0_i32_0 : i32, i32
  }
  func.func @transform_2(%arg0: i32) -> (i32, i32) {
    %c0_i32 = arith.constant 0 : i32
    %c0_i32_0 = arith.constant 0 : i32
    %c0_i32_1 = arith.constant 0 : i32
    return %c0_i32, %c0_i32_0 : i32, i32
  }
  func.func @transform_3(%arg0: i32) -> (i32, i32) {
    %c0_i32 = arith.constant 0 : i32
    %c0_i32_0 = arith.constant 0 : i32
    return %arg0, %c0_i32 : i32, i32
  }
}

module attributes {stable_mosaic.version = 11 : i64} {
  func.func @_deconv2_kernel(%arg0: i32, %arg1: memref<1x512x784xf32, #tpu.memory_space<vmem>>, %arg2: memref<1x512xf32, #tpu.memory_space<vmem>>, %arg3: memref<1x1xf32, #tpu.memory_space<vmem>>, %arg4: memref<1x1x784xf32, #tpu.memory_space<vmem>>) attributes {dimension_semantics = [#tpu.dimension_semantics<parallel>], iteration_bounds = array<i64: 2>, scalar_prefetch = 0 : i64, scratch_operands = 0 : i64, tpu.core_type = #tpu.core_type<tc>, window_params = [{transform_indices = @transform_0, window_bounds = array<i64: 1, 512, 784>}, {pipeline_mode = #tpu.pipeline_mode<synchronous>, transform_indices = @transform_1, window_bounds = array<i64: 1, 512>}, {pipeline_mode = #tpu.pipeline_mode<synchronous>, transform_indices = @transform_2, window_bounds = array<i64: 1, 1>}, {transform_indices = @transform_3, window_bounds = array<i64: 1, 1, 784>}]} {
    %c0 = arith.constant 0 : index
    %c0_0 = arith.constant 0 : index
    %c0_1 = arith.constant 0 : index
    %0 = vector.load %arg1[%c0, %c0_0, %c0_1] : memref<1x512x784xf32, #tpu.memory_space<vmem>>, vector<1x512x784xf32>
    %1 = vector.shape_cast %0 : vector<1x512x784xf32> to vector<512x784xf32>
    %c0_2 = arith.constant 0 : index
    %c0_3 = arith.constant 0 : index
    %2 = vector.load %arg2[%c0_2, %c0_3] : memref<1x512xf32, #tpu.memory_space<vmem>>, vector<1x512xf32>
    %cst = arith.constant dense<0.000000e+00> : vector<1x784xf32>
    %3 = tpu.matmul %2, %1, %cst {dimension_numbers = #tpu.dot_dimension_numbers<[1], [0], [0], [1], [0, 0, 1, 1], [], []>} : vector<1x512xf32>, vector<512x784xf32>, vector<1x784xf32> -> vector<1x784xf32>
    %c0_4 = arith.constant 0 : index
    %c0_5 = arith.constant 0 : index
    %4 = vector.load %arg3[%c0_4, %c0_5] : memref<1x1xf32, #tpu.memory_space<vmem>>, vector<1x1xf32>
    %5 = vector.broadcast %4 : vector<1x1xf32> to vector<1x784xf32>
    %6 = arith.addf %3, %5 : vector<1x784xf32>
    %7 = vector.shape_cast %6 : vector<1x784xf32> to vector<1x1x784xf32>
    %c0_6 = arith.constant 0 : index
    %c0_7 = arith.constant 0 : index
    %c0_8 = arith.constant 0 : index
    %8 = vector.load %arg4[%c0_6, %c0_7, %c0_8] : memref<1x1x784xf32, #tpu.memory_space<vmem>>, vector<1x1x784xf32>
    tpu.vector_store %arg4[%c0_6, %c0_7, %c0_8], %7 {strides = array<i32>} : memref<1x1x784xf32, #tpu.memory_space<vmem>>, vector<1x1x784xf32>,
    return
  }
  func.func @transform_0(%arg0: i32) -> (i32, i32, i32) {
    %c0_i32 = arith.constant 0 : i32
    %c0_i32_0 = arith.constant 0 : i32
    %c0_i32_1 = arith.constant 0 : i32
    return %arg0, %c0_i32, %c0_i32_0 : i32, i32, i32
  }
  func.func @transform_1(%arg0: i32) -> (i32, i32) {
    %c0_i32 = arith.constant 0 : i32
    %c0_i32_0 = arith.constant 0 : i32
    %c0_i32_1 = arith.constant 0 : i32
    return %c0_i32, %c0_i32_0 : i32, i32
  }
  func.func @transform_2(%arg0: i32) -> (i32, i32) {
    %c0_i32 = arith.constant 0 : i32
    %c0_i32_0 = arith.constant 0 : i32
    %c0_i32_1 = arith.constant 0 : i32
    return %c0_i32, %c0_i32_0 : i32, i32
  }
  func.func @transform_3(%arg0: i32) -> (i32, i32, i32) {
    %c0_i32 = arith.constant 0 : i32
    %c0_i32_0 = arith.constant 0 : i32
    %c0_i32_1 = arith.constant 0 : i32
    return %arg0, %c0_i32, %c0_i32_0 : i32, i32, i32
  }
}

module attributes {stable_mosaic.version = 11 : i64} {
  func.func @_bce_nelbo_kernel(%arg0: i32, %arg1: memref<2x784xf32, #tpu.memory_space<vmem>>, %arg2: memref<2x784xf32, #tpu.memory_space<vmem>>, %arg3: memref<1x2xf32, #tpu.memory_space<vmem>>, %arg4: memref<1x2xf32, #tpu.memory_space<vmem>>, %arg5: memref<1x2xf32, #tpu.memory_space<vmem>>) attributes {dimension_semantics = [#tpu.dimension_semantics<parallel>], iteration_bounds = array<i64: 1>, scalar_prefetch = 0 : i64, scratch_operands = 0 : i64, tpu.core_type = #tpu.core_type<tc>, window_params = [{transform_indices = @transform_0, window_bounds = array<i64: 2, 784>}, {transform_indices = @transform_1, window_bounds = array<i64: 2, 784>}, {transform_indices = @transform_2, window_bounds = array<i64: 1, 2>}, {transform_indices = @transform_3, window_bounds = array<i64: 1, 2>}, {transform_indices = @transform_4, window_bounds = array<i64: 1, 2>}]} {
    %c0 = arith.constant 0 : index
    %c0_0 = arith.constant 0 : index
    %0 = vector.load %arg1[%c0, %c0_0] : memref<2x784xf32, #tpu.memory_space<vmem>>, vector<2x784xf32>
    %c0_1 = arith.constant 0 : index
    %c0_2 = arith.constant 0 : index
    %1 = vector.load %arg2[%c0_1, %c0_2] : memref<2x784xf32, #tpu.memory_space<vmem>>, vector<2x784xf32>
    %cst = arith.constant 0.000000e+00 : f32
    %2 = vector.broadcast %cst : f32 to vector<2x784xf32>
    %3 = arith.maximumf %0, %2 : vector<2x784xf32>
    %4 = arith.mulf %0, %1 : vector<2x784xf32>
    %5 = arith.subf %3, %4 : vector<2x784xf32>
    %6 = math.absf %0 : vector<2x784xf32>
    %cst_3 = arith.constant 0.000000e+00 : f32
    %7 = vector.broadcast %cst_3 : f32 to vector<2x784xf32>
    %8 = arith.subf %7, %6 : vector<2x784xf32>
    %9 = math.exp %8 : vector<2x784xf32>
    %cst_4 = arith.constant 1.000000e+00 : f32
    %10 = vector.broadcast %cst_4 : f32 to vector<2x784xf32>
    %11 = arith.addf %10, %9 : vector<2x784xf32>
    %12 = math.log %11 : vector<2x784xf32>
    %13 = arith.addf %5, %12 : vector<2x784xf32>
    %cst_5 = arith.constant 1.000000e+00 : f32
    %14 = vector.broadcast %cst_5 : f32 to vector<1x784xf32>
    %cst_6 = arith.constant dense<0.000000e+00> : vector<1x2xf32>
    %15 = tpu.matmul %14, %13, %cst_6 {dimension_numbers = #tpu.dot_dimension_numbers<[1], [1], [0], [0], [0, 0, 1, 0], [], []>} : vector<1x784xf32>, vector<2x784xf32>, vector<1x2xf32> -> vector<1x2xf32>
    %cst_7 = arith.constant 0.000000e+00 : f32
    %16 = vector.broadcast %cst_7 : f32 to vector<1x2xf32>
    %17 = arith.subf %16, %15 : vector<1x2xf32>
    %c0_8 = arith.constant 0 : index
    %c0_9 = arith.constant 0 : index
    %18 = vector.load %arg3[%c0_8, %c0_9] : memref<1x2xf32, #tpu.memory_space<vmem>>, vector<1x2xf32>
    %c0_10 = arith.constant 0 : index
    %c0_11 = arith.constant 0 : index
    %19 = vector.load %arg4[%c0_10, %c0_11] : memref<1x2xf32, #tpu.memory_space<vmem>>, vector<1x2xf32>
    %20 = arith.subf %18, %19 : vector<1x2xf32>
    %21 = arith.subf %20, %17 : vector<1x2xf32>
    %c0_12 = arith.constant 0 : index
    %c0_13 = arith.constant 0 : index
    %22 = vector.load %arg5[%c0_12, %c0_13] : memref<1x2xf32, #tpu.memory_space<vmem>>, vector<1x2xf32>
    tpu.vector_store %arg5[%c0_12, %c0_13], %21 {strides = array<i32>} : memref<1x2xf32, #tpu.memory_space<vmem>>, vector<1x2xf32>,
    return
  }
  func.func @transform_0(%arg0: i32) -> (i32, i32) {
    %c0_i32 = arith.constant 0 : i32
    %c0_i32_0 = arith.constant 0 : i32
    return %arg0, %c0_i32 : i32, i32
  }
  func.func @transform_1(%arg0: i32) -> (i32, i32) {
    %c0_i32 = arith.constant 0 : i32
    %c0_i32_0 = arith.constant 0 : i32
    return %arg0, %c0_i32 : i32, i32
  }
  func.func @transform_2(%arg0: i32) -> (i32, i32) {
    %c0_i32 = arith.constant 0 : i32
    %c0_i32_0 = arith.constant 0 : i32
    return %c0_i32, %arg0 : i32, i32
  }
  func.func @transform_3(%arg0: i32) -> (i32, i32) {
    %c0_i32 = arith.constant 0 : i32
    %c0_i32_0 = arith.constant 0 : i32
    return %c0_i32, %arg0 : i32, i32
  }
  func.func @transform_4(%arg0: i32) -> (i32, i32) {
    %c0_i32 = arith.constant 0 : i32
    %c0_i32_0 = arith.constant 0 : i32
    return %c0_i32, %arg0 : i32, i32
  }
}

</mosaic_0001>

<bundles_post_ra>
// kernel: vae_nelbo_pallas.6
= control target key start
LH: loop header
LB: loop body
LE: loop exit
PB: predicated region body
PF: predicated region fallthrough
CT: control target
= control target key end

     0   :  { %vm69_vm0 = vcmask 130048   ;;  %vm430_vm1 = vcmask 261120   ;;  %s1012_s1 = inlined_call_operand.vmem [shape: f32[16,32], index: 1, kind: input, shape index: {}]   ;;  %s1013_s0 = inlined_call_operand.vmem [shape: f32[392,16], index: 0, kind: input, shape index: {}]   ;;  %s1014_s2 = inlined_call_operand.vmem [shape: f32[1,32], index: 2, kind: input, shape index: {}]   ;;  %s1015_s3 = inlined_call_operand.vmem [shape: f32[392,32], index: 3, kind: output, shape index: {}]  }
   0x1   :  { %v64_v0 = vld [vmem:[%s1012_s1 + $0x8] sm:$0xff]  ;;  %v63_v1 = vld [vmem:[%s1012_s1] sm:$0xff]  ;;  %v52_v5 = vld [vmem:[%s1013_s0 + $0x130] sm:$0xff] }
   0x2   :  { %534 = vmatpush.msra.mxu2 %v64_v0  ;;  %v39_v2 = vld [vmem:[%s1013_s0 + $0xc8] sm:$0xff]  ;;  %533 = vmatpush.msra.mxu1 %v64_v0  ;;  %v26_v3 = vld [vmem:[%s1013_s0 + $0x60] sm:$0xff]  ;;  %v40_v6 = vld [vmem:[%s1013_s0 + $0xd0] sm:$0xff] }
   0x3   :  { %231 = vmatpush.msra.mxu0 %v64_v0  ;;  %535 = vmatpush.msra.mxu3 %v64_v0  ;;  %v14_v4 = vld [vmem:[%s1013_s0] sm:$0xff]  ;;  %v27_v7 = vld [vmem:[%s1013_s0 + $0x68] sm:$0xff]  ;;  %v53_v9 = vld [vmem:[%s1013_s0 + $0x138] sm:$0xff] }
   0x4   :  { %537 = vmatpush.msra.mxu2 %v63_v1  ;;  %536 = vmatpush.msra.mxu1 %v63_v1  ;;  %v15_v8 = vld [vmem:[%s1013_s0 + $0x8] sm:$0xff]  ;;  %v41_v10 = vld [vmem:[%s1013_s0 + $0xd8] sm:$0xff]  ;;  %v28_v11 = vld [vmem:[%s1013_s0 + $0x70] sm:$0xff] }
   0x5   :  { %509 = vmatmul.msk.f32.vlgmr.msra.gmra.mxu2 %vm69_vm0, %v39_v2  ;;  %496 = vmatmul.msk.f32.vlgmr.msra.gmra.mxu1 %vm69_vm0, %v26_v3  ;;  %v16_v12 = vld [vmem:[%s1013_s0 + $0x10] sm:$0xff]  ;;  %v54_v13 = vld [vmem:[%s1013_s0 + $0x140] sm:$0xff]  ;;  %v29_v15 = vld [vmem:[%s1013_s0 + $0x78] sm:$0xff] }
   0x6   :  { %232 = vmatpush.msra.mxu0 %v63_v1  ;;  %538 = vmatpush.msra.mxu3 %v63_v1  ;;  %v42_v14 = vld [vmem:[%s1013_s0 + $0xe0] sm:$0xff]  ;;  %v17_v16 = vld [vmem:[%s1013_s0 + $0x18] sm:$0xff]  ;;  %v55_v17 = vld [vmem:[%s1013_s0 + $0x148] sm:$0xff] }
   0x7   :  { %484 = vmatmul.msk.f32.vlgmr.msra.gmra.mxu0 %vm69_vm0, %v14_v4  ;;  %522 = vmatmul.msk.f32.vlgmr.msra.gmra.mxu3 %vm69_vm0, %v52_v5  ;;  %v43_v18 = vld [vmem:[%s1013_s0 + $0xe8] sm:$0xff]  ;;  %v30_v19 = vld [vmem:[%s1013_s0 + $0x80] sm:$0xff]  ;;  %v56_v21 = vld [vmem:[%s1013_s0 + $0x150] sm:$0xff] }
   0x8   :  { %v18_v20 = vld [vmem:[%s1013_s0 + $0x20] sm:$0xff]  ;;  %v44_v22 = vld [vmem:[%s1013_s0 + $0xf0] sm:$0xff]  ;;  %v31_v23 = vld [vmem:[%s1013_s0 + $0x88] sm:$0xff] }
   0x9   :  { %v19_v24 = vld [vmem:[%s1013_s0 + $0x28] sm:$0xff]  ;;  %v57_v25 = vld [vmem:[%s1013_s0 + $0x158] sm:$0xff]  ;;  %v32_v27 = vld [vmem:[%s1013_s0 + $0x90] sm:$0xff] }
   0xa   :  { %v45_v26 = vld [vmem:[%s1013_s0 + $0xf8] sm:$0xff]  ;;  %v20_v28 = vld [vmem:[%s1013_s0 + $0x30] sm:$0xff]  ;;  %v58_v29 = vld [vmem:[%s1013_s0 + $0x160] sm:$0xff] }
   0xb   :  { %v46_v30 = vld [vmem:[%s1013_s0 + $0x100] sm:$0xff]  ;;  %v33_v31 = vld [vmem:[%s1013_s0 + $0x98] sm:$0xff]  ;;  %v59_v33 = vld [vmem:[%s1013_s0 + $0x168] sm:$0xff] }
   0xc   :  { %v21_v32 = vld [vmem:[%s1013_s0 + $0x38] sm:$0xff]  ;;  %v47_v34 = vld [vmem:[%s1013_s0 + $0x108] sm:$0xff]  ;;  %v34_v35 = vld [vmem:[%s1013_s0 + $0xa0] sm:$0xff] }
   0xd   :  { %510 = vmatmul.msk.f32.gmra.mxu2 %vm69_vm0, %v40_v6  ;;  %497 = vmatmul.msk.f32.gmra.mxu1 %vm69_vm0, %v27_v7  ;;  %v22_v36 = vld [vmem:[%s1013_s0 + $0x40] sm:$0xff]  ;;  %v60_v37 = vld [vmem:[%s1013_s0 + $0x170] sm:$0xff]  ;;  %v35_v39 = vld [vmem:[%s1013_s0 + $0xa8] sm:$0xff] }
   0xe   :  { %v48_v38 = vld [vmem:[%s1013_s0 + $0x110] sm:$0xff]  ;;  %v23_v40 = vld [vmem:[%s1013_s0 + $0x48] sm:$0xff]  ;;  %v61_v41 = vld [vmem:[%s1013_s0 + $0x178] sm:$0xff] }
   0xf   :  { %485 = vmatmul.msk.f32.gmra.mxu0 %vm69_vm0, %v15_v8  ;;  %523 = vmatmul.msk.f32.gmra.mxu3 %vm69_vm0, %v53_v9  ;;  %v49_v42 = vld [vmem:[%s1013_s0 + $0x118] sm:$0xff]  ;;  %v36_v43 = vld [vmem:[%s1013_s0 + $0xb0] sm:$0xff]  ;;  %v62_v45 = vld [vmem:[%s1013_s0 + $0x180] sm:$0xff] }
  0x10   :  { %v24_v44 = vld [vmem:[%s1013_s0 + $0x50] sm:$0xff]  ;;  %v50_v46 = vld [vmem:[%s1013_s0 + $0x120] sm:$0xff]  ;;  %v37_v47 = vld [vmem:[%s1013_s0 + $0xb8] sm:$0xff] }
  0x11   :  { %v25_v48 = vld [vmem:[%s1013_s0 + $0x58] sm:$0xff]  ;;  %v51_v49 = vld [vmem:[%s1013_s0 + $0x128] sm:$0xff]  ;;  %v38_v50 = vld [vmem:[%s1013_s0 + $0xc0] sm:$0xff] }
  0x12   :  { %v765_v51 = vld [vmem:[%s1014_s2] ss:$0 sm:$0xff] }
  0x15   :  { %511 = vmatmul.msk.f32.gmra.mxu2 %vm69_vm0, %v41_v10  ;;  %498 = vmatmul.msk.f32.gmra.mxu1 %vm69_vm0, %v28_v11 }
  0x17   :  { %486 = vmatmul.msk.f32.gmra.mxu0 %vm69_vm0, %v16_v12  ;;  %524 = vmatmul.msk.f32.gmra.mxu3 %vm69_vm0, %v54_v13 }
  0x1d   :  { %512 = vmatmul.msk.f32.gmra.mxu2 %vm69_vm0, %v42_v14  ;;  %499 = vmatmul.msk.f32.gmra.mxu1 %vm69_vm0, %v29_v15 }
  0x1f   :  { %487 = vmatmul.msk.f32.gmra.mxu0 %vm69_vm0, %v17_v16  ;;  %525 = vmatmul.msk.f32.gmra.mxu3 %vm69_vm0, %v55_v17 }
  0x25   :  { %513 = vmatmul.msk.f32.gmra.mxu2 %vm69_vm0, %v43_v18  ;;  %500 = vmatmul.msk.f32.gmra.mxu1 %vm69_vm0, %v30_v19 }
  0x27   :  { %488 = vmatmul.msk.f32.gmra.mxu0 %vm69_vm0, %v18_v20  ;;  %526 = vmatmul.msk.f32.gmra.mxu3 %vm69_vm0, %v56_v21 }
  0x2d   :  { %514 = vmatmul.msk.f32.gmra.mxu2 %vm69_vm0, %v44_v22  ;;  %501 = vmatmul.msk.f32.gmra.mxu1 %vm69_vm0, %v31_v23 }
  0x2f   :  { %489 = vmatmul.msk.f32.gmra.mxu0 %vm69_vm0, %v19_v24  ;;  %527 = vmatmul.msk.f32.gmra.mxu3 %vm69_vm0, %v57_v25 }
  0x35   :  { %515 = vmatmul.msk.f32.gmra.mxu2 %vm69_vm0, %v45_v26  ;;  %502 = vmatmul.msk.f32.gmra.mxu1 %vm69_vm0, %v32_v27 }
  0x37   :  { %490 = vmatmul.msk.f32.gmra.mxu0 %vm69_vm0, %v20_v28  ;;  %528 = vmatmul.msk.f32.gmra.mxu3 %vm69_vm0, %v58_v29 }
  0x3d   :  { %516 = vmatmul.msk.f32.gmra.mxu2 %vm69_vm0, %v46_v30  ;;  %503 = vmatmul.msk.f32.gmra.mxu1 %vm69_vm0, %v33_v31 }
  0x3f   :  { %491 = vmatmul.msk.f32.gmra.mxu0 %vm69_vm0, %v21_v32  ;;  %529 = vmatmul.msk.f32.gmra.mxu3 %vm69_vm0, %v59_v33 }
  0x45   :  { %517 = vmatmul.msk.f32.gmra.mxu2 %vm69_vm0, %v47_v34  ;;  %504 = vmatmul.msk.f32.gmra.mxu1 %vm69_vm0, %v34_v35 }
  0x47   :  { %492 = vmatmul.msk.f32.gmra.mxu0 %vm69_vm0, %v22_v36  ;;  %530 = vmatmul.msk.f32.gmra.mxu3 %vm69_vm0, %v60_v37 }
  0x4d   :  { %518 = vmatmul.msk.f32.gmra.mxu2 %vm69_vm0, %v48_v38  ;;  %505 = vmatmul.msk.f32.gmra.mxu1 %vm69_vm0, %v35_v39 }
  0x4f   :  { %493 = vmatmul.msk.f32.gmra.mxu0 %vm69_vm0, %v23_v40  ;;  %531 = vmatmul.msk.f32.gmra.mxu3 %vm69_vm0, %v61_v41 }
  0x55   :  { %519 = vmatmul.msk.f32.gmra.mxu2 %vm69_vm0, %v49_v42  ;;  %506 = vmatmul.msk.f32.gmra.mxu1 %vm69_vm0, %v36_v43 }
  0x57   :  { %494 = vmatmul.msk.f32.gmra.mxu0 %vm69_vm0, %v24_v44  ;;  %532 = vmatmul.msk.f32.gmra.mxu3 %vm69_vm0, %v62_v45 }
  0x5d   :  { %520 = vmatmul.msk.f32.gmra.mxu2 %vm69_vm0, %v50_v46  ;;  %507 = vmatmul.msk.f32.gmra.mxu1 %vm69_vm0, %v37_v47 }
  0x5f   :  { %495 = vmatmul.msk.f32.gmra.mxu0 %vm69_vm0, %v25_v48 }
  0x65   :  { %521 = vmatmul.msk.f32.gmra.mxu2 %vm69_vm0, %v51_v49  ;;  %508 = vmatmul.msk.f32.gmra.mxu1 %vm69_vm0, %v38_v50 }
  0x82   :  { %v270_v52 = vpop.f32.mrf.mxu1 }
  0x83   :  { %v271_v53 = vadd.f32 %v765_v51, %v270_v52 }
  0x84   :  { %v234_v54 = vpop.f32.mrf.mxu0 }
  0x85   :  { %v393_v55 = vmax.f32 %v271_v53, 0.0  ;;  %v235_v56 = vadd.f32 %v765_v51, %v234_v54 }
  0x87   :  { %443 = vst.msk [vmem:[%s1015_s3 + $0x60] sm:$0xff] %vm430_vm1, %v393_v55  ;;  %v381_v57 = vmax.f32 %v235_v56, 0.0 }
  0x88   :  { %v309_v58 = vpop.f32.mrf.mxu2 }
  0x89   :  { %v310_v59 = vadd.f32 %v765_v51, %v309_v58  ;;  %431 = vst.msk [vmem:[%s1015_s3] sm:$0xff] %vm430_vm1, %v381_v57 }
  0x8a   :  { %v273_v60 = vpop.f32.mrf.mxu1  ;;  %v348_v61 = vpop.f32.mrf.mxu3 }
  0x8b   :  { %v406_v62 = vmax.f32 %v310_v59, 0.0  ;;  %v274_v63 = vadd.f32 %v765_v51, %v273_v60  ;;  %v349_v0 = vadd.f32 %v765_v51, %v348_v61 }
  0x8c   :  { %v237_v1 = vpop.f32.mrf.mxu0 }
  0x8d   :  { %456 = vst.msk [vmem:[%s1015_s3 + $0xc8] sm:$0xff] %vm430_vm1, %v406_v62  ;;  %v394_v2 = vmax.f32 %v274_v63, 0.0  ;;  %v238_v3 = vadd.f32 %v765_v51, %v237_v1  ;;  %v419_v4 = vmax.f32 %v349_v0, 0.0 }
  0x8f   :  { %444 = vst.msk [vmem:[%s1015_s3 + $0x68] sm:$0xff] %vm430_vm1, %v394_v2  ;;  %v382_v5 = vmax.f32 %v238_v3, 0.0 }
  0x90   :  { %v312_v6 = vpop.f32.mrf.mxu2  ;;  %469 = vst.msk [vmem:[%s1015_s3 + $0x130] sm:$0xff] %vm430_vm1, %v419_v4 }
  0x91   :  { %v313_v7 = vadd.f32 %v765_v51, %v312_v6  ;;  %432 = vst.msk [vmem:[%s1015_s3 + $0x8] sm:$0xff] %vm430_vm1, %v382_v5 }
  0x92   :  { %v276_v8 = vpop.f32.mrf.mxu1  ;;  %v351_v9 = vpop.f32.mrf.mxu3 }
  0x93   :  { %v407_v10 = vmax.f32 %v313_v7, 0.0  ;;  %v277_v11 = vadd.f32 %v765_v51, %v276_v8  ;;  %v352_v12 = vadd.f32 %v765_v51, %v351_v9 }
  0x94   :  { %v240_v13 = vpop.f32.mrf.mxu0 }
  0x95   :  { %457 = vst.msk [vmem:[%s1015_s3 + $0xd0] sm:$0xff] %vm430_vm1, %v407_v10  ;;  %v395_v14 = vmax.f32 %v277_v11, 0.0  ;;  %v241_v15 = vadd.f32 %v765_v51, %v240_v13  ;;  %v420_v16 = vmax.f32 %v352_v12, 0.0 }
  0x97   :  { %445 = vst.msk [vmem:[%s1015_s3 + $0x70] sm:$0xff] %vm430_vm1, %v395_v14  ;;  %v383_v17 = vmax.f32 %v241_v15, 0.0 }
  0x98   :  { %v315_v18 = vpop.f32.mrf.mxu2  ;;  %470 = vst.msk [vmem:[%s1015_s3 + $0x138] sm:$0xff] %vm430_vm1, %v420_v16 }
  0x99   :  { %v316_v19 = vadd.f32 %v765_v51, %v315_v18  ;;  %433 = vst.msk [vmem:[%s1015_s3 + $0x10] sm:$0xff] %vm430_vm1, %v383_v17 }
  0x9a   :  { %v279_v20 = vpop.f32.mrf.mxu1  ;;  %v354_v21 = vpop.f32.mrf.mxu3 }
  0x9b   :  { %v408_v22 = vmax.f32 %v316_v19, 0.0  ;;  %v280_v23 = vadd.f32 %v765_v51, %v279_v20  ;;  %v355_v24 = vadd.f32 %v765_v51, %v354_v21 }
  0x9c   :  { %v243_v25 = vpop.f32.mrf.mxu0 }
  0x9d   :  { %458 = vst.msk [vmem:[%s1015_s3 + $0xd8] sm:$0xff] %vm430_vm1, %v408_v22  ;;  %v396_v26 = vmax.f32 %v280_v23, 0.0  ;;  %v244_v27 = vadd.f32 %v765_v51, %v243_v25  ;;  %v421_v28 = vmax.f32 %v355_v24, 0.0 }
  0x9f   :  { %446 = vst.msk [vmem:[%s1015_s3 + $0x78] sm:$0xff] %vm430_vm1, %v396_v26  ;;  %v384_v29 = vmax.f32 %v244_v27, 0.0 }
  0xa0   :  { %v318_v30 = vpop.f32.mrf.mxu2  ;;  %471 = vst.msk [vmem:[%s1015_s3 + $0x140] sm:$0xff] %vm430_vm1, %v421_v28 }
  0xa1   :  { %v319_v31 = vadd.f32 %v765_v51, %v318_v30  ;;  %434 = vst.msk [vmem:[%s1015_s3 + $0x18] sm:$0xff] %vm430_vm1, %v384_v29 }
  0xa2   :  { %v282_v32 = vpop.f32.mrf.mxu1  ;;  %v357_v33 = vpop.f32.mrf.mxu3 }
  0xa3   :  { %v409_v34 = vmax.f32 %v319_v31, 0.0  ;;  %v283_v35 = vadd.f32 %v765_v51, %v282_v32  ;;  %v358_v36 = vadd.f32 %v765_v51, %v357_v33 }
  0xa4   :  { %v246_v37 = vpop.f32.mrf.mxu0 }
  0xa5   :  { %459 = vst.msk [vmem:[%s1015_s3 + $0xe0] sm:$0xff] %vm430_vm1, %v409_v34  ;;  %v397_v38 = vmax.f32 %v283_v35, 0.0  ;;  %v247_v39 = vadd.f32 %v765_v51, %v246_v37  ;;  %v422_v40 = vmax.f32 %v358_v36, 0.0 }
  0xa7   :  { %447 = vst.msk [vmem:[%s1015_s3 + $0x80] sm:$0xff] %vm430_vm1, %v397_v38  ;;  %v385_v41 = vmax.f32 %v247_v39, 0.0 }
  0xa8   :  { %v321_v42 = vpop.f32.mrf.mxu2  ;;  %472 = vst.msk [vmem:[%s1015_s3 + $0x148] sm:$0xff] %vm430_vm1, %v422_v40 }
  0xa9   :  { %v322_v43 = vadd.f32 %v765_v51, %v321_v42  ;;  %435 = vst.msk [vmem:[%s1015_s3 + $0x20] sm:$0xff] %vm430_vm1, %v385_v41 }
  0xaa   :  { %v285_v44 = vpop.f32.mrf.mxu1  ;;  %v360_v45 = vpop.f32.mrf.mxu3 }
  0xab   :  { %v410_v46 = vmax.f32 %v322_v43, 0.0  ;;  %v286_v47 = vadd.f32 %v765_v51, %v285_v44  ;;  %v361_v48 = vadd.f32 %v765_v51, %v360_v45 }
  0xac   :  { %v249_v49 = vpop.f32.mrf.mxu0 }
  0xad   :  { %460 = vst.msk [vmem:[%s1015_s3 + $0xe8] sm:$0xff] %vm430_vm1, %v410_v46  ;;  %v398_v50 = vmax.f32 %v286_v47, 0.0  ;;  %v250_v52 = vadd.f32 %v765_v51, %v249_v49  ;;  %v423_v53 = vmax.f32 %v361_v48, 0.0 }
  0xaf   :  { %448 = vst.msk [vmem:[%s1015_s3 + $0x88] sm:$0xff] %vm430_vm1, %v398_v50  ;;  %v386_v54 = vmax.f32 %v250_v52, 0.0 }
  0xb0   :  { %v324_v55 = vpop.f32.mrf.mxu2  ;;  %473 = vst.msk [vmem:[%s1015_s3 + $0x150] sm:$0xff] %vm430_vm1, %v423_v53 }
  0xb1   :  { %v325_v56 = vadd.f32 %v765_v51, %v324_v55  ;;  %436 = vst.msk [vmem:[%s1015_s3 + $0x28] sm:$0xff] %vm430_vm1, %v386_v54 }
  0xb2   :  { %v288_v57 = vpop.f32.mrf.mxu1  ;;  %v363_v58 = vpop.f32.mrf.mxu3 }
  0xb3   :  { %v411_v59 = vmax.f32 %v325_v56, 0.0  ;;  %v289_v60 = vadd.f32 %v765_v51, %v288_v57  ;;  %v364_v61 = vadd.f32 %v765_v51, %v363_v58 }
  0xb4   :  { %v252_v62 = vpop.f32.mrf.mxu0 }
  0xb5   :  { %461 = vst.msk [vmem:[%s1015_s3 + $0xf0] sm:$0xff] %vm430_vm1, %v411_v59  ;;  %v399_v63 = vmax.f32 %v289_v60, 0.0  ;;  %v253_v0 = vadd.f32 %v765_v51, %v252_v62  ;;  %v424_v1 = vmax.f32 %v364_v61, 0.0 }
  0xb7   :  { %449 = vst.msk [vmem:[%s1015_s3 + $0x90] sm:$0xff] %vm430_vm1, %v399_v63  ;;  %v387_v2 = vmax.f32 %v253_v0, 0.0 }
  0xb8   :  { %v327_v3 = vpop.f32.mrf.mxu2  ;;  %474 = vst.msk [vmem:[%s1015_s3 + $0x158] sm:$0xff] %vm430_vm1, %v424_v1 }
  0xb9   :  { %v328_v4 = vadd.f32 %v765_v51, %v327_v3  ;;  %437 = vst.msk [vmem:[%s1015_s3 + $0x30] sm:$0xff] %vm430_vm1, %v387_v2 }
  0xba   :  { %v291_v5 = vpop.f32.mrf.mxu1  ;;  %v366_v6 = vpop.f32.mrf.mxu3 }
  0xbb   :  { %v412_v7 = vmax.f32 %v328_v4, 0.0  ;;  %v292_v8 = vadd.f32 %v765_v51, %v291_v5  ;;  %v367_v9 = vadd.f32 %v765_v51, %v366_v6 }
  0xbc   :  { %v255_v10 = vpop.f32.mrf.mxu0 }
  0xbd   :  { %462 = vst.msk [vmem:[%s1015_s3 + $0xf8] sm:$0xff] %vm430_vm1, %v412_v7  ;;  %v400_v11 = vmax.f32 %v292_v8, 0.0  ;;  %v256_v12 = vadd.f32 %v765_v51, %v255_v10  ;;  %v425_v13 = vmax.f32 %v367_v9, 0.0 }
  0xbf   :  { %450 = vst.msk [vmem:[%s1015_s3 + $0x98] sm:$0xff] %vm430_vm1, %v400_v11  ;;  %v388_v14 = vmax.f32 %v256_v12, 0.0 }
  0xc0   :  { %v330_v15 = vpop.f32.mrf.mxu2  ;;  %475 = vst.msk [vmem:[%s1015_s3 + $0x160] sm:$0xff] %vm430_vm1, %v425_v13 }
  0xc1   :  { %v331_v16 = vadd.f32 %v765_v51, %v330_v15  ;;  %438 = vst.msk [vmem:[%s1015_s3 + $0x38] sm:$0xff] %vm430_vm1, %v388_v14 }
  0xc2   :  { %v294_v17 = vpop.f32.mrf.mxu1  ;;  %v369_v18 = vpop.f32.mrf.mxu3 }
  0xc3   :  { %v413_v19 = vmax.f32 %v331_v16, 0.0  ;;  %v295_v20 = vadd.f32 %v765_v51, %v294_v17  ;;  %v370_v21 = vadd.f32 %v765_v51, %v369_v18 }
  0xc4   :  { %v258_v22 = vpop.f32.mrf.mxu0 }
  0xc5   :  { %463 = vst.msk [vmem:[%s1015_s3 + $0x100] sm:$0xff] %vm430_vm1, %v413_v19  ;;  %v401_v23 = vmax.f32 %v295_v20, 0.0  ;;  %v259_v24 = vadd.f32 %v765_v51, %v258_v22  ;;  %v426_v25 = vmax.f32 %v370_v21, 0.0 }
  0xc7   :  { %451 = vst.msk [vmem:[%s1015_s3 + $0xa0] sm:$0xff] %vm430_vm1, %v401_v23  ;;  %v389_v26 = vmax.f32 %v259_v24, 0.0 }
  0xc8   :  { %v333_v27 = vpop.f32.mrf.mxu2  ;;  %476 = vst.msk [vmem:[%s1015_s3 + $0x168] sm:$0xff] %vm430_vm1, %v426_v25 }
  0xc9   :  { %v334_v28 = vadd.f32 %v765_v51, %v333_v27  ;;  %439 = vst.msk [vmem:[%s1015_s3 + $0x40] sm:$0xff] %vm430_vm1, %v389_v26 }
  0xca   :  { %v297_v29 = vpop.f32.mrf.mxu1  ;;  %v372_v30 = vpop.f32.mrf.mxu3 }
  0xcb   :  { %v414_v31 = vmax.f32 %v334_v28, 0.0  ;;  %v298_v32 = vadd.f32 %v765_v51, %v297_v29  ;;  %v373_v33 = vadd.f32 %v765_v51, %v372_v30 }
  0xcc   :  { %v261_v34 = vpop.f32.mrf.mxu0 }
  0xcd   :  { %464 = vst.msk [vmem:[%s1015_s3 + $0x108] sm:$0xff] %vm430_vm1, %v414_v31  ;;  %v402_v35 = vmax.f32 %v298_v32, 0.0  ;;  %v262_v36 = vadd.f32 %v765_v51, %v261_v34  ;;  %v427_v37 = vmax.f32 %v373_v33, 0.0 }
  0xcf   :  { %452 = vst.msk [vmem:[%s1015_s3 + $0xa8] sm:$0xff] %vm430_vm1, %v402_v35  ;;  %v390_v38 = vmax.f32 %v262_v36, 0.0 }
  0xd0   :  { %v336_v39 = vpop.f32.mrf.mxu2  ;;  %477 = vst.msk [vmem:[%s1015_s3 + $0x170] sm:$0xff] %vm430_vm1, %v427_v37 }
  0xd1   :  { %v337_v40 = vadd.f32 %v765_v51, %v336_v39  ;;  %440 = vst.msk [vmem:[%s1015_s3 + $0x48] sm:$0xff] %vm430_vm1, %v390_v38 }
  0xd2   :  { %v300_v41 = vpop.f32.mrf.mxu1  ;;  %v375_v42 = vpop.f32.mrf.mxu3 }
  0xd3   :  { %v415_v43 = vmax.f32 %v337_v40, 0.0  ;;  %v301_v44 = vadd.f32 %v765_v51, %v300_v41  ;;  %v376_v45 = vadd.f32 %v765_v51, %v375_v42 }
  0xd4   :  { %v264_v46 = vpop.f32.mrf.mxu0 }
  0xd5   :  { %465 = vst.msk [vmem:[%s1015_s3 + $0x110] sm:$0xff] %vm430_vm1, %v415_v43  ;;  %v403_v47 = vmax.f32 %v301_v44, 0.0  ;;  %v265_v48 = vadd.f32 %v765_v51, %v264_v46  ;;  %v428_v49 = vmax.f32 %v376_v45, 0.0 }
  0xd7   :  { %453 = vst.msk [vmem:[%s1015_s3 + $0xb0] sm:$0xff] %vm430_vm1, %v403_v47  ;;  %v391_v50 = vmax.f32 %v265_v48, 0.0 }
  0xd8   :  { %v339_v52 = vpop.f32.mrf.mxu2  ;;  %478 = vst.msk [vmem:[%s1015_s3 + $0x178] sm:$0xff] %vm430_vm1, %v428_v49 }
  0xd9   :  { %v340_v53 = vadd.f32 %v765_v51, %v339_v52  ;;  %441 = vst.msk [vmem:[%s1015_s3 + $0x50] sm:$0xff] %vm430_vm1, %v391_v50 }
  0xda   :  { %v303_v54 = vpop.f32.mrf.mxu1  ;;  %v378_v55 = vpop.f32.mrf.mxu3 }
  0xdb   :  { %v416_v56 = vmax.f32 %v340_v53, 0.0  ;;  %v304_v57 = vadd.f32 %v765_v51, %v303_v54  ;;  %v379_v58 = vadd.f32 %v765_v51, %v378_v55 }
  0xdc   :  { %v267_v59 = vpop.f32.mrf.mxu0 }
  0xdd   :  { %466 = vst.msk [vmem:[%s1015_s3 + $0x118] sm:$0xff] %vm430_vm1, %v416_v56  ;;  %v404_v60 = vmax.f32 %v304_v57, 0.0  ;;  %v268_v61 = vadd.f32 %v765_v51, %v267_v59  ;;  %v429_v62 = vmax.f32 %v379_v58, 0.0 }
  0xdf   :  { %454 = vst.msk [vmem:[%s1015_s3 + $0xb8] sm:$0xff] %vm430_vm1, %v404_v60  ;;  %v392_v63 = vmax.f32 %v268_v61, 0.0 }
  0xe0   :  { %v342_v0 = vpop.f32.mrf.mxu2  ;;  %479 = vst.msk [vmem:[%s1015_s3 + $0x180] sm:$0xff] %vm430_vm1, %v429_v62 }
  0xe1   :  { %v343_v1 = vadd.f32 %v765_v51, %v342_v0  ;;  %442 = vst.msk [vmem:[%s1015_s3 + $0x58] sm:$0xff] %vm430_vm1, %v392_v63 }
  0xe2   :  { %v306_v2 = vpop.f32.mrf.mxu1 }
  0xe3   :  { %v417_v3 = vmax.f32 %v343_v1, 0.0  ;;  %v307_v4 = vadd.f32 %v765_v51, %v306_v2 }
  0xe5   :  { %467 = vst.msk [vmem:[%s1015_s3 + $0x120] sm:$0xff] %vm430_vm1, %v417_v3  ;;  %v405_v5 = vmax.f32 %v307_v4, 0.0 }
  0xe7   :  { %455 = vst.msk [vmem:[%s1015_s3 + $0xc0] sm:$0xff] %vm430_vm1, %v405_v5 }
  0xe8   :  { %v345_v6 = vpop.f32.mrf.mxu2 }
  0xe9   :  { %v346_v7 = vadd.f32 %v765_v51, %v345_v6 }
  0xeb   :  { %v418_v8 = vmax.f32 %v346_v7, 0.0 }
  0xed   :  { %468 = vst.msk [vmem:[%s1015_s3 + $0x128] sm:$0xff] %vm430_vm1, %v418_v8 }

// kernel: vae_nelbo_pallas.7
= control target key start
LH: loop header
LB: loop body
LE: loop exit
PB: predicated region body
PF: predicated region fallthrough
CT: control target
= control target key end

     0   :  { %vm371_vm0 = vcmask 523264   ;;  %vm384_vm1 = vcmask 517120   ;;  %s828_s1 = inlined_call_operand.vmem [shape: f32[512,64], index: 1, kind: input, shape index: {}]   ;;  %s829_s2 = inlined_call_operand.vmem [shape: f32[1,64], index: 2, kind: input, shape index: {}]   ;;  %s830_s0 = inlined_call_operand.vmem [shape: f32[98,512], index: 0, kind: input, shape index: {}]   ;;  %s831_s3 = inlined_call_operand.vmem [shape: f32[98,64], index: 3, kind: output, shape index: {}]  }
   0x1   :  { %v113_v0 = vld [vmem:[%s828_s1 + $0x178] sm:$0xff]  ;;  %v112_v2 = vld [vmem:[%s828_s1 + $0x170] sm:$0xff]  ;;  %v111_v6 = vld [vmem:[%s828_s1 + $0x168] sm:$0xff] }
   0x2   :  { %v81_v1 = vld [vmem:[%s828_s1 + $0x78] sm:$0xff]  ;;  %246 = vmatpush.msra.mxu2 %v113_v0  ;;  %v80_v4 = vld [vmem:[%s828_s1 + $0x70] sm:$0xff]  ;;  %v79_v8 = vld [vmem:[%s828_s1 + $0x68] sm:$0xff] }
   0x3   :  { %134 = vmatpush.msra.mxu0 %v81_v1  ;;  %v129_v3 = vld [vmem:[%s828_s1 + $0x1f8] sm:$0xff]  ;;  %v128_v7 = vld [vmem:[%s828_s1 + $0x1f0] sm:$0xff]  ;;  %v127_v10 = vld [vmem:[%s828_s1 + $0x1e8] sm:$0xff] }
   0x4   :  { %v97_v5 = vld [vmem:[%s828_s1 + $0xf8] sm:$0xff]  ;;  %302 = vmatpush.msra.mxu3 %v129_v3  ;;  %247 = vmatpush.msra.mxu2 %v112_v2  ;;  %v96_v9 = vld [vmem:[%s828_s1 + $0xf0] sm:$0xff]  ;;  %v110_v11 = vld [vmem:[%s828_s1 + $0x160] sm:$0xff] }
   0x5   :  { %190 = vmatpush.msra.mxu1 %v97_v5  ;;  %135 = vmatpush.msra.mxu0 %v80_v4  ;;  %v78_v12 = vld [vmem:[%s828_s1 + $0x60] sm:$0xff]  ;;  %v95_v13 = vld [vmem:[%s828_s1 + $0xe8] sm:$0xff]  ;;  %v109_v16 = vld [vmem:[%s828_s1 + $0x158] sm:$0xff] }
   0x6   :  { %303 = vmatpush.msra.mxu3 %v128_v7  ;;  %248 = vmatpush.msra.mxu2 %v111_v6  ;;  %v126_v14 = vld [vmem:[%s828_s1 + $0x1e0] sm:$0xff]  ;;  %v77_v17 = vld [vmem:[%s828_s1 + $0x58] sm:$0xff]  ;;  %v108_v20 = vld [vmem:[%s828_s1 + $0x150] sm:$0xff] }
   0x7   :  { %191 = vmatpush.msra.mxu1 %v96_v9  ;;  %136 = vmatpush.msra.mxu0 %v79_v8  ;;  %v94_v15 = vld [vmem:[%s828_s1 + $0xe0] sm:$0xff]  ;;  %v125_v18 = vld [vmem:[%s828_s1 + $0x1d8] sm:$0xff]  ;;  %v76_v21 = vld [vmem:[%s828_s1 + $0x50] sm:$0xff] }
   0x8   :  { %304 = vmatpush.msra.mxu3 %v127_v10  ;;  %249 = vmatpush.msra.mxu2 %v110_v11  ;;  %v93_v19 = vld [vmem:[%s828_s1 + $0xd8] sm:$0xff]  ;;  %v124_v22 = vld [vmem:[%s828_s1 + $0x1d0] sm:$0xff]  ;;  %v107_v24 = vld [vmem:[%s828_s1 + $0x148] sm:$0xff] }
   0x9   :  { %192 = vmatpush.msra.mxu1 %v95_v13  ;;  %137 = vmatpush.msra.mxu0 %v78_v12  ;;  %v92_v23 = vld [vmem:[%s828_s1 + $0xd0] sm:$0xff]  ;;  %v75_v25 = vld [vmem:[%s828_s1 + $0x48] sm:$0xff]  ;;  %v106_v28 = vld [vmem:[%s828_s1 + $0x140] sm:$0xff] }
   0xa   :  { %305 = vmatpush.msra.mxu3 %v126_v14  ;;  %250 = vmatpush.msra.mxu2 %v109_v16  ;;  %v123_v26 = vld [vmem:[%s828_s1 + $0x1c8] sm:$0xff]  ;;  %v74_v29 = vld [vmem:[%s828_s1 + $0x40] sm:$0xff]  ;;  %v105_v32 = vld [vmem:[%s828_s1 + $0x138] sm:$0xff] }
   0xb   :  { %193 = vmatpush.msra.mxu1 %v94_v15  ;;  %138 = vmatpush.msra.mxu0 %v77_v17  ;;  %v91_v27 = vld [vmem:[%s828_s1 + $0xc8] sm:$0xff]  ;;  %v122_v30 = vld [vmem:[%s828_s1 + $0x1c0] sm:$0xff]  ;;  %v73_v33 = vld [vmem:[%s828_s1 + $0x38] sm:$0xff] }
   0xc   :  { %306 = vmatpush.msra.mxu3 %v125_v18  ;;  %251 = vmatpush.msra.mxu2 %v108_v20  ;;  %v90_v31 = vld [vmem:[%s828_s1 + $0xc0] sm:$0xff]  ;;  %v121_v34 = vld [vmem:[%s828_s1 + $0x1b8] sm:$0xff]  ;;  %v104_v36 = vld [vmem:[%s828_s1 + $0x130] sm:$0xff] }
   0xd   :  { %194 = vmatpush.msra.mxu1 %v93_v19  ;;  %139 = vmatpush.msra.mxu0 %v76_v21  ;;  %v89_v35 = vld [vmem:[%s828_s1 + $0xb8] sm:$0xff]  ;;  %v72_v37 = vld [vmem:[%s828_s1 + $0x30] sm:$0xff]  ;;  %v103_v40 = vld [vmem:[%s828_s1 + $0x128] sm:$0xff] }
   0xe   :  { %307 = vmatpush.msra.mxu3 %v124_v22  ;;  %252 = vmatpush.msra.mxu2 %v107_v24  ;;  %v120_v38 = vld [vmem:[%s828_s1 + $0x1b0] sm:$0xff]  ;;  %v71_v41 = vld [vmem:[%s828_s1 + $0x28] sm:$0xff]  ;;  %v102_v44 = vld [vmem:[%s828_s1 + $0x120] sm:$0xff] }
   0xf   :  { %195 = vmatpush.msra.mxu1 %v92_v23  ;;  %140 = vmatpush.msra.mxu0 %v75_v25  ;;  %v88_v39 = vld [vmem:[%s828_s1 + $0xb0] sm:$0xff]  ;;  %v119_v42 = vld [vmem:[%s828_s1 + $0x1a8] sm:$0xff]  ;;  %v70_v45 = vld [vmem:[%s828_s1 + $0x20] sm:$0xff] }
  0x10   :  { %308 = vmatpush.msra.mxu3 %v123_v26  ;;  %253 = vmatpush.msra.mxu2 %v106_v28  ;;  %v87_v43 = vld [vmem:[%s828_s1 + $0xa8] sm:$0xff]  ;;  %v118_v46 = vld [vmem:[%s828_s1 + $0x1a0] sm:$0xff]  ;;  %v101_v48 = vld [vmem:[%s828_s1 + $0x118] sm:$0xff] }
  0x11   :  { %196 = vmatpush.msra.mxu1 %v91_v27  ;;  %141 = vmatpush.msra.mxu0 %v74_v29  ;;  %v86_v47 = vld [vmem:[%s828_s1 + $0xa0] sm:$0xff]  ;;  %v69_v49 = vld [vmem:[%s828_s1 + $0x18] sm:$0xff]  ;;  %v100_v52 = vld [vmem:[%s828_s1 + $0x110] sm:$0xff] }
  0x12   :  { %309 = vmatpush.msra.mxu3 %v122_v30  ;;  %254 = vmatpush.msra.mxu2 %v105_v32  ;;  %v117_v50 = vld [vmem:[%s828_s1 + $0x198] sm:$0xff]  ;;  %v68_v53 = vld [vmem:[%s828_s1 + $0x10] sm:$0xff]  ;;  %v99_v56 = vld [vmem:[%s828_s1 + $0x108] sm:$0xff] }
  0x13   :  { %197 = vmatpush.msra.mxu1 %v90_v31  ;;  %142 = vmatpush.msra.mxu0 %v73_v33  ;;  %v85_v51 = vld [vmem:[%s828_s1 + $0x98] sm:$0xff]  ;;  %v116_v54 = vld [vmem:[%s828_s1 + $0x190] sm:$0xff]  ;;  %v67_v57 = vld [vmem:[%s828_s1 + $0x8] sm:$0xff] }
  0x14   :  { %310 = vmatpush.msra.mxu3 %v121_v34  ;;  %255 = vmatpush.msra.mxu2 %v104_v36  ;;  %v84_v55 = vld [vmem:[%s828_s1 + $0x90] sm:$0xff]  ;;  %v115_v58 = vld [vmem:[%s828_s1 + $0x188] sm:$0xff]  ;;  %v98_v60 = vld [vmem:[%s828_s1 + $0x100] sm:$0xff] }
  0x15   :  { %198 = vmatpush.msra.mxu1 %v89_v35  ;;  %143 = vmatpush.msra.mxu0 %v72_v37  ;;  %v83_v59 = vld [vmem:[%s828_s1 + $0x88] sm:$0xff]  ;;  %v66_v61 = vld [vmem:[%s828_s1] sm:$0xff]  ;;  %v16_v62 = vld [vmem:[%s830_s0 + $0x10] sm:$0xff] }
  0x16   :  { %311 = vmatpush.msra.mxu3 %v120_v38  ;;  %256 = vmatpush.msra.mxu2 %v103_v40  ;;  %v114_v63 = vld [vmem:[%s828_s1 + $0x180] sm:$0xff]  ;;  %v17_v1 = vld [vmem:[%s830_s0 + $0x18] sm:$0xff]  ;;  %v15_v3 = vld [vmem:[%s830_s0 + $0x8] sm:$0xff] }
  0x17   :  { %199 = vmatpush.msra.mxu1 %v88_v39  ;;  %144 = vmatpush.msra.mxu0 %v71_v41  ;;  %v14_v0 = vld [vmem:[%s830_s0] sm:$0xff]  ;;  %v20_v4 = vld [vmem:[%s830_s0 + $0x30] sm:$0xff]  ;;  %v21_v6 = vld [vmem:[%s830_s0 + $0x38] sm:$0xff] }
  0x18   :  { %312 = vmatpush.msra.mxu3 %v119_v42  ;;  %257 = vmatpush.msra.mxu2 %v102_v44  ;;  %v82_v2 = vld [vmem:[%s828_s1 + $0x80] sm:$0xff]  ;;  %v19_v7 = vld [vmem:[%s830_s0 + $0x28] sm:$0xff]  ;;  %v24_v8 = vld [vmem:[%s830_s0 + $0x50] sm:$0xff] }
  0x19   :  { %200 = vmatpush.msra.mxu1 %v87_v43  ;;  %145 = vmatpush.msra.mxu0 %v70_v45  ;;  %v18_v5 = vld [vmem:[%s830_s0 + $0x20] sm:$0xff]  ;;  %v25_v10 = vld [vmem:[%s830_s0 + $0x58] sm:$0xff]  ;;  %v23_v11 = vld [vmem:[%s830_s0 + $0x48] sm:$0xff] }
  0x1a   :  { %313 = vmatpush.msra.mxu3 %v118_v46  ;;  %258 = vmatpush.msra.mxu2 %v101_v48  ;;  %v22_v9 = vld [vmem:[%s830_s0 + $0x40] sm:$0xff]  ;;  %v28_v12 = vld [vmem:[%s830_s0 + $0x70] sm:$0xff]  ;;  %v29_v14 = vld [vmem:[%s830_s0 + $0x78] sm:$0xff] }
  0x1b   :  { %201 = vmatpush.msra.mxu1 %v86_v47  ;;  %146 = vmatpush.msra.mxu0 %v69_v49  ;;  %v26_v13 = vld [vmem:[%s830_s0 + $0x60] sm:$0xff]  ;;  %v27_v15 = vld [vmem:[%s830_s0 + $0x68] sm:$0xff]  ;;  %v32_v16 = vld [vmem:[%s830_s0 + $0x90] sm:$0xff] }
  0x1c   :  { %314 = vmatpush.msra.mxu3 %v117_v50  ;;  %259 = vmatpush.msra.mxu2 %v100_v52  ;;  %v30_v17 = vld [vmem:[%s830_s0 + $0x80] sm:$0xff]  ;;  %v33_v18 = vld [vmem:[%s830_s0 + $0x98] sm:$0xff]  ;;  %v31_v19 = vld [vmem:[%s830_s0 + $0x88] sm:$0xff] }
  0x1d   :  { %202 = vmatpush.msra.mxu1 %v85_v51  ;;  %147 = vmatpush.msra.mxu0 %v68_v53  ;;  %v36_v20 = vld [vmem:[%s830_s0 + $0xb0] sm:$0xff]  ;;  %v34_v21 = vld [vmem:[%s830_s0 + $0xa0] sm:$0xff]  ;;  %v37_v22 = vld [vmem:[%s830_s0 + $0xb8] sm:$0xff] }
  0x1e   :  { %315 = vmatpush.msra.mxu3 %v116_v54  ;;  %260 = vmatpush.msra.mxu2 %v99_v56  ;;  %v35_v23 = vld [vmem:[%s830_s0 + $0xa8] sm:$0xff]  ;;  %v40_v24 = vld [vmem:[%s830_s0 + $0xd0] sm:$0xff]  ;;  %v38_v25 = vld [vmem:[%s830_s0 + $0xc0] sm:$0xff] }
  0x1f   :  { %203 = vmatpush.msra.mxu1 %v84_v55  ;;  %148 = vmatpush.msra.mxu0 %v67_v57  ;;  %v41_v26 = vld [vmem:[%s830_s0 + $0xd8] sm:$0xff]  ;;  %v39_v27 = vld [vmem:[%s830_s0 + $0xc8] sm:$0xff]  ;;  %v44_v28 = vld [vmem:[%s830_s0 + $0xf0] sm:$0xff] }
  0x20   :  { %316 = vmatpush.msra.mxu3 %v115_v58  ;;  %261 = vmatpush.msra.mxu2 %v98_v60  ;;  %v42_v29 = vld [vmem:[%s830_s0 + $0xe0] sm:$0xff]  ;;  %v45_v30 = vld [vmem:[%s830_s0 + $0xf8] sm:$0xff]  ;;  %v43_v31 = vld [vmem:[%s830_s0 + $0xe8] sm:$0xff] }
  0x21   :  { %204 = vmatpush.msra.mxu1 %v83_v59  ;;  %149 = vmatpush.msra.mxu0 %v66_v61  ;;  %v48_v32 = vld [vmem:[%s830_s0 + $0x110] sm:$0xff]  ;;  %v46_v33 = vld [vmem:[%s830_s0 + $0x100] sm:$0xff]  ;;  %v49_v34 = vld [vmem:[%s830_s0 + $0x118] sm:$0xff] }
  0x22   :  { %262 = vmatmul.f32.vlgmr.msra.gmra.mxu2 %v16_v62  ;;  %317 = vmatpush.msra.mxu3 %v114_v63  ;;  %v47_v35 = vld [vmem:[%s830_s0 + $0x108] sm:$0xff]  ;;  %v52_v36 = vld [vmem:[%s830_s0 + $0x130] sm:$0xff]  ;;  %v50_v37 = vld [vmem:[%s830_s0 + $0x120] sm:$0xff] }
  0x23   :  { %150 = vmatmul.f32.vlgmr.msra.gmra.mxu0 %v14_v0  ;;  %318 = vmatmul.f32.vlgmr.msra.gmra.mxu3 %v17_v1  ;;  %v53_v38 = vld [vmem:[%s830_s0 + $0x138] sm:$0xff]  ;;  %v51_v39 = vld [vmem:[%s830_s0 + $0x128] sm:$0xff]  ;;  %v56_v40 = vld [vmem:[%s830_s0 + $0x150] sm:$0xff] }
  0x24   :  { %205 = vmatpush.msra.mxu1 %v82_v2  ;;  %v54_v41 = vld [vmem:[%s830_s0 + $0x140] sm:$0xff]  ;;  %v57_v42 = vld [vmem:[%s830_s0 + $0x158] sm:$0xff]  ;;  %v55_v43 = vld [vmem:[%s830_s0 + $0x148] sm:$0xff] }
  0x25   :  { %206 = vmatmul.f32.vlgmr.msra.gmra.mxu1 %v15_v3  ;;  %v60_v44 = vld [vmem:[%s830_s0 + $0x170] sm:$0xff]  ;;  %v58_v45 = vld [vmem:[%s830_s0 + $0x160] sm:$0xff]  ;;  %v61_v46 = vld [vmem:[%s830_s0 + $0x178] sm:$0xff] }
  0x26   :  { %v59_v47 = vld [vmem:[%s830_s0 + $0x168] sm:$0xff]  ;;  %v64_v48 = vld [vmem:[%s830_s0 + $0x190] sm:$0x3]  ;;  %v62_v49 = vld [vmem:[%s830_s0 + $0x180] sm:$0x3] }
  0x27   :  { %v65_v50 = vld [vmem:[%s830_s0 + $0x198] sm:$0x3]  ;;  %v63_v51 = vld [vmem:[%s830_s0 + $0x188] sm:$0x3]  ;;  %v762_v52 = vld [vmem:[%s829_s2] ss:$0 sm:$0xff] }
  0x2a   :  { %265 = vmatmul.f32.gmra.mxu2 %v20_v4 }
  0x2b   :  { %153 = vmatmul.f32.gmra.mxu0 %v18_v5  ;;  %321 = vmatmul.f32.gmra.mxu3 %v21_v6 }
  0x2d   :  { %209 = vmatmul.f32.gmra.mxu1 %v19_v7 }
  0x32   :  { %268 = vmatmul.f32.gmra.mxu2 %v24_v8 }
  0x33   :  { %156 = vmatmul.f32.gmra.mxu0 %v22_v9  ;;  %324 = vmatmul.f32.gmra.mxu3 %v25_v10 }
  0x35   :  { %212 = vmatmul.f32.gmra.mxu1 %v23_v11 }
  0x3a   :  { %271 = vmatmul.f32.gmra.mxu2 %v28_v12 }
  0x3b   :  { %159 = vmatmul.f32.gmra.mxu0 %v26_v13  ;;  %327 = vmatmul.f32.gmra.mxu3 %v29_v14 }
  0x3d   :  { %215 = vmatmul.f32.gmra.mxu1 %v27_v15 }
  0x42   :  { %274 = vmatmul.f32.gmra.mxu2 %v32_v16 }
  0x43   :  { %162 = vmatmul.f32.gmra.mxu0 %v30_v17  ;;  %330 = vmatmul.f32.gmra.mxu3 %v33_v18 }
  0x45   :  { %218 = vmatmul.f32.gmra.mxu1 %v31_v19 }
  0x4a   :  { %277 = vmatmul.f32.gmra.mxu2 %v36_v20 }
  0x4b   :  { %165 = vmatmul.f32.gmra.mxu0 %v34_v21  ;;  %333 = vmatmul.f32.gmra.mxu3 %v37_v22 }
  0x4d   :  { %221 = vmatmul.f32.gmra.mxu1 %v35_v23 }
  0x52   :  { %280 = vmatmul.f32.gmra.mxu2 %v40_v24 }
  0x53   :  { %168 = vmatmul.f32.gmra.mxu0 %v38_v25  ;;  %336 = vmatmul.f32.gmra.mxu3 %v41_v26 }
  0x55   :  { %224 = vmatmul.f32.gmra.mxu1 %v39_v27 }
  0x5a   :  { %283 = vmatmul.f32.gmra.mxu2 %v44_v28 }
  0x5b   :  { %171 = vmatmul.f32.gmra.mxu0 %v42_v29  ;;  %339 = vmatmul.f32.gmra.mxu3 %v45_v30 }
  0x5d   :  { %227 = vmatmul.f32.gmra.mxu1 %v43_v31 }
  0x62   :  { %286 = vmatmul.f32.gmra.mxu2 %v48_v32 }
  0x63   :  { %174 = vmatmul.f32.gmra.mxu0 %v46_v33  ;;  %342 = vmatmul.f32.gmra.mxu3 %v49_v34 }
  0x65   :  { %230 = vmatmul.f32.gmra.mxu1 %v47_v35 }
  0x6a   :  { %289 = vmatmul.f32.gmra.mxu2 %v52_v36 }
  0x6b   :  { %177 = vmatmul.f32.gmra.mxu0 %v50_v37  ;;  %345 = vmatmul.f32.gmra.mxu3 %v53_v38 }
  0x6d   :  { %233 = vmatmul.f32.gmra.mxu1 %v51_v39 }
  0x72   :  { %292 = vmatmul.f32.gmra.mxu2 %v56_v40 }
  0x73   :  { %180 = vmatmul.f32.gmra.mxu0 %v54_v41  ;;  %348 = vmatmul.f32.gmra.mxu3 %v57_v42 }
  0x75   :  { %236 = vmatmul.f32.gmra.mxu1 %v55_v43 }
  0x7a   :  { %295 = vmatmul.f32.gmra.mxu2 %v60_v44 }
  0x7b   :  { %183 = vmatmul.f32.gmra.mxu0 %v58_v45  ;;  %351 = vmatmul.f32.gmra.mxu3 %v61_v46 }
  0x7d   :  { %239 = vmatmul.f32.gmra.mxu1 %v59_v47 }
  0x82   :  { %298 = vmatmul.f32.gmra.mxu2 %v64_v48 }
  0x83   :  { %186 = vmatmul.f32.gmra.mxu0 %v62_v49  ;;  %354 = vmatmul.f32.gmra.mxu3 %v65_v50 }
  0x85   :  { %242 = vmatmul.f32.gmra.mxu1 %v63_v51 }
  0xa0   :  { %v151_v53 = vpop.f32.mrf.mxu0 }
  0xa1   :  { %v152_v54 = vadd.f32 %v762_v52, %v151_v53 }
  0xa2   :  { %v207_v55 = vpop.f32.mrf.mxu1 }
  0xa3   :  { %v208_v56 = vadd.f32 %v207_v55, %v152_v54 }
  0xa5   :  { %v263_v57 = vpop.f32.mrf.mxu2 }
  0xa6   :  { %v264_v58 = vadd.f32 %v263_v57, %v208_v56  ;;  %v319_v59 = vpop.f32.mrf.mxu3 }
  0xa8   :  { %v320_v60 = vadd.f32 %v319_v59, %v264_v58  ;;  %v154_v61 = vpop.f32.mrf.mxu0 }
  0xa9   :  { %v155_v62 = vadd.f32 %v762_v52, %v154_v61 }
  0xaa   :  { %v358_v63 = vmax.f32 %v320_v60, 0.0  ;;  %v210_v0 = vpop.f32.mrf.mxu1 }
  0xab   :  { %v211_v1 = vadd.f32 %v210_v0, %v155_v62 }
  0xac   :  { %372 = vst.msk [vmem:[%s831_s3] sm:$0xff] %vm371_vm0, %v358_v63 }
  0xad   :  { %v266_v2 = vpop.f32.mrf.mxu2 }
  0xae   :  { %v267_v3 = vadd.f32 %v266_v2, %v211_v1  ;;  %v322_v4 = vpop.f32.mrf.mxu3 }
  0xb0   :  { %v323_v5 = vadd.f32 %v322_v4, %v267_v3  ;;  %v157_v6 = vpop.f32.mrf.mxu0 }
  0xb1   :  { %v158_v7 = vadd.f32 %v762_v52, %v157_v6 }
  0xb2   :  { %v359_v8 = vmax.f32 %v323_v5, 0.0  ;;  %v213_v9 = vpop.f32.mrf.mxu1 }
  0xb3   :  { %v214_v10 = vadd.f32 %v213_v9, %v158_v7 }
  0xb4   :  { %373 = vst.msk [vmem:[%s831_s3 + $0x8] sm:$0xff] %vm371_vm0, %v359_v8 }
  0xb5   :  { %v269_v11 = vpop.f32.mrf.mxu2 }
  0xb6   :  { %v270_v12 = vadd.f32 %v269_v11, %v214_v10  ;;  %v325_v13 = vpop.f32.mrf.mxu3 }
  0xb8   :  { %v326_v14 = vadd.f32 %v325_v13, %v270_v12  ;;  %v160_v15 = vpop.f32.mrf.mxu0 }
  0xb9   :  { %v161_v16 = vadd.f32 %v762_v52, %v160_v15 }
  0xba   :  { %v360_v17 = vmax.f32 %v326_v14, 0.0  ;;  %v216_v18 = vpop.f32.mrf.mxu1 }
  0xbb   :  { %v217_v19 = vadd.f32 %v216_v18, %v161_v16 }
  0xbc   :  { %374 = vst.msk [vmem:[%s831_s3 + $0x10] sm:$0xff] %vm371_vm0, %v360_v17 }
  0xbd   :  { %v272_v20 = vpop.f32.mrf.mxu2 }
  0xbe   :  { %v273_v21 = vadd.f32 %v272_v20, %v217_v19  ;;  %v328_v22 = vpop.f32.mrf.mxu3 }
  0xc0   :  { %v329_v23 = vadd.f32 %v328_v22, %v273_v21  ;;  %v163_v24 = vpop.f32.mrf.mxu0 }
  0xc1   :  { %v164_v25 = vadd.f32 %v762_v52, %v163_v24 }
  0xc2   :  { %v361_v26 = vmax.f32 %v329_v23, 0.0  ;;  %v219_v27 = vpop.f32.mrf.mxu1 }
  0xc3   :  { %v220_v28 = vadd.f32 %v219_v27, %v164_v25 }
  0xc4   :  { %375 = vst.msk [vmem:[%s831_s3 + $0x18] sm:$0xff] %vm371_vm0, %v361_v26 }
  0xc5   :  { %v275_v29 = vpop.f32.mrf.mxu2 }
  0xc6   :  { %v276_v30 = vadd.f32 %v275_v29, %v220_v28  ;;  %v331_v31 = vpop.f32.mrf.mxu3 }
  0xc8   :  { %v332_v32 = vadd.f32 %v331_v31, %v276_v30  ;;  %v166_v33 = vpop.f32.mrf.mxu0 }
  0xc9   :  { %v167_v34 = vadd.f32 %v762_v52, %v166_v33 }
  0xca   :  { %v362_v35 = vmax.f32 %v332_v32, 0.0  ;;  %v222_v36 = vpop.f32.mrf.mxu1 }
  0xcb   :  { %v223_v37 = vadd.f32 %v222_v36, %v167_v34 }
  0xcc   :  { %376 = vst.msk [vmem:[%s831_s3 + $0x20] sm:$0xff] %vm371_vm0, %v362_v35 }
  0xcd   :  { %v278_v38 = vpop.f32.mrf.mxu2 }
  0xce   :  { %v279_v39 = vadd.f32 %v278_v38, %v223_v37  ;;  %v334_v40 = vpop.f32.mrf.mxu3 }
  0xd0   :  { %v335_v41 = vadd.f32 %v334_v40, %v279_v39  ;;  %v169_v42 = vpop.f32.mrf.mxu0 }
  0xd1   :  { %v170_v43 = vadd.f32 %v762_v52, %v169_v42 }
  0xd2   :  { %v363_v44 = vmax.f32 %v335_v41, 0.0  ;;  %v225_v45 = vpop.f32.mrf.mxu1 }
  0xd3   :  { %v226_v46 = vadd.f32 %v225_v45, %v170_v43 }
  0xd4   :  { %377 = vst.msk [vmem:[%s831_s3 + $0x28] sm:$0xff] %vm371_vm0, %v363_v44 }
  0xd5   :  { %v281_v47 = vpop.f32.mrf.mxu2 }
  0xd6   :  { %v282_v48 = vadd.f32 %v281_v47, %v226_v46  ;;  %v337_v49 = vpop.f32.mrf.mxu3 }
  0xd8   :  { %v338_v50 = vadd.f32 %v337_v49, %v282_v48  ;;  %v172_v51 = vpop.f32.mrf.mxu0 }
  0xd9   :  { %v173_v53 = vadd.f32 %v762_v52, %v172_v51 }
  0xda   :  { %v364_v54 = vmax.f32 %v338_v50, 0.0  ;;  %v228_v55 = vpop.f32.mrf.mxu1 }
  0xdb   :  { %v229_v56 = vadd.f32 %v228_v55, %v173_v53 }
  0xdc   :  { %378 = vst.msk [vmem:[%s831_s3 + $0x30] sm:$0xff] %vm371_vm0, %v364_v54 }
  0xdd   :  { %v284_v57 = vpop.f32.mrf.mxu2 }
  0xde   :  { %v285_v58 = vadd.f32 %v284_v57, %v229_v56  ;;  %v340_v59 = vpop.f32.mrf.mxu3 }
  0xe0   :  { %v341_v60 = vadd.f32 %v340_v59, %v285_v58  ;;  %v175_v61 = vpop.f32.mrf.mxu0 }
  0xe1   :  { %v176_v62 = vadd.f32 %v762_v52, %v175_v61 }
  0xe2   :  { %v365_v63 = vmax.f32 %v341_v60, 0.0  ;;  %v231_v0 = vpop.f32.mrf.mxu1 }
  0xe3   :  { %v232_v1 = vadd.f32 %v231_v0, %v176_v62 }
  0xe4   :  { %379 = vst.msk [vmem:[%s831_s3 + $0x38] sm:$0xff] %vm371_vm0, %v365_v63 }
  0xe5   :  { %v287_v2 = vpop.f32.mrf.mxu2 }
  0xe6   :  { %v288_v3 = vadd.f32 %v287_v2, %v232_v1  ;;  %v343_v4 = vpop.f32.mrf.mxu3 }
  0xe8   :  { %v344_v5 = vadd.f32 %v343_v4, %v288_v3  ;;  %v178_v6 = vpop.f32.mrf.mxu0 }
  0xe9   :  { %v179_v7 = vadd.f32 %v762_v52, %v178_v6 }
  0xea   :  { %v366_v8 = vmax.f32 %v344_v5, 0.0  ;;  %v234_v9 = vpop.f32.mrf.mxu1 }
  0xeb   :  { %v235_v10 = vadd.f32 %v234_v9, %v179_v7 }
  0xec   :  { %380 = vst.msk [vmem:[%s831_s3 + $0x40] sm:$0xff] %vm371_vm0, %v366_v8 }
  0xed   :  { %v290_v11 = vpop.f32.mrf.mxu2 }
  0xee   :  { %v291_v12 = vadd.f32 %v290_v11, %v235_v10  ;;  %v346_v13 = vpop.f32.mrf.mxu3 }
  0xf0   :  { %v347_v14 = vadd.f32 %v346_v13, %v291_v12  ;;  %v181_v15 = vpop.f32.mrf.mxu0 }
  0xf1   :  { %v182_v16 = vadd.f32 %v762_v52, %v181_v15 }
  0xf2   :  { %v367_v17 = vmax.f32 %v347_v14, 0.0  ;;  %v237_v18 = vpop.f32.mrf.mxu1 }
  0xf3   :  { %v238_v19 = vadd.f32 %v237_v18, %v182_v16 }
  0xf4   :  { %381 = vst.msk [vmem:[%s831_s3 + $0x48] sm:$0xff] %vm371_vm0, %v367_v17 }
  0xf5   :  { %v293_v20 = vpop.f32.mrf.mxu2 }
  0xf6   :  { %v294_v21 = vadd.f32 %v293_v20, %v238_v19  ;;  %v349_v22 = vpop.f32.mrf.mxu3 }
  0xf8   :  { %v350_v23 = vadd.f32 %v349_v22, %v294_v21  ;;  %v184_v24 = vpop.f32.mrf.mxu0 }
  0xf9   :  { %v185_v25 = vadd.f32 %v762_v52, %v184_v24 }
  0xfa   :  { %v368_v26 = vmax.f32 %v350_v23, 0.0  ;;  %v240_v27 = vpop.f32.mrf.mxu1 }
  0xfb   :  { %v241_v28 = vadd.f32 %v240_v27, %v185_v25 }
  0xfc   :  { %382 = vst.msk [vmem:[%s831_s3 + $0x50] sm:$0xff] %vm371_vm0, %v368_v26 }
  0xfd   :  { %v296_v29 = vpop.f32.mrf.mxu2 }
  0xfe   :  { %v297_v30 = vadd.f32 %v296_v29, %v241_v28  ;;  %v352_v31 = vpop.f32.mrf.mxu3 }
 0x100   :  { %v353_v32 = vadd.f32 %v352_v31, %v297_v30  ;;  %v187_v33 = vpop.f32.mrf.mxu0 }
 0x101   :  { %v188_v34 = vadd.f32 %v762_v52, %v187_v33 }
 0x102   :  { %v369_v35 = vmax.f32 %v353_v32, 0.0  ;;  %v243_v36 = vpop.f32.mrf.mxu1 }
 0x103   :  { %v244_v37 = vadd.f32 %v243_v36, %v188_v34 }
 0x104   :  { %383 = vst.msk [vmem:[%s831_s3 + $0x58] sm:$0xff] %vm371_vm0, %v369_v35 }
 0x105   :  { %v299_v38 = vpop.f32.mrf.mxu2 }
 0x106   :  { %v300_v39 = vadd.f32 %v299_v38, %v244_v37  ;;  %v355_v40 = vpop.f32.mrf.mxu3 }
 0x108   :  { %v356_v41 = vadd.f32 %v355_v40, %v300_v39 }
 0x10a   :  { %v370_v42 = vmax.f32 %v356_v41, 0.0 }
 0x10c   :  { %385 = vst.msk [vmem:[%s831_s3 + $0x60] sm:$0x3] %vm384_vm1, %v370_v42 }

// kernel: vae_nelbo_pallas.8
= control target key start
LH: loop header
LB: loop body
LE: loop exit
PB: predicated region body
PF: predicated region fallthrough
CT: control target
= control target key end

     0   :  { %vm499_vm0 = vcmask 523264   ;;  %vm1988_vm1 = vcmask 261120   ;;  %vm2015_vm6 = vcmask 8192   ;;  %vm2746_vm7 = vcmask 1045508   ;;  %s5880_s1 = inlined_call_operand.vmem [shape: f32[3136,32], index: 1, kind: input, shape index: {}]   ;;  %s5881_s0 = inlined_call_operand.vmem [shape: f32[2,3136], index: 0, kind: input, shape index: {}]   ;;  %s5882_s2 = inlined_call_operand.vmem [shape: f32[1,32], index: 2, kind: input, shape index: {}]   ;;  %s5883_s3 = inlined_call_operand.vmem [shape: f32[3136,32], index: 3, kind: input, shape index: {}]   ;;  %s5884_s4 = inlined_call_operand.vmem [shape: f32[1,32], index: 4, kind: input, shape index: {}]   ;;  %s5885_s7 = inlined_call_operand.vmem [shape: f32[1,3136], index: 7, kind: input, shape index: {}]   ;;  %s5886_s6 = inlined_call_operand.vmem [shape: f32[32,3136], index: 6, kind: input, shape index: {}]   ;;  %s5887_s5 = inlined_call_operand.vmem [shape: f32[2,32], index: 5, kind: input, shape index: {}]   ;;  %s5888_s10 = inlined_call_operand.vmem [shape: f32[1,2], index: 10, kind: output, shape index: {2}]   ;;  %s5889_s9 = inlined_call_operand.vmem [shape: f32[1,2], index: 9, kind: output, shape index: {1}]   ;;  %s5890_s8 = inlined_call_operand.vmem [shape: f32[2,3136], index: 8, kind: output, shape index: {0}]  }
   0x1   :  { %v54_v0 = vld [vmem:[%s5880_s1 + $0x78] sm:$0xff]  ;;  %v53_v3 = vld [vmem:[%s5880_s1 + $0x70] sm:$0xff]  ;;  %v52_v7 = vld [vmem:[%s5880_s1 + $0x68] sm:$0xff]  ;;  %vm2744_vm8 = vcmask 1041408   ;;  %vm2748_vm9 = vcmask 1043456   ;;  %vm2777_vm10 = vcmask 517120  }
   0x2   :  { %v70_v1 = vld [vmem:[%s5880_s1 + $0xf8] sm:$0xff]  ;;  %502 = vmatpush.msra.mxu0 %v54_v0  ;;  %v69_v4 = vld [vmem:[%s5880_s1 + $0xf0] sm:$0xff]  ;;  %v68_v8 = vld [vmem:[%s5880_s1 + $0xe8] sm:$0xff] }
   0x3   :  { %v86_v2 = vld [vmem:[%s5880_s1 + $0x178] sm:$0xff]  ;;  %522 = vmatpush.msra.mxu1 %v70_v1  ;;  %v85_v5 = vld [vmem:[%s5880_s1 + $0x170] sm:$0xff]  ;;  %v84_v9 = vld [vmem:[%s5880_s1 + $0x168] sm:$0xff] }
   0x4   :  { %542 = vmatpush.msra.mxu2 %v86_v2  ;;  %v102_v6 = vld [vmem:[%s5880_s1 + $0x1f8] sm:$0xff]  ;;  %503 = vmatpush.msra.mxu0 %v53_v3  ;;  %v101_v10 = vld [vmem:[%s5880_s1 + $0x1f0] sm:$0xff]  ;;  %v51_v11 = vld [vmem:[%s5880_s1 + $0x60] sm:$0xff] }
   0x5   :  { %523 = vmatpush.msra.mxu1 %v69_v4  ;;  %562 = vmatpush.msra.mxu3 %v102_v6  ;;  %v67_v12 = vld [vmem:[%s5880_s1 + $0xe0] sm:$0xff]  ;;  %v100_v14 = vld [vmem:[%s5880_s1 + $0x1e8] sm:$0xff]  ;;  %v50_v15 = vld [vmem:[%s5880_s1 + $0x58] sm:$0xff] }
   0x6   :  { %543 = vmatpush.msra.mxu2 %v85_v5  ;;  %504 = vmatpush.msra.mxu0 %v52_v7  ;;  %v83_v13 = vld [vmem:[%s5880_s1 + $0x160] sm:$0xff]  ;;  %v66_v16 = vld [vmem:[%s5880_s1 + $0xd8] sm:$0xff]  ;;  %v49_v19 = vld [vmem:[%s5880_s1 + $0x50] sm:$0xff] }
   0x7   :  { %524 = vmatpush.msra.mxu1 %v68_v8  ;;  %563 = vmatpush.msra.mxu3 %v101_v10  ;;  %v82_v17 = vld [vmem:[%s5880_s1 + $0x158] sm:$0xff]  ;;  %v99_v18 = vld [vmem:[%s5880_s1 + $0x1e0] sm:$0xff]  ;;  %v65_v20 = vld [vmem:[%s5880_s1 + $0xd0] sm:$0xff] }
   0x8   :  { %544 = vmatpush.msra.mxu2 %v84_v9  ;;  %505 = vmatpush.msra.mxu0 %v51_v11  ;;  %v81_v21 = vld [vmem:[%s5880_s1 + $0x150] sm:$0xff]  ;;  %v98_v22 = vld [vmem:[%s5880_s1 + $0x1d8] sm:$0xff]  ;;  %v48_v23 = vld [vmem:[%s5880_s1 + $0x48] sm:$0xff] }
   0x9   :  { %525 = vmatpush.msra.mxu1 %v67_v12  ;;  %564 = vmatpush.msra.mxu3 %v100_v14  ;;  %v64_v24 = vld [vmem:[%s5880_s1 + $0xc8] sm:$0xff]  ;;  %v97_v26 = vld [vmem:[%s5880_s1 + $0x1d0] sm:$0xff]  ;;  %v47_v27 = vld [vmem:[%s5880_s1 + $0x40] sm:$0xff] }
   0xa   :  { %545 = vmatpush.msra.mxu2 %v83_v13  ;;  %506 = vmatpush.msra.mxu0 %v50_v15  ;;  %v80_v25 = vld [vmem:[%s5880_s1 + $0x148] sm:$0xff]  ;;  %v63_v28 = vld [vmem:[%s5880_s1 + $0xc0] sm:$0xff]  ;;  %v46_v31 = vld [vmem:[%s5880_s1 + $0x38] sm:$0xff] }
   0xb   :  { %526 = vmatpush.msra.mxu1 %v66_v16  ;;  %565 = vmatpush.msra.mxu3 %v99_v18  ;;  %v79_v29 = vld [vmem:[%s5880_s1 + $0x140] sm:$0xff]  ;;  %v96_v30 = vld [vmem:[%s5880_s1 + $0x1c8] sm:$0xff]  ;;  %v62_v32 = vld [vmem:[%s5880_s1 + $0xb8] sm:$0xff] }
   0xc   :  { %546 = vmatpush.msra.mxu2 %v82_v17  ;;  %507 = vmatpush.msra.mxu0 %v49_v19  ;;  %v78_v33 = vld [vmem:[%s5880_s1 + $0x138] sm:$0xff]  ;;  %v95_v34 = vld [vmem:[%s5880_s1 + $0x1c0] sm:$0xff]  ;;  %v45_v35 = vld [vmem:[%s5880_s1 + $0x30] sm:$0xff] }
   0xd   :  { %527 = vmatpush.msra.mxu1 %v65_v20  ;;  %566 = vmatpush.msra.mxu3 %v98_v22  ;;  %v61_v36 = vld [vmem:[%s5880_s1 + $0xb0] sm:$0xff]  ;;  %v94_v38 = vld [vmem:[%s5880_s1 + $0x1b8] sm:$0xff]  ;;  %v44_v39 = vld [vmem:[%s5880_s1 + $0x28] sm:$0xff] }
   0xe   :  { %547 = vmatpush.msra.mxu2 %v81_v21  ;;  %508 = vmatpush.msra.mxu0 %v48_v23  ;;  %v77_v37 = vld [vmem:[%s5880_s1 + $0x130] sm:$0xff]  ;;  %v60_v40 = vld [vmem:[%s5880_s1 + $0xa8] sm:$0xff]  ;;  %v43_v43 = vld [vmem:[%s5880_s1 + $0x20] sm:$0xff] }
   0xf   :  { %528 = vmatpush.msra.mxu1 %v64_v24  ;;  %567 = vmatpush.msra.mxu3 %v97_v26  ;;  %v76_v41 = vld [vmem:[%s5880_s1 + $0x128] sm:$0xff]  ;;  %v93_v42 = vld [vmem:[%s5880_s1 + $0x1b0] sm:$0xff]  ;;  %v59_v44 = vld [vmem:[%s5880_s1 + $0xa0] sm:$0xff] }
  0x10   :  { %548 = vmatpush.msra.mxu2 %v80_v25  ;;  %509 = vmatpush.msra.mxu0 %v47_v27  ;;  %v75_v45 = vld [vmem:[%s5880_s1 + $0x120] sm:$0xff]  ;;  %v92_v46 = vld [vmem:[%s5880_s1 + $0x1a8] sm:$0xff]  ;;  %v42_v47 = vld [vmem:[%s5880_s1 + $0x18] sm:$0xff] }
  0x11   :  { %529 = vmatpush.msra.mxu1 %v63_v28  ;;  %568 = vmatpush.msra.mxu3 %v96_v30  ;;  %v58_v48 = vld [vmem:[%s5880_s1 + $0x98] sm:$0xff]  ;;  %v91_v50 = vld [vmem:[%s5880_s1 + $0x1a0] sm:$0xff]  ;;  %v41_v51 = vld [vmem:[%s5880_s1 + $0x10] sm:$0xff] }
  0x12   :  { %549 = vmatpush.msra.mxu2 %v79_v29  ;;  %510 = vmatpush.msra.mxu0 %v46_v31  ;;  %v74_v49 = vld [vmem:[%s5880_s1 + $0x118] sm:$0xff]  ;;  %v57_v52 = vld [vmem:[%s5880_s1 + $0x90] sm:$0xff]  ;;  %v40_v55 = vld [vmem:[%s5880_s1 + $0x8] sm:$0xff] }
  0x13   :  { %530 = vmatpush.msra.mxu1 %v62_v32  ;;  %569 = vmatpush.msra.mxu3 %v95_v34  ;;  %v73_v53 = vld [vmem:[%s5880_s1 + $0x110] sm:$0xff]  ;;  %v90_v54 = vld [vmem:[%s5880_s1 + $0x198] sm:$0xff]  ;;  %v56_v56 = vld [vmem:[%s5880_s1 + $0x88] sm:$0xff] }
  0x14   :  { %550 = vmatpush.msra.mxu2 %v78_v33  ;;  %511 = vmatpush.msra.mxu0 %v45_v35  ;;  %v72_v57 = vld [vmem:[%s5880_s1 + $0x108] sm:$0xff]  ;;  %v89_v58 = vld [vmem:[%s5880_s1 + $0x190] sm:$0xff]  ;;  %v39_v59 = vld [vmem:[%s5880_s1] sm:$0xff] }
  0x15   :  { %531 = vmatpush.msra.mxu1 %v61_v36  ;;  %570 = vmatpush.msra.mxu3 %v94_v38  ;;  %v55_v60 = vld [vmem:[%s5880_s1 + $0x80] sm:$0xff]  ;;  %v88_v62 = vld [vmem:[%s5880_s1 + $0x188] sm:$0xff]  ;;  %v118_v63 = vld [vmem:[%s5880_s1 + $0x278] sm:$0xff] }
  0x16   :  { %551 = vmatpush.msra.mxu2 %v77_v37  ;;  %512 = vmatpush.msra.mxu0 %v44_v39  ;;  %v71_v61 = vld [vmem:[%s5880_s1 + $0x100] sm:$0xff]  ;;  %v134_v0 = vld [vmem:[%s5880_s1 + $0x2f8] sm:$0xff]  ;;  %v117_v3 = vld [vmem:[%s5880_s1 + $0x270] sm:$0xff] }
  0x17   :  { %532 = vmatpush.msra.mxu1 %v60_v40  ;;  %571 = vmatpush.msra.mxu3 %v93_v42  ;;  %v150_v1 = vld [vmem:[%s5880_s1 + $0x378] sm:$0xff]  ;;  %v87_v2 = vld [vmem:[%s5880_s1 + $0x180] sm:$0xff]  ;;  %v133_v4 = vld [vmem:[%s5880_s1 + $0x2f0] sm:$0xff] }
  0x18   :  { %552 = vmatpush.msra.mxu2 %v76_v41  ;;  %513 = vmatpush.msra.mxu0 %v43_v43  ;;  %v149_v5 = vld [vmem:[%s5880_s1 + $0x370] sm:$0xff]  ;;  %v166_v6 = vld [vmem:[%s5880_s1 + $0x3f8] sm:$0xff]  ;;  %v116_v7 = vld [vmem:[%s5880_s1 + $0x268] sm:$0xff] }
  0x19   :  { %533 = vmatpush.msra.mxu1 %v59_v44  ;;  %572 = vmatpush.msra.mxu3 %v92_v46  ;;  %v132_v8 = vld [vmem:[%s5880_s1 + $0x2e8] sm:$0xff]  ;;  %v165_v10 = vld [vmem:[%s5880_s1 + $0x3f0] sm:$0xff]  ;;  %v115_v11 = vld [vmem:[%s5880_s1 + $0x260] sm:$0xff] }
  0x1a   :  { %553 = vmatpush.msra.mxu2 %v75_v45  ;;  %514 = vmatpush.msra.mxu0 %v42_v47  ;;  %v148_v9 = vld [vmem:[%s5880_s1 + $0x368] sm:$0xff]  ;;  %v131_v12 = vld [vmem:[%s5880_s1 + $0x2e0] sm:$0xff]  ;;  %v114_v15 = vld [vmem:[%s5880_s1 + $0x258] sm:$0xff] }
  0x1b   :  { %534 = vmatpush.msra.mxu1 %v58_v48  ;;  %573 = vmatpush.msra.mxu3 %v91_v50  ;;  %v147_v13 = vld [vmem:[%s5880_s1 + $0x360] sm:$0xff]  ;;  %v164_v14 = vld [vmem:[%s5880_s1 + $0x3e8] sm:$0xff]  ;;  %v130_v16 = vld [vmem:[%s5880_s1 + $0x2d8] sm:$0xff] }
  0x1c   :  { %554 = vmatpush.msra.mxu2 %v74_v49  ;;  %515 = vmatpush.msra.mxu0 %v41_v51  ;;  %v146_v17 = vld [vmem:[%s5880_s1 + $0x358] sm:$0xff]  ;;  %v163_v18 = vld [vmem:[%s5880_s1 + $0x3e0] sm:$0xff]  ;;  %v113_v19 = vld [vmem:[%s5880_s1 + $0x250] sm:$0xff] }
  0x1d   :  { %535 = vmatpush.msra.mxu1 %v57_v52  ;;  %574 = vmatpush.msra.mxu3 %v90_v54  ;;  %v129_v20 = vld [vmem:[%s5880_s1 + $0x2d0] sm:$0xff]  ;;  %v162_v22 = vld [vmem:[%s5880_s1 + $0x3d8] sm:$0xff]  ;;  %v3152_v23 = vld [vmem:[%s5881_s0] sm:$0xff] }
  0x1e   :  { %555 = vmatpush.msra.mxu2 %v73_v53  ;;  %516 = vmatpush.msra.mxu0 %v40_v55  ;;  %v145_v21 = vld [vmem:[%s5880_s1 + $0x350] sm:$0xff]  ;;  %v112_v24 = vld [vmem:[%s5880_s1 + $0x248] sm:$0xff]  ;;  %442 = vst [vmem:[#allocation1] ss:$4 sm:$0xff] %v3152_v23  ;;  %v111_v28 = vld [vmem:[%s5880_s1 + $0x240] sm:$0xff] }
  0x1f   :  { %536 = vmatpush.msra.mxu1 %v56_v56  ;;  %575 = vmatpush.msra.mxu3 %v89_v58  ;;  %v128_v25 = vld [vmem:[%s5880_s1 + $0x2c8] sm:$0xff]  ;;  %v161_v27 = vld [vmem:[%s5880_s1 + $0x3d0] sm:$0xff]  ;;  %v127_v29 = vld [vmem:[%s5880_s1 + $0x2c0] sm:$0xff] }
  0x20   :  { %556 = vmatpush.msra.mxu2 %v72_v57  ;;  %517 = vmatpush.msra.mxu0 %v39_v59  ;;  %v144_v26 = vld [vmem:[%s5880_s1 + $0x348] sm:$0xff]  ;;  %v143_v30 = vld [vmem:[%s5880_s1 + $0x340] sm:$0xff]  ;;  %v110_v32 = vld [vmem:[%s5880_s1 + $0x238] sm:$0xff] }
  0x21   :  { %537 = vmatpush.msra.mxu1 %v55_v60  ;;  %576 = vmatpush.msra.mxu3 %v88_v62  ;;  %v160_v31 = vld [vmem:[%s5880_s1 + $0x3c8] sm:$0xff]  ;;  %v126_v33 = vld [vmem:[%s5880_s1 + $0x2b8] sm:$0xff]  ;;  %v159_v35 = vld [vmem:[%s5880_s1 + $0x3c0] sm:$0xff] }
  0x22   :  { %557 = vmatpush.msra.mxu2 %v71_v61  ;;  %582 = vmatpush.msrb.mxu0 %v118_v63  ;;  %v142_v34 = vld [vmem:[%s5880_s1 + $0x338] sm:$0xff]  ;;  %v109_v36 = vld [vmem:[%s5880_s1 + $0x230] sm:$0xff]  ;;  %v3206_v40 = vld [vmem:[%s5881_s0 + $0x8] sm:$0xff] }
  0x23   :  { %602 = vmatpush.msrb.mxu1 %v134_v0  ;;  %577 = vmatpush.msra.mxu3 %v87_v2  ;;  %v125_v37 = vld [vmem:[%s5880_s1 + $0x2b0] sm:$0xff]  ;;  %v158_v39 = vld [vmem:[%s5880_s1 + $0x3b8] sm:$0xff]  ;;  %v108_v41 = vld [vmem:[%s5880_s1 + $0x228] sm:$0xff]  ;;  %444 = vst [vmem:[#allocation1 + $0x20] ss:$4 sm:$0xff] %v3206_v40 }
  0x24   :  { %622 = vmatpush.msrb.mxu2 %v150_v1  ;;  %583 = vmatpush.msrb.mxu0 %v117_v3  ;;  %v141_v38 = vld [vmem:[%s5880_s1 + $0x330] sm:$0xff]  ;;  %v124_v42 = vld [vmem:[%s5880_s1 + $0x2a8] sm:$0xff]  ;;  %v107_v50 = vld [vmem:[%s5880_s1 + $0x220] sm:$0xff] }
  0x25   :  { %603 = vmatpush.msrb.mxu1 %v133_v4  ;;  %642 = vmatpush.msrb.mxu3 %v166_v6  ;;  %v3217_v43 = vld [vmem:[%s5881_s0 + $0x10] sm:$0xff]  ;;  %v140_v44 = vld [vmem:[%s5880_s1 + $0x328] sm:$0xff]  ;;  %v3223_v46 = vld.sshfl [vmem:[#allocation1] sm:$0xff pattern:$0x73625140] }
  0x26   :  { %623 = vmatpush.msrb.mxu2 %v149_v5  ;;  %584 = vmatpush.msrb.mxu0 %v116_v7  ;;  %v447_v45 = vld.sshfl [vmem:[#allocation1 + $0x10] sm:$0xff pattern:$0x73625140]  ;;  %v3225_v47 = vld.sshfl [vmem:[#allocation1 + $0x8] sm:$0xff pattern:$0x73625140] }
  0x27   :  { %604 = vmatpush.msrb.mxu1 %v132_v8  ;;  %643 = vmatpush.msrb.mxu3 %v165_v10  ;;  %v3227_v48 = vld.sshfl [vmem:[#allocation1 + $0x18] sm:$0xff pattern:$0x73625140]  ;;  %v157_v49 = vld [vmem:[%s5880_s1 + $0x3b0] sm:$0xff]  ;;  %v123_v51 = vld [vmem:[%s5880_s1 + $0x2a0] sm:$0xff] }
  0x28   :  { %624 = vmatpush.msrb.mxu2 %v148_v9  ;;  %585 = vmatpush.msrb.mxu0 %v115_v11  ;;  %453 = vst [vmem:[#allocation1] ss:$4 sm:$0xff] %v3217_v43  ;;  %v139_v52 = vld [vmem:[%s5880_s1 + $0x320] sm:$0xff]  ;;  %v156_v53 = vld [vmem:[%s5880_s1 + $0x3a8] sm:$0xff]  ;;  %v106_v54 = vld [vmem:[%s5880_s1 + $0x218] sm:$0xff] }
  0x29   :  { %605 = vmatpush.msrb.mxu1 %v131_v12  ;;  %644 = vmatpush.msrb.mxu3 %v164_v14  ;;  %v122_v55 = vld [vmem:[%s5880_s1 + $0x298] sm:$0xff]  ;;  %v155_v57 = vld [vmem:[%s5880_s1 + $0x3a0] sm:$0xff]  ;;  %v105_v58 = vld [vmem:[%s5880_s1 + $0x210] sm:$0xff] }
  0x2a   :  { %625 = vmatpush.msrb.mxu2 %v147_v13  ;;  %586 = vmatpush.msrb.mxu0 %v114_v15  ;;  %v138_v56 = vld [vmem:[%s5880_s1 + $0x318] sm:$0xff]  ;;  %v121_v59 = vld [vmem:[%s5880_s1 + $0x290] sm:$0xff]  ;;  %v3270_v62 = vld.sshfl [vmem:[#allocation1 + $0x20] sm:$0xff pattern:$0x73625140] }
  0x2b   :  { %606 = vmatpush.msrb.mxu1 %v130_v16  ;;  %645 = vmatpush.msrb.mxu3 %v163_v18  ;;  %v3266_v60 = vld [vmem:[%s5881_s0 + $0x18] sm:$0xff]  ;;  %v3268_v61 = vld.sshfl [vmem:[#allocation1 + $0x30] sm:$0xff pattern:$0x73625140]  ;;  %v104_v3 = vld [vmem:[%s5880_s1 + $0x208] sm:$0xff] }
  0x2c   :  { %626 = vmatpush.msrb.mxu2 %v146_v17  ;;  %587 = vmatpush.msrb.mxu0 %v113_v19  ;;  %v3272_v63 = vld.sshfl [vmem:[#allocation1 + $0x38] sm:$0xff pattern:$0x73625140]  ;;  %v3274_v0 = vld.sshfl [vmem:[#allocation1 + $0x28] sm:$0xff pattern:$0x73625140] }
  0x2d   :  { %607 = vmatpush.msrb.mxu1 %v129_v20  ;;  %646 = vmatpush.msrb.mxu3 %v162_v22  ;;  %v137_v1 = vld [vmem:[%s5880_s1 + $0x310] sm:$0xff]  ;;  %v154_v2 = vld [vmem:[%s5880_s1 + $0x398] sm:$0xff]  ;;  %454 = vst [vmem:[#allocation1 + $0x20] ss:$4 sm:$0xff] %v3266_v60  ;;  %v120_v4 = vld [vmem:[%s5880_s1 + $0x288] sm:$0xff] }
  0x2e   :  { %627 = vmatpush.msrb.mxu2 %v145_v21  ;;  %588 = vmatpush.msrb.mxu0 %v112_v24  ;;  %v136_v5 = vld [vmem:[%s5880_s1 + $0x308] sm:$0xff]  ;;  %v153_v6 = vld [vmem:[%s5880_s1 + $0x390] sm:$0xff]  ;;  %v103_v7 = vld [vmem:[%s5880_s1 + $0x200] sm:$0xff] }
  0x2f   :  { %608 = vmatpush.msrb.mxu1 %v128_v25  ;;  %647 = vmatpush.msrb.mxu3 %v161_v27  ;;  %v119_v8 = vld [vmem:[%s5880_s1 + $0x280] sm:$0xff]  ;;  %v152_v10 = vld [vmem:[%s5880_s1 + $0x388] sm:$0xff]  ;;  %v182_v11 = vld [vmem:[%s5880_s1 + $0x478] sm:$0xff] }
  0x30   :  { %628 = vmatpush.msrb.mxu2 %v144_v26  ;;  %589 = vmatpush.msrb.mxu0 %v111_v28  ;;  %v135_v9 = vld [vmem:[%s5880_s1 + $0x300] sm:$0xff]  ;;  %v198_v12 = vld [vmem:[%s5880_s1 + $0x4f8] sm:$0xff]  ;;  %v181_v15 = vld [vmem:[%s5880_s1 + $0x470] sm:$0xff] }
  0x31   :  { %609 = vmatpush.msrb.mxu1 %v127_v29  ;;  %648 = vmatpush.msrb.mxu3 %v160_v31  ;;  %v214_v13 = vld [vmem:[%s5880_s1 + $0x578] sm:$0xff]  ;;  %v151_v14 = vld [vmem:[%s5880_s1 + $0x380] sm:$0xff]  ;;  %v197_v16 = vld [vmem:[%s5880_s1 + $0x4f0] sm:$0xff] }
  0x32   :  { %629 = vmatpush.msrb.mxu2 %v143_v30  ;;  %590 = vmatpush.msrb.mxu0 %v110_v32  ;;  %v213_v17 = vld [vmem:[%s5880_s1 + $0x570] sm:$0xff]  ;;  %v230_v18 = vld [vmem:[%s5880_s1 + $0x5f8] sm:$0xff]  ;;  %v180_v19 = vld [vmem:[%s5880_s1 + $0x468] sm:$0xff] }
  0x33   :  { %610 = vmatpush.msrb.mxu1 %v126_v33  ;;  %649 = vmatpush.msrb.mxu3 %v159_v35  ;;  %v196_v20 = vld [vmem:[%s5880_s1 + $0x4e8] sm:$0xff]  ;;  %v229_v22 = vld [vmem:[%s5880_s1 + $0x5f0] sm:$0xff]  ;;  %v179_v24 = vld [vmem:[%s5880_s1 + $0x460] sm:$0xff] }
  0x34   :  { %630 = vmatpush.msrb.mxu2 %v142_v34  ;;  %591 = vmatpush.msrb.mxu0 %v109_v36  ;;  %v212_v21 = vld [vmem:[%s5880_s1 + $0x568] sm:$0xff]  ;;  %v195_v25 = vld [vmem:[%s5880_s1 + $0x4e0] sm:$0xff]  ;;  %v3357_v28 = vld.sshfl [vmem:[#allocation1 + $0x10] sm:$0xff pattern:$0x73625140] }
  0x35   :  { %611 = vmatpush.msrb.mxu1 %v125_v37  ;;  %650 = vmatpush.msrb.mxu3 %v158_v39  ;;  %v211_v26 = vld [vmem:[%s5880_s1 + $0x560] sm:$0xff]  ;;  %v3359_v29 = vld.sshfl [vmem:[#allocation1 + $0x8] sm:$0xff pattern:$0x73625140]  ;;  %v178_v33 = vld [vmem:[%s5880_s1 + $0x458] sm:$0xff] }
  0x36   :  { %631 = vmatpush.msrb.mxu2 %v141_v38  ;;  %592 = vmatpush.msrb.mxu0 %v108_v41  ;;  %v3355_v27 = vld.sshfl [vmem:[#allocation1] sm:$0xff pattern:$0x73625140]  ;;  %v228_v30 = vld [vmem:[%s5880_s1 + $0x5e8] sm:$0xff]  ;;  %v194_v34 = vld [vmem:[%s5880_s1 + $0x4d8] sm:$0xff] }
  0x37   :  { %612 = vmatpush.msrb.mxu1 %v124_v42  ;;  %651 = vmatpush.msrb.mxu3 %v157_v49  ;;  %v3367_v31 = vld [vmem:[%s5881_s0 + $0x20] sm:$0xff]  ;;  %v3369_v32 = vld.sshfl [vmem:[#allocation1 + $0x18] sm:$0xff pattern:$0x73625140]  ;;  %v177_v37 = vld [vmem:[%s5880_s1 + $0x450] sm:$0xff] }
  0x38   :  { %632 = vmatpush.msrb.mxu2 %v140_v44  ;;  %593 = vmatpush.msrb.mxu0 %v107_v50  ;;  %463 = vst [vmem:[#allocation1] ss:$4 sm:$0xff] %v3367_v31  ;;  %v210_v35 = vld [vmem:[%s5880_s1 + $0x558] sm:$0xff]  ;;  %v227_v36 = vld [vmem:[%s5880_s1 + $0x5e0] sm:$0xff]  ;;  %v193_v38 = vld [vmem:[%s5880_s1 + $0x4d0] sm:$0xff] }
  0x39   :  { %613 = vmatpush.msrb.mxu1 %v123_v51  ;;  %652 = vmatpush.msrb.mxu3 %v156_v53  ;;  %v209_v39 = vld [vmem:[%s5880_s1 + $0x550] sm:$0xff]  ;;  %v226_v41 = vld [vmem:[%s5880_s1 + $0x5d8] sm:$0xff]  ;;  %v176_v42 = vld [vmem:[%s5880_s1 + $0x448] sm:$0xff] }
  0x3a   :  { %633 = vmatpush.msrb.mxu2 %v139_v52  ;;  %594 = vmatpush.msrb.mxu0 %v106_v54  ;;  %v192_v44 = vld [vmem:[%s5880_s1 + $0x4c8] sm:$0xff]  ;;  %v207_v49 = vld [vmem:[%s5880_s1 + $0x540] sm:$0xff]  ;;  %v174_v51 = vld [vmem:[%s5880_s1 + $0x438] sm:$0xff] }
  0x3b   :  { %614 = vmatpush.msrb.mxu1 %v122_v55  ;;  %653 = vmatpush.msrb.mxu3 %v155_v57  ;;  %v224_v50 = vld [vmem:[%s5880_s1 + $0x5c8] sm:$0xff]  ;;  %v190_v52 = vld [vmem:[%s5880_s1 + $0x4b8] sm:$0xff]  ;;  %v223_v54 = vld [vmem:[%s5880_s1 + $0x5c0] sm:$0xff] }
  0x3c   :  { %634 = vmatpush.msrb.mxu2 %v138_v56  ;;  %595 = vmatpush.msrb.mxu0 %v105_v58  ;;  %v206_v53 = vld [vmem:[%s5880_s1 + $0x538] sm:$0xff]  ;;  %v173_v55 = vld [vmem:[%s5880_s1 + $0x430] sm:$0xff] }
  0x3d   :  { %615 = vmatpush.msrb.mxu1 %v121_v59  ;;  %654 = vmatpush.msrb.mxu3 %v154_v2  ;;  %v189_v56 = vld [vmem:[%s5880_s1 + $0x4b0] sm:$0xff]  ;;  %v222_v58 = vld [vmem:[%s5880_s1 + $0x5b8] sm:$0xff]  ;;  %v172_v59 = vld [vmem:[%s5880_s1 + $0x428] sm:$0xff] }
  0x3e   :  { %635 = vmatpush.msrb.mxu2 %v137_v1  ;;  %596 = vmatpush.msrb.mxu0 %v104_v3  ;;  %v205_v57 = vld [vmem:[%s5880_s1 + $0x530] sm:$0xff]  ;;  %v187_v1 = vld [vmem:[%s5880_s1 + $0x4a0] sm:$0xff]  ;;  %v220_v3 = vld [vmem:[%s5880_s1 + $0x5a8] sm:$0xff] }
  0x3f   :  { %616 = vmatpush.msrb.mxu1 %v120_v4  ;;  %655 = vmatpush.msrb.mxu3 %v153_v6  ;;  %v203_v2 = vld [vmem:[%s5880_s1 + $0x520] sm:$0xff]  ;;  %v170_v4 = vld [vmem:[%s5880_s1 + $0x418] sm:$0xff] }
  0x40   :  { %636 = vmatpush.msrb.mxu2 %v136_v5  ;;  %597 = vmatpush.msrb.mxu0 %v103_v7  ;;  %v186_v5 = vld [vmem:[%s5880_s1 + $0x498] sm:$0xff]  ;;  %v219_v7 = vld [vmem:[%s5880_s1 + $0x5a0] sm:$0xff] }
  0x41   :  { %558 = vmatmul.f32.vlgmr.msra.gmra.mxu2 %v447_v45  ;;  %617 = vmatpush.msrb.mxu1 %v119_v8  ;;  %v208_v45 = vld [vmem:[%s5880_s1 + $0x548] sm:$0xff]  ;;  %v202_v6 = vld [vmem:[%s5880_s1 + $0x518] sm:$0xff]  ;;  %v169_v8 = vld [vmem:[%s5880_s1 + $0x410] sm:$0xff] }
  0x42   :  { %637 = vmatpush.msrb.mxu2 %v135_v9  ;;  %656 = vmatpush.msrb.mxu3 %v152_v10  ;;  %v185_v9 = vld [vmem:[%s5880_s1 + $0x490] sm:$0xff] }
  0x43   :  { %518 = vmatmul.f32.vlgmr.msra.gmra.mxu0 %v3223_v46  ;;  %538 = vmatmul.f32.vlgmr.msra.gmra.mxu1 %v3225_v47  ;;  %v225_v46 = vld [vmem:[%s5880_s1 + $0x5d0] sm:$0xff]  ;;  %v175_v47 = vld [vmem:[%s5880_s1 + $0x440] sm:$0xff] }
  0x44   :  { %578 = vmatmul.f32.vlgmr.msra.gmra.mxu3 %v3227_v48  ;;  %662 = vmatpush.msra.mxu0 %v182_v11  ;;  %v191_v48 = vld [vmem:[%s5880_s1 + $0x4c0] sm:$0xff]  ;;  %v201_v10 = vld [vmem:[%s5880_s1 + $0x510] sm:$0xff]  ;;  %v218_v11 = vld [vmem:[%s5880_s1 + $0x598] sm:$0xff] }
  0x45   :  { %682 = vmatpush.msra.mxu1 %v198_v12  ;;  %702 = vmatpush.msra.mxu2 %v214_v13  ;;  %v168_v12 = vld [vmem:[%s5880_s1 + $0x408] sm:$0xff] }
  0x46   :  { %657 = vmatpush.msrb.mxu3 %v151_v14  ;;  %663 = vmatpush.msra.mxu0 %v181_v15  ;;  %v184_v13 = vld [vmem:[%s5880_s1 + $0x488] sm:$0xff]  ;;  %v217_v15 = vld [vmem:[%s5880_s1 + $0x590] sm:$0xff] }
  0x47   :  { %683 = vmatpush.msra.mxu1 %v197_v16  ;;  %703 = vmatpush.msra.mxu2 %v213_v17  ;;  %v200_v14 = vld [vmem:[%s5880_s1 + $0x508] sm:$0xff]  ;;  %v167_v16 = vld [vmem:[%s5880_s1 + $0x400] sm:$0xff] }
  0x48   :  { %722 = vmatpush.msra.mxu3 %v230_v18  ;;  %664 = vmatpush.msra.mxu0 %v180_v19  ;;  %v183_v17 = vld [vmem:[%s5880_s1 + $0x480] sm:$0xff]  ;;  %v216_v19 = vld [vmem:[%s5880_s1 + $0x588] sm:$0xff] }
  0x49   :  { %684 = vmatpush.msra.mxu1 %v196_v20  ;;  %704 = vmatpush.msra.mxu2 %v212_v21  ;;  %v199_v18 = vld [vmem:[%s5880_s1 + $0x500] sm:$0xff]  ;;  %v246_v20 = vld [vmem:[%s5880_s1 + $0x678] sm:$0xff] }
  0x4a   :  { %723 = vmatpush.msra.mxu3 %v229_v22  ;;  %638 = vmatmul.f32.vlgmr.msrb.gmra.mxu2 %v3268_v61  ;;  %v188_v61 = vld [vmem:[%s5880_s1 + $0x4a8] sm:$0xff]  ;;  %v262_v21 = vld [vmem:[%s5880_s1 + $0x6f8] sm:$0xff] }
  0x4b   :  { %665 = vmatpush.msra.mxu0 %v179_v24  ;;  %685 = vmatpush.msra.mxu1 %v195_v25  ;;  %v278_v22 = vld [vmem:[%s5880_s1 + $0x778] sm:$0xff]  ;;  %v215_v24 = vld [vmem:[%s5880_s1 + $0x580] sm:$0xff]  ;;  %v245_v25 = vld [vmem:[%s5880_s1 + $0x670] sm:$0xff] }
  0x4c   :  { %705 = vmatpush.msra.mxu2 %v211_v26  ;;  %724 = vmatpush.msra.mxu3 %v228_v30  ;;  %v261_v26 = vld [vmem:[%s5880_s1 + $0x6f0] sm:$0xff] }
  0x4d   :  { %598 = vmatmul.f32.vlgmr.msrb.gmra.mxu0 %v3270_v62  ;;  %658 = vmatmul.f32.vlgmr.msrb.gmra.mxu3 %v3272_v63  ;;  %v204_v62 = vld [vmem:[%s5880_s1 + $0x528] sm:$0xff]  ;;  %v221_v63 = vld [vmem:[%s5880_s1 + $0x5b0] sm:$0xff] }
  0x4e   :  { %666 = vmatpush.msra.mxu0 %v178_v33  ;;  %686 = vmatpush.msra.mxu1 %v194_v34  ;;  %v277_v30 = vld [vmem:[%s5880_s1 + $0x770] sm:$0xff]  ;;  %v260_v33 = vld [vmem:[%s5880_s1 + $0x6e8] sm:$0xff] }
  0x4f   :  { %706 = vmatpush.msra.mxu2 %v210_v35  ;;  %725 = vmatpush.msra.mxu3 %v227_v36  ;;  %v276_v34 = vld [vmem:[%s5880_s1 + $0x768] sm:$0xff]  ;;  %v293_v35 = vld [vmem:[%s5880_s1 + $0x7f0] sm:$0xff]  ;;  %v243_v36 = vld [vmem:[%s5880_s1 + $0x660] sm:$0xff] }
  0x50   :  { %618 = vmatmul.f32.vlgmr.msrb.gmra.mxu1 %v3274_v0  ;;  %667 = vmatpush.msra.mxu0 %v177_v37  ;;  %v171_v0 = vld [vmem:[%s5880_s1 + $0x420] sm:$0xff] }
  0x51   :  { %687 = vmatpush.msra.mxu1 %v193_v38  ;;  %707 = vmatpush.msra.mxu2 %v209_v39  ;;  %v3563_v37 = vld.sshfl [vmem:[#allocation1 + $0x20] sm:$0xff pattern:$0x73625140]  ;;  %v3565_v38 = vld.sshfl [vmem:[#allocation1 + $0x30] sm:$0xff pattern:$0x73625140] }
  0x52   :  { %726 = vmatpush.msra.mxu3 %v226_v41  ;;  %668 = vmatpush.msra.mxu0 %v176_v42  ;;  %v3567_v39 = vld.sshfl [vmem:[#allocation1 + $0x28] sm:$0xff pattern:$0x73625140]  ;;  %v3577_v41 = vld.sshfl [vmem:[#allocation1 + $0x38] sm:$0xff pattern:$0x73625140] }
  0x53   :  { %688 = vmatpush.msra.mxu1 %v192_v44  ;;  %708 = vmatpush.msra.mxu2 %v208_v45  ;;  %v275_v42 = vld [vmem:[%s5880_s1 + $0x760] sm:$0xff]  ;;  %v292_v44 = vld [vmem:[%s5880_s1 + $0x7e8] sm:$0xff]  ;;  %v242_v45 = vld [vmem:[%s5880_s1 + $0x658] sm:$0xff] }
  0x54   :  { %727 = vmatpush.msra.mxu3 %v225_v46  ;;  %669 = vmatpush.msra.mxu0 %v175_v47  ;;  %v258_v46 = vld [vmem:[%s5880_s1 + $0x6d8] sm:$0xff] }
  0x55   :  { %689 = vmatpush.msra.mxu1 %v191_v48  ;;  %709 = vmatpush.msra.mxu2 %v207_v49  ;;  %v274_v47 = vld [vmem:[%s5880_s1 + $0x758] sm:$0xff]  ;;  %v291_v48 = vld [vmem:[%s5880_s1 + $0x7e0] sm:$0xff]  ;;  %v241_v49 = vld [vmem:[%s5880_s1 + $0x650] sm:$0xff] }
  0x56   :  { %728 = vmatpush.msra.mxu3 %v224_v50  ;;  %670 = vmatpush.msra.mxu0 %v174_v51  ;;  %v257_v50 = vld [vmem:[%s5880_s1 + $0x6d0] sm:$0xff] }
  0x57   :  { %690 = vmatpush.msra.mxu1 %v190_v52  ;;  %710 = vmatpush.msra.mxu2 %v206_v53  ;;  %v273_v51 = vld [vmem:[%s5880_s1 + $0x750] sm:$0xff]  ;;  %v290_v52 = vld [vmem:[%s5880_s1 + $0x7d8] sm:$0xff]  ;;  %v240_v53 = vld [vmem:[%s5880_s1 + $0x648] sm:$0xff] }
  0x58   :  { %729 = vmatpush.msra.mxu3 %v223_v54  ;;  %671 = vmatpush.msra.mxu0 %v173_v55  ;;  %v256_v54 = vld [vmem:[%s5880_s1 + $0x6c8] sm:$0xff] }
  0x59   :  { %691 = vmatpush.msra.mxu1 %v189_v56  ;;  %711 = vmatpush.msra.mxu2 %v205_v57  ;;  %v272_v55 = vld [vmem:[%s5880_s1 + $0x748] sm:$0xff]  ;;  %v289_v56 = vld [vmem:[%s5880_s1 + $0x7d0] sm:$0xff]  ;;  %v239_v57 = vld [vmem:[%s5880_s1 + $0x640] sm:$0xff] }
  0x5a   :  { %730 = vmatpush.msra.mxu3 %v222_v58  ;;  %672 = vmatpush.msra.mxu0 %v172_v59  ;;  %v255_v58 = vld [vmem:[%s5880_s1 + $0x6c0] sm:$0xff] }
  0x5b   :  { %692 = vmatpush.msra.mxu1 %v188_v61  ;;  %712 = vmatpush.msra.mxu2 %v204_v62  ;;  %v271_v59 = vld [vmem:[%s5880_s1 + $0x740] sm:$0xff]  ;;  %v288_v61 = vld [vmem:[%s5880_s1 + $0x7c8] sm:$0xff]  ;;  %v238_v62 = vld [vmem:[%s5880_s1 + $0x638] sm:$0xff] }
  0x5c   :  { %731 = vmatpush.msra.mxu3 %v221_v63  ;;  %673 = vmatpush.msra.mxu0 %v171_v0  ;;  %v254_v63 = vld [vmem:[%s5880_s1 + $0x6b8] sm:$0xff] }
  0x5d   :  { %693 = vmatpush.msra.mxu1 %v187_v1  ;;  %713 = vmatpush.msra.mxu2 %v203_v2  ;;  %v270_v0 = vld [vmem:[%s5880_s1 + $0x738] sm:$0xff]  ;;  %v287_v1 = vld [vmem:[%s5880_s1 + $0x7c0] sm:$0xff]  ;;  %v237_v2 = vld [vmem:[%s5880_s1 + $0x630] sm:$0xff] }
  0x5e   :  { %732 = vmatpush.msra.mxu3 %v220_v3  ;;  %674 = vmatpush.msra.mxu0 %v170_v4  ;;  %v253_v3 = vld [vmem:[%s5880_s1 + $0x6b0] sm:$0xff] }
  0x5f   :  { %694 = vmatpush.msra.mxu1 %v186_v5  ;;  %714 = vmatpush.msra.mxu2 %v202_v6  ;;  %v269_v4 = vld [vmem:[%s5880_s1 + $0x730] sm:$0xff]  ;;  %v286_v5 = vld [vmem:[%s5880_s1 + $0x7b8] sm:$0xff]  ;;  %v236_v6 = vld [vmem:[%s5880_s1 + $0x628] sm:$0xff] }
  0x60   :  { %733 = vmatpush.msra.mxu3 %v219_v7  ;;  %675 = vmatpush.msra.mxu0 %v169_v8  ;;  %v252_v7 = vld [vmem:[%s5880_s1 + $0x6a8] sm:$0xff] }
  0x61   :  { %695 = vmatpush.msra.mxu1 %v185_v9  ;;  %715 = vmatpush.msra.mxu2 %v201_v10  ;;  %v268_v8 = vld [vmem:[%s5880_s1 + $0x728] sm:$0xff]  ;;  %v285_v9 = vld [vmem:[%s5880_s1 + $0x7b0] sm:$0xff]  ;;  %v235_v10 = vld [vmem:[%s5880_s1 + $0x620] sm:$0xff] }
  0x62   :  { %734 = vmatpush.msra.mxu3 %v218_v11  ;;  %676 = vmatpush.msra.mxu0 %v168_v12  ;;  %v251_v11 = vld [vmem:[%s5880_s1 + $0x6a0] sm:$0xff] }
  0x63   :  { %696 = vmatpush.msra.mxu1 %v184_v13  ;;  %716 = vmatpush.msra.mxu2 %v200_v14  ;;  %v267_v12 = vld [vmem:[%s5880_s1 + $0x720] sm:$0xff]  ;;  %v284_v13 = vld [vmem:[%s5880_s1 + $0x7a8] sm:$0xff]  ;;  %v234_v14 = vld [vmem:[%s5880_s1 + $0x618] sm:$0xff] }
  0x64   :  { %735 = vmatpush.msra.mxu3 %v217_v15  ;;  %677 = vmatpush.msra.mxu0 %v167_v16  ;;  %v250_v15 = vld [vmem:[%s5880_s1 + $0x698] sm:$0xff] }
  0x65   :  { %697 = vmatpush.msra.mxu1 %v183_v17  ;;  %717 = vmatpush.msra.mxu2 %v199_v18  ;;  %v266_v16 = vld [vmem:[%s5880_s1 + $0x718] sm:$0xff]  ;;  %v283_v17 = vld [vmem:[%s5880_s1 + $0x7a0] sm:$0xff]  ;;  %v233_v18 = vld [vmem:[%s5880_s1 + $0x610] sm:$0xff] }
  0x66   :  { %736 = vmatpush.msra.mxu3 %v216_v19  ;;  %678 = vmatmul.f32.vlgmr.msra.gmra.mxu0 %v3355_v27  ;;  %v294_v27 = vld [vmem:[%s5880_s1 + $0x7f8] sm:$0xff]  ;;  %v249_v19 = vld [vmem:[%s5880_s1 + $0x690] sm:$0xff] }
  0x67   :  { %718 = vmatmul.f32.vlgmr.msra.gmra.mxu2 %v3357_v28  ;;  %742 = vmatpush.msrb.mxu0 %v246_v20  ;;  %v244_v28 = vld [vmem:[%s5880_s1 + $0x668] sm:$0xff]  ;;  %v265_v20 = vld [vmem:[%s5880_s1 + $0x710] sm:$0xff] }
  0x68   :  { %762 = vmatpush.msrb.mxu1 %v262_v21  ;;  %782 = vmatpush.msrb.mxu2 %v278_v22  ;;  %v282_v21 = vld [vmem:[%s5880_s1 + $0x798] sm:$0xff]  ;;  %v232_v22 = vld [vmem:[%s5880_s1 + $0x608] sm:$0xff] }
  0x69   :  { %737 = vmatpush.msra.mxu3 %v215_v24  ;;  %698 = vmatmul.f32.vlgmr.msra.gmra.mxu1 %v3359_v29  ;;  %v259_v29 = vld [vmem:[%s5880_s1 + $0x6e0] sm:$0xff]  ;;  %v248_v24 = vld [vmem:[%s5880_s1 + $0x688] sm:$0xff] }
  0x6a   :  { %738 = vmatmul.f32.vlgmr.msra.gmra.mxu3 %v3369_v32  ;;  %743 = vmatpush.msrb.mxu0 %v245_v25  ;;  %v3575_v32 = vld [vmem:[%s5881_s0 + $0x28] sm:$0xff] }
  0x6b   :  { %763 = vmatpush.msrb.mxu1 %v261_v26  ;;  %783 = vmatpush.msrb.mxu2 %v277_v30  ;;  %464 = vst [vmem:[#allocation1 + $0x20] ss:$4 sm:$0xff] %v3575_v32  ;;  %v264_v25 = vld [vmem:[%s5880_s1 + $0x708] sm:$0xff]  ;;  %v281_v26 = vld [vmem:[%s5880_s1 + $0x790] sm:$0xff]  ;;  %v231_v30 = vld [vmem:[%s5880_s1 + $0x600] sm:$0xff] }
  0x6c   :  { %802 = vmatpush.msrb.mxu3 %v294_v27  ;;  %744 = vmatpush.msrb.mxu0 %v244_v28  ;;  %v247_v27 = vld [vmem:[%s5880_s1 + $0x680] sm:$0xff] }
  0x6d   :  { %764 = vmatpush.msrb.mxu1 %v260_v33  ;;  %784 = vmatpush.msrb.mxu2 %v276_v34  ;;  %v263_v28 = vld [vmem:[%s5880_s1 + $0x700] sm:$0xff]  ;;  %v280_v33 = vld [vmem:[%s5880_s1 + $0x788] sm:$0xff]  ;;  %v310_v34 = vld [vmem:[%s5880_s1 + $0x878] sm:$0xff] }
  0x6e   :  { %803 = vmatpush.msrb.mxu3 %v293_v35  ;;  %745 = vmatpush.msrb.mxu0 %v243_v36  ;;  %v326_v35 = vld [vmem:[%s5880_s1 + $0x8f8] sm:$0xff] }
  0x6f   :  { %765 = vmatpush.msrb.mxu1 %v259_v29  ;;  %785 = vmatpush.msrb.mxu2 %v275_v42  ;;  %v342_v36 = vld [vmem:[%s5880_s1 + $0x978] sm:$0xff]  ;;  %v279_v29 = vld [vmem:[%s5880_s1 + $0x780] sm:$0xff]  ;;  %v309_v42 = vld [vmem:[%s5880_s1 + $0x870] sm:$0xff] }
  0x70   :  { %804 = vmatpush.msrb.mxu3 %v292_v44  ;;  %746 = vmatpush.msrb.mxu0 %v242_v45  ;;  %v3750_v44 = vld [vmem:[%s5881_s0 + $0x30] sm:$0x3] }
  0x71   :  { %766 = vmatpush.msrb.mxu1 %v258_v46  ;;  %786 = vmatpush.msrb.mxu2 %v274_v47  ;;  %v325_v45 = vld [vmem:[%s5880_s1 + $0x8f0] sm:$0xff]  ;;  %v308_v46 = vld [vmem:[%s5880_s1 + $0x868] sm:$0xff] }
  0x72   :  { %805 = vmatpush.msrb.mxu3 %v291_v48  ;;  %747 = vmatpush.msrb.mxu0 %v241_v49  ;;  %v324_v47 = vld [vmem:[%s5880_s1 + $0x8e8] sm:$0xff]  ;;  %v357_v49 = vld [vmem:[%s5880_s1 + $0x9f0] sm:$0xff] }
  0x73   :  { %767 = vmatpush.msrb.mxu1 %v257_v50  ;;  %787 = vmatpush.msrb.mxu2 %v273_v51  ;;  %v340_v48 = vld [vmem:[%s5880_s1 + $0x968] sm:$0xff]  ;;  %v307_v50 = vld [vmem:[%s5880_s1 + $0x860] sm:$0xff] }
  0x74   :  { %806 = vmatpush.msrb.mxu3 %v290_v52  ;;  %748 = vmatpush.msrb.mxu0 %v240_v53  ;;  %v323_v51 = vld [vmem:[%s5880_s1 + $0x8e0] sm:$0xff]  ;;  %v3783_v53 = vld.sshfl [vmem:[#allocation1 + $0x10] sm:$0xff pattern:$0x73625140] }
  0x75   :  { %768 = vmatpush.msrb.mxu1 %v256_v54  ;;  %788 = vmatpush.msrb.mxu2 %v272_v55  ;;  %v3781_v52 = vld.sshfl [vmem:[#allocation1] sm:$0xff pattern:$0x73625140]  ;;  %v356_v55 = vld [vmem:[%s5880_s1 + $0x9e8] sm:$0xff] }
  0x76   :  { %807 = vmatpush.msrb.mxu3 %v289_v56  ;;  %749 = vmatpush.msrb.mxu0 %v239_v57  ;;  %v339_v54 = vld [vmem:[%s5880_s1 + $0x960] sm:$0xff]  ;;  %v306_v56 = vld [vmem:[%s5880_s1 + $0x858] sm:$0xff] }
  0x77   :  { %769 = vmatpush.msrb.mxu1 %v255_v58  ;;  %789 = vmatpush.msrb.mxu2 %v271_v59  ;;  %v322_v57 = vld [vmem:[%s5880_s1 + $0x8d8] sm:$0xff]  ;;  %v355_v59 = vld [vmem:[%s5880_s1 + $0x9e0] sm:$0xff] }
  0x78   :  { %808 = vmatpush.msrb.mxu3 %v288_v61  ;;  %750 = vmatpush.msrb.mxu0 %v238_v62  ;;  %v338_v58 = vld [vmem:[%s5880_s1 + $0x958] sm:$0xff]  ;;  %v305_v61 = vld [vmem:[%s5880_s1 + $0x850] sm:$0xff] }
  0x79   :  { %770 = vmatpush.msrb.mxu1 %v254_v63  ;;  %790 = vmatpush.msrb.mxu2 %v270_v0  ;;  %v321_v62 = vld [vmem:[%s5880_s1 + $0x8d0] sm:$0xff]  ;;  %v354_v0 = vld [vmem:[%s5880_s1 + $0x9d8] sm:$0xff] }
  0x7a   :  { %809 = vmatpush.msrb.mxu3 %v287_v1  ;;  %751 = vmatpush.msrb.mxu0 %v237_v2  ;;  %v337_v63 = vld [vmem:[%s5880_s1 + $0x950] sm:$0xff]  ;;  %v304_v1 = vld [vmem:[%s5880_s1 + $0x848] sm:$0xff] }
  0x7b   :  { %771 = vmatpush.msrb.mxu1 %v253_v3  ;;  %791 = vmatpush.msrb.mxu2 %v269_v4  ;;  %v320_v2 = vld [vmem:[%s5880_s1 + $0x8c8] sm:$0xff]  ;;  %v353_v4 = vld [vmem:[%s5880_s1 + $0x9d0] sm:$0xff] }
  0x7c   :  { %810 = vmatpush.msrb.mxu3 %v286_v5  ;;  %752 = vmatpush.msrb.mxu0 %v236_v6  ;;  %v336_v3 = vld [vmem:[%s5880_s1 + $0x948] sm:$0xff]  ;;  %v303_v5 = vld [vmem:[%s5880_s1 + $0x840] sm:$0xff] }
  0x7d   :  { %772 = vmatpush.msrb.mxu1 %v252_v7  ;;  %792 = vmatpush.msrb.mxu2 %v268_v8  ;;  %v319_v6 = vld [vmem:[%s5880_s1 + $0x8c0] sm:$0xff]  ;;  %v352_v8 = vld [vmem:[%s5880_s1 + $0x9c8] sm:$0xff] }
  0x7e   :  { %811 = vmatpush.msrb.mxu3 %v285_v9  ;;  %753 = vmatpush.msrb.mxu0 %v235_v10  ;;  %v335_v7 = vld [vmem:[%s5880_s1 + $0x940] sm:$0xff]  ;;  %v302_v9 = vld [vmem:[%s5880_s1 + $0x838] sm:$0xff] }
  0x7f   :  { %773 = vmatpush.msrb.mxu1 %v251_v11  ;;  %793 = vmatpush.msrb.mxu2 %v267_v12  ;;  %v318_v10 = vld [vmem:[%s5880_s1 + $0x8b8] sm:$0xff]  ;;  %v351_v12 = vld [vmem:[%s5880_s1 + $0x9c0] sm:$0xff] }
  0x80   :  { %812 = vmatpush.msrb.mxu3 %v284_v13  ;;  %754 = vmatpush.msrb.mxu0 %v234_v14  ;;  %v334_v11 = vld [vmem:[%s5880_s1 + $0x938] sm:$0xff]  ;;  %v301_v13 = vld [vmem:[%s5880_s1 + $0x830] sm:$0xff] }
  0x81   :  { %774 = vmatpush.msrb.mxu1 %v250_v15  ;;  %794 = vmatpush.msrb.mxu2 %v266_v16  ;;  %v317_v14 = vld [vmem:[%s5880_s1 + $0x8b0] sm:$0xff]  ;;  %v350_v16 = vld [vmem:[%s5880_s1 + $0x9b8] sm:$0xff] }
  0x82   :  { %813 = vmatpush.msrb.mxu3 %v283_v17  ;;  %755 = vmatpush.msrb.mxu0 %v233_v18  ;;  %v333_v15 = vld [vmem:[%s5880_s1 + $0x930] sm:$0xff]  ;;  %v300_v17 = vld [vmem:[%s5880_s1 + $0x828] sm:$0xff] }
  0x83   :  { %775 = vmatpush.msrb.mxu1 %v249_v19  ;;  %795 = vmatpush.msrb.mxu2 %v265_v20  ;;  %v316_v18 = vld [vmem:[%s5880_s1 + $0x8a8] sm:$0xff]  ;;  %v349_v20 = vld [vmem:[%s5880_s1 + $0x9b0] sm:$0xff] }
  0x84   :  { %814 = vmatpush.msrb.mxu3 %v282_v21  ;;  %756 = vmatpush.msrb.mxu0 %v232_v22  ;;  %v332_v19 = vld [vmem:[%s5880_s1 + $0x928] sm:$0xff]  ;;  %v299_v21 = vld [vmem:[%s5880_s1 + $0x820] sm:$0xff] }
  0x85   :  { %776 = vmatpush.msrb.mxu1 %v248_v24  ;;  %796 = vmatpush.msrb.mxu2 %v264_v25  ;;  %v315_v22 = vld [vmem:[%s5880_s1 + $0x8a0] sm:$0xff]  ;;  %v348_v25 = vld [vmem:[%s5880_s1 + $0x9a8] sm:$0xff] }
  0x86   :  { %815 = vmatpush.msrb.mxu3 %v281_v26  ;;  %757 = vmatpush.msrb.mxu0 %v231_v30  ;;  %v331_v24 = vld [vmem:[%s5880_s1 + $0x920] sm:$0xff]  ;;  %v298_v26 = vld [vmem:[%s5880_s1 + $0x818] sm:$0xff] }
  0x87   :  { %777 = vmatpush.msrb.mxu1 %v247_v27  ;;  %797 = vmatpush.msrb.mxu2 %v263_v28  ;;  %v314_v30 = vld [vmem:[%s5880_s1 + $0x898] sm:$0xff]  ;;  %v347_v28 = vld [vmem:[%s5880_s1 + $0x9a0] sm:$0xff] }
  0x88   :  { %816 = vmatpush.msrb.mxu3 %v280_v33  ;;  %758 = vmatmul.f32.vlgmr.msrb.gmra.mxu0 %v3563_v37  ;;  %v341_v37 = vld [vmem:[%s5880_s1 + $0x970] sm:$0xff]  ;;  %v330_v27 = vld [vmem:[%s5880_s1 + $0x918] sm:$0xff] }
  0x89   :  { %798 = vmatmul.f32.vlgmr.msrb.gmra.mxu2 %v3565_v38  ;;  %822 = vmatpush.msra.mxu0 %v310_v34  ;;  %v358_v38 = vld [vmem:[%s5880_s1 + $0x9f8] sm:$0xff]  ;;  %v297_v33 = vld [vmem:[%s5880_s1 + $0x810] sm:$0xff] }
  0x8a   :  { %842 = vmatpush.msra.mxu1 %v326_v35  ;;  %862 = vmatpush.msra.mxu2 %v342_v36  ;;  %v313_v34 = vld [vmem:[%s5880_s1 + $0x890] sm:$0xff]  ;;  %v346_v36 = vld [vmem:[%s5880_s1 + $0x998] sm:$0xff] }
  0x8b   :  { %817 = vmatpush.msrb.mxu3 %v279_v29  ;;  %778 = vmatmul.f32.vlgmr.msrb.gmra.mxu1 %v3567_v39  ;;  %v3785_v39 = vld.sshfl [vmem:[#allocation1 + $0x8] sm:$0xff pattern:$0x73625140]  ;;  %v329_v35 = vld [vmem:[%s5880_s1 + $0x910] sm:$0xff] }
  0x8c   :  { %818 = vmatmul.f32.vlgmr.msrb.gmra.mxu3 %v3577_v41  ;;  %823 = vmatpush.msra.mxu0 %v309_v42  ;;  %v3787_v41 = vld.sshfl [vmem:[#allocation1 + $0x18] sm:$0xff pattern:$0x73625140]  ;;  %v296_v29 = vld [vmem:[%s5880_s1 + $0x808] sm:$0xff] }
  0x8d   :  { %843 = vmatpush.msra.mxu1 %v325_v45  ;;  %863 = vmatpush.msra.mxu2 %v341_v37  ;;  %473 = vst [vmem:[#allocation1] ss:$4 sm:$0xff] %v3750_v44  ;;  %v312_v42 = vld [vmem:[%s5880_s1 + $0x888] sm:$0xff]  ;;  %v345_v37 = vld [vmem:[%s5880_s1 + $0x990] sm:$0xff] }
  0x8e   :  { %882 = vmatpush.msra.mxu3 %v358_v38  ;;  %824 = vmatpush.msra.mxu0 %v308_v46  ;;  %v328_v45 = vld [vmem:[%s5880_s1 + $0x908] sm:$0xff]  ;;  %v295_v38 = vld [vmem:[%s5880_s1 + $0x800] sm:$0xff] }
  0x8f   :  { %844 = vmatpush.msra.mxu1 %v324_v47  ;;  %864 = vmatpush.msra.mxu2 %v340_v48  ;;  %v311_v46 = vld [vmem:[%s5880_s1 + $0x880] sm:$0xff]  ;;  %v344_v48 = vld [vmem:[%s5880_s1 + $0x988] sm:$0xff] }
  0x90   :  { %883 = vmatpush.msra.mxu3 %v357_v49  ;;  %825 = vmatpush.msra.mxu0 %v307_v50  ;;  %v327_v47 = vld [vmem:[%s5880_s1 + $0x900] sm:$0xff]  ;;  %v374_v49 = vld [vmem:[%s5880_s1 + $0xa78] sm:$0xff] }
  0x91   :  { %845 = vmatpush.msra.mxu1 %v323_v51  ;;  %865 = vmatpush.msra.mxu2 %v339_v54  ;;  %v390_v50 = vld [vmem:[%s5880_s1 + $0xaf8] sm:$0xff]  ;;  %v343_v54 = vld [vmem:[%s5880_s1 + $0x980] sm:$0xff] }
  0x92   :  { %884 = vmatpush.msra.mxu3 %v356_v55  ;;  %826 = vmatpush.msra.mxu0 %v306_v56  ;;  %v406_v51 = vld [vmem:[%s5880_s1 + $0xb78] sm:$0xff]  ;;  %v373_v55 = vld [vmem:[%s5880_s1 + $0xa70] sm:$0xff] }
  0x93   :  { %846 = vmatpush.msra.mxu1 %v322_v57  ;;  %866 = vmatpush.msra.mxu2 %v338_v58  ;;  %v389_v56 = vld [vmem:[%s5880_s1 + $0xaf0] sm:$0xff]  ;;  %v388_v58 = vld [vmem:[%s5880_s1 + $0xae8] sm:$0xff] }
  0x94   :  { %885 = vmatpush.msra.mxu3 %v355_v59  ;;  %827 = vmatpush.msra.mxu0 %v305_v61  ;;  %v405_v57 = vld [vmem:[%s5880_s1 + $0xb70] sm:$0xff]  ;;  %v404_v59 = vld [vmem:[%s5880_s1 + $0xb68] sm:$0xff] }
  0x95   :  { %847 = vmatpush.msra.mxu1 %v321_v62  ;;  %867 = vmatpush.msra.mxu2 %v337_v63  ;;  %v421_v61 = vld [vmem:[%s5880_s1 + $0xbf0] sm:$0xff]  ;;  %v371_v62 = vld [vmem:[%s5880_s1 + $0xa60] sm:$0xff] }
  0x96   :  { %886 = vmatpush.msra.mxu3 %v354_v0  ;;  %828 = vmatpush.msra.mxu0 %v304_v1  ;;  %v387_v63 = vld [vmem:[%s5880_s1 + $0xae0] sm:$0xff]  ;;  %v3988_v1 = vld.sshfl [vmem:[#allocation1 + $0x30] sm:$0xff pattern:$0x73625140] }
  0x97   :  { %848 = vmatpush.msra.mxu1 %v320_v2  ;;  %868 = vmatpush.msra.mxu2 %v336_v3  ;;  %v3986_v0 = vld.sshfl [vmem:[#allocation1 + $0x20] sm:$0xff pattern:$0x73625140]  ;;  %v420_v3 = vld [vmem:[%s5880_s1 + $0xbe8] sm:$0xff] }
  0x98   :  { %887 = vmatpush.msra.mxu3 %v353_v4  ;;  %829 = vmatpush.msra.mxu0 %v303_v5  ;;  %v403_v2 = vld [vmem:[%s5880_s1 + $0xb60] sm:$0xff]  ;;  %v370_v4 = vld [vmem:[%s5880_s1 + $0xa58] sm:$0xff] }
  0x99   :  { %849 = vmatpush.msra.mxu1 %v319_v6  ;;  %869 = vmatpush.msra.mxu2 %v335_v7  ;;  %v386_v5 = vld [vmem:[%s5880_s1 + $0xad8] sm:$0xff]  ;;  %v369_v7 = vld [vmem:[%s5880_s1 + $0xa50] sm:$0xff] }
  0x9a   :  { %888 = vmatpush.msra.mxu3 %v352_v8  ;;  %830 = vmatpush.msra.mxu0 %v302_v9  ;;  %v402_v6 = vld [vmem:[%s5880_s1 + $0xb58] sm:$0xff]  ;;  %v385_v8 = vld [vmem:[%s5880_s1 + $0xad0] sm:$0xff] }
  0x9b   :  { %850 = vmatpush.msra.mxu1 %v318_v10  ;;  %870 = vmatpush.msra.mxu2 %v334_v11  ;;  %v401_v9 = vld [vmem:[%s5880_s1 + $0xb50] sm:$0xff]  ;;  %v418_v10 = vld [vmem:[%s5880_s1 + $0xbd8] sm:$0xff]  ;;  %v368_v11 = vld [vmem:[%s5880_s1 + $0xa48] sm:$0xff] }
  0x9c   :  { %889 = vmatpush.msra.mxu3 %v351_v12  ;;  %831 = vmatpush.msra.mxu0 %v301_v13  ;;  %v384_v12 = vld [vmem:[%s5880_s1 + $0xac8] sm:$0xff] }
  0x9d   :  { %851 = vmatpush.msra.mxu1 %v317_v14  ;;  %871 = vmatpush.msra.mxu2 %v333_v15  ;;  %v400_v13 = vld [vmem:[%s5880_s1 + $0xb48] sm:$0xff]  ;;  %v417_v14 = vld [vmem:[%s5880_s1 + $0xbd0] sm:$0xff]  ;;  %v367_v15 = vld [vmem:[%s5880_s1 + $0xa40] sm:$0xff] }
  0x9e   :  { %890 = vmatpush.msra.mxu3 %v350_v16  ;;  %832 = vmatpush.msra.mxu0 %v300_v17  ;;  %v383_v16 = vld [vmem:[%s5880_s1 + $0xac0] sm:$0xff] }
  0x9f   :  { %852 = vmatpush.msra.mxu1 %v316_v18  ;;  %872 = vmatpush.msra.mxu2 %v332_v19  ;;  %v399_v17 = vld [vmem:[%s5880_s1 + $0xb40] sm:$0xff]  ;;  %v416_v18 = vld [vmem:[%s5880_s1 + $0xbc8] sm:$0xff]  ;;  %v366_v19 = vld [vmem:[%s5880_s1 + $0xa38] sm:$0xff] }
  0xa0   :  { %891 = vmatpush.msra.mxu3 %v349_v20  ;;  %833 = vmatpush.msra.mxu0 %v299_v21  ;;  %v382_v20 = vld [vmem:[%s5880_s1 + $0xab8] sm:$0xff] }
  0xa1   :  { %853 = vmatpush.msra.mxu1 %v315_v22  ;;  %873 = vmatpush.msra.mxu2 %v331_v24  ;;  %v398_v21 = vld [vmem:[%s5880_s1 + $0xb38] sm:$0xff]  ;;  %v415_v22 = vld [vmem:[%s5880_s1 + $0xbc0] sm:$0xff]  ;;  %v365_v24 = vld [vmem:[%s5880_s1 + $0xa30] sm:$0xff] }
  0xa2   :  { %892 = vmatpush.msra.mxu3 %v348_v25  ;;  %834 = vmatpush.msra.mxu0 %v298_v26  ;;  %v381_v25 = vld [vmem:[%s5880_s1 + $0xab0] sm:$0xff] }
  0xa3   :  { %854 = vmatpush.msra.mxu1 %v314_v30  ;;  %874 = vmatpush.msra.mxu2 %v330_v27  ;;  %v397_v26 = vld [vmem:[%s5880_s1 + $0xb30] sm:$0xff]  ;;  %v414_v30 = vld [vmem:[%s5880_s1 + $0xbb8] sm:$0xff]  ;;  %v364_v27 = vld [vmem:[%s5880_s1 + $0xa28] sm:$0xff] }
  0xa4   :  { %893 = vmatpush.msra.mxu3 %v347_v28  ;;  %835 = vmatpush.msra.mxu0 %v297_v33  ;;  %v380_v28 = vld [vmem:[%s5880_s1 + $0xaa8] sm:$0xff]  ;;  %v4079_v33 = vld.sshfl [vmem:[#allocation1] sm:$0xff pattern:$0x73625140] }
  0xa5   :  { %855 = vmatpush.msra.mxu1 %v313_v34  ;;  %875 = vmatpush.msra.mxu2 %v329_v35  ;;  %v396_v34 = vld [vmem:[%s5880_s1 + $0xb28] sm:$0xff]  ;;  %v413_v35 = vld [vmem:[%s5880_s1 + $0xbb0] sm:$0xff]  ;;  %1398 = vst [vmem:[#allocation1] ss:$4 sm:$0xff] %v3152_v23 }
  0xa6   :  { %894 = vmatpush.msra.mxu3 %v346_v36  ;;  %836 = vmatpush.msra.mxu0 %v296_v29  ;;  %v363_v36 = vld [vmem:[%s5880_s1 + $0xa20] sm:$0xff]  ;;  %v412_v23 = vld [vmem:[%s5880_s1 + $0xba8] sm:$0xff] }
  0xa7   :  { %856 = vmatpush.msra.mxu1 %v312_v42  ;;  %876 = vmatpush.msra.mxu2 %v328_v45  ;;  %v379_v29 = vld [vmem:[%s5880_s1 + $0xaa0] sm:$0xff]  ;;  %v362_v45 = vld [vmem:[%s5880_s1 + $0xa18] sm:$0xff] }
  0xa8   :  { %895 = vmatpush.msra.mxu3 %v345_v37  ;;  %837 = vmatpush.msra.mxu0 %v295_v38  ;;  %v395_v42 = vld [vmem:[%s5880_s1 + $0xb20] sm:$0xff]  ;;  %v378_v37 = vld [vmem:[%s5880_s1 + $0xa98] sm:$0xff] }
  0xa9   :  { %857 = vmatpush.msra.mxu1 %v311_v46  ;;  %877 = vmatpush.msra.mxu2 %v327_v47  ;;  %v394_v38 = vld [vmem:[%s5880_s1 + $0xb18] sm:$0xff]  ;;  %v411_v46 = vld [vmem:[%s5880_s1 + $0xba0] sm:$0xff]  ;;  %v361_v47 = vld [vmem:[%s5880_s1 + $0xa10] sm:$0xff] }
  0xaa   :  { %896 = vmatpush.msra.mxu3 %v344_v48  ;;  %838 = vmatmul.f32.vlgmr.msra.gmra.mxu0 %v3781_v52  ;;  %v422_v52 = vld [vmem:[%s5880_s1 + $0xbf8] sm:$0xff]  ;;  %v377_v48 = vld [vmem:[%s5880_s1 + $0xa90] sm:$0xff] }
  0xab   :  { %878 = vmatmul.f32.vlgmr.msra.gmra.mxu2 %v3783_v53  ;;  %902 = vmatpush.msrb.mxu0 %v374_v49  ;;  %v372_v53 = vld [vmem:[%s5880_s1 + $0xa68] sm:$0xff]  ;;  %v393_v49 = vld [vmem:[%s5880_s1 + $0xb10] sm:$0xff] }
  0xac   :  { %922 = vmatpush.msrb.mxu1 %v390_v50  ;;  %942 = vmatpush.msrb.mxu2 %v406_v51  ;;  %v410_v50 = vld [vmem:[%s5880_s1 + $0xb98] sm:$0xff]  ;;  %v360_v51 = vld [vmem:[%s5880_s1 + $0xa08] sm:$0xff] }
  0xad   :  { %897 = vmatpush.msra.mxu3 %v343_v54  ;;  %858 = vmatmul.f32.vlgmr.msra.gmra.mxu1 %v3785_v39  ;;  %v3990_v39 = vld.sshfl [vmem:[#allocation1 + $0x28] sm:$0xff pattern:$0x73625140] }
  0xae   :  { %898 = vmatmul.f32.vlgmr.msra.gmra.mxu3 %v3787_v41  ;;  %903 = vmatpush.msrb.mxu0 %v373_v55  ;;  %v3992_v41 = vld.sshfl [vmem:[#allocation1 + $0x38] sm:$0xff pattern:$0x73625140]  ;;  %v376_v54 = vld [vmem:[%s5880_s1 + $0xa88] sm:$0xff] }
  0xaf   :  { %923 = vmatpush.msrb.mxu1 %v389_v56  ;;  %943 = vmatpush.msrb.mxu2 %v405_v57  ;;  %1400 = vst [vmem:[#allocation1 + $0x20] ss:$4 sm:$0xff] %v3206_v40  ;;  %v419_v40 = vld [vmem:[%s5880_s1 + $0xbe0] sm:$0xff]  ;;  %v392_v55 = vld [vmem:[%s5880_s1 + $0xb08] sm:$0xff]  ;;  %v409_v56 = vld [vmem:[%s5880_s1 + $0xb90] sm:$0xff] }
  0xb0   :  { %962 = vmatpush.msrb.mxu3 %v422_v52  ;;  %904 = vmatpush.msrb.mxu0 %v372_v53  ;;  %v359_v57 = vld [vmem:[%s5880_s1 + $0xa00] sm:$0xff] }
  0xb1   :  { %924 = vmatpush.msrb.mxu1 %v388_v58  ;;  %944 = vmatpush.msrb.mxu2 %v404_v59  ;;  %v375_v52 = vld [vmem:[%s5880_s1 + $0xa80] sm:$0xff]  ;;  %v408_v58 = vld [vmem:[%s5880_s1 + $0xb88] sm:$0xff]  ;;  %v430_v59 = vld [vmem:[%s5880_s1 + $0xc38] sm:$0xff] }
  0xb2   :  { %963 = vmatpush.msrb.mxu3 %v421_v61  ;;  %905 = vmatpush.msrb.mxu0 %v371_v62  ;;  %v391_v53 = vld [vmem:[%s5880_s1 + $0xb00] sm:$0xff]  ;;  %v1017_v61 = vld [vmem:[%s5883_s3 + $0x78] sm:$0xff] }
  0xb3   :  { %925 = vmatpush.msrb.mxu1 %v387_v63  ;;  %945 = vmatpush.msrb.mxu2 %v403_v2  ;;  %v1033_v62 = vld [vmem:[%s5883_s3 + $0xf8] sm:$0xff]  ;;  %v407_v63 = vld [vmem:[%s5880_s1 + $0xb80] sm:$0xff]  ;;  %v429_v2 = vld [vmem:[%s5880_s1 + $0xc30] sm:$0xff] }
  0xb4   :  { %964 = vmatpush.msrb.mxu3 %v420_v3  ;;  %906 = vmatpush.msrb.mxu0 %v370_v4  ;;  %v1016_v3 = vld [vmem:[%s5883_s3 + $0x70] sm:$0xff] }
  0xb5   :  { %926 = vmatpush.msrb.mxu1 %v386_v5  ;;  %946 = vmatpush.msrb.mxu2 %v402_v6  ;;  %v1032_v4 = vld [vmem:[%s5883_s3 + $0xf0] sm:$0xff]  ;;  %v1015_v5 = vld [vmem:[%s5883_s3 + $0x68] sm:$0xff] }
  0xb6   :  { %965 = vmatpush.msrb.mxu3 %v419_v40  ;;  %907 = vmatpush.msrb.mxu0 %v369_v7  ;;  %v1031_v6 = vld [vmem:[%s5883_s3 + $0xe8] sm:$0xff]  ;;  %v1014_v40 = vld [vmem:[%s5883_s3 + $0x60] sm:$0xff] }
  0xb7   :  { %927 = vmatpush.msrb.mxu1 %v385_v8  ;;  %947 = vmatpush.msrb.mxu2 %v401_v9  ;;  %v1030_v7 = vld [vmem:[%s5883_s3 + $0xe0] sm:$0xff]  ;;  %v1047_v8 = vld [vmem:[%s5883_s3 + $0x168] sm:$0xff]  ;;  %v426_v9 = vld [vmem:[%s5880_s1 + $0xc18] sm:$0xff] }
  0xb8   :  { %966 = vmatpush.msrb.mxu3 %v418_v10  ;;  %908 = vmatpush.msrb.mxu0 %v368_v11  ;;  %v1013_v10 = vld [vmem:[%s5883_s3 + $0x58] sm:$0xff] }
  0xb9   :  { %928 = vmatpush.msrb.mxu1 %v384_v12  ;;  %948 = vmatpush.msrb.mxu2 %v400_v13  ;;  %v1029_v11 = vld [vmem:[%s5883_s3 + $0xd8] sm:$0xff]  ;;  %v1046_v12 = vld [vmem:[%s5883_s3 + $0x160] sm:$0xff]  ;;  %v425_v13 = vld [vmem:[%s5880_s1 + $0xc10] sm:$0xff] }
  0xba   :  { %967 = vmatpush.msrb.mxu3 %v417_v14  ;;  %909 = vmatpush.msrb.mxu0 %v367_v15  ;;  %v1012_v14 = vld [vmem:[%s5883_s3 + $0x50] sm:$0xff] }
  0xbb   :  { %929 = vmatpush.msrb.mxu1 %v383_v16  ;;  %949 = vmatpush.msrb.mxu2 %v399_v17  ;;  %v1028_v15 = vld [vmem:[%s5883_s3 + $0xd0] sm:$0xff]  ;;  %v1045_v16 = vld [vmem:[%s5883_s3 + $0x158] sm:$0xff]  ;;  %v424_v17 = vld [vmem:[%s5880_s1 + $0xc08] sm:$0xff] }
  0xbc   :  { %968 = vmatpush.msrb.mxu3 %v416_v18  ;;  %910 = vmatpush.msrb.mxu0 %v366_v19  ;;  %v1011_v18 = vld [vmem:[%s5883_s3 + $0x48] sm:$0xff] }
  0xbd   :  { %930 = vmatpush.msrb.mxu1 %v382_v20  ;;  %950 = vmatpush.msrb.mxu2 %v398_v21  ;;  %v1027_v19 = vld [vmem:[%s5883_s3 + $0xc8] sm:$0xff]  ;;  %v1044_v20 = vld [vmem:[%s5883_s3 + $0x150] sm:$0xff]  ;;  %v423_v21 = vld [vmem:[%s5880_s1 + $0xc00] sm:$0xff] }
  0xbe   :  { %969 = vmatpush.msrb.mxu3 %v415_v22  ;;  %911 = vmatpush.msrb.mxu0 %v365_v24  ;;  %v1010_v22 = vld [vmem:[%s5883_s3 + $0x40] sm:$0xff] }
  0xbf   :  { %931 = vmatpush.msrb.mxu1 %v381_v25  ;;  %951 = vmatpush.msrb.mxu2 %v397_v26  ;;  %v1026_v24 = vld [vmem:[%s5883_s3 + $0xc0] sm:$0xff]  ;;  %v1043_v25 = vld [vmem:[%s5883_s3 + $0x148] sm:$0xff]  ;;  %v1009_v26 = vld [vmem:[%s5883_s3 + $0x38] sm:$0xff] }
  0xc0   :  { %970 = vmatpush.msrb.mxu3 %v414_v30  ;;  %912 = vmatpush.msrb.mxu0 %v364_v27  ;;  %v1065_v30 = vld [vmem:[%s5883_s3 + $0x1f8] sm:$0xff] }
  0xc1   :  { %932 = vmatpush.msrb.mxu1 %v380_v28  ;;  %952 = vmatpush.msrb.mxu2 %v396_v34  ;;  %v1025_v27 = vld [vmem:[%s5883_s3 + $0xb8] sm:$0xff]  ;;  %v1042_v28 = vld [vmem:[%s5883_s3 + $0x140] sm:$0xff]  ;;  %v1008_v34 = vld [vmem:[%s5883_s3 + $0x30] sm:$0xff] }
  0xc2   :  { %971 = vmatpush.msrb.mxu3 %v413_v35  ;;  %913 = vmatpush.msrb.mxu0 %v363_v36  ;;  %v1064_v35 = vld [vmem:[%s5883_s3 + $0x1f0] sm:$0xff] }
  0xc3   :  { %933 = vmatpush.msrb.mxu1 %v379_v29  ;;  %953 = vmatpush.msrb.mxu2 %v395_v42  ;;  %v1024_v36 = vld [vmem:[%s5883_s3 + $0xb0] sm:$0xff]  ;;  %v1041_v29 = vld [vmem:[%s5883_s3 + $0x138] sm:$0xff]  ;;  %v1007_v42 = vld [vmem:[%s5883_s3 + $0x28] sm:$0xff] }
  0xc4   :  { %972 = vmatpush.msrb.mxu3 %v412_v23  ;;  %914 = vmatpush.msrb.mxu0 %v362_v45  ;;  %v1023_v23 = vld [vmem:[%s5883_s3 + $0xa8] sm:$0xff]  ;;  %v1040_v45 = vld [vmem:[%s5883_s3 + $0x130] sm:$0xff] }
  0xc5   :  { %934 = vmatpush.msrb.mxu1 %v378_v37  ;;  %954 = vmatpush.msrb.mxu2 %v394_v38  ;;  %v1006_v37 = vld [vmem:[%s5883_s3 + $0x20] sm:$0xff] }
  0xc6   :  { %973 = vmatpush.msrb.mxu3 %v411_v46  ;;  %915 = vmatpush.msrb.mxu0 %v361_v47  ;;  %v1062_v38 = vld [vmem:[%s5883_s3 + $0x1e0] sm:$0xff]  ;;  %v1039_v47 = vld [vmem:[%s5883_s3 + $0x128] sm:$0xff] }
  0xc7   :  { %935 = vmatpush.msrb.mxu1 %v377_v48  ;;  %955 = vmatpush.msrb.mxu2 %v393_v49  ;;  %v1022_v46 = vld [vmem:[%s5883_s3 + $0xa0] sm:$0xff]  ;;  %v1005_v48 = vld [vmem:[%s5883_s3 + $0x18] sm:$0xff] }
  0xc8   :  { %974 = vmatpush.msrb.mxu3 %v410_v50  ;;  %916 = vmatpush.msrb.mxu0 %v360_v51  ;;  %v1061_v49 = vld [vmem:[%s5883_s3 + $0x1d8] sm:$0xff]  ;;  %v1038_v51 = vld [vmem:[%s5883_s3 + $0x120] sm:$0xff] }
  0xc9   :  { %936 = vmatpush.msrb.mxu1 %v376_v54  ;;  %956 = vmatpush.msrb.mxu2 %v392_v55  ;;  %v1021_v50 = vld [vmem:[%s5883_s3 + $0x98] sm:$0xff]  ;;  %v1004_v54 = vld [vmem:[%s5883_s3 + $0x10] sm:$0xff] }
  0xca   :  { %975 = vmatpush.msrb.mxu3 %v409_v56  ;;  %917 = vmatpush.msrb.mxu0 %v359_v57  ;;  %v1060_v55 = vld [vmem:[%s5883_s3 + $0x1d0] sm:$0xff]  ;;  %v1037_v57 = vld [vmem:[%s5883_s3 + $0x118] sm:$0xff] }
  0xcb   :  { %937 = vmatpush.msrb.mxu1 %v375_v52  ;;  %957 = vmatpush.msrb.mxu2 %v391_v53  ;;  %v1020_v56 = vld [vmem:[%s5883_s3 + $0x90] sm:$0xff]  ;;  %v1003_v52 = vld [vmem:[%s5883_s3 + $0x8] sm:$0xff] }
  0xcc   :  { %976 = vmatpush.msrb.mxu3 %v408_v58  ;;  %918 = vmatmul.f32.vlgmr.msrb.gmra.mxu0 %v3986_v0  ;;  %v1049_v0 = vld [vmem:[%s5883_s3 + $0x178] sm:$0xff]  ;;  %v1059_v53 = vld [vmem:[%s5883_s3 + $0x1c8] sm:$0xff] }
  0xcd   :  { %958 = vmatmul.f32.vlgmr.msrb.gmra.mxu2 %v3988_v1  ;;  %990 = vmatpush.msra.mxu0 %v430_v59  ;;  %v428_v1 = vld [vmem:[%s5880_s1 + $0xc28] sm:$0xff]  ;;  %v1036_v59 = vld [vmem:[%s5883_s3 + $0x110] sm:$0xff] }
  0xce   :  { %1457 = vmatpush.msra.mxu1 %v1017_v61  ;;  %1477 = vmatpush.msra.mxu2 %v1033_v62  ;;  %v1019_v58 = vld [vmem:[%s5883_s3 + $0x88] sm:$0xff]  ;;  %v1002_v61 = vld [vmem:[%s5883_s3] sm:$0xff] }
  0xcf   :  { %977 = vmatpush.msrb.mxu3 %v407_v63  ;;  %938 = vmatmul.f32.vlgmr.msrb.gmra.mxu1 %v3990_v39  ;;  %v1048_v39 = vld [vmem:[%s5883_s3 + $0x170] sm:$0xff]  ;;  %v1058_v62 = vld [vmem:[%s5883_s3 + $0x1c0] sm:$0xff] }
  0xd0   :  { %978 = vmatmul.f32.vlgmr.msrb.gmra.mxu3 %v3992_v41  ;;  %991 = vmatpush.msra.mxu0 %v429_v2  ;;  %v427_v41 = vld [vmem:[%s5880_s1 + $0xc20] sm:$0xff]  ;;  %v1035_v2 = vld [vmem:[%s5883_s3 + $0x108] sm:$0xff] }
  0xd1   :  { %1458 = vmatpush.msra.mxu1 %v1016_v3  ;;  %1478 = vmatpush.msra.mxu2 %v1032_v4  ;;  %v1018_v63 = vld [vmem:[%s5883_s3 + $0x80] sm:$0xff]  ;;  %v1081_v3 = vld [vmem:[%s5883_s3 + $0x278] sm:$0xff] }
  0xd2   :  { %1497 = vmatpush.msra.mxu3 %v1049_v0  ;;  %992 = vmatpush.msra.mxu0 %v428_v1  ;;  %v1057_v4 = vld [vmem:[%s5883_s3 + $0x1b8] sm:$0xff]  ;;  %v1034_v1 = vld [vmem:[%s5883_s3 + $0x100] sm:$0xff] }
  0xd3   :  { %1459 = vmatpush.msra.mxu1 %v1015_v5  ;;  %1479 = vmatpush.msra.mxu2 %v1031_v6  ;;  %v1097_v0 = vld [vmem:[%s5883_s3 + $0x2f8] sm:$0xff]  ;;  %v1080_v5 = vld [vmem:[%s5883_s3 + $0x270] sm:$0xff] }
  0xd4   :  { %1498 = vmatpush.msra.mxu3 %v1048_v39  ;;  %993 = vmatpush.msra.mxu0 %v427_v41  ;;  %v1056_v6 = vld [vmem:[%s5883_s3 + $0x1b0] sm:$0xff]  ;;  %v1113_v41 = vld [vmem:[%s5883_s3 + $0x378] sm:$0xff] }
  0xd5   :  { %1460 = vmatpush.msra.mxu1 %v1014_v40  ;;  %1480 = vmatpush.msra.mxu2 %v1030_v7  ;;  %v1096_v39 = vld [vmem:[%s5883_s3 + $0x2f0] sm:$0xff]  ;;  %v1079_v40 = vld [vmem:[%s5883_s3 + $0x268] sm:$0xff] }
  0xd6   :  { %1499 = vmatpush.msra.mxu3 %v1047_v8  ;;  %994 = vmatpush.msra.mxu0 %v426_v9  ;;  %v1055_v7 = vld [vmem:[%s5883_s3 + $0x1a8] sm:$0xff]  ;;  %v1112_v9 = vld [vmem:[%s5883_s3 + $0x370] sm:$0xff] }
  0xd7   :  { %1461 = vmatpush.msra.mxu1 %v1013_v10  ;;  %1481 = vmatpush.msra.mxu2 %v1029_v11  ;;  %v1095_v8 = vld [vmem:[%s5883_s3 + $0x2e8] sm:$0xff]  ;;  %v1078_v10 = vld [vmem:[%s5883_s3 + $0x260] sm:$0xff] }
  0xd8   :  { %1500 = vmatpush.msra.mxu3 %v1046_v12  ;;  %995 = vmatpush.msra.mxu0 %v425_v13  ;;  %v1054_v11 = vld [vmem:[%s5883_s3 + $0x1a0] sm:$0xff]  ;;  %v1111_v13 = vld [vmem:[%s5883_s3 + $0x368] sm:$0xff] }
  0xd9   :  { %1462 = vmatpush.msra.mxu1 %v1012_v14  ;;  %1482 = vmatpush.msra.mxu2 %v1028_v15  ;;  %v1094_v12 = vld [vmem:[%s5883_s3 + $0x2e0] sm:$0xff]  ;;  %v1053_v14 = vld [vmem:[%s5883_s3 + $0x198] sm:$0xff] }
  0xda   :  { %1501 = vmatpush.msra.mxu3 %v1045_v16  ;;  %996 = vmatpush.msra.mxu0 %v424_v17  ;;  %v1077_v15 = vld [vmem:[%s5883_s3 + $0x258] sm:$0xff]  ;;  %v1110_v17 = vld [vmem:[%s5883_s3 + $0x360] sm:$0xff] }
  0xdb   :  { %1463 = vmatpush.msra.mxu1 %v1011_v18  ;;  %1483 = vmatpush.msra.mxu2 %v1027_v19  ;;  %v1093_v16 = vld [vmem:[%s5883_s3 + $0x2d8] sm:$0xff]  ;;  %v1052_v18 = vld [vmem:[%s5883_s3 + $0x190] sm:$0xff] }
  0xdc   :  { %1502 = vmatpush.msra.mxu3 %v1044_v20  ;;  %997 = vmatpush.msra.mxu0 %v423_v21  ;;  %v1076_v19 = vld [vmem:[%s5883_s3 + $0x250] sm:$0xff]  ;;  %v1109_v21 = vld [vmem:[%s5883_s3 + $0x358] sm:$0xff] }
  0xdd   :  { %1464 = vmatpush.msra.mxu1 %v1010_v22  ;;  %1484 = vmatpush.msra.mxu2 %v1026_v24  ;;  %v1092_v20 = vld [vmem:[%s5883_s3 + $0x2d0] sm:$0xff]  ;;  %v1051_v22 = vld [vmem:[%s5883_s3 + $0x188] sm:$0xff] }
  0xde   :  { %1503 = vmatpush.msra.mxu3 %v1043_v25  ;;  %2791 = vmatmul.msk.f32.vlgmr.msra.gmra.mxu0 %vm499_vm0, %v4079_v33  ;;  %v1063_v33 = vld [vmem:[%s5883_s3 + $0x1e8] sm:$0xff] }
  0xdf   :  { %1465 = vmatpush.msra.mxu1 %v1009_v26  ;;  %1517 = vmatpush.msrb.mxu0 %v1065_v30  ;;  %v1075_v24 = vld [vmem:[%s5883_s3 + $0x248] sm:$0xff]  ;;  %v4429_v30 = vld.sshfl [vmem:[#allocation1] sm:$0xff pattern:$0x73625140] }
  0xe0   :  { %1485 = vmatpush.msra.mxu2 %v1025_v27  ;;  %1504 = vmatpush.msra.mxu3 %v1042_v28  ;;  %v1091_v25 = vld [vmem:[%s5883_s3 + $0x2c8] sm:$0xff]  ;;  %v4431_v27 = vld.sshfl [vmem:[#allocation1 + $0x10] sm:$0xff pattern:$0x73625140] }
  0xe1   :  { %1466 = vmatpush.msra.mxu1 %v1008_v34  ;;  %1518 = vmatpush.msrb.mxu0 %v1064_v35  ;;  %v4427_v26 = vld.sshfl [vmem:[#allocation1 + $0x8] sm:$0xff pattern:$0x73625140]  ;;  %v4433_v28 = vld.sshfl [vmem:[#allocation1 + $0x18] sm:$0xff pattern:$0x73625140] }
  0xe2   :  { %1486 = vmatpush.msra.mxu2 %v1024_v36  ;;  %1505 = vmatpush.msra.mxu3 %v1041_v29  ;;  %v1108_v34 = vld [vmem:[%s5883_s3 + $0x350] sm:$0xff]  ;;  %v1074_v35 = vld [vmem:[%s5883_s3 + $0x240] sm:$0xff]  ;;  %1409 = vst [vmem:[#allocation1] ss:$4 sm:$0xff] %v3217_v43  ;;  %v1129_v43 = vld [vmem:[%s5883_s3 + $0x3f8] sm:$0xff] }
  0xe3   :  { %1467 = vmatpush.msra.mxu1 %v1007_v42  ;;  %1519 = vmatpush.msrb.mxu0 %v1063_v33  ;;  %v1050_v36 = vld [vmem:[%s5883_s3 + $0x180] sm:$0xff]  ;;  %v1107_v42 = vld [vmem:[%s5883_s3 + $0x348] sm:$0xff]  ;;  %v1073_v33 = vld [vmem:[%s5883_s3 + $0x238] sm:$0xff] }
  0xe4   :  { %1487 = vmatpush.msra.mxu2 %v1023_v23  ;;  %1506 = vmatpush.msra.mxu3 %v1040_v45  ;;  %v1090_v29 = vld [vmem:[%s5883_s3 + $0x2c0] sm:$0xff]  ;;  %v1089_v23 = vld [vmem:[%s5883_s3 + $0x2b8] sm:$0xff] }
  0xe5   :  { %1468 = vmatpush.msra.mxu1 %v1006_v37  ;;  %1520 = vmatpush.msrb.mxu0 %v1062_v38  ;;  %v1106_v45 = vld [vmem:[%s5883_s3 + $0x340] sm:$0xff]  ;;  %v1128_v37 = vld [vmem:[%s5883_s3 + $0x3f0] sm:$0xff] }
  0xe6   :  { %1488 = vmatpush.msra.mxu2 %v1022_v46  ;;  %1507 = vmatpush.msra.mxu3 %v1039_v47  ;;  %v1072_v38 = vld [vmem:[%s5883_s3 + $0x230] sm:$0xff]  ;;  %v1105_v47 = vld [vmem:[%s5883_s3 + $0x338] sm:$0xff] }
  0xe7   :  { %1469 = vmatpush.msra.mxu1 %v1005_v48  ;;  %1521 = vmatpush.msrb.mxu0 %v1061_v49  ;;  %v1088_v46 = vld [vmem:[%s5883_s3 + $0x2b0] sm:$0xff]  ;;  %v1127_v48 = vld [vmem:[%s5883_s3 + $0x3e8] sm:$0xff] }
  0xe8   :  { %1489 = vmatpush.msra.mxu2 %v1021_v50  ;;  %1508 = vmatpush.msra.mxu3 %v1038_v51  ;;  %v1071_v49 = vld [vmem:[%s5883_s3 + $0x228] sm:$0xff]  ;;  %v1104_v51 = vld [vmem:[%s5883_s3 + $0x330] sm:$0xff] }
  0xe9   :  { %1470 = vmatpush.msra.mxu1 %v1004_v54  ;;  %1522 = vmatpush.msrb.mxu0 %v1060_v55  ;;  %v1087_v50 = vld [vmem:[%s5883_s3 + $0x2a8] sm:$0xff]  ;;  %v1126_v54 = vld [vmem:[%s5883_s3 + $0x3e0] sm:$0xff] }
  0xea   :  { %1490 = vmatpush.msra.mxu2 %v1020_v56  ;;  %1509 = vmatpush.msra.mxu3 %v1037_v57  ;;  %v1070_v55 = vld [vmem:[%s5883_s3 + $0x220] sm:$0xff]  ;;  %v4496_v57 = vld.sshfl [vmem:[#allocation1 + $0x28] sm:$0xff pattern:$0x73625140] }
  0xeb   :  { %1471 = vmatpush.msra.mxu1 %v1003_v52  ;;  %1523 = vmatpush.msrb.mxu0 %v1059_v53  ;;  %v1086_v56 = vld [vmem:[%s5883_s3 + $0x2a0] sm:$0xff]  ;;  %v4498_v52 = vld.sshfl [vmem:[#allocation1 + $0x30] sm:$0xff pattern:$0x73625140] }
  0xec   :  { %1491 = vmatpush.msra.mxu2 %v1019_v58  ;;  %1510 = vmatpush.msra.mxu3 %v1036_v59  ;;  %v4500_v53 = vld.sshfl [vmem:[#allocation1 + $0x20] sm:$0xff pattern:$0x73625140]  ;;  %v4502_v58 = vld.sshfl [vmem:[#allocation1 + $0x38] sm:$0xff pattern:$0x73625140] }
  0xed   :  { %1472 = vmatpush.msra.mxu1 %v1002_v61  ;;  %1524 = vmatpush.msrb.mxu0 %v1058_v62  ;;  %v1103_v59 = vld [vmem:[%s5883_s3 + $0x328] sm:$0xff]  ;;  %v1125_v61 = vld [vmem:[%s5883_s3 + $0x3d8] sm:$0xff]  ;;  %1410 = vst [vmem:[#allocation1 + $0x20] ss:$4 sm:$0xff] %v3266_v60  ;;  %v1124_v60 = vld [vmem:[%s5883_s3 + $0x3d0] sm:$0xff] }
  0xee   :  { %1492 = vmatpush.msra.mxu2 %v1018_v63  ;;  %1511 = vmatpush.msra.mxu3 %v1035_v2  ;;  %v1069_v62 = vld [vmem:[%s5883_s3 + $0x218] sm:$0xff]  ;;  %v1102_v2 = vld [vmem:[%s5883_s3 + $0x320] sm:$0xff] }
  0xef   :  { %1537 = vmatpush.msrb.mxu1 %v1081_v3  ;;  %1525 = vmatpush.msrb.mxu0 %v1057_v4  ;;  %v1085_v63 = vld [vmem:[%s5883_s3 + $0x298] sm:$0xff]  ;;  %v1068_v3 = vld [vmem:[%s5883_s3 + $0x210] sm:$0xff] }
  0xf0   :  { %1557 = vmatpush.msrb.mxu2 %v1097_v0  ;;  %1512 = vmatpush.msra.mxu3 %v1034_v1  ;;  %v1084_v4 = vld [vmem:[%s5883_s3 + $0x290] sm:$0xff]  ;;  %v1101_v0 = vld [vmem:[%s5883_s3 + $0x318] sm:$0xff]  ;;  %v1123_v1 = vld [vmem:[%s5883_s3 + $0x3c8] sm:$0xff] }
  0xf1   :  { %1538 = vmatpush.msrb.mxu1 %v1080_v5  ;;  %1526 = vmatpush.msrb.mxu0 %v1056_v6  ;;  %v1067_v5 = vld [vmem:[%s5883_s3 + $0x208] sm:$0xff] }
  0xf2   :  { %1558 = vmatpush.msrb.mxu2 %v1096_v39  ;;  %1577 = vmatpush.msrb.mxu3 %v1113_v41  ;;  %v1083_v6 = vld [vmem:[%s5883_s3 + $0x288] sm:$0xff]  ;;  %v1100_v39 = vld [vmem:[%s5883_s3 + $0x310] sm:$0xff]  ;;  %v1122_v41 = vld [vmem:[%s5883_s3 + $0x3c0] sm:$0xff] }
  0xf3   :  { %1539 = vmatpush.msrb.mxu1 %v1079_v40  ;;  %1527 = vmatpush.msrb.mxu0 %v1055_v7  ;;  %v1066_v40 = vld [vmem:[%s5883_s3 + $0x200] sm:$0xff] }
  0xf4   :  { %1559 = vmatpush.msrb.mxu2 %v1095_v8  ;;  %1578 = vmatpush.msrb.mxu3 %v1112_v9  ;;  %v1082_v7 = vld [vmem:[%s5883_s3 + $0x280] sm:$0xff]  ;;  %v1099_v8 = vld [vmem:[%s5883_s3 + $0x308] sm:$0xff]  ;;  %v1121_v9 = vld [vmem:[%s5883_s3 + $0x3b8] sm:$0xff] }
  0xf5   :  { %1540 = vmatpush.msrb.mxu1 %v1078_v10  ;;  %1528 = vmatpush.msrb.mxu0 %v1054_v11  ;;  %v1145_v10 = vld [vmem:[%s5883_s3 + $0x478] sm:$0xff] }
  0xf6   :  { %1560 = vmatpush.msrb.mxu2 %v1094_v12  ;;  %1579 = vmatpush.msrb.mxu3 %v1111_v13  ;;  %v1161_v11 = vld [vmem:[%s5883_s3 + $0x4f8] sm:$0xff]  ;;  %v1098_v12 = vld [vmem:[%s5883_s3 + $0x300] sm:$0xff]  ;;  %v1120_v13 = vld [vmem:[%s5883_s3 + $0x3b0] sm:$0xff] }
  0xf7   :  { %1541 = vmatpush.msrb.mxu1 %v1077_v15  ;;  %1529 = vmatpush.msrb.mxu0 %v1053_v14  ;;  %v1144_v14 = vld [vmem:[%s5883_s3 + $0x470] sm:$0xff] }
  0xf8   :  { %1561 = vmatpush.msrb.mxu2 %v1093_v16  ;;  %1580 = vmatpush.msrb.mxu3 %v1110_v17  ;;  %v1160_v15 = vld [vmem:[%s5883_s3 + $0x4f0] sm:$0xff]  ;;  %v1177_v16 = vld [vmem:[%s5883_s3 + $0x578] sm:$0xff]  ;;  %v1119_v17 = vld [vmem:[%s5883_s3 + $0x3a8] sm:$0xff] }
  0xf9   :  { %1542 = vmatpush.msrb.mxu1 %v1076_v19  ;;  %1530 = vmatpush.msrb.mxu0 %v1052_v18  ;;  %v1143_v18 = vld [vmem:[%s5883_s3 + $0x468] sm:$0xff] }
  0xfa   :  { %1562 = vmatpush.msrb.mxu2 %v1092_v20  ;;  %1581 = vmatpush.msrb.mxu3 %v1109_v21  ;;  %v1159_v19 = vld [vmem:[%s5883_s3 + $0x4e8] sm:$0xff]  ;;  %v1176_v20 = vld [vmem:[%s5883_s3 + $0x570] sm:$0xff]  ;;  %v1118_v21 = vld [vmem:[%s5883_s3 + $0x3a0] sm:$0xff] }
  0xfb   :  { %1543 = vmatpush.msrb.mxu1 %v1075_v24  ;;  %1531 = vmatpush.msrb.mxu0 %v1051_v22  ;;  %v1142_v22 = vld [vmem:[%s5883_s3 + $0x460] sm:$0xff] }
  0xfc   :  { %1563 = vmatpush.msrb.mxu2 %v1091_v25  ;;  %1582 = vmatpush.msrb.mxu3 %v1108_v34  ;;  %v1158_v24 = vld [vmem:[%s5883_s3 + $0x4e0] sm:$0xff]  ;;  %v1175_v25 = vld [vmem:[%s5883_s3 + $0x568] sm:$0xff] }
  0xfd   :  { %1544 = vmatpush.msrb.mxu1 %v1074_v35  ;;  %1532 = vmatpush.msrb.mxu0 %v1050_v36  ;;  %v1174_v34 = vld [vmem:[%s5883_s3 + $0x560] sm:$0xff]  ;;  %v1116_v35 = vld [vmem:[%s5883_s3 + $0x390] sm:$0xff] }
  0xfe   :  { %1564 = vmatpush.msrb.mxu2 %v1090_v29  ;;  %1583 = vmatpush.msrb.mxu3 %v1107_v42  ;;  %v1140_v36 = vld [vmem:[%s5883_s3 + $0x450] sm:$0xff]  ;;  %v1173_v29 = vld [vmem:[%s5883_s3 + $0x558] sm:$0xff]  ;;  %v1115_v42 = vld [vmem:[%s5883_s3 + $0x388] sm:$0xff] }
  0xff   :  { %1597 = vmatpush.msra.mxu0 %v1129_v43  ;;  %1545 = vmatpush.msrb.mxu1 %v1073_v33  ;;  %v1139_v43 = vld [vmem:[%s5883_s3 + $0x448] sm:$0xff] }
 0x100   :  { %1565 = vmatpush.msrb.mxu2 %v1089_v23  ;;  %1584 = vmatpush.msrb.mxu3 %v1106_v45  ;;  %v1155_v33 = vld [vmem:[%s5883_s3 + $0x4c8] sm:$0xff]  ;;  %v1172_v23 = vld [vmem:[%s5883_s3 + $0x550] sm:$0xff]  ;;  %v1114_v45 = vld [vmem:[%s5883_s3 + $0x380] sm:$0xff] }
 0x101   :  { %1598 = vmatpush.msra.mxu0 %v1128_v37  ;;  %1546 = vmatpush.msrb.mxu1 %v1072_v38  ;;  %v1138_v37 = vld [vmem:[%s5883_s3 + $0x440] sm:$0xff] }
 0x102   :  { %1566 = vmatpush.msrb.mxu2 %v1088_v46  ;;  %1585 = vmatpush.msrb.mxu3 %v1105_v47  ;;  %v1154_v38 = vld [vmem:[%s5883_s3 + $0x4c0] sm:$0xff]  ;;  %v1171_v46 = vld [vmem:[%s5883_s3 + $0x548] sm:$0xff]  ;;  %v1193_v47 = vld [vmem:[%s5883_s3 + $0x5f8] sm:$0xff] }
 0x103   :  { %1599 = vmatpush.msra.mxu0 %v1127_v48  ;;  %1547 = vmatpush.msrb.mxu1 %v1071_v49  ;;  %v1137_v48 = vld [vmem:[%s5883_s3 + $0x438] sm:$0xff] }
 0x104   :  { %1567 = vmatpush.msrb.mxu2 %v1087_v50  ;;  %1586 = vmatpush.msrb.mxu3 %v1104_v51  ;;  %v1153_v49 = vld [vmem:[%s5883_s3 + $0x4b8] sm:$0xff]  ;;  %v1170_v50 = vld [vmem:[%s5883_s3 + $0x540] sm:$0xff]  ;;  %v1192_v51 = vld [vmem:[%s5883_s3 + $0x5f0] sm:$0xff] }
 0x105   :  { %1600 = vmatpush.msra.mxu0 %v1126_v54  ;;  %1548 = vmatpush.msrb.mxu1 %v1070_v55  ;;  %v1136_v54 = vld [vmem:[%s5883_s3 + $0x430] sm:$0xff] }
 0x106   :  { %1568 = vmatpush.msrb.mxu2 %v1086_v56  ;;  %1587 = vmatpush.msrb.mxu3 %v1103_v59  ;;  %v1152_v55 = vld [vmem:[%s5883_s3 + $0x4b0] sm:$0xff]  ;;  %v1169_v56 = vld [vmem:[%s5883_s3 + $0x538] sm:$0xff] }
 0x107   :  { %1601 = vmatpush.msra.mxu0 %v1125_v61  ;;  %1549 = vmatpush.msrb.mxu1 %v1069_v62  ;;  %v4689_v59 = vld.sshfl [vmem:[#allocation1 + $0x10] sm:$0xff pattern:$0x73625140]  ;;  %v4691_v61 = vld.sshfl [vmem:[#allocation1 + $0x18] sm:$0xff pattern:$0x73625140] }
 0x108   :  { %1569 = vmatpush.msrb.mxu2 %v1085_v63  ;;  %1588 = vmatpush.msrb.mxu3 %v1102_v2  ;;  %v1135_v62 = vld [vmem:[%s5883_s3 + $0x428] sm:$0xff]  ;;  %v1190_v2 = vld [vmem:[%s5883_s3 + $0x5e0] sm:$0xff] }
 0x109   :  { %1602 = vmatpush.msra.mxu0 %v1124_v60  ;;  %1550 = vmatpush.msrb.mxu1 %v1068_v3  ;;  %v1151_v63 = vld [vmem:[%s5883_s3 + $0x4a8] sm:$0xff]  ;;  %v1134_v60 = vld [vmem:[%s5883_s3 + $0x420] sm:$0xff] }
 0x10a   :  { %1570 = vmatpush.msrb.mxu2 %v1084_v4  ;;  %1589 = vmatpush.msrb.mxu3 %v1101_v0  ;;  %v1167_v3 = vld [vmem:[%s5883_s3 + $0x528] sm:$0xff]  ;;  %v1189_v4 = vld [vmem:[%s5883_s3 + $0x5d8] sm:$0xff] }
 0x10b   :  { %1603 = vmatpush.msra.mxu0 %v1123_v1  ;;  %1551 = vmatpush.msrb.mxu1 %v1067_v5  ;;  %v1133_v0 = vld [vmem:[%s5883_s3 + $0x418] sm:$0xff]  ;;  %v1166_v5 = vld [vmem:[%s5883_s3 + $0x520] sm:$0xff] }
 0x10c   :  { %1571 = vmatpush.msrb.mxu2 %v1083_v6  ;;  %1590 = vmatpush.msrb.mxu3 %v1100_v39  ;;  %v1149_v1 = vld [vmem:[%s5883_s3 + $0x498] sm:$0xff]  ;;  %v1188_v6 = vld [vmem:[%s5883_s3 + $0x5d0] sm:$0xff] }
 0x10d   :  { %1493 = vmatmul.f32.vlgmr.msra.gmra.mxu2 %v4427_v26  ;;  %1604 = vmatpush.msra.mxu0 %v1122_v41  ;;  %v1117_v26 = vld [vmem:[%s5883_s3 + $0x398] sm:$0xff]  ;;  %v1132_v39 = vld [vmem:[%s5883_s3 + $0x410] sm:$0xff] }
 0x10e   :  { %1552 = vmatpush.msrb.mxu1 %v1066_v40  ;;  %1572 = vmatpush.msrb.mxu2 %v1082_v7  ;;  %v1148_v41 = vld [vmem:[%s5883_s3 + $0x490] sm:$0xff]  ;;  %v1165_v40 = vld [vmem:[%s5883_s3 + $0x518] sm:$0xff]  ;;  %v1187_v7 = vld [vmem:[%s5883_s3 + $0x5c8] sm:$0xff] }
 0x10f   :  { %1591 = vmatpush.msrb.mxu3 %v1099_v8  ;;  %1473 = vmatmul.f32.vlgmr.msra.gmra.mxu1 %v4429_v30  ;;  %v1141_v30 = vld [vmem:[%s5883_s3 + $0x458] sm:$0xff]  ;;  %v1131_v8 = vld [vmem:[%s5883_s3 + $0x408] sm:$0xff] }
 0x110   :  { %1513 = vmatmul.f32.vlgmr.msra.gmra.mxu3 %v4431_v27  ;;  %1605 = vmatpush.msra.mxu0 %v1121_v9  ;;  %v1157_v27 = vld [vmem:[%s5883_s3 + $0x4d8] sm:$0xff]  ;;  %v1147_v9 = vld [vmem:[%s5883_s3 + $0x488] sm:$0xff] }
 0x111   :  { %1617 = vmatpush.msra.mxu1 %v1145_v10  ;;  %1637 = vmatpush.msra.mxu2 %v1161_v11  ;;  %v1164_v10 = vld [vmem:[%s5883_s3 + $0x510] sm:$0xff]  ;;  %v1186_v11 = vld [vmem:[%s5883_s3 + $0x5c0] sm:$0xff] }
 0x112   :  { %1592 = vmatpush.msrb.mxu3 %v1098_v12  ;;  %1606 = vmatpush.msra.mxu0 %v1120_v13  ;;  %v1130_v12 = vld [vmem:[%s5883_s3 + $0x400] sm:$0xff] }
 0x113   :  { %1618 = vmatpush.msra.mxu1 %v1144_v14  ;;  %1638 = vmatpush.msra.mxu2 %v1160_v15  ;;  %v1146_v13 = vld [vmem:[%s5883_s3 + $0x480] sm:$0xff]  ;;  %v1163_v14 = vld [vmem:[%s5883_s3 + $0x508] sm:$0xff]  ;;  %v1185_v15 = vld [vmem:[%s5883_s3 + $0x5b8] sm:$0xff] }
 0x114   :  { %1657 = vmatpush.msra.mxu3 %v1177_v16  ;;  %1607 = vmatpush.msra.mxu0 %v1119_v17  ;;  %v1209_v16 = vld [vmem:[%s5883_s3 + $0x678] sm:$0xff] }
 0x115   :  { %1619 = vmatpush.msra.mxu1 %v1143_v18  ;;  %1639 = vmatpush.msra.mxu2 %v1159_v19  ;;  %v1225_v17 = vld [vmem:[%s5883_s3 + $0x6f8] sm:$0xff]  ;;  %v1162_v18 = vld [vmem:[%s5883_s3 + $0x500] sm:$0xff]  ;;  %v1184_v19 = vld [vmem:[%s5883_s3 + $0x5b0] sm:$0xff] }
 0x116   :  { %1658 = vmatpush.msra.mxu3 %v1176_v20  ;;  %1573 = vmatmul.f32.vlgmr.msrb.gmra.mxu2 %v4496_v57  ;;  %v1191_v57 = vld [vmem:[%s5883_s3 + $0x5e8] sm:$0xff]  ;;  %v1208_v20 = vld [vmem:[%s5883_s3 + $0x670] sm:$0xff] }
 0x117   :  { %1608 = vmatpush.msra.mxu0 %v1118_v21  ;;  %1620 = vmatpush.msra.mxu1 %v1142_v22  ;;  %v1224_v21 = vld [vmem:[%s5883_s3 + $0x6f0] sm:$0xff]  ;;  %v1241_v22 = vld [vmem:[%s5883_s3 + $0x778] sm:$0xff] }
 0x118   :  { %1640 = vmatpush.msra.mxu2 %v1158_v24  ;;  %1659 = vmatpush.msra.mxu3 %v1175_v25  ;;  %v1183_v24 = vld [vmem:[%s5883_s3 + $0x5a8] sm:$0xff] }
 0x119   :  { %1533 = vmatmul.f32.vlgmr.msrb.gmra.mxu0 %v4433_v28  ;;  %1593 = vmatmul.f32.vlgmr.msrb.gmra.mxu3 %v4498_v52  ;;  %v1156_v28 = vld [vmem:[%s5883_s3 + $0x4d0] sm:$0xff]  ;;  %v1411_v52 = vld.sshfl [vmem:[#allocation1] sm:$0xff pattern:$0x73625140]  ;;  %v1207_v25 = vld [vmem:[%s5883_s3 + $0x668] sm:$0xff] }
 0x11a   :  { %1609 = vmatpush.msra.mxu0 %v1117_v26  ;;  %1621 = vmatpush.msra.mxu1 %v1141_v30  ;;  %v1223_v26 = vld [vmem:[%s5883_s3 + $0x6e8] sm:$0xff]  ;;  %v1240_v30 = vld [vmem:[%s5883_s3 + $0x770] sm:$0xff] }
 0x11b   :  { %1641 = vmatpush.msra.mxu2 %v1157_v27  ;;  %1660 = vmatpush.msra.mxu3 %v1174_v34  ;;  %v1182_v27 = vld [vmem:[%s5883_s3 + $0x5a0] sm:$0xff] }
 0x11c   :  { %1553 = vmatmul.f32.vlgmr.msrb.gmra.mxu1 %v4500_v53  ;;  %1610 = vmatpush.msra.mxu0 %v1116_v35  ;;  %v4686_v53 = vld.sshfl [vmem:[#allocation1 + $0x8] sm:$0xff pattern:$0x73625140]  ;;  %v1206_v34 = vld [vmem:[%s5883_s3 + $0x660] sm:$0xff] }
 0x11d   :  { %1622 = vmatpush.msra.mxu1 %v1140_v36  ;;  %1642 = vmatpush.msra.mxu2 %v1156_v28  ;;  %1419 = vst [vmem:[#allocation1] ss:$4 sm:$0xff] %v3367_v31  ;;  %v1150_v31 = vld [vmem:[%s5883_s3 + $0x4a0] sm:$0xff]  ;;  %v1239_v36 = vld [vmem:[%s5883_s3 + $0x768] sm:$0xff]  ;;  %v1181_v28 = vld [vmem:[%s5883_s3 + $0x598] sm:$0xff] }
 0x11e   :  { %1661 = vmatpush.msra.mxu3 %v1173_v29  ;;  %1611 = vmatpush.msra.mxu0 %v1115_v42  ;;  %v1222_v35 = vld [vmem:[%s5883_s3 + $0x6e0] sm:$0xff]  ;;  %v1205_v29 = vld [vmem:[%s5883_s3 + $0x658] sm:$0xff] }
 0x11f   :  { %1623 = vmatpush.msra.mxu1 %v1139_v43  ;;  %1643 = vmatpush.msra.mxu2 %v1155_v33  ;;  %v1221_v42 = vld [vmem:[%s5883_s3 + $0x6d8] sm:$0xff]  ;;  %v1238_v43 = vld [vmem:[%s5883_s3 + $0x760] sm:$0xff]  ;;  %v1180_v33 = vld [vmem:[%s5883_s3 + $0x590] sm:$0xff] }
 0x120   :  { %1662 = vmatpush.msra.mxu3 %v1172_v23  ;;  %1612 = vmatpush.msra.mxu0 %v1114_v45  ;;  %v1204_v23 = vld [vmem:[%s5883_s3 + $0x650] sm:$0xff] }
 0x121   :  { %1624 = vmatpush.msra.mxu1 %v1138_v37  ;;  %1644 = vmatpush.msra.mxu2 %v1154_v38  ;;  %v1220_v45 = vld [vmem:[%s5883_s3 + $0x6d0] sm:$0xff]  ;;  %v1237_v37 = vld [vmem:[%s5883_s3 + $0x758] sm:$0xff]  ;;  %v1179_v38 = vld [vmem:[%s5883_s3 + $0x588] sm:$0xff] }
 0x122   :  { %1663 = vmatpush.msra.mxu3 %v1171_v46  ;;  %1677 = vmatpush.msrb.mxu0 %v1193_v47  ;;  %v1203_v46 = vld [vmem:[%s5883_s3 + $0x648] sm:$0xff] }
 0x123   :  { %1625 = vmatpush.msra.mxu1 %v1137_v48  ;;  %1613 = vmatmul.f32.vlgmr.msra.gmra.mxu0 %v4502_v58  ;;  %v1168_v58 = vld [vmem:[%s5883_s3 + $0x530] sm:$0xff]  ;;  %v1219_v47 = vld [vmem:[%s5883_s3 + $0x6c8] sm:$0xff] }
 0x124   :  { %1645 = vmatpush.msra.mxu2 %v1153_v49  ;;  %1664 = vmatpush.msra.mxu3 %v1170_v50  ;;  %v1236_v48 = vld [vmem:[%s5883_s3 + $0x750] sm:$0xff]  ;;  %v1178_v49 = vld [vmem:[%s5883_s3 + $0x580] sm:$0xff] }
 0x125   :  { %1678 = vmatpush.msrb.mxu0 %v1192_v51  ;;  %1626 = vmatpush.msra.mxu1 %v1136_v54  ;;  %v1202_v50 = vld [vmem:[%s5883_s3 + $0x640] sm:$0xff]  ;;  %v1235_v54 = vld [vmem:[%s5883_s3 + $0x748] sm:$0xff] }
 0x126   :  { %1646 = vmatpush.msra.mxu2 %v1152_v55  ;;  %1665 = vmatpush.msra.mxu3 %v1169_v56  ;;  %v1218_v51 = vld [vmem:[%s5883_s3 + $0x6c0] sm:$0xff]  ;;  %v1257_v55 = vld [vmem:[%s5883_s3 + $0x7f8] sm:$0xff] }
 0x127   :  { %1679 = vmatpush.msrb.mxu0 %v1191_v57  ;;  %1627 = vmatpush.msra.mxu1 %v1135_v62  ;;  %v1201_v56 = vld [vmem:[%s5883_s3 + $0x638] sm:$0xff]  ;;  %v1216_v62 = vld [vmem:[%s5883_s3 + $0x6b0] sm:$0xff] }
 0x128   :  { %1647 = vmatpush.msra.mxu2 %v1151_v63  ;;  %1666 = vmatpush.msra.mxu3 %v1168_v58  ;;  %v1217_v57 = vld [vmem:[%s5883_s3 + $0x6b8] sm:$0xff]  ;;  %v1199_v58 = vld [vmem:[%s5883_s3 + $0x628] sm:$0xff] }
 0x129   :  { %1680 = vmatpush.msrb.mxu0 %v1190_v2  ;;  %1628 = vmatpush.msra.mxu1 %v1134_v60  ;;  %v1233_v63 = vld [vmem:[%s5883_s3 + $0x738] sm:$0xff]  ;;  %v1415_v2 = vld.sshfl [vmem:[#allocation1 + $0x20] sm:$0xff pattern:$0x73625140] }
 0x12a   :  { %1648 = vmatpush.msra.mxu2 %v1150_v31  ;;  %1667 = vmatpush.msra.mxu3 %v1167_v3  ;;  %v4889_v60 = vld.sshfl [vmem:[#allocation1 + $0x28] sm:$0xff pattern:$0x73625140]  ;;  %v4891_v31 = vld.sshfl [vmem:[#allocation1 + $0x30] sm:$0xff pattern:$0x73625140] }
 0x12b   :  { %1681 = vmatpush.msrb.mxu0 %v1189_v4  ;;  %1629 = vmatpush.msra.mxu1 %v1133_v0  ;;  %v4893_v3 = vld.sshfl [vmem:[#allocation1 + $0x38] sm:$0xff pattern:$0x73625140]  ;;  %v1255_v4 = vld [vmem:[%s5883_s3 + $0x7e8] sm:$0xff]  ;;  %v1232_v0 = vld [vmem:[%s5883_s3 + $0x730] sm:$0xff] }
 0x12c   :  { %1649 = vmatpush.msra.mxu2 %v1149_v1  ;;  %1668 = vmatpush.msra.mxu3 %v1166_v5  ;;  %1420 = vst [vmem:[#allocation1 + $0x20] ss:$4 sm:$0xff] %v3575_v32  ;;  %v1198_v1 = vld [vmem:[%s5883_s3 + $0x620] sm:$0xff] }
 0x12d   :  { %1682 = vmatpush.msrb.mxu0 %v1188_v6  ;;  %1630 = vmatpush.msra.mxu1 %v1132_v39  ;;  %v1254_v5 = vld [vmem:[%s5883_s3 + $0x7e0] sm:$0xff]  ;;  %v1231_v6 = vld [vmem:[%s5883_s3 + $0x728] sm:$0xff]  ;;  %v1197_v39 = vld [vmem:[%s5883_s3 + $0x618] sm:$0xff] }
 0x12e   :  { %1650 = vmatpush.msra.mxu2 %v1148_v41  ;;  %1669 = vmatpush.msra.mxu3 %v1165_v40  ;;  %v1214_v32 = vld [vmem:[%s5883_s3 + $0x6a0] sm:$0xff]  ;;  %v1253_v41 = vld [vmem:[%s5883_s3 + $0x7d8] sm:$0xff] }
 0x12f   :  { %1683 = vmatpush.msrb.mxu0 %v1187_v7  ;;  %1631 = vmatpush.msra.mxu1 %v1131_v8  ;;  %v1213_v40 = vld [vmem:[%s5883_s3 + $0x698] sm:$0xff]  ;;  %v1230_v7 = vld [vmem:[%s5883_s3 + $0x720] sm:$0xff]  ;;  %v1196_v8 = vld [vmem:[%s5883_s3 + $0x610] sm:$0xff] }
 0x130   :  { %1651 = vmatpush.msra.mxu2 %v1147_v9  ;;  %1670 = vmatpush.msra.mxu3 %v1164_v10  ;;  %v1252_v9 = vld [vmem:[%s5883_s3 + $0x7d0] sm:$0xff] }
 0x131   :  { %1684 = vmatpush.msrb.mxu0 %v1186_v11  ;;  %1632 = vmatpush.msra.mxu1 %v1130_v12  ;;  %v1212_v10 = vld [vmem:[%s5883_s3 + $0x690] sm:$0xff]  ;;  %v1229_v11 = vld [vmem:[%s5883_s3 + $0x718] sm:$0xff]  ;;  %v1195_v12 = vld [vmem:[%s5883_s3 + $0x608] sm:$0xff] }
 0x132   :  { %1652 = vmatpush.msra.mxu2 %v1146_v13  ;;  %1671 = vmatpush.msra.mxu3 %v1163_v14  ;;  %v1251_v13 = vld [vmem:[%s5883_s3 + $0x7c8] sm:$0xff] }
 0x133   :  { %1633 = vmatmul.f32.vlgmr.msra.gmra.mxu1 %v1411_v52  ;;  %1653 = vmatmul.f32.vlgmr.msra.gmra.mxu2 %v4686_v53  ;;  %v1234_v52 = vld [vmem:[%s5883_s3 + $0x740] sm:$0xff]  ;;  %v1256_v53 = vld [vmem:[%s5883_s3 + $0x7f0] sm:$0xff]  ;;  %v1211_v14 = vld [vmem:[%s5883_s3 + $0x688] sm:$0xff] }
 0x134   :  { %1685 = vmatpush.msrb.mxu0 %v1185_v15  ;;  %1697 = vmatpush.msrb.mxu1 %v1209_v16  ;;  %v1228_v15 = vld [vmem:[%s5883_s3 + $0x710] sm:$0xff]  ;;  %v1194_v16 = vld [vmem:[%s5883_s3 + $0x600] sm:$0xff] }
 0x135   :  { %1717 = vmatpush.msrb.mxu2 %v1225_v17  ;;  %1672 = vmatpush.msra.mxu3 %v1162_v18  ;;  %v1250_v17 = vld [vmem:[%s5883_s3 + $0x7c0] sm:$0xff] }
 0x136   :  { %1686 = vmatpush.msrb.mxu0 %v1184_v19  ;;  %1673 = vmatmul.f32.vlgmr.msra.gmra.mxu3 %v4689_v59  ;;  %v1200_v59 = vld [vmem:[%s5883_s3 + $0x630] sm:$0xff]  ;;  %v1210_v18 = vld [vmem:[%s5883_s3 + $0x680] sm:$0xff]  ;;  %v1227_v19 = vld [vmem:[%s5883_s3 + $0x708] sm:$0xff] }
 0x137   :  { %1698 = vmatpush.msrb.mxu1 %v1208_v20  ;;  %1718 = vmatpush.msrb.mxu2 %v1224_v21  ;;  %v1249_v20 = vld [vmem:[%s5883_s3 + $0x7b8] sm:$0xff] }
 0x138   :  { %1737 = vmatpush.msrb.mxu3 %v1241_v22  ;;  %1687 = vmatpush.msrb.mxu0 %v1183_v24  ;;  %v1273_v21 = vld [vmem:[%s5883_s3 + $0x878] sm:$0xff]  ;;  %v1226_v24 = vld [vmem:[%s5883_s3 + $0x700] sm:$0xff] }
 0x139   :  { %1699 = vmatpush.msrb.mxu1 %v1207_v25  ;;  %1719 = vmatpush.msrb.mxu2 %v1223_v26  ;;  %v1289_v22 = vld [vmem:[%s5883_s3 + $0x8f8] sm:$0xff]  ;;  %v1248_v25 = vld [vmem:[%s5883_s3 + $0x7b0] sm:$0xff] }
 0x13a   :  { %1738 = vmatpush.msrb.mxu3 %v1240_v30  ;;  %1688 = vmatpush.msrb.mxu0 %v1182_v27  ;;  %v1272_v26 = vld [vmem:[%s5883_s3 + $0x870] sm:$0xff]  ;;  %v1305_v27 = vld [vmem:[%s5883_s3 + $0x978] sm:$0xff] }
 0x13b   :  { %1700 = vmatpush.msrb.mxu1 %v1206_v34  ;;  %1720 = vmatpush.msrb.mxu2 %v1222_v35  ;;  %v1288_v30 = vld [vmem:[%s5883_s3 + $0x8f0] sm:$0xff]  ;;  %v1247_v34 = vld [vmem:[%s5883_s3 + $0x7a8] sm:$0xff] }
 0x13c   :  { %1739 = vmatpush.msrb.mxu3 %v1239_v36  ;;  %1689 = vmatpush.msrb.mxu0 %v1181_v28  ;;  %v1271_v35 = vld [vmem:[%s5883_s3 + $0x868] sm:$0xff]  ;;  %v1304_v28 = vld [vmem:[%s5883_s3 + $0x970] sm:$0xff] }
 0x13d   :  { %1701 = vmatpush.msrb.mxu1 %v1205_v29  ;;  %1721 = vmatpush.msrb.mxu2 %v1221_v42  ;;  %v1287_v36 = vld [vmem:[%s5883_s3 + $0x8e8] sm:$0xff]  ;;  %v1246_v29 = vld [vmem:[%s5883_s3 + $0x7a0] sm:$0xff] }
 0x13e   :  { %1740 = vmatpush.msrb.mxu3 %v1238_v43  ;;  %1690 = vmatpush.msrb.mxu0 %v1180_v33  ;;  %v1270_v42 = vld [vmem:[%s5883_s3 + $0x860] sm:$0xff]  ;;  %v1303_v33 = vld [vmem:[%s5883_s3 + $0x968] sm:$0xff] }
 0x13f   :  { %1702 = vmatpush.msrb.mxu1 %v1204_v23  ;;  %1722 = vmatpush.msrb.mxu2 %v1220_v45  ;;  %v1286_v43 = vld [vmem:[%s5883_s3 + $0x8e0] sm:$0xff]  ;;  %v1245_v23 = vld [vmem:[%s5883_s3 + $0x798] sm:$0xff] }
 0x140   :  { %1741 = vmatpush.msrb.mxu3 %v1237_v37  ;;  %1691 = vmatpush.msrb.mxu0 %v1179_v38  ;;  %v1269_v45 = vld [vmem:[%s5883_s3 + $0x858] sm:$0xff]  ;;  %v1302_v38 = vld [vmem:[%s5883_s3 + $0x960] sm:$0xff] }
 0x141   :  { %1703 = vmatpush.msrb.mxu1 %v1203_v46  ;;  %1723 = vmatpush.msrb.mxu2 %v1219_v47  ;;  %v1285_v37 = vld [vmem:[%s5883_s3 + $0x8d8] sm:$0xff]  ;;  %v1244_v46 = vld [vmem:[%s5883_s3 + $0x790] sm:$0xff] }
 0x142   :  { %1742 = vmatpush.msrb.mxu3 %v1236_v48  ;;  %1692 = vmatpush.msrb.mxu0 %v1178_v49  ;;  %v1268_v47 = vld [vmem:[%s5883_s3 + $0x850] sm:$0xff]  ;;  %v1301_v49 = vld [vmem:[%s5883_s3 + $0x958] sm:$0xff] }
 0x143   :  { %1704 = vmatpush.msrb.mxu1 %v1202_v50  ;;  %1724 = vmatpush.msrb.mxu2 %v1218_v51  ;;  %v1284_v48 = vld [vmem:[%s5883_s3 + $0x8d0] sm:$0xff]  ;;  %v1243_v50 = vld [vmem:[%s5883_s3 + $0x788] sm:$0xff] }
 0x144   :  { %1743 = vmatpush.msrb.mxu3 %v1235_v54  ;;  %1693 = vmatmul.f32.vlgmr.msrb.gmra.mxu0 %v4691_v61  ;;  %v1215_v61 = vld [vmem:[%s5883_s3 + $0x6a8] sm:$0xff] }
 0x145   :  { %1705 = vmatpush.msrb.mxu1 %v1201_v56  ;;  %1757 = vmatpush.msra.mxu0 %v1257_v55  ;;  %v1267_v51 = vld [vmem:[%s5883_s3 + $0x848] sm:$0xff]  ;;  %v1300_v55 = vld [vmem:[%s5883_s3 + $0x950] sm:$0xff]  ;;  %v1242_v56 = vld [vmem:[%s5883_s3 + $0x780] sm:$0xff] }
 0x146   :  { %1725 = vmatpush.msrb.mxu2 %v1217_v57  ;;  %1744 = vmatpush.msrb.mxu3 %v1234_v52  ;;  %v1283_v54 = vld [vmem:[%s5883_s3 + $0x8c8] sm:$0xff]  ;;  %v1266_v57 = vld [vmem:[%s5883_s3 + $0x840] sm:$0xff] }
 0x147   :  { %1706 = vmatpush.msrb.mxu1 %v1200_v59  ;;  %1758 = vmatpush.msra.mxu0 %v1256_v53  ;;  %v1282_v52 = vld [vmem:[%s5883_s3 + $0x8c0] sm:$0xff]  ;;  %v1299_v53 = vld [vmem:[%s5883_s3 + $0x948] sm:$0xff]  ;;  %v1321_v59 = vld [vmem:[%s5883_s3 + $0x9f8] sm:$0xff] }
 0x148   :  { %1726 = vmatpush.msrb.mxu2 %v1216_v62  ;;  %1745 = vmatpush.msrb.mxu3 %v1233_v63  ;;  %v1265_v62 = vld [vmem:[%s5883_s3 + $0x838] sm:$0xff] }
 0x149   :  { %1707 = vmatpush.msrb.mxu1 %v1199_v58  ;;  %1759 = vmatpush.msra.mxu0 %v1255_v4  ;;  %v1281_v63 = vld [vmem:[%s5883_s3 + $0x8b8] sm:$0xff]  ;;  %v1298_v58 = vld [vmem:[%s5883_s3 + $0x940] sm:$0xff] }
 0x14a   :  { %1727 = vmatpush.msrb.mxu2 %v1215_v61  ;;  %1746 = vmatpush.msrb.mxu3 %v1232_v0  ;;  %v1297_v4 = vld [vmem:[%s5883_s3 + $0x938] sm:$0xff]  ;;  %v1263_v61 = vld [vmem:[%s5883_s3 + $0x828] sm:$0xff]  ;;  %v1421_v0 = vld.sshfl [vmem:[#allocation1] sm:$0xff pattern:$0x73625140] }
 0x14b   :  { %1708 = vmatpush.msrb.mxu1 %v1198_v1  ;;  %1760 = vmatpush.msra.mxu0 %v1254_v5  ;;  %v5091_v1 = vld.sshfl [vmem:[#allocation1 + $0x8] sm:$0xff pattern:$0x73625140]  ;;  %v5093_v5 = vld.sshfl [vmem:[#allocation1 + $0x10] sm:$0xff pattern:$0x73625140] }
 0x14c   :  { %1728 = vmatpush.msrb.mxu2 %v1214_v32  ;;  %1747 = vmatpush.msrb.mxu3 %v1231_v6  ;;  %v5095_v32 = vld.sshfl [vmem:[#allocation1 + $0x18] sm:$0xff pattern:$0x73625140]  ;;  %v1319_v6 = vld [vmem:[%s5883_s3 + $0x9e8] sm:$0xff] }
 0x14d   :  { %1709 = vmatpush.msrb.mxu1 %v1197_v39  ;;  %1761 = vmatpush.msra.mxu0 %v1253_v41  ;;  %1429 = vst [vmem:[#allocation1] ss:$4 sm:$0xff] %v3750_v44  ;;  %v1296_v39 = vld [vmem:[%s5883_s3 + $0x930] sm:$0xff]  ;;  %v1262_v41 = vld [vmem:[%s5883_s3 + $0x820] sm:$0xff] }
 0x14e   :  { %1729 = vmatpush.msrb.mxu2 %v1213_v40  ;;  %1748 = vmatpush.msrb.mxu3 %v1230_v7  ;;  %v1318_v40 = vld [vmem:[%s5883_s3 + $0x9e0] sm:$0xff]  ;;  %v1295_v7 = vld [vmem:[%s5883_s3 + $0x928] sm:$0xff] }
 0x14f   :  { %1710 = vmatpush.msrb.mxu1 %v1196_v8  ;;  %1762 = vmatpush.msra.mxu0 %v1252_v9  ;;  %v1278_v44 = vld [vmem:[%s5883_s3 + $0x8a0] sm:$0xff]  ;;  %v1261_v8 = vld [vmem:[%s5883_s3 + $0x818] sm:$0xff] }
 0x150   :  { %1730 = vmatpush.msrb.mxu2 %v1212_v10  ;;  %1749 = vmatpush.msrb.mxu3 %v1229_v11  ;;  %v1317_v9 = vld [vmem:[%s5883_s3 + $0x9d8] sm:$0xff]  ;;  %v1294_v11 = vld [vmem:[%s5883_s3 + $0x920] sm:$0xff] }
 0x151   :  { %1711 = vmatpush.msrb.mxu1 %v1195_v12  ;;  %1763 = vmatpush.msra.mxu0 %v1251_v13  ;;  %v1277_v10 = vld [vmem:[%s5883_s3 + $0x898] sm:$0xff]  ;;  %v1260_v12 = vld [vmem:[%s5883_s3 + $0x810] sm:$0xff] }
 0x152   :  { %1731 = vmatpush.msrb.mxu2 %v1211_v14  ;;  %1750 = vmatpush.msrb.mxu3 %v1228_v15  ;;  %v1316_v13 = vld [vmem:[%s5883_s3 + $0x9d0] sm:$0xff]  ;;  %v1293_v15 = vld [vmem:[%s5883_s3 + $0x918] sm:$0xff] }
 0x153   :  { %1712 = vmatpush.msrb.mxu1 %v1194_v16  ;;  %1764 = vmatpush.msra.mxu0 %v1250_v17  ;;  %v1276_v14 = vld [vmem:[%s5883_s3 + $0x890] sm:$0xff]  ;;  %v1259_v16 = vld [vmem:[%s5883_s3 + $0x808] sm:$0xff] }
 0x154   :  { %1732 = vmatpush.msrb.mxu2 %v1210_v18  ;;  %1751 = vmatpush.msrb.mxu3 %v1227_v19  ;;  %v1315_v17 = vld [vmem:[%s5883_s3 + $0x9c8] sm:$0xff]  ;;  %v1292_v19 = vld [vmem:[%s5883_s3 + $0x910] sm:$0xff] }
 0x155   :  { %1713 = vmatmul.f32.vlgmr.msrb.gmra.mxu1 %v1415_v2  ;;  %1733 = vmatmul.f32.vlgmr.msrb.gmra.mxu2 %v4889_v60  ;;  %v1320_v2 = vld [vmem:[%s5883_s3 + $0x9f0] sm:$0xff]  ;;  %v1275_v18 = vld [vmem:[%s5883_s3 + $0x888] sm:$0xff] }
 0x156   :  { %1765 = vmatpush.msra.mxu0 %v1249_v20  ;;  %1777 = vmatpush.msra.mxu1 %v1273_v21  ;;  %v1264_v60 = vld [vmem:[%s5883_s3 + $0x830] sm:$0xff]  ;;  %v1258_v20 = vld [vmem:[%s5883_s3 + $0x800] sm:$0xff] }
 0x157   :  { %1797 = vmatpush.msra.mxu2 %v1289_v22  ;;  %1752 = vmatpush.msrb.mxu3 %v1226_v24  ;;  %v1314_v21 = vld [vmem:[%s5883_s3 + $0x9c0] sm:$0xff]  ;;  %v1291_v24 = vld [vmem:[%s5883_s3 + $0x908] sm:$0xff] }
 0x158   :  { %1766 = vmatpush.msra.mxu0 %v1248_v25  ;;  %1753 = vmatmul.f32.vlgmr.msrb.gmra.mxu3 %v4891_v31  ;;  %v1280_v31 = vld [vmem:[%s5883_s3 + $0x8b0] sm:$0xff]  ;;  %v1274_v22 = vld [vmem:[%s5883_s3 + $0x880] sm:$0xff]  ;;  %v1313_v25 = vld [vmem:[%s5883_s3 + $0x9b8] sm:$0xff] }
 0x159   :  { %1778 = vmatpush.msra.mxu1 %v1272_v26  ;;  %1798 = vmatpush.msra.mxu2 %v1288_v30  ;;  %v1337_v26 = vld [vmem:[%s5883_s3 + $0xa78] sm:$0xff] }
 0x15a   :  { %1817 = vmatpush.msra.mxu3 %v1305_v27  ;;  %1767 = vmatpush.msra.mxu0 %v1247_v34  ;;  %v1353_v30 = vld [vmem:[%s5883_s3 + $0xaf8] sm:$0xff]  ;;  %v1290_v27 = vld [vmem:[%s5883_s3 + $0x900] sm:$0xff]  ;;  %v1312_v34 = vld [vmem:[%s5883_s3 + $0x9b0] sm:$0xff] }
 0x15b   :  { %1779 = vmatpush.msra.mxu1 %v1271_v35  ;;  %1799 = vmatpush.msra.mxu2 %v1287_v36  ;;  %v1336_v35 = vld [vmem:[%s5883_s3 + $0xa70] sm:$0xff] }
 0x15c   :  { %1818 = vmatpush.msra.mxu3 %v1304_v28  ;;  %1768 = vmatpush.msra.mxu0 %v1246_v29  ;;  %v1352_v36 = vld [vmem:[%s5883_s3 + $0xaf0] sm:$0xff]  ;;  %v1369_v28 = vld [vmem:[%s5883_s3 + $0xb78] sm:$0xff]  ;;  %v1311_v29 = vld [vmem:[%s5883_s3 + $0x9a8] sm:$0xff] }
 0x15d   :  { %1780 = vmatpush.msra.mxu1 %v1270_v42  ;;  %1800 = vmatpush.msra.mxu2 %v1286_v43  ;;  %v1335_v42 = vld [vmem:[%s5883_s3 + $0xa68] sm:$0xff] }
 0x15e   :  { %1819 = vmatpush.msra.mxu3 %v1303_v33  ;;  %1769 = vmatpush.msra.mxu0 %v1245_v23  ;;  %v1351_v43 = vld [vmem:[%s5883_s3 + $0xae8] sm:$0xff]  ;;  %v1368_v33 = vld [vmem:[%s5883_s3 + $0xb70] sm:$0xff]  ;;  %v1310_v23 = vld [vmem:[%s5883_s3 + $0x9a0] sm:$0xff] }
 0x15f   :  { %1781 = vmatpush.msra.mxu1 %v1269_v45  ;;  %1801 = vmatpush.msra.mxu2 %v1285_v37  ;;  %v1334_v45 = vld [vmem:[%s5883_s3 + $0xa60] sm:$0xff] }
 0x160   :  { %1820 = vmatpush.msra.mxu3 %v1302_v38  ;;  %1770 = vmatpush.msra.mxu0 %v1244_v46  ;;  %v1350_v37 = vld [vmem:[%s5883_s3 + $0xae0] sm:$0xff]  ;;  %v1367_v38 = vld [vmem:[%s5883_s3 + $0xb68] sm:$0xff]  ;;  %v1309_v46 = vld [vmem:[%s5883_s3 + $0x998] sm:$0xff] }
 0x161   :  { %1782 = vmatpush.msra.mxu1 %v1268_v47  ;;  %1802 = vmatpush.msra.mxu2 %v1284_v48  ;;  %v1333_v47 = vld [vmem:[%s5883_s3 + $0xa58] sm:$0xff] }
 0x162   :  { %1821 = vmatpush.msra.mxu3 %v1301_v49  ;;  %1771 = vmatpush.msra.mxu0 %v1243_v50  ;;  %v1349_v48 = vld [vmem:[%s5883_s3 + $0xad8] sm:$0xff]  ;;  %v1366_v49 = vld [vmem:[%s5883_s3 + $0xb60] sm:$0xff]  ;;  %v1308_v50 = vld [vmem:[%s5883_s3 + $0x990] sm:$0xff] }
 0x163   :  { %1783 = vmatpush.msra.mxu1 %v1267_v51  ;;  %1803 = vmatpush.msra.mxu2 %v1283_v54  ;;  %v1332_v51 = vld [vmem:[%s5883_s3 + $0xa50] sm:$0xff] }
 0x164   :  { %1822 = vmatpush.msra.mxu3 %v1300_v55  ;;  %1772 = vmatpush.msra.mxu0 %v1242_v56  ;;  %v1348_v54 = vld [vmem:[%s5883_s3 + $0xad0] sm:$0xff]  ;;  %v1365_v55 = vld [vmem:[%s5883_s3 + $0xb58] sm:$0xff]  ;;  %v1307_v56 = vld [vmem:[%s5883_s3 + $0x988] sm:$0xff] }
 0x165   :  { %1784 = vmatpush.msra.mxu1 %v1266_v57  ;;  %1804 = vmatpush.msra.mxu2 %v1282_v52  ;;  %v1331_v57 = vld [vmem:[%s5883_s3 + $0xa48] sm:$0xff] }
 0x166   :  { %1823 = vmatpush.msra.mxu3 %v1299_v53  ;;  %1773 = vmatmul.f32.vlgmr.msra.gmra.mxu0 %v4893_v3  ;;  %v1279_v3 = vld [vmem:[%s5883_s3 + $0x8a8] sm:$0xff]  ;;  %v1364_v53 = vld [vmem:[%s5883_s3 + $0xb50] sm:$0xff] }
 0x167   :  { %1785 = vmatpush.msra.mxu1 %v1265_v62  ;;  %1837 = vmatpush.msrb.mxu0 %v1321_v59  ;;  %v1347_v52 = vld [vmem:[%s5883_s3 + $0xac8] sm:$0xff]  ;;  %v1306_v59 = vld [vmem:[%s5883_s3 + $0x980] sm:$0xff] }
 0x168   :  { %1805 = vmatpush.msra.mxu2 %v1281_v63  ;;  %1824 = vmatpush.msra.mxu3 %v1298_v58  ;;  %v1330_v62 = vld [vmem:[%s5883_s3 + $0xa40] sm:$0xff]  ;;  %v1363_v58 = vld [vmem:[%s5883_s3 + $0xb48] sm:$0xff] }
 0x169   :  { %1786 = vmatpush.msra.mxu1 %v1264_v60  ;;  %1838 = vmatpush.msrb.mxu0 %v1320_v2  ;;  %v1346_v63 = vld [vmem:[%s5883_s3 + $0xac0] sm:$0xff]  ;;  %v1329_v2 = vld [vmem:[%s5883_s3 + $0xa38] sm:$0xff] }
 0x16a   :  { %1806 = vmatpush.msra.mxu2 %v1280_v31  ;;  %1825 = vmatpush.msra.mxu3 %v1297_v4  ;;  %v1385_v60 = vld [vmem:[%s5883_s3 + $0xbf8] sm:$0xff]  ;;  %v1362_v4 = vld [vmem:[%s5883_s3 + $0xb40] sm:$0xff] }
 0x16b   :  { %1787 = vmatpush.msra.mxu1 %v1263_v61  ;;  %1839 = vmatpush.msrb.mxu0 %v1319_v6  ;;  %v1345_v31 = vld [vmem:[%s5883_s3 + $0xab8] sm:$0xff]  ;;  %v1328_v61 = vld [vmem:[%s5883_s3 + $0xa30] sm:$0xff]  ;;  %v1327_v6 = vld [vmem:[%s5883_s3 + $0xa28] sm:$0xff] }
 0x16c   :  { %1807 = vmatpush.msra.mxu2 %v1279_v3  ;;  %1826 = vmatpush.msra.mxu3 %v1296_v39  ;;  %v1343_v3 = vld [vmem:[%s5883_s3 + $0xaa8] sm:$0xff]  ;;  %v1360_v39 = vld [vmem:[%s5883_s3 + $0xb30] sm:$0xff] }
 0x16d   :  { %1788 = vmatpush.msra.mxu1 %v1262_v41  ;;  %1840 = vmatpush.msrb.mxu0 %v1318_v40  ;;  %v1326_v41 = vld [vmem:[%s5883_s3 + $0xa20] sm:$0xff] }
 0x16e   :  { %1808 = vmatpush.msra.mxu2 %v1278_v44  ;;  %1827 = vmatpush.msra.mxu3 %v1295_v7  ;;  %v1382_v40 = vld [vmem:[%s5883_s3 + $0xbe0] sm:$0xff]  ;;  %v1359_v7 = vld [vmem:[%s5883_s3 + $0xb28] sm:$0xff] }
 0x16f   :  { %1789 = vmatpush.msra.mxu1 %v1261_v8  ;;  %1841 = vmatpush.msrb.mxu0 %v1317_v9  ;;  %v1342_v44 = vld [vmem:[%s5883_s3 + $0xaa0] sm:$0xff]  ;;  %v1325_v8 = vld [vmem:[%s5883_s3 + $0xa18] sm:$0xff] }
 0x170   :  { %1809 = vmatpush.msra.mxu2 %v1277_v10  ;;  %1828 = vmatpush.msra.mxu3 %v1294_v11  ;;  %v1381_v9 = vld [vmem:[%s5883_s3 + $0xbd8] sm:$0xff]  ;;  %v1358_v11 = vld [vmem:[%s5883_s3 + $0xb20] sm:$0xff] }
 0x171   :  { %1790 = vmatpush.msra.mxu1 %v1260_v12  ;;  %1842 = vmatpush.msrb.mxu0 %v1316_v13  ;;  %v1341_v10 = vld [vmem:[%s5883_s3 + $0xa98] sm:$0xff]  ;;  %v1324_v12 = vld [vmem:[%s5883_s3 + $0xa10] sm:$0xff] }
 0x172   :  { %1810 = vmatpush.msra.mxu2 %v1276_v14  ;;  %1829 = vmatpush.msra.mxu3 %v1293_v15  ;;  %v1380_v13 = vld [vmem:[%s5883_s3 + $0xbd0] sm:$0xff]  ;;  %v1357_v15 = vld [vmem:[%s5883_s3 + $0xb18] sm:$0xff] }
 0x173   :  { %1791 = vmatpush.msra.mxu1 %v1259_v16  ;;  %1843 = vmatpush.msrb.mxu0 %v1315_v17  ;;  %v1340_v14 = vld [vmem:[%s5883_s3 + $0xa90] sm:$0xff]  ;;  %v1323_v16 = vld [vmem:[%s5883_s3 + $0xa08] sm:$0xff] }
 0x174   :  { %1811 = vmatpush.msra.mxu2 %v1275_v18  ;;  %1830 = vmatpush.msra.mxu3 %v1292_v19  ;;  %v1379_v17 = vld [vmem:[%s5883_s3 + $0xbc8] sm:$0xff]  ;;  %v1356_v19 = vld [vmem:[%s5883_s3 + $0xb10] sm:$0xff] }
 0x175   :  { %1792 = vmatpush.msra.mxu1 %v1258_v20  ;;  %1844 = vmatpush.msrb.mxu0 %v1314_v21  ;;  %v1339_v18 = vld [vmem:[%s5883_s3 + $0xa88] sm:$0xff]  ;;  %v1322_v20 = vld [vmem:[%s5883_s3 + $0xa00] sm:$0xff] }
 0x176   :  { %1812 = vmatpush.msra.mxu2 %v1274_v22  ;;  %1831 = vmatpush.msra.mxu3 %v1291_v24  ;;  %v1378_v21 = vld [vmem:[%s5883_s3 + $0xbc0] sm:$0xff]  ;;  %v1355_v24 = vld [vmem:[%s5883_s3 + $0xb08] sm:$0xff] }
 0x177   :  { %1793 = vmatmul.f32.vlgmr.msra.gmra.mxu1 %v1421_v0  ;;  %1813 = vmatmul.f32.vlgmr.msra.gmra.mxu2 %v5091_v1  ;;  %v1384_v0 = vld [vmem:[%s5883_s3 + $0xbf0] sm:$0xff]  ;;  %v1338_v22 = vld [vmem:[%s5883_s3 + $0xa80] sm:$0xff] }
 0x178   :  { %1845 = vmatpush.msrb.mxu0 %v1313_v25  ;;  %1857 = vmatpush.msrb.mxu1 %v1337_v26  ;;  %v1344_v1 = vld [vmem:[%s5883_s3 + $0xab0] sm:$0xff]  ;;  %v1425_v25 = vld.sshfl [vmem:[#allocation1 + $0x20] sm:$0xff pattern:$0x73625140] }
 0x179   :  { %1877 = vmatpush.msrb.mxu2 %v1353_v30  ;;  %1832 = vmatpush.msra.mxu3 %v1290_v27  ;;  %v1426_v26 = vld.sshfl [vmem:[#allocation1 + $0x28] sm:$0xff pattern:$0x73625140]  ;;  %v1377_v30 = vld [vmem:[%s5883_s3 + $0xbb8] sm:$0xff]  ;;  %v1354_v27 = vld [vmem:[%s5883_s3 + $0xb00] sm:$0xff] }
 0x17a   :  { %1846 = vmatpush.msrb.mxu0 %v1312_v34  ;;  %1833 = vmatmul.f32.vlgmr.msra.gmra.mxu3 %v5093_v5  ;;  %v1361_v5 = vld [vmem:[%s5883_s3 + $0xb38] sm:$0xff] }
 0x17b   :  { %1858 = vmatpush.msrb.mxu1 %v1336_v35  ;;  %1878 = vmatpush.msrb.mxu2 %v1352_v36  ;;  %v1393_v34 = vld [vmem:[%s5883_s3 + $0xc38] sm:$0xff]  ;;  %v1427_v35 = vld.sshfl [vmem:[#allocation1 + $0x30] sm:$0xff pattern:$0x73625140] }
 0x17c   :  { %1897 = vmatpush.msrb.mxu3 %v1369_v28  ;;  %1847 = vmatpush.msrb.mxu0 %v1311_v29  ;;  %v1376_v36 = vld [vmem:[%s5883_s3 + $0xbb0] sm:$0xff]  ;;  %v1375_v29 = vld [vmem:[%s5883_s3 + $0xba8] sm:$0xff] }
 0x17d   :  { %1859 = vmatpush.msrb.mxu1 %v1335_v42  ;;  %1879 = vmatpush.msrb.mxu2 %v1351_v43  ;;  %v1392_v28 = vld [vmem:[%s5883_s3 + $0xc30] sm:$0xff]  ;;  %v1391_v42 = vld [vmem:[%s5883_s3 + $0xc28] sm:$0xff]  ;;  %v1374_v43 = vld [vmem:[%s5883_s3 + $0xba0] sm:$0xff] }
 0x17e   :  { %1898 = vmatpush.msrb.mxu3 %v1368_v33  ;;  %1848 = vmatpush.msrb.mxu0 %v1310_v23  ;;  %v1390_v33 = vld [vmem:[%s5883_s3 + $0xc20] sm:$0xff]  ;;  %v1373_v23 = vld [vmem:[%s5883_s3 + $0xb98] sm:$0xff] }
 0x17f   :  { %1860 = vmatpush.msrb.mxu1 %v1334_v45  ;;  %1880 = vmatpush.msrb.mxu2 %v1350_v37  ;;  %v1389_v45 = vld [vmem:[%s5883_s3 + $0xc18] sm:$0xff]  ;;  %v1372_v37 = vld [vmem:[%s5883_s3 + $0xb90] sm:$0xff] }
 0x180   :  { %1899 = vmatpush.msrb.mxu3 %v1367_v38  ;;  %1849 = vmatpush.msrb.mxu0 %v1309_v46  ;;  %v1388_v38 = vld [vmem:[%s5883_s3 + $0xc10] sm:$0xff]  ;;  %v1371_v46 = vld [vmem:[%s5883_s3 + $0xb88] sm:$0xff] }
 0x181   :  { %1861 = vmatpush.msrb.mxu1 %v1333_v47  ;;  %1881 = vmatpush.msrb.mxu2 %v1349_v48  ;;  %v1387_v47 = vld [vmem:[%s5883_s3 + $0xc08] sm:$0xff]  ;;  %v1370_v48 = vld [vmem:[%s5883_s3 + $0xb80] sm:$0xff] }
 0x182   :  { %1900 = vmatpush.msrb.mxu3 %v1366_v49  ;;  %1850 = vmatpush.msrb.mxu0 %v1308_v50  ;;  %v1428_v49 = vld.sshfl [vmem:[#allocation1 + $0x38] sm:$0xff pattern:$0x73625140]  ;;  %v1386_v50 = vld [vmem:[%s5883_s3 + $0xc00] sm:$0xff] }
 0x183   :  { %1862 = vmatpush.msrb.mxu1 %v1332_v51  ;;  %1882 = vmatpush.msrb.mxu2 %v1348_v54  ;;  %v1430_v51 = vld.sshfl [vmem:[#allocation1] sm:$0xff pattern:$0x73625140]  ;;  %v539_v54 = vpop.f32.mrf.mxu1 }
 0x184   :  { %1901 = vmatpush.msrb.mxu3 %v1365_v55  ;;  %1851 = vmatpush.msrb.mxu0 %v1307_v56  ;;  %v519_v55 = vpop.f32.mrf.mxu0  ;;  %v559_v56 = vpop.f32.mrf.mxu2 }
 0x185   :  { %1863 = vmatpush.msrb.mxu1 %v1331_v57  ;;  %1883 = vmatpush.msrb.mxu2 %v1347_v52  ;;  %v579_v57 = vpop.f32.mrf.mxu3 }
 0x186   :  { %1902 = vmatpush.msrb.mxu3 %v1364_v53  ;;  %1852 = vmatpush.msrb.mxu0 %v1306_v59 }
 0x187   :  { %1864 = vmatpush.msrb.mxu1 %v1330_v62  ;;  %1884 = vmatpush.msrb.mxu2 %v1346_v63 }
 0x188   :  { %1903 = vmatpush.msrb.mxu3 %v1363_v58  ;;  %1853 = vmatmul.f32.vlgmr.msrb.gmra.mxu0 %v5095_v32  ;;  %v1383_v32 = vld [vmem:[%s5883_s3 + $0xbe8] sm:$0xff] }
 0x189   :  { %1865 = vmatpush.msrb.mxu1 %v1329_v2  ;;  %1917 = vmatpush.msra.mxu0 %v1385_v60 }
 0x18a   :  { %1885 = vmatpush.msrb.mxu2 %v1345_v31  ;;  %1904 = vmatpush.msrb.mxu3 %v1362_v4 }
 0x18b   :  { %1866 = vmatpush.msrb.mxu1 %v1328_v61  ;;  %1918 = vmatpush.msra.mxu0 %v1384_v0  ;;  %v619_v52 = vpop.f32.mrf.mxu1 }
 0x18c   :  { %1886 = vmatpush.msrb.mxu2 %v1344_v1  ;;  %1905 = vmatpush.msrb.mxu3 %v1361_v5  ;;  %v599_v53 = vpop.f32.mrf.mxu0  ;;  %v639_v59 = vpop.f32.mrf.mxu2 }
 0x18d   :  { %1867 = vmatpush.msrb.mxu1 %v1327_v6  ;;  %1919 = vmatpush.msra.mxu0 %v1383_v32  ;;  %v659_v62 = vpop.f32.mrf.mxu3 }
 0x18e   :  { %1887 = vmatpush.msrb.mxu2 %v1343_v3  ;;  %1906 = vmatpush.msrb.mxu3 %v1360_v39 }
 0x18f   :  { %1868 = vmatpush.msrb.mxu1 %v1326_v41  ;;  %1920 = vmatpush.msra.mxu0 %v1382_v40  ;;  %v2824_v40 = vld [vmem:[%s5884_s4] ss:$0 sm:$0xff] }
 0x190   :  { %1888 = vmatpush.msrb.mxu2 %v1342_v44  ;;  %1907 = vmatpush.msrb.mxu3 %v1359_v7 }
 0x191   :  { %1869 = vmatpush.msrb.mxu1 %v1325_v8  ;;  %1921 = vmatpush.msra.mxu0 %v1381_v9  ;;  %v2823_v9 = vld [vmem:[%s5882_s2] ss:$0 sm:$0xff] }
 0x192   :  { %1889 = vmatpush.msrb.mxu2 %v1341_v10  ;;  %1908 = vmatpush.msrb.mxu3 %v1358_v11 }
 0x193   :  { %1870 = vmatpush.msrb.mxu1 %v1324_v12  ;;  %1922 = vmatpush.msra.mxu0 %v1380_v13  ;;  %v699_v63 = vpop.f32.mrf.mxu1  ;;  %v520_v13 = vadd.f32 %v2823_v9, %v519_v55  ;;  %v2068_v9 = vld [vmem:[%s5886_s6 + $0xd8] sm:$0xff] }
 0x194   :  { %1890 = vmatpush.msrb.mxu2 %v1340_v14  ;;  %1909 = vmatpush.msrb.mxu3 %v1357_v15  ;;  %v679_v58 = vpop.f32.mrf.mxu0  ;;  %v719_v2 = vpop.f32.mrf.mxu2 }
 0x195   :  { %1871 = vmatpush.msrb.mxu1 %v1323_v16  ;;  %1923 = vmatpush.msra.mxu0 %v1379_v17  ;;  %v739_v60 = vpop.f32.mrf.mxu3  ;;  %v540_v16 = vadd.f32 %v539_v54, %v520_v13 }
 0x196   :  { %1891 = vmatpush.msrb.mxu2 %v1339_v18  ;;  %1910 = vmatpush.msrb.mxu3 %v1356_v19 }
 0x197   :  { %1872 = vmatpush.msrb.mxu1 %v1322_v20  ;;  %1924 = vmatpush.msra.mxu0 %v1378_v21  ;;  %v560_v19 = vadd.f32 %v559_v56, %v540_v16 }
 0x198   :  { %1892 = vmatpush.msrb.mxu2 %v1338_v22  ;;  %1911 = vmatpush.msrb.mxu3 %v1355_v24 }
 0x199   :  { %1873 = vmatmul.f32.vlgmr.msrb.gmra.mxu1 %v1425_v25  ;;  %1893 = vmatmul.f32.vlgmr.msrb.gmra.mxu2 %v1426_v26  ;;  %v580_v22 = vadd.f32 %v579_v57, %v560_v19 }
 0x19a   :  { %1925 = vmatpush.msra.mxu0 %v1377_v30  ;;  %1912 = vmatpush.msrb.mxu3 %v1354_v27 }
 0x19b   :  { %1945 = vmatpush.msra.mxu1 %v1393_v34  ;;  %1913 = vmatmul.f32.vlgmr.msrb.gmra.mxu3 %v1427_v35  ;;  %v5414_v31 = vpop.f32.mrf.mxu1  ;;  %v600_v26 = vadd.f32 %v599_v53, %v580_v22  ;;  %v2098_v22 = vld [vmem:[%s5886_s6 + $0x1c8] sm:$0xff] }
 0x19c   :  { %1926 = vmatpush.msra.mxu0 %v1376_v36  ;;  %v759_v4 = vpop.f32.mrf.mxu0  ;;  %v5416_v61 = vpop.f32.mrf.mxu2 }
 0x19d   :  { %1946 = vmatpush.msra.mxu1 %v1392_v28  ;;  %v5418_v0 = vpop.f32.mrf.mxu3  ;;  %v620_v34 = vadd.f32 %v619_v52, %v600_v26 }
 0x19e   :  { %1927 = vmatpush.msra.mxu0 %v1375_v29 }
 0x19f   :  { %1947 = vmatpush.msra.mxu1 %v1391_v42  ;;  %v640_v29 = vadd.f32 %v639_v59, %v620_v34  ;;  %v2047_v34 = vld [vmem:[%s5886_s6 + $0x30] sm:$0xff] }
 0x1a0   :  { %1928 = vmatpush.msra.mxu0 %v1374_v43 }
 0x1a1   :  { %1948 = vmatpush.msra.mxu1 %v1390_v33 }
 0x1a2   :  { %1929 = vmatpush.msra.mxu0 %v1373_v23  ;;  %v660_v23 = vadd.f32 %v659_v62, %v640_v29  ;;  %v2118_v62 = vld [vmem:[%s5886_s6 + $0x268] sm:$0xff] }
 0x1a3   :  { %1949 = vmatpush.msra.mxu1 %v1389_v45  ;;  %v5420_v1 = vpop.f32.mrf.mxu1 }
 0x1a4   :  { %1930 = vmatpush.msra.mxu0 %v1372_v37  ;;  %v5422_v5 = vpop.f32.mrf.mxu0  ;;  %v5424_v6 = vpop.f32.mrf.mxu2  ;;  %v680_v37 = vadd.f32 %v679_v58, %v660_v23  ;;  %v2119_v58 = vld [vmem:[%s5886_s6 + $0x270] sm:$0xff] }
 0x1a5   :  { %1950 = vmatpush.msra.mxu1 %v1388_v38  ;;  %v5426_v32 = vpop.f32.mrf.mxu3 }
 0x1a6   :  { %1931 = vmatpush.msra.mxu0 %v1371_v46 }
 0x1a7   :  { %1951 = vmatpush.msra.mxu1 %v1387_v47 }
 0x1a8   :  { %1932 = vmatpush.msra.mxu0 %v1370_v48 }
 0x1a9   :  { %1933 = vmatmul.f32.vlgmr.msra.gmra.mxu0 %v1428_v49  ;;  %1952 = vmatpush.msra.mxu1 %v1386_v50  ;;  %v700_v49 = vadd.f32 %v699_v63, %v680_v37 }
 0x1aa   :  { %2792 = vmatmul.msk.f32.vlgmr.msra.gmra.mxu1 %vm499_vm0, %v1430_v51  ;;  %2254 = vmatpush.msrb.mxu0 %v2118_v62 }
 0x1ab   :  { %v5428_v3 = vpop.f32.mrf.mxu1  ;;  %v720_v54 = vadd.f32 %v719_v2, %v700_v49  ;;  %2274 = vmatpush.msrb.mxu1 %v2119_v58  ;;  %v2093_v2 = vld [vmem:[%s5886_s6 + $0x1a0] sm:$0xff] }
 0x1ac   :  { %v5430_v39 = vpop.f32.mrf.mxu0  ;;  %v5432_v41 = vpop.f32.mrf.mxu2  ;;  %2255 = vmatpush.msrb.mxu0 %v2093_v2  ;;  %v2051_v2 = vld [vmem:[%s5886_s6 + $0x50] sm:$0xff] }
 0x1ad   :  { %v5437_v44 = vpop.f32.mrf.mxu3  ;;  %v740_v57 = vadd.f32 %v739_v60, %v720_v54  ;;  %v2094_v60 = vld [vmem:[%s5886_s6 + $0x1a8] sm:$0xff] }
 0x1ae   :  { %2275 = vmatpush.msrb.mxu1 %v2094_v60  ;;  %2256 = vmatpush.msrb.mxu0 %v2068_v9  ;;  %v2052_v9 = vld [vmem:[%s5886_s6 + $0x58] sm:$0xff] }
 0x1af   :  { %v760_v59 = vadd.f32 %v759_v4, %v740_v57  ;;  %v2102_v57 = vld [vmem:[%s5886_s6 + $0x1e8] sm:$0xff] }
 0x1b3   :  { %v1474_v7 = vpop.f32.mrf.mxu1 }
 0x1b4   :  { %v1475_v8 = vadd.f32 %v2824_v40, %v1474_v7  ;;  %v5442_v10 = vpop.f32.mrf.mxu0  ;;  %v1494_v11 = vpop.f32.mrf.mxu2 }
 0x1b5   :  { %v1514_v14 = vpop.f32.mrf.mxu3 }
 0x1b6   :  { %v1495_v12 = vadd.f32 %v1494_v11, %v1475_v8  ;;  %v780_v8 = vadd.f32 %v5414_v31, %v760_v59  ;;  %v2069_v11 = vld [vmem:[%s5886_s6 + $0xe0] sm:$0xff]  ;;  %v2044_v31 = vld [vmem:[%s5886_s6 + $0x18] sm:$0xff] }
 0x1b7   :  { %2276 = vmatpush.msrb.mxu1 %v2069_v11  ;;  %v2076_v59 = vld [vmem:[%s5886_s6 + $0x118] sm:$0xff] }
 0x1b8   :  { %v1515_v15 = vadd.f32 %v1514_v14, %v1495_v12  ;;  %v800_v13 = vadd.f32 %v5416_v61, %v780_v8  ;;  %v2123_v61 = vld [vmem:[%s5886_s6 + $0x290] sm:$0xff] }
 0x1b9   :  { %2277 = vmatpush.msrb.mxu1 %v2044_v31 }
 0x1ba   :  { %v820_v19 = vadd.f32 %v5418_v0, %v800_v13  ;;  %v2073_v0 = vld [vmem:[%s5886_s6 + $0x100] sm:$0xff]  ;;  %v2130_v13 = vld [vmem:[%s5886_s6 + $0x2c8] sm:$0xff] }
 0x1bb   :  { %v1554_v20 = vpop.f32.mrf.mxu1  ;;  %2354 = vmatpush.msra.mxu1 %v2123_v61  ;;  %v2067_v61 = vld [vmem:[%s5886_s6 + $0xd0] sm:$0xff] }
 0x1bc   :  { %v1534_v17 = vpop.f32.mrf.mxu0  ;;  %v1574_v24 = vpop.f32.mrf.mxu2 }
 0x1bd   :  { %v1535_v18 = vadd.f32 %v1534_v17, %v1515_v15  ;;  %v1594_v30 = vpop.f32.mrf.mxu3  ;;  %v2043_v15 = vld [vmem:[%s5886_s6 + $0x10] sm:$0xff]  ;;  %v2122_v17 = vld [vmem:[%s5886_s6 + $0x288] sm:$0xff]  ;;  %2355 = vmatpush.msra.mxu1 %v2098_v22 }
 0x1be   :  { %2257 = vmatpush.msrb.mxu0 %v2043_v15  ;;  %v2131_v15 = vld [vmem:[%s5886_s6 + $0x2d0] sm:$0xff]  ;;  %v2042_v22 = vld [vmem:[%s5886_s6 + $0x8] sm:$0xff] }
 0x1bf   :  { %v1555_v21 = vadd.f32 %v1554_v20, %v1535_v18  ;;  %2356 = vmatpush.msra.mxu1 %v2073_v0  ;;  %v2055_v0 = vld [vmem:[%s5886_s6 + $0x70] sm:$0xff] }
 0x1c0   :  { %2334 = vmatpush.msra.mxu0 %v2122_v17  ;;  %v2832_v17 = vmov 1.0  }
 0x1c1   :  { %v1575_v25 = vadd.f32 %v1574_v24, %v1555_v21  ;;  %v2097_v21 = vld [vmem:[%s5886_s6 + $0x1c0] sm:$0xff] }
 0x1c2   :  { %2335 = vmatpush.msra.mxu0 %v2097_v21 }
 0x1c3   :  { %v1595_v27 = vadd.f32 %v1594_v30, %v1575_v25  ;;  %v1634_v36 = vpop.f32.mrf.mxu1  ;;  %v840_v25 = vadd.f32 %v5422_v5, %v820_v19  ;;  %v2072_v30 = vld [vmem:[%s5886_s6 + $0xf8] sm:$0xff] }
 0x1c4   :  { %v1614_v35 = vpop.f32.mrf.mxu0  ;;  %v1654_v42 = vpop.f32.mrf.mxu2  ;;  %2336 = vmatpush.msra.mxu0 %v2072_v30  ;;  %v2048_v5 = vld [vmem:[%s5886_s6 + $0x38] sm:$0xff] }
 0x1c5   :  { %v1615_v28 = vadd.f32 %v1614_v35, %v1595_v27  ;;  %v1674_v45 = vpop.f32.mrf.mxu3  ;;  %2357 = vmatpush.msra.mxu1 %v2048_v5  ;;  %v2056_v5 = vld [vmem:[%s5886_s6 + $0x78] sm:$0xff] }
 0x1c6   :  { %2337 = vmatpush.msra.mxu0 %v2047_v34  ;;  %v2096_v34 = vld [vmem:[%s5886_s6 + $0x1b8] sm:$0xff] }
 0x1c7   :  { %v1635_v43 = vadd.f32 %v1634_v36, %v1615_v28  ;;  %v860_v36 = vadd.f32 %v5420_v1, %v840_v25  ;;  %v2121_v25 = vld [vmem:[%s5886_s6 + $0x280] sm:$0xff] }
 0x1c9   :  { %v1655_v33 = vadd.f32 %v1654_v42, %v1635_v43  ;;  %v880_v29 = vadd.f32 %v5424_v6, %v860_v36 }
 0x1cb   :  { %v1675_v46 = vadd.f32 %v1674_v45, %v1655_v33  ;;  %v900_v45 = vadd.f32 %v5426_v32, %v880_v29  ;;  %v1957_v32 = vld [vmem:[%s5887_s5] sm:$0x3]  ;;  %v2116_v29 = vld [vmem:[%s5886_s6 + $0x258] sm:$0xff] }
 0x1cc   :  { %v1694_v38 = vpop.f32.mrf.mxu0 }
 0x1cd   :  { %v1695_v48 = vadd.f32 %v1694_v38, %v1675_v46  ;;  %v920_v38 = vadd.f32 %v5430_v39, %v900_v45  ;;  %v2125_v45 = vld [vmem:[%s5886_s6 + $0x2a0] sm:$0xff] }
 0x1cf   :  { %v940_v1 = vadd.f32 %v5428_v3, %v920_v38  ;;  %v2126_v3 = vld [vmem:[%s5886_s6 + $0x2a8] sm:$0xff] }
 0x1d0   :  { %v2110_v38 = vld [vmem:[%s5886_s6 + $0x228] sm:$0xff] }
 0x1d1   :  { %v960_v6 = vadd.f32 %v5432_v41, %v940_v1  ;;  %v2127_v41 = vld [vmem:[%s5886_s6 + $0x2b0] sm:$0xff]  ;;  %v2085_v1 = vld [vmem:[%s5886_s6 + $0x160] sm:$0xff] }
 0x1d2   :  { %v1714_v47 = vpop.f32.mrf.mxu1 }
 0x1d3   :  { %v1715_v51 = vadd.f32 %v1714_v47, %v1695_v48 }
 0x1d8   :  { %v1734_v50 = vpop.f32.mrf.mxu2 }
 0x1d9   :  { %v1735_v55 = vadd.f32 %v1734_v50, %v1715_v51  ;;  %v980_v50 = vadd.f32 %v5437_v44, %v960_v6  ;;  %v2075_v6 = vld [vmem:[%s5886_s6 + $0x110] sm:$0xff] }
 0x1db   :  { %v1754_v56 = vpop.f32.mrf.mxu3  ;;  %v1000_v51 = vadd.f32 %v5442_v10, %v980_v50  ;;  %v2101_v10 = vld [vmem:[%s5886_s6 + $0x1e0] sm:$0xff]  ;;  %v2060_v50 = vld [vmem:[%s5886_s6 + $0x98] sm:$0xff] }
 0x1dc   :  { %v1755_v53 = vadd.f32 %v1754_v56, %v1735_v55 }
 0x1e3   :  { %v1774_v52 = vpop.f32.mrf.mxu0 }
 0x1e4   :  { %v1775_v7 = vadd.f32 %v1774_v52, %v1755_v53 }
 0x1f4   :  { %v1794_v40 = vpop.f32.mrf.mxu1 }
 0x1f5   :  { %v1795_v4 = vadd.f32 %v1794_v40, %v1775_v7  ;;  %v2077_v40 = vld [vmem:[%s5886_s6 + $0x120] sm:$0xff] }
 0x1fa   :  { %v1814_v63 = vpop.f32.mrf.mxu2 }
 0x1fb   :  { %v1815_v12 = vadd.f32 %v1814_v63, %v1795_v4  ;;  %v2117_v63 = vld [vmem:[%s5886_s6 + $0x260] sm:$0xff] }
 0x1fd   :  { %v1834_v14 = vpop.f32.mrf.mxu3 }
 0x1fe   :  { %v1835_v18 = vadd.f32 %v1834_v14, %v1815_v12  ;;  %v2092_v12 = vld [vmem:[%s5886_s6 + $0x198] sm:$0xff] }
 0x205   :  { %v1854_v16 = vpop.f32.mrf.mxu0 }
 0x206   :  { %v1855_v24 = vadd.f32 %v1854_v16, %v1835_v18  ;;  %v2105_v18 = vld [vmem:[%s5886_s6 + $0x200] sm:$0xff] }
 0x216   :  { %v1874_v20 = vpop.f32.mrf.mxu1 }
 0x217   :  { %v1875_v27 = vadd.f32 %v1874_v20, %v1855_v24  ;;  %v2106_v20 = vld [vmem:[%s5886_s6 + $0x208] sm:$0xff]  ;;  %v2080_v24 = vld [vmem:[%s5886_s6 + $0x138] sm:$0xff] }
 0x21c   :  { %v1894_v26 = vpop.f32.mrf.mxu2 }
 0x21d   :  { %v1895_v35 = vadd.f32 %v1894_v26, %v1875_v27  ;;  %v2081_v26 = vld [vmem:[%s5886_s6 + $0x140] sm:$0xff] }
 0x21e   :  { %v1914_v28 = vpop.f32.mrf.mxu3 }
 0x21f   :  { %v1915_v42 = vadd.f32 %v1914_v28, %v1895_v35  ;;  %v2134_v35 = vld [vmem:[%s5886_s6 + $0x2e8] sm:$0xff]  ;;  %v2071_v28 = vld [vmem:[%s5886_s6 + $0xf0] sm:$0xff] }
 0x226   :  { %v1934_v43 = vpop.f32.mrf.mxu0 }
 0x227   :  { %v1935_v33 = vadd.f32 %v1934_v43, %v1915_v42  ;;  %v1954_v23 = vpop.f32.mrf.mxu1  ;;  %v2135_v42 = vld [vmem:[%s5886_s6 + $0x2f0] sm:$0xff]  ;;  %v2109_v43 = vld [vmem:[%s5886_s6 + $0x220] sm:$0xff] }
 0x229   :  { %v5499_v37 = vadd.f32 %v1954_v23, %v1935_v33  ;;  %v2046_v33 = vld [vmem:[%s5886_s6 + $0x28] sm:$0xff]  ;;  %v2091_v23 = vld [vmem:[%s5886_s6 + $0x190] sm:$0xff] }
 0x22b   :  { %v1958_v46 = vmul.f32 0.5, %v5499_v37  ;;  %v1965_v47 = vmul.f32 1.442695, %v5499_v37 }
 0x22d   :  { %v1959_v48 = vmul.f32 1.442695, %v1958_v46  ;;  %2826 = vpow2.f32 %v1965_v47  ;;  %v2100_v46 = vld [vmem:[%s5886_s6 + $0x1d8] sm:$0xff]  ;;  %v2041_v47 = vld [vmem:[%s5886_s6] sm:$0xff] }
 0x22f   :  { %2828 = vpow2.f32 %v1959_v48  ;;  %v2084_v48 = vld [vmem:[%s5886_s6 + $0x158] sm:$0xff] }
 0x233   :  { %v2827_v49 = vpop.eup %2826 }
 0x234   :  { %2830 = vrcp.f32 %v2827_v49  ;;  %v1978_v58 = vand.u32 2147483648, %v2827_v49  ;;  %v1976_v8 = vand.u32 2147483647, %v2827_v49  ;;  %vm1972_vm3 = vweird.f32 %v2827_v49 }
 0x235   :  { %v2829_v39 = vpop.eup %2828 }
 0x236   :  { %v1961_v54 = vmul.f32 %v2829_v39, %v1957_v32  ;;  %v1979_v14 = vor.u32 1.1754944e-38, %v1978_v58  ;;  %vm1977_vm5 = vcmp.eq.f32.partialorder %v1976_v8, 8.507059e+37  ;;  %v2059_v32 = vld [vmem:[%s5886_s6 + $0x90] sm:$0xff]  ;;  %v2050_v39 = vld [vmem:[%s5886_s6 + $0x48] sm:$0xff]  ;;  %v2108_v8 = vld [vmem:[%s5886_s6 + $0x218] sm:$0xff] }
 0x237   :  { %v2063_v58 = vld [vmem:[%s5886_s6 + $0xb0] sm:$0xff] }
 0x238   :  { %v5511_v55 = vadd.f32 %v1961_v54, %v1000_v51  ;;  %v2138_v54 = vld [vmem:[%s5886_s6 + $0x308] sm:$0xff] }
 0x23a   :  { %v2831_v56 = vpop.eup %2830  ;;  %2799 = vmatmul.msk.f32.vlgmr.msrb.gmra.mxu0 %vm1988_vm1, %v5511_v55  ;;  %2800 = vmatmul.msk.f32.vlgmr.msrb.gmra.mxu1 %vm1988_vm1, %v5511_v55  ;;  %v1985_v44 = vmul.f32 %v5511_v55, %v5511_v55  ;;  %v1963_v60 = vsub.f32 %v5511_v55, %v1000_v51  ;;  %v2095_v51 = vld [vmem:[%s5886_s6 + $0x1b0] sm:$0xff] }
 0x23b   :  { %v1968_v52 = vmul.f32 %v2831_v56, %v2827_v49  ;;  %2414 = vmatpush.msrb.mxu0 %v2126_v3  ;;  %2434 = vmatpush.msrb.mxu1 %v2127_v41  ;;  %vm1973_vm2 = vweird.f32 %v2831_v56  ;;  %v2120_v49 = vld [vmem:[%s5886_s6 + $0x278] sm:$0xff]  ;;  %v2139_v3 = vld [vmem:[%s5886_s6 + $0x310] sm:$0xff]  ;;  %v2129_v41 = vld [vmem:[%s5886_s6 + $0x2c0] sm:$0xff] }
 0x23c   :  { %v1986_v53 = vadd.f32 1.837877, %v1985_v44  ;;  %vm1974_vm4 = vmor %vm1972_vm3, %vm1973_vm2  ;;  %v1964_v31 = vmul.f32 %v1963_v60, %v1963_v60  ;;  %v2113_v44 = vld [vmem:[%s5886_s6 + $0x240] sm:$0xff] }
 0x23d   :  { %v1969_v62 = vsub.f32 1.0, %v1968_v52  ;;  %2415 = vmatpush.msrb.mxu0 %v2101_v10  ;;  %2435 = vmatpush.msrb.mxu1 %v2102_v57  ;;  %v2114_v10 = vld [vmem:[%s5886_s6 + $0x248] sm:$0xff]  ;;  %v2104_v57 = vld [vmem:[%s5886_s6 + $0x1f8] sm:$0xff]  ;;  %v2045_v52 = vld [vmem:[%s5886_s6 + $0x20] sm:$0xff] }
 0x23e   :  { %v1987_v7 = vmul.f32 -0.5, %v1986_v53  ;;  %v2088_v53 = vld [vmem:[%s5886_s6 + $0x178] sm:$0xff]  ;;  %v2133_v60 = vld [vmem:[%s5886_s6 + $0x2e0] sm:$0xff] }
 0x23f   :  { %v1970_v4 = vmul.f32 %v2831_v56, %v1969_v62  ;;  %2416 = vmatpush.msrb.mxu0 %v2076_v59  ;;  %2436 = vmatpush.msrb.mxu1 %v2077_v40  ;;  %v2089_v59 = vld [vmem:[%s5886_s6 + $0x180] sm:$0xff]  ;;  %v2079_v40 = vld [vmem:[%s5886_s6 + $0x130] sm:$0xff]  ;;  %v2124_v62 = vld [vmem:[%s5886_s6 + $0x298] sm:$0xff] }
 0x240   :  { %2795 = vmatpush.xpose.msk.msra.mxu3 %vm1988_vm1, %v1987_v7  ;;  %v2064_v7 = vld [vmem:[%s5886_s6 + $0xb8] sm:$0xff] }
 0x241   :  { %v1971_v11 = vadd.f32 %v2831_v56, %v1970_v4  ;;  %2417 = vmatpush.msrb.mxu0 %v2051_v2  ;;  %2437 = vmatpush.msrb.mxu1 %v2052_v9  ;;  %v2099_v2 = vld [vmem:[%s5886_s6 + $0x1d0] sm:$0xff]  ;;  %v2074_v4 = vld [vmem:[%s5886_s6 + $0x108] sm:$0xff]  ;;  %v2049_v9 = vld [vmem:[%s5886_s6 + $0x40] sm:$0xff] }
 0x242   :  { %2803 = vmatmul.msk.f32.vlgmr.msra.gmra.mxu0 %vm1988_vm1, %v5511_v55  ;;  %2804 = vmatmul.msk.f32.vlgmr.msra.gmra.mxu1 %vm1988_vm1, %v5511_v55 }
 0x243   :  { %v1975_v16 = vsel %vm1974_vm4, %v2831_v56, %v1971_v11  ;;  %2796 = vmatmul.msk.f32.vlgmr.msra.gmra.mxu3 %vm1988_vm1, %v2832_v17  ;;  %2494 = vmatpush.msra.mxu0 %v2130_v13  ;;  %v2070_v56 = vld [vmem:[%s5886_s6 + $0xe8] sm:$0xff]  ;;  %v2083_v11 = vld [vmem:[%s5886_s6 + $0x150] sm:$0xff] }
 0x244   :  { %2234 = vmatpush.msrb.mxu3 %v2117_v63  ;;  %v1980_v19 = vsel %vm1977_vm5, %v1979_v14, %v1975_v16  ;;  %2514 = vmatpush.msra.mxu1 %v2131_v15  ;;  %v2054_v63 = vld [vmem:[%s5886_s6 + $0x68] sm:$0xff]  ;;  %v2103_v14 = vld [vmem:[%s5886_s6 + $0x1f0] sm:$0xff]  ;;  %v2137_v15 = vld [vmem:[%s5886_s6 + $0x300] sm:$0xff] }
 0x245   :  { %v1981_v21 = vmul.f32 %v1980_v19, %v1964_v31  ;;  %2495 = vmatpush.msra.mxu0 %v2105_v18  ;;  %v2058_v13 = vld [vmem:[%s5886_s6 + $0x88] sm:$0xff]  ;;  %v2112_v16 = vld [vmem:[%s5886_s6 + $0x238] sm:$0xff] }
 0x246   :  { %2235 = vmatpush.msrb.mxu3 %v2092_v12  ;;  %2515 = vmatpush.msra.mxu1 %v2106_v20  ;;  %v2128_v12 = vld [vmem:[%s5886_s6 + $0x2b8] sm:$0xff]  ;;  %v2078_v31 = vld [vmem:[%s5886_s6 + $0x128] sm:$0xff]  ;;  %v2107_v20 = vld [vmem:[%s5886_s6 + $0x210] sm:$0xff] }
 0x247   :  { %v1982_v30 = vadd.f32 %v1981_v21, %v5499_v37  ;;  %2496 = vmatpush.msra.mxu0 %v2080_v24  ;;  %v2066_v37 = vld [vmem:[%s5886_s6 + $0xc8] sm:$0xff]  ;;  %v2132_v18 = vld [vmem:[%s5886_s6 + $0x2d8] sm:$0xff] }
 0x248   :  { %2236 = vmatpush.msrb.mxu3 %v2067_v61  ;;  %2516 = vmatpush.msra.mxu1 %v2081_v26  ;;  %v2087_v61 = vld [vmem:[%s5886_s6 + $0x170] sm:$0xff]  ;;  %v2062_v19 = vld [vmem:[%s5886_s6 + $0xa8] sm:$0xff]  ;;  %v2136_v24 = vld [vmem:[%s5886_s6 + $0x2f8] sm:$0xff] }
 0x249   :  { %v1983_v27 = vadd.f32 1.837877, %v1982_v30  ;;  %2497 = vmatpush.msra.mxu0 %v2055_v0  ;;  %v2082_v21 = vld [vmem:[%s5886_s6 + $0x148] sm:$0xff]  ;;  %v2061_v30 = vld [vmem:[%s5886_s6 + $0xa0] sm:$0xff]  ;;  %v2140_v0 = vld [vmem:[%s5886_s6 + $0x318] sm:$0xff] }
 0x24a   :  { %2237 = vmatpush.msrb.mxu3 %v2042_v22  ;;  %2807 = vmatmul.msk.f32.vlgmr.msrb.gmra.mxu0 %vm1988_vm1, %v5511_v55  ;;  %v2057_v22 = vld [vmem:[%s5886_s6 + $0x80] sm:$0xff]  ;;  %v2086_v26 = vld [vmem:[%s5886_s6 + $0x168] sm:$0xff] }
 0x24b   :  { %2808 = vmatmul.msk.f32.vlgmr.msrb.gmra.mxu1 %vm1988_vm1, %v5511_v55  ;;  %v1984_v36 = vmul.f32 -0.5, %v1983_v27  ;;  %2798 = vmatmul.msk.f32.vlgmr.msrb.gmra.mxu3 %vm1988_vm1, %v5511_v55  ;;  %v2115_v27 = vld [vmem:[%s5886_s6 + $0x250] sm:$0xff] }
 0x24c   :  { %2314 = vmatpush.msra.mxu3 %v2121_v25  ;;  %2517 = vmatpush.msra.mxu1 %v2056_v5  ;;  %v2111_v25 = vld [vmem:[%s5886_s6 + $0x230] sm:$0xff]  ;;  %v2065_v5 = vld [vmem:[%s5886_s6 + $0xc0] sm:$0xff] }
 0x24d   :  { %2793 = vmatpush.xpose.msk.msra.mxu2 %vm1988_vm1, %v1984_v36  ;;  %2574 = vmatpush.msrb.mxu0 %v2134_v35 }
 0x24e   :  { %2315 = vmatpush.msra.mxu3 %v2096_v34  ;;  %2594 = vmatpush.msrb.mxu1 %v2135_v42  ;;  %v2090_v34 = vld [vmem:[%s5886_s6 + $0x188] sm:$0xff]  ;;  %v2141_v42 = vld [vmem:[%s5885_s7] sm:$0xff] }
 0x24f   :  { %2575 = vmatpush.msrb.mxu0 %v2109_v43  ;;  %v2151_v43 = vperm.slane %v2141_v42, 2 }
 0x250   :  { %2316 = vmatpush.msra.mxu3 %v2071_v28  ;;  %2794 = vmatmul.msk.f32.vlgmr.msra.gmra.mxu2 %vm1988_vm1, %v2832_v17  ;;  %v2053_v17 = vld [vmem:[%s5886_s6 + $0x60] sm:$0xff] }
 0x251   :  { %2214 = vmatpush.msrb.mxu2 %v2116_v29  ;;  %2595 = vmatpush.msrb.mxu1 %v2110_v38  ;;  %v2150_v38 = vperm.slane %v2141_v42, 1 }
 0x252   :  { %2317 = vmatpush.msra.mxu3 %v2046_v33  ;;  %2811 = vmatmul.msk.f32.vlgmr.msra.gmra.mxu0 %vm1988_vm1, %v5511_v55  ;;  %v2152_v33 = vperm.slane %v2141_v42, 3 }
 0x253   :  { %2215 = vmatpush.msrb.mxu2 %v2091_v23  ;;  %2812 = vmatmul.msk.f32.vlgmr.msra.gmra.mxu1 %vm1988_vm1, %v5511_v55 }
 0x254   :  { %2394 = vmatpush.msrb.mxu3 %v2125_v45  ;;  %2576 = vmatpush.msrb.mxu0 %v2084_v48 }
 0x255   :  { %2802 = vmatmul.msk.f32.vlgmr.msra.gmra.mxu3 %vm1988_vm1, %v5511_v55  ;;  %2216 = vmatpush.msrb.mxu2 %v2066_v37 }
 0x256   :  { %2395 = vmatpush.msrb.mxu3 %v2100_v46  ;;  %2596 = vmatpush.msrb.mxu1 %v2085_v1  ;;  %v2149_v1 = vperm.slane %v2141_v42, 0 }
 0x257   :  { %2217 = vmatpush.msrb.mxu2 %v2041_v47  ;;  %2577 = vmatpush.msrb.mxu0 %v2059_v32  ;;  %v2155_v32 = vperm.slane %v2141_v42, 6 }
 0x258   :  { %2396 = vmatpush.msrb.mxu3 %v2075_v6  ;;  %2797 = vmatmul.msk.f32.vlgmr.msrb.gmra.mxu2 %vm1988_vm1, %v5511_v55 }
 0x259   :  { %2294 = vmatpush.msra.mxu2 %v2120_v49  ;;  %2597 = vmatpush.msrb.mxu1 %v2060_v50  ;;  %v2156_v50 = vperm.slane %v2141_v42, 7 }
 0x25a   :  { %2397 = vmatpush.msrb.mxu3 %v2050_v39  ;;  %2815 = vmatmul.msk.f32.vlgmr.msrb.gmra.mxu0 %vm1988_vm1, %v5511_v55 }
 0x25b   :  { %2295 = vmatpush.msra.mxu2 %v2095_v51  ;;  %2816 = vmatmul.msk.f32.vlgmr.msrb.gmra.mxu1 %vm1988_vm1, %v5511_v55 }
 0x25c   :  { %2654 = vmatpush.msra.mxu0 %v2138_v54  ;;  %2674 = vmatpush.msra.mxu1 %v2139_v3  ;;  %v2154_v54 = vperm.slane %v2141_v42, 5 }
 0x25d   :  { %2806 = vmatmul.msk.f32.vlgmr.msrb.gmra.mxu3 %vm1988_vm1, %v5511_v55  ;;  %2296 = vmatpush.msra.mxu2 %v2070_v56 }
 0x25e   :  { %2474 = vmatpush.msra.mxu3 %v2129_v41  ;;  %2655 = vmatpush.msra.mxu0 %v2113_v44 }
 0x25f   :  { %2675 = vmatpush.msra.mxu1 %v2114_v10  ;;  %2297 = vmatpush.msra.mxu2 %v2045_v52 }
 0x260   :  { %2475 = vmatpush.msra.mxu3 %v2104_v57  ;;  %2656 = vmatpush.msra.mxu0 %v2088_v53 }
 0x261   :  { %2676 = vmatpush.msra.mxu1 %v2089_v59  ;;  %2801 = vmatmul.msk.f32.vlgmr.msra.gmra.mxu2 %vm1988_vm1, %v5511_v55  ;;  %v2142_v59 = vld [vmem:[%s5885_s7 + $0x8] sm:$0xff] }
 0x262   :  { %2476 = vmatpush.msra.mxu3 %v2079_v40  ;;  %2374 = vmatpush.msrb.mxu2 %v2124_v62 }
 0x263   :  { %2657 = vmatpush.msra.mxu0 %v2063_v58  ;;  %2677 = vmatpush.msra.mxu1 %v2064_v7  ;;  %v2153_v58 = vperm.slane %v2141_v42, 4 }
 0x264   :  { %2477 = vmatpush.msra.mxu3 %v2054_v63  ;;  %2819 = vmatmul.msk.f32.vlgmr.msra.gmra.mxu0 %vm1988_vm1, %v5511_v55 }
 0x265   :  { %2820 = vmatmul.msk.f32.vlgmr.msra.gmra.mxu1 %vm1988_vm1, %v5511_v55  ;;  %2375 = vmatpush.msrb.mxu2 %v2099_v2  ;;  %v2159_v2 = vperm.slane %v2142_v59, 2 }
 0x266   :  { %2810 = vmatmul.msk.f32.vlgmr.msra.gmra.mxu3 %vm1988_vm1, %v5511_v55 }
 0x267   :  { %2554 = vmatpush.msrb.mxu3 %v2133_v60  ;;  %2376 = vmatpush.msrb.mxu2 %v2074_v4  ;;  %v2160_v60 = vperm.slane %v2142_v59, 3 }
 0x269   :  { %2555 = vmatpush.msrb.mxu3 %v2108_v8  ;;  %2377 = vmatpush.msrb.mxu2 %v2049_v9 }
 0x26a   :  { %2805 = vmatmul.msk.f32.vlgmr.msrb.gmra.mxu2 %vm1988_vm1, %v5511_v55 }
 0x26b   :  { %2556 = vmatpush.msrb.mxu3 %v2083_v11  ;;  %2454 = vmatpush.msra.mxu2 %v2128_v12  ;;  %v2158_v11 = vperm.slane %v2142_v59, 1 }
 0x26d   :  { %2557 = vmatpush.msrb.mxu3 %v2058_v13  ;;  %2455 = vmatpush.msra.mxu2 %v2103_v14 }
 0x26e   :  { %2814 = vmatmul.msk.f32.vlgmr.msrb.gmra.mxu3 %vm1988_vm1, %v5511_v55 }
 0x26f   :  { %2634 = vmatpush.msra.mxu3 %v2137_v15  ;;  %2456 = vmatpush.msra.mxu2 %v2078_v31 }
 0x271   :  { %2635 = vmatpush.msra.mxu3 %v2112_v16  ;;  %2457 = vmatpush.msra.mxu2 %v2053_v17 }
 0x272   :  { %2809 = vmatmul.msk.f32.vlgmr.msra.gmra.mxu2 %vm1988_vm1, %v5511_v55 }
 0x273   :  { %2636 = vmatpush.msra.mxu3 %v2087_v61  ;;  %2534 = vmatpush.msrb.mxu2 %v2132_v18  ;;  %v2157_v18 = vperm.slane %v2142_v59, 0 }
 0x275   :  { %2637 = vmatpush.msra.mxu3 %v2062_v19  ;;  %2535 = vmatpush.msrb.mxu2 %v2107_v20 }
 0x276   :  { %2818 = vmatmul.msk.f32.vlgmr.msra.gmra.mxu3 %vm1988_vm1, %v5511_v55 }
 0x277   :  { %2536 = vmatpush.msrb.mxu2 %v2082_v21 }
 0x279   :  { %2537 = vmatpush.msrb.mxu2 %v2057_v22  ;;  %v2163_v22 = vperm.slane %v2142_v59, 6 }
 0x27a   :  { %2813 = vmatmul.msk.f32.vlgmr.msrb.gmra.mxu2 %vm1988_vm1, %v5511_v55 }
 0x27b   :  { %2614 = vmatpush.msra.mxu2 %v2136_v24  ;;  %v2164_v24 = vperm.slane %v2142_v59, 7 }
 0x27d   :  { %2615 = vmatpush.msra.mxu2 %v2111_v25 }
 0x27f   :  { %2616 = vmatpush.msra.mxu2 %v2086_v26 }
 0x281   :  { %2617 = vmatpush.msra.mxu2 %v2061_v30  ;;  %v2162_v30 = vperm.slane %v2142_v59, 5 }
 0x282   :  { %2817 = vmatmul.msk.f32.vlgmr.msra.gmra.mxu2 %vm1988_vm1, %v5511_v55 }
 0x283   :  { %2694 = vmatpush.msrb.mxu2 %v2140_v0 }
 0x285   :  { %2695 = vmatpush.msrb.mxu2 %v2115_v27 }
 0x287   :  { %2696 = vmatpush.msrb.mxu2 %v2090_v34 }
 0x289   :  { %2697 = vmatpush.msrb.mxu2 %v2065_v5 }
 0x28a   :  { %2821 = vmatmul.msk.f32.vlgmr.msrb.gmra.mxu2 %vm1988_vm1, %v5511_v55 }
 0x2b7   :  { %v2259_v36 = vpop.f32.mrf.mxu0  ;;  %v2279_v28 = vpop.f32.mrf.mxu1 }
 0x2b8   :  { %v2260_v55 = vadd.f32 %v2259_v36, %v2151_v43  ;;  %v2280_v46 = vadd.f32 %v2279_v28, %v2152_v33  ;;  %v2143_v36 = vld [vmem:[%s5885_s7 + $0x10] sm:$0xff]  ;;  %v2161_v43 = vperm.slane %v2142_v59, 4 }
 0x2b9   :  { %v2170_v59 = vperm.slane %v2143_v36, 5 }
 0x2ba   :  { %v2727_v6 = vrot.slane %v2260_v55, 4  ;;  %v2728_v49 = vrot.slane %v2280_v46, 2 }
 0x2bc   :  { %v2747_v56 = vsel %vm2746_vm7, %v2727_v6, %v2728_v49 }
 0x2bf   :  { %v2339_v23 = vpop.f32.mrf.mxu0  ;;  %v2359_v37 = vpop.f32.mrf.mxu1 }
 0x2c0   :  { %v2340_v44 = vadd.f32 %v2339_v23, %v2155_v32  ;;  %v2360_v10 = vadd.f32 %v2359_v37, %v2156_v50  ;;  %v2167_v37 = vperm.slane %v2143_v36, 2 }
 0x2c2   :  { %v2730_v7 = vrot.slane %v2340_v44, 4  ;;  %v2731_v63 = vrot.slane %v2360_v10, 2  ;;  %v2172_v10 = vperm.slane %v2143_v36, 7 }
 0x2c4   :  { %v2751_v12 = vsel %vm2746_vm7, %v2730_v7, %v2731_v63 }
 0x2c6   :  { %v2037_v35 = vpop.f32.mrf.mxu3 }
 0x2c7   :  { %2040 = vst.msk [vmem:[%s5888_s10] sm:$0x1] %vm2015_vm6, %v2037_v35  ;;  %v2419_v41 = vpop.f32.mrf.mxu0 }
 0x2c8   :  { %v2439_v57 = vpop.f32.mrf.mxu1  ;;  %v2420_v14 = vadd.f32 %v2419_v41, %v2159_v2 }
 0x2c9   :  { %v2440_v15 = vadd.f32 %v2439_v57, %v2160_v60 }
 0x2ca   :  { %v2733_v20 = vrot.slane %v2420_v14, 4 }
 0x2cb   :  { %v2734_v21 = vrot.slane %v2440_v15, 2 }
 0x2cd   :  { %v2754_v27 = vsel %vm2746_vm7, %v2733_v20, %v2734_v21 }
 0x2ce   :  { %v2239_v29 = vpop.f32.mrf.mxu3 }
 0x2cf   :  { %v2240_v48 = vadd.f32 %v2239_v29, %v2150_v38  ;;  %v2499_v31 = vpop.f32.mrf.mxu0  ;;  %v2168_v38 = vperm.slane %v2143_v36, 3 }
 0x2d0   :  { %v2519_v17 = vpop.f32.mrf.mxu1  ;;  %v2500_v34 = vadd.f32 %v2499_v31, %v2163_v22 }
 0x2d1   :  { %v2726_v51 = vrot.slane %v2240_v48, 6  ;;  %v2520_v5 = vadd.f32 %v2519_v17, %v2164_v24  ;;  %v2166_v48 = vperm.slane %v2143_v36, 1  ;;  %v2825_v17 = vld [vmem:[%s5885_s7 + $0x18] ss:$0 sm:$0xff] }
 0x2d2   :  { %v2736_v23 = vrot.slane %v2500_v34, 4 }
 0x2d3   :  { %v2012_v45 = vpop.f32.mrf.mxu2 }
 0x2d4   :  { %2016 = vst.msk [vmem:[%s5889_s9] sm:$0x1] %vm2015_vm6, %v2012_v45  ;;  %v2737_v45 = vrot.slane %v2520_v5, 2 }
 0x2d6   :  { %v2757_v6 = vsel %vm2746_vm7, %v2736_v23, %v2737_v45 }
 0x2d7   :  { %v2579_v29 = vpop.f32.mrf.mxu0 }
 0x2d8   :  { %v2319_v47 = vpop.f32.mrf.mxu3  ;;  %v2599_v33 = vpop.f32.mrf.mxu1  ;;  %v2580_v49 = vadd.f32 %v2579_v29, %v2167_v37 }
 0x2d9   :  { %v2320_v40 = vadd.f32 %v2319_v47, %v2154_v54  ;;  %v2600_v32 = vadd.f32 %v2599_v33, %v2168_v38  ;;  %v2165_v54 = vperm.slane %v2143_v36, 0 }
 0x2db   :  { %v2219_v39 = vpop.f32.mrf.mxu2  ;;  %v2729_v8 = vrot.slane %v2320_v40, 6  ;;  %v2740_v41 = vrot.slane %v2600_v32, 2 }
 0x2dc   :  { %v2220_v3 = vadd.f32 %v2219_v39, %v2149_v1 }
 0x2de   :  { %v2745_v52 = vsel %vm2744_vm8, %v2220_v3, %v2726_v51  ;;  %v2739_v3 = vrot.slane %v2580_v49, 4 }
 0x2df   :  { %v2749_v53 = vsel %vm2748_vm9, %v2745_v52, %v2747_v56  ;;  %v2171_v56 = vperm.slane %v2143_v36, 6 }
 0x2e0   :  { %2771 = vst [vmem:[%s5890_s8] sm:$0xff] %v2749_v53  ;;  %v2399_v62 = vpop.f32.mrf.mxu3 }
 0x2e1   :  { %v2400_v61 = vadd.f32 %v2399_v62, %v2158_v11  ;;  %v2659_v44 = vpop.f32.mrf.mxu0 }
 0x2e2   :  { %v2679_v57 = vpop.f32.mrf.mxu1  ;;  %v2660_v7 = vadd.f32 %v2659_v44, %v2171_v56 }
 0x2e3   :  { %v2732_v26 = vrot.slane %v2400_v61, 6  ;;  %v2680_v63 = vadd.f32 %v2679_v57, %v2172_v10 }
 0x2e4   :  { %v2299_v4 = vpop.f32.mrf.mxu2 }
 0x2e5   :  { %v2300_v9 = vadd.f32 %v2299_v4, %v2153_v58  ;;  %v2760_v58 = vsel %vm2746_vm7, %v2739_v3, %v2740_v41  ;;  %v2743_v11 = vrot.slane %v2680_v63, 2 }
 0x2e7   :  { %v2750_v13 = vsel %vm2744_vm8, %v2300_v9, %v2729_v8  ;;  %v2169_v8 = vperm.slane %v2143_v36, 4  ;;  %v2742_v9 = vrot.slane %v2660_v7, 4 }
 0x2e8   :  { %v2752_v16 = vsel %vm2748_vm9, %v2750_v13, %v2751_v12 }
 0x2e9   :  { %2772 = vst [vmem:[%s5890_s8 + $0x8] sm:$0xff] %v2752_v16  ;;  %v2479_v19 = vpop.f32.mrf.mxu3  ;;  %v2763_v15 = vsel %vm2746_vm7, %v2742_v9, %v2743_v11 }
 0x2ea   :  { %v2480_v42 = vadd.f32 %v2479_v19, %v2162_v30 }
 0x2ec   :  { %v2735_v47 = vrot.slane %v2480_v42, 6 }
 0x2ed   :  { %v2379_v25 = vpop.f32.mrf.mxu2 }
 0x2ee   :  { %v2380_v0 = vadd.f32 %v2379_v25, %v2157_v18 }
 0x2f0   :  { %v2753_v35 = vsel %vm2744_vm8, %v2380_v0, %v2732_v26 }
 0x2f1   :  { %v2755_v28 = vsel %vm2748_vm9, %v2753_v35, %v2754_v27  ;;  %v2559_v55 = vpop.f32.mrf.mxu3 }
 0x2f2   :  { %2773 = vst [vmem:[%s5890_s8 + $0x10] sm:$0xff] %v2755_v28  ;;  %v2560_v51 = vadd.f32 %v2559_v55, %v2166_v48 }
 0x2f4   :  { %v2738_v53 = vrot.slane %v2560_v51, 6 }
 0x2f5   :  { %v2459_v46 = vpop.f32.mrf.mxu2 }
 0x2f6   :  { %v2460_v1 = vadd.f32 %v2459_v46, %v2161_v43 }
 0x2f8   :  { %v2756_v50 = vsel %vm2744_vm8, %v2460_v1, %v2735_v47 }
 0x2f9   :  { %v2758_v39 = vsel %vm2748_vm9, %v2756_v50, %v2757_v6  ;;  %v2639_v62 = vpop.f32.mrf.mxu3 }
 0x2fa   :  { %2774 = vst [vmem:[%s5890_s8 + $0x18] sm:$0xff] %v2758_v39  ;;  %v2640_v4 = vadd.f32 %v2639_v62, %v2170_v59 }
 0x2fc   :  { %v2741_v13 = vrot.slane %v2640_v4, 6 }
 0x2fd   :  { %v2539_v52 = vpop.f32.mrf.mxu2 }
 0x2fe   :  { %v2540_v40 = vadd.f32 %v2539_v52, %v2165_v54 }
 0x300   :  { %v2759_v2 = vsel %vm2744_vm8, %v2540_v40, %v2738_v53 }
 0x301   :  { %v2761_v60 = vsel %vm2748_vm9, %v2759_v2, %v2760_v58 }
 0x302   :  { %2775 = vst [vmem:[%s5890_s8 + $0x20] sm:$0xff] %v2761_v60 }
 0x305   :  { %v2619_v12 = vpop.f32.mrf.mxu2 }
 0x306   :  { %v2620_v14 = vadd.f32 %v2619_v12, %v2169_v8 }
 0x308   :  { %v2762_v31 = vsel %vm2744_vm8, %v2620_v14, %v2741_v13 }
 0x309   :  { %v2764_v16 = vsel %vm2748_vm9, %v2762_v31, %v2763_v15 }
 0x30a   :  { %2776 = vst [vmem:[%s5890_s8 + $0x28] sm:$0xff] %v2764_v16 }
 0x30d   :  { %v2699_v61 = vpop.f32.mrf.mxu2 }
 0x30e   :  { %v2700_v18 = vadd.f32 %v2825_v17, %v2699_v61 }
 0x310   :  { %2778 = vst.msk [vmem:[%s5890_s8 + $0x30] sm:$0x3] %vm2777_vm10, %v2700_v18 }

// kernel: vae_nelbo_pallas.9
= control target key start
LH: loop header
LB: loop body
LE: loop exit
PB: predicated region body
PF: predicated region fallthrough
CT: control target
= control target key end

     0   :  { %vm1899_vm0 = vcmask 261120   ;;  %s3937_s1 = inlined_call_operand.vmem [shape: f32[1024,32], index: 1, kind: input, shape index: {}]   ;;  %s3938_s0 = inlined_call_operand.vmem [shape: f32[392,1024], index: 0, kind: input, shape index: {}]   ;;  %s3939_s2 = inlined_call_operand.vmem [shape: f32[1,32], index: 2, kind: input, shape index: {}]   ;;  %s3940_s3 = inlined_call_operand.vmem [shape: f32[392,32], index: 3, kind: output, shape index: {}]  }
   0x1   :  { %v421_v0 = vld [vmem:[%s3937_s1 + $0x78] sm:$0xff]  ;;  %v420_v2 = vld [vmem:[%s3937_s1 + $0x70] sm:$0xff]  ;;  %v419_v6 = vld [vmem:[%s3937_s1 + $0x68] sm:$0xff] }
   0x2   :  { %v453_v1 = vld [vmem:[%s3937_s1 + $0x178] sm:$0xff]  ;;  %538 = vmatpush.msra.mxu0 %v421_v0  ;;  %v452_v4 = vld [vmem:[%s3937_s1 + $0x170] sm:$0xff]  ;;  %v451_v8 = vld [vmem:[%s3937_s1 + $0x168] sm:$0xff] }
   0x3   :  { %866 = vmatpush.msra.mxu2 %v453_v1  ;;  %v437_v3 = vld [vmem:[%s3937_s1 + $0xf8] sm:$0xff]  ;;  %v436_v7 = vld [vmem:[%s3937_s1 + $0xf0] sm:$0xff]  ;;  %v435_v10 = vld [vmem:[%s3937_s1 + $0xe8] sm:$0xff] }
   0x4   :  { %v469_v5 = vld [vmem:[%s3937_s1 + $0x1f8] sm:$0xff]  ;;  %702 = vmatpush.msra.mxu1 %v437_v3  ;;  %539 = vmatpush.msra.mxu0 %v420_v2  ;;  %v468_v9 = vld [vmem:[%s3937_s1 + $0x1f0] sm:$0xff]  ;;  %v418_v11 = vld [vmem:[%s3937_s1 + $0x60] sm:$0xff] }
   0x5   :  { %1030 = vmatpush.msra.mxu3 %v469_v5  ;;  %867 = vmatpush.msra.mxu2 %v452_v4  ;;  %v450_v12 = vld [vmem:[%s3937_s1 + $0x160] sm:$0xff]  ;;  %v467_v13 = vld [vmem:[%s3937_s1 + $0x1e8] sm:$0xff]  ;;  %v417_v16 = vld [vmem:[%s3937_s1 + $0x58] sm:$0xff] }
   0x6   :  { %703 = vmatpush.msra.mxu1 %v436_v7  ;;  %540 = vmatpush.msra.mxu0 %v419_v6  ;;  %v434_v14 = vld [vmem:[%s3937_s1 + $0xe0] sm:$0xff]  ;;  %v449_v17 = vld [vmem:[%s3937_s1 + $0x158] sm:$0xff]  ;;  %v416_v20 = vld [vmem:[%s3937_s1 + $0x50] sm:$0xff] }
   0x7   :  { %1031 = vmatpush.msra.mxu3 %v468_v9  ;;  %868 = vmatpush.msra.mxu2 %v451_v8  ;;  %v466_v15 = vld [vmem:[%s3937_s1 + $0x1e0] sm:$0xff]  ;;  %v433_v18 = vld [vmem:[%s3937_s1 + $0xd8] sm:$0xff]  ;;  %v448_v21 = vld [vmem:[%s3937_s1 + $0x150] sm:$0xff] }
   0x8   :  { %704 = vmatpush.msra.mxu1 %v435_v10  ;;  %541 = vmatpush.msra.mxu0 %v418_v11  ;;  %v465_v19 = vld [vmem:[%s3937_s1 + $0x1d8] sm:$0xff]  ;;  %v432_v22 = vld [vmem:[%s3937_s1 + $0xd0] sm:$0xff]  ;;  %v415_v24 = vld [vmem:[%s3937_s1 + $0x48] sm:$0xff] }
   0x9   :  { %1032 = vmatpush.msra.mxu3 %v467_v13  ;;  %869 = vmatpush.msra.mxu2 %v450_v12  ;;  %v464_v23 = vld [vmem:[%s3937_s1 + $0x1d0] sm:$0xff]  ;;  %v447_v25 = vld [vmem:[%s3937_s1 + $0x148] sm:$0xff]  ;;  %v414_v28 = vld [vmem:[%s3937_s1 + $0x40] sm:$0xff] }
   0xa   :  { %705 = vmatpush.msra.mxu1 %v434_v14  ;;  %542 = vmatpush.msra.mxu0 %v417_v16  ;;  %v431_v26 = vld [vmem:[%s3937_s1 + $0xc8] sm:$0xff]  ;;  %v446_v29 = vld [vmem:[%s3937_s1 + $0x140] sm:$0xff]  ;;  %v413_v32 = vld [vmem:[%s3937_s1 + $0x38] sm:$0xff] }
   0xb   :  { %1033 = vmatpush.msra.mxu3 %v466_v15  ;;  %870 = vmatpush.msra.mxu2 %v449_v17  ;;  %v463_v27 = vld [vmem:[%s3937_s1 + $0x1c8] sm:$0xff]  ;;  %v430_v30 = vld [vmem:[%s3937_s1 + $0xc0] sm:$0xff]  ;;  %v445_v33 = vld [vmem:[%s3937_s1 + $0x138] sm:$0xff] }
   0xc   :  { %706 = vmatpush.msra.mxu1 %v433_v18  ;;  %543 = vmatpush.msra.mxu0 %v416_v20  ;;  %v462_v31 = vld [vmem:[%s3937_s1 + $0x1c0] sm:$0xff]  ;;  %v429_v34 = vld [vmem:[%s3937_s1 + $0xb8] sm:$0xff]  ;;  %v412_v36 = vld [vmem:[%s3937_s1 + $0x30] sm:$0xff] }
   0xd   :  { %1034 = vmatpush.msra.mxu3 %v465_v19  ;;  %871 = vmatpush.msra.mxu2 %v448_v21  ;;  %v461_v35 = vld [vmem:[%s3937_s1 + $0x1b8] sm:$0xff]  ;;  %v444_v37 = vld [vmem:[%s3937_s1 + $0x130] sm:$0xff]  ;;  %v411_v40 = vld [vmem:[%s3937_s1 + $0x28] sm:$0xff] }
   0xe   :  { %707 = vmatpush.msra.mxu1 %v432_v22  ;;  %544 = vmatpush.msra.mxu0 %v415_v24  ;;  %v428_v38 = vld [vmem:[%s3937_s1 + $0xb0] sm:$0xff]  ;;  %v443_v41 = vld [vmem:[%s3937_s1 + $0x128] sm:$0xff]  ;;  %v410_v44 = vld [vmem:[%s3937_s1 + $0x20] sm:$0xff] }
   0xf   :  { %1035 = vmatpush.msra.mxu3 %v464_v23  ;;  %872 = vmatpush.msra.mxu2 %v447_v25  ;;  %v460_v39 = vld [vmem:[%s3937_s1 + $0x1b0] sm:$0xff]  ;;  %v427_v42 = vld [vmem:[%s3937_s1 + $0xa8] sm:$0xff]  ;;  %v442_v45 = vld [vmem:[%s3937_s1 + $0x120] sm:$0xff] }
  0x10   :  { %708 = vmatpush.msra.mxu1 %v431_v26  ;;  %545 = vmatpush.msra.mxu0 %v414_v28  ;;  %v459_v43 = vld [vmem:[%s3937_s1 + $0x1a8] sm:$0xff]  ;;  %v426_v46 = vld [vmem:[%s3937_s1 + $0xa0] sm:$0xff]  ;;  %v409_v48 = vld [vmem:[%s3937_s1 + $0x18] sm:$0xff] }
  0x11   :  { %1036 = vmatpush.msra.mxu3 %v463_v27  ;;  %873 = vmatpush.msra.mxu2 %v446_v29  ;;  %v458_v47 = vld [vmem:[%s3937_s1 + $0x1a0] sm:$0xff]  ;;  %v441_v49 = vld [vmem:[%s3937_s1 + $0x118] sm:$0xff]  ;;  %v408_v52 = vld [vmem:[%s3937_s1 + $0x10] sm:$0xff] }
  0x12   :  { %709 = vmatpush.msra.mxu1 %v430_v30  ;;  %546 = vmatpush.msra.mxu0 %v413_v32  ;;  %v425_v50 = vld [vmem:[%s3937_s1 + $0x98] sm:$0xff]  ;;  %v440_v53 = vld [vmem:[%s3937_s1 + $0x110] sm:$0xff]  ;;  %v407_v56 = vld [vmem:[%s3937_s1 + $0x8] sm:$0xff] }
  0x13   :  { %1037 = vmatpush.msra.mxu3 %v462_v31  ;;  %874 = vmatpush.msra.mxu2 %v445_v33  ;;  %v457_v51 = vld [vmem:[%s3937_s1 + $0x198] sm:$0xff]  ;;  %v424_v54 = vld [vmem:[%s3937_s1 + $0x90] sm:$0xff]  ;;  %v439_v57 = vld [vmem:[%s3937_s1 + $0x108] sm:$0xff] }
  0x14   :  { %710 = vmatpush.msra.mxu1 %v429_v34  ;;  %547 = vmatpush.msra.mxu0 %v412_v36  ;;  %v456_v55 = vld [vmem:[%s3937_s1 + $0x190] sm:$0xff]  ;;  %v423_v58 = vld [vmem:[%s3937_s1 + $0x88] sm:$0xff]  ;;  %v406_v60 = vld [vmem:[%s3937_s1] sm:$0xff] }
  0x15   :  { %1038 = vmatpush.msra.mxu3 %v461_v35  ;;  %875 = vmatpush.msra.mxu2 %v444_v37  ;;  %v455_v59 = vld [vmem:[%s3937_s1 + $0x188] sm:$0xff]  ;;  %v438_v61 = vld [vmem:[%s3937_s1 + $0x100] sm:$0xff]  ;;  %v16_v63 = vld [vmem:[%s3938_s0 + $0x10] sm:$0xff] }
  0x16   :  { %711 = vmatpush.msra.mxu1 %v428_v38  ;;  %548 = vmatpush.msra.mxu0 %v411_v40  ;;  %v14_v62 = vld [vmem:[%s3938_s0] sm:$0xff]  ;;  %v517_v0 = vld [vmem:[%s3937_s1 + $0x378] sm:$0xff]  ;;  %v15_v3 = vld [vmem:[%s3938_s0 + $0x8] sm:$0xff] }
  0x17   :  { %1039 = vmatpush.msra.mxu3 %v460_v39  ;;  %876 = vmatpush.msra.mxu2 %v443_v41  ;;  %v422_v1 = vld [vmem:[%s3937_s1 + $0x80] sm:$0xff]  ;;  %v17_v4 = vld [vmem:[%s3938_s0 + $0x18] sm:$0xff]  ;;  %v516_v8 = vld [vmem:[%s3937_s1 + $0x370] sm:$0xff] }
  0x18   :  { %712 = vmatpush.msra.mxu1 %v427_v42  ;;  %549 = vmatpush.msra.mxu0 %v410_v44  ;;  %v454_v2 = vld [vmem:[%s3937_s1 + $0x180] sm:$0xff]  ;;  %v485_v5 = vld [vmem:[%s3937_s1 + $0x278] sm:$0xff]  ;;  %v484_v9 = vld [vmem:[%s3937_s1 + $0x270] sm:$0xff] }
  0x19   :  { %1040 = vmatpush.msra.mxu3 %v459_v43  ;;  %877 = vmatpush.msra.mxu2 %v442_v45  ;;  %v533_v6 = vld [vmem:[%s3937_s1 + $0x3f8] sm:$0xff]  ;;  %v532_v10 = vld [vmem:[%s3937_s1 + $0x3f0] sm:$0xff]  ;;  %v22_v12 = vld [vmem:[%s3938_s0 + $0x40] sm:$0xff] }
  0x1a   :  { %713 = vmatpush.msra.mxu1 %v426_v46  ;;  %550 = vmatpush.msra.mxu0 %v409_v48  ;;  %v501_v7 = vld [vmem:[%s3937_s1 + $0x2f8] sm:$0xff]  ;;  %v500_v11 = vld [vmem:[%s3937_s1 + $0x2f0] sm:$0xff]  ;;  %v23_v14 = vld [vmem:[%s3938_s0 + $0x48] sm:$0xff] }
  0x1b   :  { %1041 = vmatpush.msra.mxu3 %v458_v47  ;;  %878 = vmatpush.msra.mxu2 %v441_v49  ;;  %v24_v13 = vld [vmem:[%s3938_s0 + $0x50] sm:$0xff]  ;;  %v25_v15 = vld [vmem:[%s3938_s0 + $0x58] sm:$0xff]  ;;  %v30_v16 = vld [vmem:[%s3938_s0 + $0x80] sm:$0xff] }
  0x1c   :  { %714 = vmatpush.msra.mxu1 %v425_v50  ;;  %551 = vmatpush.msra.mxu0 %v408_v52  ;;  %v32_v17 = vld [vmem:[%s3938_s0 + $0x90] sm:$0xff]  ;;  %v31_v18 = vld [vmem:[%s3938_s0 + $0x88] sm:$0xff]  ;;  %v33_v19 = vld [vmem:[%s3938_s0 + $0x98] sm:$0xff] }
  0x1d   :  { %1042 = vmatpush.msra.mxu3 %v457_v51  ;;  %879 = vmatpush.msra.mxu2 %v440_v53  ;;  %v515_v20 = vld [vmem:[%s3937_s1 + $0x368] sm:$0xff]  ;;  %v38_v24 = vld [vmem:[%s3938_s0 + $0xc0] sm:$0xff]  ;;  %v40_v25 = vld [vmem:[%s3938_s0 + $0xd0] sm:$0xff] }
  0x1e   :  { %715 = vmatpush.msra.mxu1 %v424_v54  ;;  %552 = vmatpush.msra.mxu0 %v407_v56  ;;  %v483_v21 = vld [vmem:[%s3937_s1 + $0x268] sm:$0xff]  ;;  %v41_v27 = vld [vmem:[%s3938_s0 + $0xd8] sm:$0xff]  ;;  %v46_v28 = vld [vmem:[%s3938_s0 + $0x100] sm:$0xff] }
  0x1f   :  { %1043 = vmatpush.msra.mxu3 %v456_v55  ;;  %880 = vmatpush.msra.mxu2 %v439_v57  ;;  %v531_v22 = vld [vmem:[%s3937_s1 + $0x3e8] sm:$0xff]  ;;  %v48_v29 = vld [vmem:[%s3938_s0 + $0x110] sm:$0xff]  ;;  %v49_v31 = vld [vmem:[%s3938_s0 + $0x118] sm:$0xff] }
  0x20   :  { %716 = vmatpush.msra.mxu1 %v423_v58  ;;  %553 = vmatpush.msra.mxu0 %v406_v60  ;;  %v499_v23 = vld [vmem:[%s3937_s1 + $0x2e8] sm:$0xff]  ;;  %v54_v32 = vld [vmem:[%s3938_s0 + $0x140] sm:$0xff]  ;;  %v56_v33 = vld [vmem:[%s3938_s0 + $0x150] sm:$0xff] }
  0x21   :  { %1044 = vmatpush.msra.mxu3 %v455_v59  ;;  %881 = vmatpush.msra.mxu2 %v438_v61  ;;  %v39_v26 = vld [vmem:[%s3938_s0 + $0xc8] sm:$0xff]  ;;  %v57_v35 = vld [vmem:[%s3938_s0 + $0x158] sm:$0xff]  ;;  %v514_v36 = vld [vmem:[%s3937_s1 + $0x360] sm:$0xff] }
  0x22   :  { %554 = vmatmul.f32.vlgmr.msra.gmra.mxu0 %v14_v62  ;;  %882 = vmatmul.f32.vlgmr.msra.gmra.mxu2 %v16_v63  ;;  %v47_v30 = vld [vmem:[%s3938_s0 + $0x108] sm:$0xff]  ;;  %v482_v37 = vld [vmem:[%s3937_s1 + $0x260] sm:$0xff]  ;;  %v64_v41 = vld [vmem:[%s3938_s0 + $0x190] sm:$0xff] }
  0x23   :  { %1522 = vmatpush.msrb.mxu2 %v517_v0  ;;  %717 = vmatpush.msra.mxu1 %v422_v1  ;;  %v55_v34 = vld [vmem:[%s3938_s0 + $0x148] sm:$0xff]  ;;  %v530_v38 = vld [vmem:[%s3937_s1 + $0x3e0] sm:$0xff]  ;;  %v65_v43 = vld [vmem:[%s3938_s0 + $0x198] sm:$0xff] }
  0x24   :  { %1045 = vmatpush.msra.mxu3 %v454_v2  ;;  %718 = vmatmul.f32.vlgmr.msra.gmra.mxu1 %v15_v3  ;;  %v498_v39 = vld [vmem:[%s3937_s1 + $0x2e0] sm:$0xff]  ;;  %v63_v42 = vld [vmem:[%s3938_s0 + $0x188] sm:$0xff]  ;;  %v72_v45 = vld [vmem:[%s3938_s0 + $0x1d0] sm:$0xff] }
  0x25   :  { %1046 = vmatmul.f32.vlgmr.msra.gmra.mxu3 %v17_v4  ;;  %1194 = vmatpush.msrb.mxu0 %v485_v5  ;;  %v62_v40 = vld [vmem:[%s3938_s0 + $0x180] sm:$0xff]  ;;  %v71_v46 = vld [vmem:[%s3938_s0 + $0x1c8] sm:$0xff]  ;;  %v73_v47 = vld [vmem:[%s3938_s0 + $0x1d8] sm:$0xff] }
  0x26   :  { %1686 = vmatpush.msrb.mxu3 %v533_v6  ;;  %1358 = vmatpush.msrb.mxu1 %v501_v7  ;;  %v70_v44 = vld [vmem:[%s3938_s0 + $0x1c0] sm:$0xff]  ;;  %v80_v49 = vld [vmem:[%s3938_s0 + $0x210] sm:$0xff]  ;;  %v79_v50 = vld [vmem:[%s3938_s0 + $0x208] sm:$0xff] }
  0x27   :  { %1523 = vmatpush.msrb.mxu2 %v516_v8  ;;  %1195 = vmatpush.msrb.mxu0 %v484_v9  ;;  %v78_v48 = vld [vmem:[%s3938_s0 + $0x200] sm:$0xff]  ;;  %v81_v51 = vld [vmem:[%s3938_s0 + $0x218] sm:$0xff]  ;;  %v88_v57 = vld [vmem:[%s3938_s0 + $0x250] sm:$0xff] }
  0x28   :  { %1687 = vmatpush.msrb.mxu3 %v532_v10  ;;  %1359 = vmatpush.msrb.mxu1 %v500_v11  ;;  %v513_v52 = vld [vmem:[%s3937_s1 + $0x358] sm:$0xff]  ;;  %v86_v56 = vld [vmem:[%s3938_s0 + $0x240] sm:$0xff]  ;;  %v87_v58 = vld [vmem:[%s3938_s0 + $0x248] sm:$0xff] }
  0x29   :  { %1524 = vmatpush.msrb.mxu2 %v515_v20  ;;  %1196 = vmatpush.msrb.mxu0 %v483_v21  ;;  %v481_v53 = vld [vmem:[%s3937_s1 + $0x258] sm:$0xff]  ;;  %v94_v60 = vld [vmem:[%s3938_s0 + $0x280] sm:$0xff]  ;;  %v96_v61 = vld [vmem:[%s3938_s0 + $0x290] sm:$0xff] }
  0x2a   :  { %557 = vmatmul.f32.gmra.mxu0 %v22_v12  ;;  %885 = vmatmul.f32.gmra.mxu2 %v24_v13  ;;  %v529_v54 = vld [vmem:[%s3937_s1 + $0x3d8] sm:$0xff]  ;;  %v95_v62 = vld [vmem:[%s3938_s0 + $0x288] sm:$0xff]  ;;  %v102_v0 = vld [vmem:[%s3938_s0 + $0x2c0] sm:$0xff] }
  0x2b   :  { %1688 = vmatpush.msrb.mxu3 %v531_v22  ;;  %1360 = vmatpush.msrb.mxu1 %v499_v23  ;;  %v497_v55 = vld [vmem:[%s3937_s1 + $0x2d8] sm:$0xff]  ;;  %v104_v1 = vld [vmem:[%s3938_s0 + $0x2d0] sm:$0xff]  ;;  %v103_v2 = vld [vmem:[%s3938_s0 + $0x2c8] sm:$0xff] }
  0x2c   :  { %721 = vmatmul.f32.gmra.mxu1 %v23_v14  ;;  %1525 = vmatpush.msrb.mxu2 %v514_v36  ;;  %v89_v59 = vld [vmem:[%s3938_s0 + $0x258] sm:$0xff]  ;;  %v512_v4 = vld [vmem:[%s3937_s1 + $0x350] sm:$0xff]  ;;  %v110_v5 = vld [vmem:[%s3938_s0 + $0x300] sm:$0xff] }
  0x2d   :  { %1049 = vmatmul.f32.gmra.mxu3 %v25_v15  ;;  %1197 = vmatpush.msrb.mxu0 %v482_v37  ;;  %v97_v63 = vld [vmem:[%s3938_s0 + $0x298] sm:$0xff]  ;;  %v112_v6 = vld [vmem:[%s3938_s0 + $0x310] sm:$0xff]  ;;  %v111_v9 = vld [vmem:[%s3938_s0 + $0x308] sm:$0xff] }
  0x2e   :  { %1689 = vmatpush.msrb.mxu3 %v530_v38  ;;  %1361 = vmatpush.msrb.mxu1 %v498_v39  ;;  %v105_v3 = vld [vmem:[%s3938_s0 + $0x2d8] sm:$0xff]  ;;  %v480_v7 = vld [vmem:[%s3937_s1 + $0x250] sm:$0xff]  ;;  %v118_v12 = vld [vmem:[%s3938_s0 + $0x340] sm:$0xff] }
  0x2f   :  { %1526 = vmatpush.msrb.mxu2 %v513_v52  ;;  %1198 = vmatpush.msrb.mxu0 %v481_v53  ;;  %v528_v8 = vld [vmem:[%s3937_s1 + $0x3d0] sm:$0xff]  ;;  %v113_v10 = vld [vmem:[%s3938_s0 + $0x318] sm:$0xff]  ;;  %v119_v14 = vld [vmem:[%s3938_s0 + $0x348] sm:$0xff] }
  0x30   :  { %1690 = vmatpush.msrb.mxu3 %v529_v54  ;;  %1362 = vmatpush.msrb.mxu1 %v497_v55  ;;  %v496_v11 = vld [vmem:[%s3937_s1 + $0x2d0] sm:$0xff]  ;;  %v121_v15 = vld [vmem:[%s3938_s0 + $0x358] sm:$0xff]  ;;  %v511_v20 = vld [vmem:[%s3937_s1 + $0x348] sm:$0xff] }
  0x31   :  { %1527 = vmatpush.msrb.mxu2 %v512_v4  ;;  %1199 = vmatpush.msrb.mxu0 %v480_v7  ;;  %v120_v13 = vld [vmem:[%s3938_s0 + $0x350] sm:$0xff]  ;;  %v134_v21 = vld [vmem:[%s3938_s0 + $0x3c0] sm:$0xff]  ;;  %v135_v23 = vld [vmem:[%s3938_s0 + $0x3c8] sm:$0xff] }
  0x32   :  { %560 = vmatmul.f32.gmra.mxu0 %v30_v16  ;;  %888 = vmatmul.f32.gmra.mxu2 %v32_v17  ;;  %v126_v16 = vld [vmem:[%s3938_s0 + $0x380] sm:$0xff]  ;;  %v128_v17 = vld [vmem:[%s3938_s0 + $0x390] sm:$0xff]  ;;  %v145_v36 = vld [vmem:[%s3938_s0 + $0x418] sm:$0xff] }
  0x33   :  { %1691 = vmatpush.msrb.mxu3 %v528_v8  ;;  %1363 = vmatpush.msrb.mxu1 %v496_v11  ;;  %v136_v22 = vld [vmem:[%s3938_s0 + $0x3d0] sm:$0xff]  ;;  %v158_v53 = vld [vmem:[%s3938_s0 + $0x480] sm:$0xff] }
  0x34   :  { %724 = vmatmul.f32.gmra.mxu1 %v31_v18  ;;  %v127_v18 = vld [vmem:[%s3938_s0 + $0x388] sm:$0xff]  ;;  %1528 = vmatpush.msrb.mxu2 %v511_v20  ;;  %v160_v54 = vld [vmem:[%s3938_s0 + $0x490] sm:$0xff]  ;;  %v166_v4 = vld [vmem:[%s3938_s0 + $0x4c0] sm:$0xff] }
  0x35   :  { %1052 = vmatmul.f32.gmra.mxu3 %v33_v19  ;;  %v129_v19 = vld [vmem:[%s3938_s0 + $0x398] sm:$0xff] }
  0x3a   :  { %563 = vmatmul.f32.gmra.mxu0 %v38_v24  ;;  %891 = vmatmul.f32.gmra.mxu2 %v40_v25  ;;  %v479_v24 = vld [vmem:[%s3937_s1 + $0x248] sm:$0xff] }
  0x3b   :  { %v527_v25 = vld [vmem:[%s3937_s1 + $0x3c8] sm:$0xff]  ;;  %1200 = vmatpush.msrb.mxu0 %v479_v24  ;;  %v177_v24 = vld [vmem:[%s3938_s0 + $0x518] sm:$0xff] }
  0x3c   :  { %727 = vmatmul.f32.gmra.mxu1 %v39_v26  ;;  %v137_v26 = vld [vmem:[%s3938_s0 + $0x3d8] sm:$0xff]  ;;  %1692 = vmatpush.msrb.mxu3 %v527_v25 }
  0x3d   :  { %1055 = vmatmul.f32.gmra.mxu3 %v41_v27  ;;  %v495_v27 = vld [vmem:[%s3937_s1 + $0x2c8] sm:$0xff] }
  0x3e   :  { %1364 = vmatpush.msrb.mxu1 %v495_v27  ;;  %v509_v27 = vld [vmem:[%s3937_s1 + $0x338] sm:$0xff] }
  0x42   :  { %566 = vmatmul.f32.gmra.mxu0 %v46_v28  ;;  %894 = vmatmul.f32.gmra.mxu2 %v48_v29  ;;  %v2446_v28 = vld [vmem:[%s3939_s2] ss:$0 sm:$0xff] }
  0x44   :  { %730 = vmatmul.f32.gmra.mxu1 %v47_v30  ;;  %v142_v30 = vld [vmem:[%s3938_s0 + $0x400] sm:$0xff] }
  0x45   :  { %1058 = vmatmul.f32.gmra.mxu3 %v49_v31  ;;  %v144_v31 = vld [vmem:[%s3938_s0 + $0x410] sm:$0xff] }
  0x4a   :  { %569 = vmatmul.f32.gmra.mxu0 %v54_v32  ;;  %897 = vmatmul.f32.gmra.mxu2 %v56_v33 }
  0x4c   :  { %733 = vmatmul.f32.gmra.mxu1 %v55_v34  ;;  %v143_v34 = vld [vmem:[%s3938_s0 + $0x408] sm:$0xff] }
  0x4d   :  { %1061 = vmatmul.f32.gmra.mxu3 %v57_v35 }
  0x52   :  { %572 = vmatmul.f32.gmra.mxu0 %v62_v40  ;;  %900 = vmatmul.f32.gmra.mxu2 %v64_v41  ;;  %v150_v40 = vld [vmem:[%s3938_s0 + $0x440] sm:$0xff]  ;;  %v152_v41 = vld [vmem:[%s3938_s0 + $0x450] sm:$0xff] }
  0x54   :  { %736 = vmatmul.f32.gmra.mxu1 %v63_v42 }
  0x55   :  { %1064 = vmatmul.f32.gmra.mxu3 %v65_v43 }
  0x5a   :  { %575 = vmatmul.f32.gmra.mxu0 %v70_v44  ;;  %903 = vmatmul.f32.gmra.mxu2 %v72_v45 }
  0x5c   :  { %739 = vmatmul.f32.gmra.mxu1 %v71_v46  ;;  %v151_v46 = vld [vmem:[%s3938_s0 + $0x448] sm:$0xff] }
  0x5d   :  { %1067 = vmatmul.f32.gmra.mxu3 %v73_v47 }
  0x62   :  { %578 = vmatmul.f32.gmra.mxu0 %v78_v48  ;;  %906 = vmatmul.f32.gmra.mxu2 %v80_v49  ;;  %v153_v48 = vld [vmem:[%s3938_s0 + $0x458] sm:$0xff] }
  0x64   :  { %742 = vmatmul.f32.gmra.mxu1 %v79_v50 }
  0x65   :  { %1070 = vmatmul.f32.gmra.mxu3 %v81_v51  ;;  %v510_v51 = vld [vmem:[%s3937_s1 + $0x340] sm:$0xff] }
  0x66   :  { %1529 = vmatpush.msrb.mxu2 %v510_v51 }
  0x68   :  { %1530 = vmatpush.msrb.mxu2 %v509_v27 }
  0x6a   :  { %581 = vmatmul.f32.gmra.mxu0 %v86_v56  ;;  %909 = vmatmul.f32.gmra.mxu2 %v88_v57 }
  0x6c   :  { %745 = vmatmul.f32.gmra.mxu1 %v87_v58 }
  0x6d   :  { %1073 = vmatmul.f32.gmra.mxu3 %v89_v59  ;;  %v159_v59 = vld [vmem:[%s3938_s0 + $0x488] sm:$0xff] }
  0x72   :  { %584 = vmatmul.f32.gmra.mxu0 %v94_v60  ;;  %912 = vmatmul.f32.gmra.mxu2 %v96_v61  ;;  %v478_v60 = vld [vmem:[%s3937_s1 + $0x240] sm:$0xff] }
  0x73   :  { %v526_v61 = vld [vmem:[%s3937_s1 + $0x3c0] sm:$0xff]  ;;  %1201 = vmatpush.msrb.mxu0 %v478_v60  ;;  %v200_v60 = vld [vmem:[%s3938_s0 + $0x5d0] sm:$0xff] }
  0x74   :  { %748 = vmatmul.f32.gmra.mxu1 %v95_v62  ;;  %1693 = vmatpush.msrb.mxu3 %v526_v61 }
  0x75   :  { %1076 = vmatmul.f32.gmra.mxu3 %v97_v63  ;;  %v161_v63 = vld [vmem:[%s3938_s0 + $0x498] sm:$0xff] }
  0x7a   :  { %587 = vmatmul.f32.gmra.mxu0 %v102_v0  ;;  %915 = vmatmul.f32.gmra.mxu2 %v104_v1  ;;  %v494_v0 = vld [vmem:[%s3937_s1 + $0x2c0] sm:$0xff] }
  0x7b   :  { %1365 = vmatpush.msrb.mxu1 %v494_v0 }
  0x7c   :  { %751 = vmatmul.f32.gmra.mxu1 %v103_v2 }
  0x7d   :  { %1079 = vmatmul.f32.gmra.mxu3 %v105_v3 }
  0x82   :  { %590 = vmatmul.f32.gmra.mxu0 %v110_v5  ;;  %918 = vmatmul.f32.gmra.mxu2 %v112_v6  ;;  %v168_v5 = vld [vmem:[%s3938_s0 + $0x4d0] sm:$0xff] }
  0x84   :  { %754 = vmatmul.f32.gmra.mxu1 %v111_v9 }
  0x85   :  { %1082 = vmatmul.f32.gmra.mxu3 %v113_v10  ;;  %v167_v10 = vld [vmem:[%s3938_s0 + $0x4c8] sm:$0xff] }
  0x8a   :  { %593 = vmatmul.f32.gmra.mxu0 %v118_v12  ;;  %921 = vmatmul.f32.gmra.mxu2 %v120_v13  ;;  %v169_v12 = vld [vmem:[%s3938_s0 + $0x4d8] sm:$0xff] }
  0x8c   :  { %757 = vmatmul.f32.gmra.mxu1 %v119_v14 }
  0x8d   :  { %1085 = vmatmul.f32.gmra.mxu3 %v121_v15 }
  0x92   :  { %596 = vmatmul.f32.gmra.mxu0 %v126_v16  ;;  %924 = vmatmul.f32.gmra.mxu2 %v128_v17  ;;  %v174_v16 = vld [vmem:[%s3938_s0 + $0x500] sm:$0xff]  ;;  %v176_v17 = vld [vmem:[%s3938_s0 + $0x510] sm:$0xff] }
  0x94   :  { %760 = vmatmul.f32.gmra.mxu1 %v127_v18 }
  0x95   :  { %1088 = vmatmul.f32.gmra.mxu3 %v129_v19 }
  0x9a   :  { %599 = vmatmul.f32.gmra.mxu0 %v134_v21  ;;  %927 = vmatmul.f32.gmra.mxu2 %v136_v22  ;;  %v175_v22 = vld [vmem:[%s3938_s0 + $0x508] sm:$0xff] }
  0x9c   :  { %763 = vmatmul.f32.gmra.mxu1 %v135_v23 }
  0x9d   :  { %1091 = vmatmul.f32.gmra.mxu3 %v137_v26 }
  0x9f   :  { %v555_v29 = vpop.f32.mrf.mxu0 }
  0xa0   :  { %v556_v32 = vadd.f32 %v2446_v28, %v555_v29 }
  0xa1   :  { %v719_v33 = vpop.f32.mrf.mxu1 }
  0xa2   :  { %v720_v35 = vadd.f32 %v719_v33, %v556_v32  ;;  %602 = vmatmul.f32.gmra.mxu0 %v142_v30  ;;  %930 = vmatmul.f32.gmra.mxu2 %v144_v31  ;;  %v182_v30 = vld [vmem:[%s3938_s0 + $0x540] sm:$0xff]  ;;  %v184_v31 = vld [vmem:[%s3938_s0 + $0x550] sm:$0xff] }
  0xa4   :  { %766 = vmatmul.f32.gmra.mxu1 %v143_v34 }
  0xa5   :  { %1094 = vmatmul.f32.gmra.mxu3 %v145_v36  ;;  %v883_v37 = vpop.f32.mrf.mxu2  ;;  %v183_v36 = vld [vmem:[%s3938_s0 + $0x548] sm:$0xff] }
  0xa6   :  { %v884_v38 = vadd.f32 %v883_v37, %v720_v35  ;;  %v477_v37 = vld [vmem:[%s3937_s1 + $0x238] sm:$0xff] }
  0xa7   :  { %v558_v39 = vpop.f32.mrf.mxu0  ;;  %1202 = vmatpush.msrb.mxu0 %v477_v37 }
  0xa8   :  { %v559_v42 = vadd.f32 %v2446_v28, %v558_v39  ;;  %v1047_v43 = vpop.f32.mrf.mxu3 }
  0xa9   :  { %v2468_v44 = vadd.f32 %v1047_v43, %v884_v38  ;;  %v722_v45 = vpop.f32.mrf.mxu1  ;;  %v525_v38 = vld [vmem:[%s3937_s1 + $0x3b8] sm:$0xff] }
  0xaa   :  { %v723_v47 = vadd.f32 %v722_v45, %v559_v42  ;;  %605 = vmatmul.f32.gmra.mxu0 %v150_v40  ;;  %933 = vmatmul.f32.gmra.mxu2 %v152_v41  ;;  %v185_v40 = vld [vmem:[%s3938_s0 + $0x558] sm:$0xff] }
  0xab   :  { %v493_v41 = vld [vmem:[%s3937_s1 + $0x2b8] sm:$0xff]  ;;  %1694 = vmatpush.msrb.mxu3 %v525_v38 }
  0xac   :  { %769 = vmatmul.f32.gmra.mxu1 %v151_v46  ;;  %v190_v46 = vld [vmem:[%s3938_s0 + $0x580] sm:$0xff] }
  0xad   :  { %1097 = vmatmul.f32.gmra.mxu3 %v153_v48  ;;  %v886_v49 = vpop.f32.mrf.mxu2  ;;  %1366 = vmatpush.msrb.mxu1 %v493_v41 }
  0xae   :  { %v887_v50 = vadd.f32 %v886_v49, %v723_v47  ;;  %v192_v47 = vld [vmem:[%s3938_s0 + $0x590] sm:$0xff] }
  0xaf   :  { %v561_v52 = vpop.f32.mrf.mxu0 }
  0xb0   :  { %v562_v55 = vadd.f32 %v2446_v28, %v561_v52  ;;  %v1050_v56 = vpop.f32.mrf.mxu3  ;;  %v191_v52 = vld [vmem:[%s3938_s0 + $0x588] sm:$0xff] }
  0xb1   :  { %v2486_v57 = vadd.f32 %v1050_v56, %v887_v50  ;;  %v725_v58 = vpop.f32.mrf.mxu1 }
  0xb2   :  { %v726_v62 = vadd.f32 %v725_v58, %v562_v55  ;;  %608 = vmatmul.f32.gmra.mxu0 %v158_v53  ;;  %936 = vmatmul.f32.gmra.mxu2 %v160_v54  ;;  %v193_v54 = vld [vmem:[%s3938_s0 + $0x598] sm:$0xff] }
  0xb4   :  { %772 = vmatmul.f32.gmra.mxu1 %v159_v59  ;;  %v198_v59 = vld [vmem:[%s3938_s0 + $0x5c0] sm:$0xff] }
  0xb5   :  { %1100 = vmatmul.f32.gmra.mxu3 %v161_v63  ;;  %v889_v1 = vpop.f32.mrf.mxu2 }
  0xb6   :  { %v890_v2 = vadd.f32 %v889_v1, %v726_v62  ;;  %v199_v1 = vld [vmem:[%s3938_s0 + $0x5c8] sm:$0xff] }
  0xb7   :  { %v564_v3 = vpop.f32.mrf.mxu0 }
  0xb8   :  { %v565_v6 = vadd.f32 %v2446_v28, %v564_v3  ;;  %v1053_v7 = vpop.f32.mrf.mxu3  ;;  %v201_v3 = vld [vmem:[%s3938_s0 + $0x5d8] sm:$0xff] }
  0xb9   :  { %v2510_v8 = vadd.f32 %v1053_v7, %v890_v2  ;;  %v728_v9 = vpop.f32.mrf.mxu1  ;;  %v206_v7 = vld [vmem:[%s3938_s0 + $0x600] sm:$0xff] }
  0xba   :  { %v729_v11 = vadd.f32 %v728_v9, %v565_v6  ;;  %611 = vmatmul.f32.gmra.mxu0 %v166_v4  ;;  %939 = vmatmul.f32.gmra.mxu2 %v168_v5  ;;  %v208_v9 = vld [vmem:[%s3938_s0 + $0x610] sm:$0xff] }
  0xbc   :  { %775 = vmatmul.f32.gmra.mxu1 %v167_v10 }
  0xbd   :  { %1103 = vmatmul.f32.gmra.mxu3 %v169_v12  ;;  %v892_v13 = vpop.f32.mrf.mxu2 }
  0xbe   :  { %v893_v14 = vadd.f32 %v892_v13, %v729_v11 }
  0xbf   :  { %v567_v15 = vpop.f32.mrf.mxu0 }
  0xc0   :  { %v568_v18 = vadd.f32 %v2446_v28, %v567_v15  ;;  %v1056_v19 = vpop.f32.mrf.mxu3  ;;  %v508_v15 = vld [vmem:[%s3937_s1 + $0x330] sm:$0xff] }
  0xc1   :  { %v2525_v20 = vadd.f32 %v1056_v19, %v893_v14  ;;  %v731_v21 = vpop.f32.mrf.mxu1  ;;  %v207_v14 = vld [vmem:[%s3938_s0 + $0x608] sm:$0xff]  ;;  %v524_v19 = vld [vmem:[%s3937_s1 + $0x3b0] sm:$0xff]  ;;  %1531 = vmatpush.msrb.mxu2 %v508_v15 }
  0xc2   :  { %v732_v23 = vadd.f32 %v731_v21, %v568_v18  ;;  %614 = vmatmul.f32.gmra.mxu0 %v174_v16  ;;  %942 = vmatmul.f32.gmra.mxu2 %v176_v17  ;;  %v209_v17 = vld [vmem:[%s3938_s0 + $0x618] sm:$0xff]  ;;  %v476_v18 = vld [vmem:[%s3937_s1 + $0x230] sm:$0xff]  ;;  %v239_v15 = vld [vmem:[%s3938_s0 + $0x708] sm:$0xff] }
  0xc3   :  { %1203 = vmatpush.msrb.mxu0 %v476_v18  ;;  %v492_v21 = vld [vmem:[%s3937_s1 + $0x2b0] sm:$0xff]  ;;  %1695 = vmatpush.msrb.mxu3 %v524_v19 }
  0xc4   :  { %778 = vmatmul.f32.gmra.mxu1 %v175_v22 }
  0xc5   :  { %1106 = vmatmul.f32.gmra.mxu3 %v177_v24  ;;  %v895_v25 = vpop.f32.mrf.mxu2  ;;  %1367 = vmatpush.msrb.mxu1 %v492_v21 }
  0xc6   :  { %v896_v26 = vadd.f32 %v895_v25, %v732_v23  ;;  %v214_v25 = vld [vmem:[%s3938_s0 + $0x640] sm:$0xff] }
  0xc7   :  { %v570_v29 = vpop.f32.mrf.mxu0 }
  0xc8   :  { %v571_v32 = vadd.f32 %v2446_v28, %v570_v29  ;;  %v1059_v33 = vpop.f32.mrf.mxu3 }
  0xc9   :  { %v2543_v34 = vadd.f32 %v1059_v33, %v896_v26  ;;  %v734_v35 = vpop.f32.mrf.mxu1  ;;  %v216_v26 = vld [vmem:[%s3938_s0 + $0x650] sm:$0xff] }
  0xca   :  { %v735_v39 = vadd.f32 %v734_v35, %v571_v32  ;;  %617 = vmatmul.f32.gmra.mxu0 %v182_v30  ;;  %945 = vmatmul.f32.gmra.mxu2 %v184_v31  ;;  %v215_v32 = vld [vmem:[%s3938_s0 + $0x648] sm:$0xff]  ;;  %v217_v35 = vld [vmem:[%s3938_s0 + $0x658] sm:$0xff] }
  0xcc   :  { %781 = vmatmul.f32.gmra.mxu1 %v183_v36 }
  0xcd   :  { %1109 = vmatmul.f32.gmra.mxu3 %v185_v40  ;;  %v898_v42 = vpop.f32.mrf.mxu2  ;;  %v224_v40 = vld [vmem:[%s3938_s0 + $0x690] sm:$0xff] }
  0xce   :  { %v899_v43 = vadd.f32 %v898_v42, %v735_v39  ;;  %v222_v39 = vld [vmem:[%s3938_s0 + $0x680] sm:$0xff] }
  0xcf   :  { %v573_v45 = vpop.f32.mrf.mxu0 }
  0xd0   :  { %v574_v48 = vadd.f32 %v2446_v28, %v573_v45  ;;  %v1062_v49 = vpop.f32.mrf.mxu3 }
  0xd1   :  { %v2567_v50 = vadd.f32 %v1062_v49, %v899_v43  ;;  %v737_v51 = vpop.f32.mrf.mxu1 }
  0xd2   :  { %v738_v53 = vadd.f32 %v737_v51, %v574_v48  ;;  %620 = vmatmul.f32.gmra.mxu0 %v190_v46  ;;  %948 = vmatmul.f32.gmra.mxu2 %v192_v47  ;;  %v223_v46 = vld [vmem:[%s3938_s0 + $0x688] sm:$0xff]  ;;  %v225_v48 = vld [vmem:[%s3938_s0 + $0x698] sm:$0xff] }
  0xd4   :  { %784 = vmatmul.f32.gmra.mxu1 %v191_v52 }
  0xd5   :  { %1112 = vmatmul.f32.gmra.mxu3 %v193_v54  ;;  %v901_v55 = vpop.f32.mrf.mxu2  ;;  %v232_v54 = vld [vmem:[%s3938_s0 + $0x6d0] sm:$0xff] }
  0xd6   :  { %v902_v56 = vadd.f32 %v901_v55, %v738_v53  ;;  %v230_v53 = vld [vmem:[%s3938_s0 + $0x6c0] sm:$0xff] }
  0xd7   :  { %v576_v58 = vpop.f32.mrf.mxu0 }
  0xd8   :  { %v577_v61 = vadd.f32 %v2446_v28, %v576_v58  ;;  %v1065_v62 = vpop.f32.mrf.mxu3 }
  0xd9   :  { %v2582_v63 = vadd.f32 %v1065_v62, %v902_v56  ;;  %v740_v0 = vpop.f32.mrf.mxu1 }
  0xda   :  { %v741_v2 = vadd.f32 %v740_v0, %v577_v61  ;;  %623 = vmatmul.f32.gmra.mxu0 %v198_v59  ;;  %951 = vmatmul.f32.gmra.mxu2 %v200_v60  ;;  %v231_v60 = vld [vmem:[%s3938_s0 + $0x6c8] sm:$0xff]  ;;  %v233_v0 = vld [vmem:[%s3938_s0 + $0x6d8] sm:$0xff] }
  0xdb   :  { %v507_v61 = vld [vmem:[%s3937_s1 + $0x328] sm:$0xff] }
  0xdc   :  { %787 = vmatmul.f32.gmra.mxu1 %v199_v1  ;;  %v475_v1 = vld [vmem:[%s3937_s1 + $0x228] sm:$0xff]  ;;  %1532 = vmatpush.msrb.mxu2 %v507_v61 }
  0xdd   :  { %1115 = vmatmul.f32.gmra.mxu3 %v201_v3  ;;  %v904_v4 = vpop.f32.mrf.mxu2  ;;  %1204 = vmatpush.msrb.mxu0 %v475_v1  ;;  %v491_v3 = vld [vmem:[%s3937_s1 + $0x2a8] sm:$0xff] }
  0xde   :  { %v905_v5 = vadd.f32 %v904_v4, %v741_v2  ;;  %v523_v2 = vld [vmem:[%s3937_s1 + $0x3a8] sm:$0xff]  ;;  %1368 = vmatpush.msrb.mxu1 %v491_v3  ;;  %v265_v3 = vld [vmem:[%s3938_s0 + $0x7d8] sm:$0xff] }
  0xdf   :  { %v579_v6 = vpop.f32.mrf.mxu0  ;;  %1696 = vmatpush.msrb.mxu3 %v523_v2  ;;  %v263_v1 = vld [vmem:[%s3938_s0 + $0x7c8] sm:$0xff] }
  0xe0   :  { %v580_v10 = vadd.f32 %v2446_v28, %v579_v6  ;;  %v1068_v11 = vpop.f32.mrf.mxu3 }
  0xe1   :  { %v2597_v12 = vadd.f32 %v1068_v11, %v905_v5  ;;  %v743_v13 = vpop.f32.mrf.mxu1 }
  0xe2   :  { %v744_v16 = vadd.f32 %v743_v13, %v580_v10  ;;  %626 = vmatmul.f32.gmra.mxu0 %v206_v7  ;;  %954 = vmatmul.f32.gmra.mxu2 %v208_v9  ;;  %v238_v7 = vld [vmem:[%s3938_s0 + $0x700] sm:$0xff]  ;;  %v240_v9 = vld [vmem:[%s3938_s0 + $0x710] sm:$0xff] }
  0xe4   :  { %790 = vmatmul.f32.gmra.mxu1 %v207_v14 }
  0xe5   :  { %1118 = vmatmul.f32.gmra.mxu3 %v209_v17  ;;  %v907_v22 = vpop.f32.mrf.mxu2  ;;  %v241_v17 = vld [vmem:[%s3938_s0 + $0x718] sm:$0xff] }
  0xe6   :  { %v908_v23 = vadd.f32 %v907_v22, %v744_v16  ;;  %v246_v22 = vld [vmem:[%s3938_s0 + $0x740] sm:$0xff] }
  0xe7   :  { %v582_v24 = vpop.f32.mrf.mxu0 }
  0xe8   :  { %v583_v27 = vadd.f32 %v2446_v28, %v582_v24  ;;  %v1071_v29 = vpop.f32.mrf.mxu3 }
  0xe9   :  { %v2624_v30 = vadd.f32 %v1071_v29, %v908_v23  ;;  %v746_v31 = vpop.f32.mrf.mxu1  ;;  %v248_v23 = vld [vmem:[%s3938_s0 + $0x750] sm:$0xff]  ;;  %v247_v29 = vld [vmem:[%s3938_s0 + $0x748] sm:$0xff] }
  0xea   :  { %v747_v33 = vadd.f32 %v746_v31, %v583_v27  ;;  %629 = vmatmul.f32.gmra.mxu0 %v214_v25  ;;  %957 = vmatmul.f32.gmra.mxu2 %v216_v26 }
  0xec   :  { %793 = vmatmul.f32.gmra.mxu1 %v215_v32  ;;  %v249_v32 = vld [vmem:[%s3938_s0 + $0x758] sm:$0xff] }
  0xed   :  { %1121 = vmatmul.f32.gmra.mxu3 %v217_v35  ;;  %v910_v36 = vpop.f32.mrf.mxu2 }
  0xee   :  { %v911_v37 = vadd.f32 %v910_v36, %v747_v33 }
  0xef   :  { %v585_v38 = vpop.f32.mrf.mxu0 }
  0xf0   :  { %v586_v41 = vadd.f32 %v2446_v28, %v585_v38  ;;  %v1074_v42 = vpop.f32.mrf.mxu3  ;;  %v256_v38 = vld [vmem:[%s3938_s0 + $0x790] sm:$0xff] }
  0xf1   :  { %v2639_v43 = vadd.f32 %v1074_v42, %v911_v37  ;;  %v749_v45 = vpop.f32.mrf.mxu1  ;;  %v254_v37 = vld [vmem:[%s3938_s0 + $0x780] sm:$0xff] }
  0xf2   :  { %v750_v47 = vadd.f32 %v749_v45, %v586_v41  ;;  %632 = vmatmul.f32.gmra.mxu0 %v222_v39  ;;  %960 = vmatmul.f32.gmra.mxu2 %v224_v40  ;;  %v255_v45 = vld [vmem:[%s3938_s0 + $0x788] sm:$0xff] }
  0xf4   :  { %796 = vmatmul.f32.gmra.mxu1 %v223_v46  ;;  %v506_v46 = vld [vmem:[%s3937_s1 + $0x320] sm:$0xff] }
  0xf5   :  { %1124 = vmatmul.f32.gmra.mxu3 %v225_v48  ;;  %v913_v49 = vpop.f32.mrf.mxu2  ;;  %v257_v48 = vld [vmem:[%s3938_s0 + $0x798] sm:$0xff]  ;;  %1533 = vmatpush.msrb.mxu2 %v506_v46  ;;  %v286_v46 = vld [vmem:[%s3938_s0 + $0x880] sm:$0xff] }
  0xf6   :  { %v914_v51 = vadd.f32 %v913_v49, %v750_v47  ;;  %v474_v49 = vld [vmem:[%s3937_s1 + $0x220] sm:$0xff] }
  0xf7   :  { %v588_v52 = vpop.f32.mrf.mxu0  ;;  %1205 = vmatpush.msrb.mxu0 %v474_v49 }
  0xf8   :  { %v589_v55 = vadd.f32 %v2446_v28, %v588_v52  ;;  %v1077_v56 = vpop.f32.mrf.mxu3 }
  0xf9   :  { %v2654_v58 = vadd.f32 %v1077_v56, %v914_v51  ;;  %v752_v59 = vpop.f32.mrf.mxu1  ;;  %v522_v51 = vld [vmem:[%s3937_s1 + $0x3a0] sm:$0xff] }
  0xfa   :  { %v753_v62 = vadd.f32 %v752_v59, %v589_v55  ;;  %635 = vmatmul.f32.gmra.mxu0 %v230_v53  ;;  %963 = vmatmul.f32.gmra.mxu2 %v232_v54  ;;  %v490_v53 = vld [vmem:[%s3937_s1 + $0x2a0] sm:$0xff]  ;;  %v264_v59 = vld [vmem:[%s3938_s0 + $0x7d0] sm:$0xff] }
  0xfb   :  { %1697 = vmatpush.msrb.mxu3 %v522_v51  ;;  %1369 = vmatpush.msrb.mxu1 %v490_v53  ;;  %v262_v56 = vld [vmem:[%s3938_s0 + $0x7c0] sm:$0xff]  ;;  %v287_v53 = vld [vmem:[%s3938_s0 + $0x888] sm:$0xff] }
  0xfc   :  { %799 = vmatmul.f32.gmra.mxu1 %v231_v60 }
  0xfd   :  { %1127 = vmatmul.f32.gmra.mxu3 %v233_v0  ;;  %v916_v4 = vpop.f32.mrf.mxu2 }
  0xfe   :  { %v917_v5 = vadd.f32 %v916_v4, %v753_v62 }
  0xff   :  { %v591_v6 = vpop.f32.mrf.mxu0 }
 0x100   :  { %v592_v10 = vadd.f32 %v2446_v28, %v591_v6  ;;  %v1080_v11 = vpop.f32.mrf.mxu3 }
 0x101   :  { %v2681_v13 = vadd.f32 %v1080_v11, %v917_v5  ;;  %v755_v14 = vpop.f32.mrf.mxu1 }
 0x102   :  { %v756_v16 = vadd.f32 %v755_v14, %v592_v10  ;;  %638 = vmatmul.f32.gmra.mxu0 %v238_v7  ;;  %966 = vmatmul.f32.gmra.mxu2 %v240_v9  ;;  %v270_v7 = vld [vmem:[%s3938_s0 + $0x800] sm:$0xff]  ;;  %v272_v9 = vld [vmem:[%s3938_s0 + $0x810] sm:$0xff] }
 0x104   :  { %802 = vmatmul.f32.gmra.mxu1 %v239_v15 }
 0x105   :  { %1130 = vmatmul.f32.gmra.mxu3 %v241_v17  ;;  %v919_v18 = vpop.f32.mrf.mxu2 }
 0x106   :  { %v920_v19 = vadd.f32 %v919_v18, %v756_v16  ;;  %v271_v16 = vld [vmem:[%s3938_s0 + $0x808] sm:$0xff]  ;;  %v273_v18 = vld [vmem:[%s3938_s0 + $0x818] sm:$0xff] }
 0x107   :  { %v594_v21 = vpop.f32.mrf.mxu0 }
 0x108   :  { %v595_v24 = vadd.f32 %v2446_v28, %v594_v21  ;;  %v1083_v25 = vpop.f32.mrf.mxu3 }
 0x109   :  { %v2696_v26 = vadd.f32 %v1083_v25, %v920_v19  ;;  %v758_v27 = vpop.f32.mrf.mxu1 }
 0x10a   :  { %v759_v31 = vadd.f32 %v758_v27, %v595_v24  ;;  %641 = vmatmul.f32.gmra.mxu0 %v246_v22  ;;  %969 = vmatmul.f32.gmra.mxu2 %v248_v23  ;;  %v278_v23 = vld [vmem:[%s3938_s0 + $0x840] sm:$0xff]  ;;  %v280_v24 = vld [vmem:[%s3938_s0 + $0x850] sm:$0xff] }
 0x10c   :  { %805 = vmatmul.f32.gmra.mxu1 %v247_v29 }
 0x10d   :  { %1133 = vmatmul.f32.gmra.mxu3 %v249_v32  ;;  %v922_v33 = vpop.f32.mrf.mxu2  ;;  %v279_v32 = vld [vmem:[%s3938_s0 + $0x848] sm:$0xff] }
 0x10e   :  { %v923_v35 = vadd.f32 %v922_v33, %v759_v31  ;;  %v505_v33 = vld [vmem:[%s3937_s1 + $0x318] sm:$0xff] }
 0x10f   :  { %v597_v36 = vpop.f32.mrf.mxu0  ;;  %1534 = vmatpush.msrb.mxu2 %v505_v33 }
 0x110   :  { %v598_v39 = vadd.f32 %v2446_v28, %v597_v36  ;;  %v1086_v40 = vpop.f32.mrf.mxu3  ;;  %v281_v36 = vld [vmem:[%s3938_s0 + $0x858] sm:$0xff] }
 0x111   :  { %v2711_v41 = vadd.f32 %v1086_v40, %v923_v35  ;;  %v761_v42 = vpop.f32.mrf.mxu1  ;;  %v489_v40 = vld [vmem:[%s3937_s1 + $0x298] sm:$0xff] }
 0x112   :  { %v762_v47 = vadd.f32 %v761_v42, %v598_v39  ;;  %644 = vmatmul.f32.gmra.mxu0 %v254_v37  ;;  %972 = vmatmul.f32.gmra.mxu2 %v256_v38  ;;  %v473_v37 = vld [vmem:[%s3937_s1 + $0x218] sm:$0xff] }
 0x113   :  { %1206 = vmatpush.msrb.mxu0 %v473_v37  ;;  %v521_v38 = vld [vmem:[%s3937_s1 + $0x398] sm:$0xff]  ;;  %1370 = vmatpush.msrb.mxu1 %v489_v40  ;;  %v310_v37 = vld [vmem:[%s3938_s0 + $0x940] sm:$0xff] }
 0x114   :  { %808 = vmatmul.f32.gmra.mxu1 %v255_v45  ;;  %1698 = vmatpush.msrb.mxu3 %v521_v38  ;;  %v312_v38 = vld [vmem:[%s3938_s0 + $0x950] sm:$0xff] }
 0x115   :  { %1136 = vmatmul.f32.gmra.mxu3 %v257_v48  ;;  %v925_v52 = vpop.f32.mrf.mxu2 }
 0x116   :  { %v926_v54 = vadd.f32 %v925_v52, %v762_v47  ;;  %v288_v47 = vld [vmem:[%s3938_s0 + $0x890] sm:$0xff] }
 0x117   :  { %v600_v55 = vpop.f32.mrf.mxu0 }
 0x118   :  { %v601_v60 = vadd.f32 %v2446_v28, %v600_v55  ;;  %v1089_v61 = vpop.f32.mrf.mxu3  ;;  %v289_v55 = vld [vmem:[%s3938_s0 + $0x898] sm:$0xff] }
 0x119   :  { %v2738_v62 = vadd.f32 %v1089_v61, %v926_v54  ;;  %v764_v0 = vpop.f32.mrf.mxu1  ;;  %v294_v61 = vld [vmem:[%s3938_s0 + $0x8c0] sm:$0xff] }
 0x11a   :  { %v765_v2 = vadd.f32 %v764_v0, %v601_v60  ;;  %647 = vmatmul.f32.gmra.mxu0 %v262_v56  ;;  %975 = vmatmul.f32.gmra.mxu2 %v264_v59  ;;  %v296_v0 = vld [vmem:[%s3938_s0 + $0x8d0] sm:$0xff] }
 0x11c   :  { %811 = vmatmul.f32.gmra.mxu1 %v263_v1 }
 0x11d   :  { %1139 = vmatmul.f32.gmra.mxu3 %v265_v3  ;;  %v928_v4 = vpop.f32.mrf.mxu2 }
 0x11e   :  { %v929_v5 = vadd.f32 %v928_v4, %v765_v2 }
 0x11f   :  { %v603_v6 = vpop.f32.mrf.mxu0 }
 0x120   :  { %v604_v10 = vadd.f32 %v2446_v28, %v603_v6  ;;  %v1092_v11 = vpop.f32.mrf.mxu3 }
 0x121   :  { %v2753_v14 = vadd.f32 %v1092_v11, %v929_v5  ;;  %v767_v15 = vpop.f32.mrf.mxu1  ;;  %v295_v5 = vld [vmem:[%s3938_s0 + $0x8c8] sm:$0xff] }
 0x122   :  { %v768_v17 = vadd.f32 %v767_v15, %v604_v10  ;;  %650 = vmatmul.f32.gmra.mxu0 %v270_v7  ;;  %978 = vmatmul.f32.gmra.mxu2 %v272_v9  ;;  %v297_v7 = vld [vmem:[%s3938_s0 + $0x8d8] sm:$0xff]  ;;  %v302_v15 = vld [vmem:[%s3938_s0 + $0x900] sm:$0xff] }
 0x124   :  { %814 = vmatmul.f32.gmra.mxu1 %v271_v16  ;;  %v304_v16 = vld [vmem:[%s3938_s0 + $0x910] sm:$0xff] }
 0x125   :  { %1142 = vmatmul.f32.gmra.mxu3 %v273_v18  ;;  %v931_v19 = vpop.f32.mrf.mxu2 }
 0x126   :  { %v932_v21 = vadd.f32 %v931_v19, %v768_v17 }
 0x127   :  { %v606_v22 = vpop.f32.mrf.mxu0 }
 0x128   :  { %v607_v25 = vadd.f32 %v2446_v28, %v606_v22  ;;  %v1095_v27 = vpop.f32.mrf.mxu3  ;;  %v303_v22 = vld [vmem:[%s3938_s0 + $0x908] sm:$0xff] }
 0x129   :  { %v2768_v29 = vadd.f32 %v1095_v27, %v932_v21  ;;  %v770_v31 = vpop.f32.mrf.mxu1  ;;  %v472_v27 = vld [vmem:[%s3937_s1 + $0x210] sm:$0xff] }
 0x12a   :  { %v771_v35 = vadd.f32 %v770_v31, %v607_v25  ;;  %653 = vmatmul.f32.gmra.mxu0 %v278_v23  ;;  %981 = vmatmul.f32.gmra.mxu2 %v280_v24  ;;  %v305_v24 = vld [vmem:[%s3938_s0 + $0x918] sm:$0xff]  ;;  %v504_v25 = vld [vmem:[%s3937_s1 + $0x310] sm:$0xff] }
 0x12b   :  { %1535 = vmatpush.msrb.mxu2 %v504_v25  ;;  %v520_v31 = vld [vmem:[%s3937_s1 + $0x390] sm:$0xff]  ;;  %1207 = vmatpush.msrb.mxu0 %v472_v27 }
 0x12c   :  { %817 = vmatmul.f32.gmra.mxu1 %v279_v32  ;;  %1699 = vmatpush.msrb.mxu3 %v520_v31  ;;  %v487_v31 = vld [vmem:[%s3937_s1 + $0x288] sm:$0xff] }
 0x12d   :  { %1145 = vmatmul.f32.gmra.mxu3 %v281_v36  ;;  %v934_v39 = vpop.f32.mrf.mxu2 }
 0x12e   :  { %v935_v42 = vadd.f32 %v934_v39, %v771_v35  ;;  %v488_v35 = vld [vmem:[%s3937_s1 + $0x290] sm:$0xff] }
 0x12f   :  { %v609_v45 = vpop.f32.mrf.mxu0  ;;  %1371 = vmatpush.msrb.mxu1 %v488_v35  ;;  %v336_v35 = vld [vmem:[%s3938_s0 + $0xa10] sm:$0xff] }
 0x130   :  { %v610_v48 = vadd.f32 %v2446_v28, %v609_v45  ;;  %v1098_v49 = vpop.f32.mrf.mxu3 }
 0x131   :  { %v2795_v51 = vadd.f32 %v1098_v49, %v935_v42  ;;  %v773_v52 = vpop.f32.mrf.mxu1  ;;  %1372 = vmatpush.msrb.mxu1 %v487_v31  ;;  %v486_v31 = vld [vmem:[%s3937_s1 + $0x280] sm:$0xff] }
 0x132   :  { %v774_v54 = vadd.f32 %v773_v52, %v610_v48  ;;  %656 = vmatmul.f32.gmra.mxu0 %v286_v46  ;;  %984 = vmatmul.f32.gmra.mxu2 %v288_v47  ;;  %v311_v46 = vld [vmem:[%s3938_s0 + $0x948] sm:$0xff]  ;;  %v313_v48 = vld [vmem:[%s3938_s0 + $0x958] sm:$0xff] }
 0x133   :  { %1373 = vmatpush.msrb.mxu1 %v486_v31 }
 0x134   :  { %820 = vmatmul.f32.gmra.mxu1 %v287_v53 }
 0x135   :  { %1148 = vmatmul.f32.gmra.mxu3 %v289_v55  ;;  %v937_v56 = vpop.f32.mrf.mxu2  ;;  %v320_v55 = vld [vmem:[%s3938_s0 + $0x990] sm:$0xff] }
 0x136   :  { %v938_v59 = vadd.f32 %v937_v56, %v774_v54  ;;  %v318_v54 = vld [vmem:[%s3938_s0 + $0x980] sm:$0xff] }
 0x137   :  { %v612_v60 = vpop.f32.mrf.mxu0 }
 0x138   :  { %v613_v1 = vadd.f32 %v2446_v28, %v612_v60  ;;  %v1101_v2 = vpop.f32.mrf.mxu3 }
 0x139   :  { %v2810_v3 = vadd.f32 %v1101_v2, %v938_v59  ;;  %v776_v4 = vpop.f32.mrf.mxu1  ;;  %v321_v2 = vld [vmem:[%s3938_s0 + $0x998] sm:$0xff] }
 0x13a   :  { %v777_v6 = vadd.f32 %v776_v4, %v613_v1  ;;  %659 = vmatmul.f32.gmra.mxu0 %v294_v61  ;;  %987 = vmatmul.f32.gmra.mxu2 %v296_v0  ;;  %v319_v0 = vld [vmem:[%s3938_s0 + $0x988] sm:$0xff] }
 0x13c   :  { %823 = vmatmul.f32.gmra.mxu1 %v295_v5 }
 0x13d   :  { %1151 = vmatmul.f32.gmra.mxu3 %v297_v7  ;;  %v940_v9 = vpop.f32.mrf.mxu2  ;;  %v326_v7 = vld [vmem:[%s3938_s0 + $0x9c0] sm:$0xff] }
 0x13e   :  { %v941_v10 = vadd.f32 %v940_v9, %v777_v6  ;;  %v328_v9 = vld [vmem:[%s3938_s0 + $0x9d0] sm:$0xff] }
 0x13f   :  { %v615_v11 = vpop.f32.mrf.mxu0 }
 0x140   :  { %v616_v17 = vadd.f32 %v2446_v28, %v615_v11  ;;  %v1104_v18 = vpop.f32.mrf.mxu3 }
 0x141   :  { %v2825_v19 = vadd.f32 %v1104_v18, %v941_v10  ;;  %v779_v21 = vpop.f32.mrf.mxu1 }
 0x142   :  { %v780_v23 = vadd.f32 %v779_v21, %v616_v17  ;;  %662 = vmatmul.f32.gmra.mxu0 %v302_v15  ;;  %990 = vmatmul.f32.gmra.mxu2 %v304_v16  ;;  %v327_v17 = vld [vmem:[%s3938_s0 + $0x9c8] sm:$0xff]  ;;  %v329_v21 = vld [vmem:[%s3938_s0 + $0x9d8] sm:$0xff] }
 0x144   :  { %826 = vmatmul.f32.gmra.mxu1 %v303_v22  ;;  %v503_v22 = vld [vmem:[%s3937_s1 + $0x308] sm:$0xff] }
 0x145   :  { %1154 = vmatmul.f32.gmra.mxu3 %v305_v24  ;;  %v943_v32 = vpop.f32.mrf.mxu2  ;;  %1536 = vmatpush.msrb.mxu2 %v503_v22  ;;  %v519_v24 = vld [vmem:[%s3937_s1 + $0x388] sm:$0xff]  ;;  %v502_v22 = vld [vmem:[%s3937_s1 + $0x300] sm:$0xff] }
 0x146   :  { %v944_v33 = vadd.f32 %v943_v32, %v780_v23  ;;  %v471_v23 = vld [vmem:[%s3937_s1 + $0x208] sm:$0xff]  ;;  %1700 = vmatpush.msrb.mxu3 %v519_v24  ;;  %v470_v24 = vld [vmem:[%s3937_s1 + $0x200] sm:$0xff] }
 0x147   :  { %v618_v36 = vpop.f32.mrf.mxu0  ;;  %1208 = vmatpush.msrb.mxu0 %v471_v23  ;;  %1537 = vmatpush.msrb.mxu2 %v502_v22  ;;  %v375_v22 = vld [vmem:[%s3938_s0 + $0xb48] sm:$0xff] }
 0x148   :  { %v619_v39 = vadd.f32 %v2446_v28, %v618_v36  ;;  %v1107_v40 = vpop.f32.mrf.mxu3 }
 0x149   :  { %v2852_v42 = vadd.f32 %v1107_v40, %v944_v33  ;;  %v782_v45 = vpop.f32.mrf.mxu1  ;;  %v334_v33 = vld [vmem:[%s3938_s0 + $0xa00] sm:$0xff]  ;;  %v335_v40 = vld [vmem:[%s3938_s0 + $0xa08] sm:$0xff]  ;;  %1209 = vmatpush.msrb.mxu0 %v470_v24  ;;  %v377_v24 = vld [vmem:[%s3938_s0 + $0xb58] sm:$0xff] }
 0x14a   :  { %v783_v47 = vadd.f32 %v782_v45, %v619_v39  ;;  %665 = vmatmul.f32.gmra.mxu0 %v310_v37  ;;  %993 = vmatmul.f32.gmra.mxu2 %v312_v38 }
 0x14c   :  { %829 = vmatmul.f32.gmra.mxu1 %v311_v46  ;;  %v337_v46 = vld [vmem:[%s3938_s0 + $0xa18] sm:$0xff] }
 0x14d   :  { %1157 = vmatmul.f32.gmra.mxu3 %v313_v48  ;;  %v946_v49 = vpop.f32.mrf.mxu2 }
 0x14e   :  { %v947_v52 = vadd.f32 %v946_v49, %v783_v47 }
 0x14f   :  { %v621_v53 = vpop.f32.mrf.mxu0 }
 0x150   :  { %v622_v56 = vadd.f32 %v2446_v28, %v621_v53  ;;  %v1110_v59 = vpop.f32.mrf.mxu3  ;;  %v344_v53 = vld [vmem:[%s3938_s0 + $0xa50] sm:$0xff] }
 0x151   :  { %v2867_v60 = vadd.f32 %v1110_v59, %v947_v52  ;;  %v785_v61 = vpop.f32.mrf.mxu1  ;;  %v342_v52 = vld [vmem:[%s3938_s0 + $0xa40] sm:$0xff] }
 0x152   :  { %v786_v1 = vadd.f32 %v785_v61, %v622_v56  ;;  %668 = vmatmul.f32.gmra.mxu0 %v318_v54  ;;  %996 = vmatmul.f32.gmra.mxu2 %v320_v55  ;;  %v343_v61 = vld [vmem:[%s3938_s0 + $0xa48] sm:$0xff] }
 0x154   :  { %832 = vmatmul.f32.gmra.mxu1 %v319_v0 }
 0x155   :  { %1160 = vmatmul.f32.gmra.mxu3 %v321_v2  ;;  %v949_v4 = vpop.f32.mrf.mxu2 }
 0x156   :  { %v950_v5 = vadd.f32 %v949_v4, %v786_v1  ;;  %v345_v1 = vld [vmem:[%s3938_s0 + $0xa58] sm:$0xff] }
 0x157   :  { %v624_v6 = vpop.f32.mrf.mxu0 }
 0x158   :  { %v625_v10 = vadd.f32 %v2446_v28, %v624_v6  ;;  %v1113_v11 = vpop.f32.mrf.mxu3  ;;  %v350_v6 = vld [vmem:[%s3938_s0 + $0xa80] sm:$0xff] }
 0x159   :  { %v2882_v15 = vadd.f32 %v1113_v11, %v950_v5  ;;  %v788_v16 = vpop.f32.mrf.mxu1 }
 0x15a   :  { %v789_v18 = vadd.f32 %v788_v16, %v625_v10  ;;  %671 = vmatmul.f32.gmra.mxu0 %v326_v7  ;;  %999 = vmatmul.f32.gmra.mxu2 %v328_v9  ;;  %v352_v7 = vld [vmem:[%s3938_s0 + $0xa90] sm:$0xff] }
 0x15c   :  { %835 = vmatmul.f32.gmra.mxu1 %v327_v17  ;;  %v351_v17 = vld [vmem:[%s3938_s0 + $0xa88] sm:$0xff] }
 0x15d   :  { %1163 = vmatmul.f32.gmra.mxu3 %v329_v21  ;;  %v952_v25 = vpop.f32.mrf.mxu2  ;;  %v353_v21 = vld [vmem:[%s3938_s0 + $0xa98] sm:$0xff] }
 0x15e   :  { %v953_v27 = vadd.f32 %v952_v25, %v789_v18  ;;  %v518_v25 = vld [vmem:[%s3937_s1 + $0x380] sm:$0xff] }
 0x15f   :  { %v627_v32 = vpop.f32.mrf.mxu0  ;;  %1701 = vmatpush.msrb.mxu3 %v518_v25 }
 0x160   :  { %v628_v36 = vadd.f32 %v2446_v28, %v627_v32  ;;  %v1116_v37 = vpop.f32.mrf.mxu3 }
 0x161   :  { %v2909_v38 = vadd.f32 %v1116_v37, %v953_v27  ;;  %v791_v39 = vpop.f32.mrf.mxu1 }
 0x162   :  { %v792_v45 = vadd.f32 %v791_v39, %v628_v36  ;;  %674 = vmatmul.f32.gmra.mxu0 %v334_v33  ;;  %1002 = vmatmul.f32.gmra.mxu2 %v336_v35  ;;  %v358_v33 = vld [vmem:[%s3938_s0 + $0xac0] sm:$0xff]  ;;  %v360_v35 = vld [vmem:[%s3938_s0 + $0xad0] sm:$0xff] }
 0x164   :  { %838 = vmatmul.f32.gmra.mxu1 %v335_v40 }
 0x165   :  { %1166 = vmatmul.f32.gmra.mxu3 %v337_v46  ;;  %v955_v47 = vpop.f32.mrf.mxu2 }
 0x166   :  { %v956_v48 = vadd.f32 %v955_v47, %v792_v45  ;;  %v359_v45 = vld [vmem:[%s3938_s0 + $0xac8] sm:$0xff]  ;;  %v361_v47 = vld [vmem:[%s3938_s0 + $0xad8] sm:$0xff] }
 0x167   :  { %v630_v49 = vpop.f32.mrf.mxu0 }
 0x168   :  { %v631_v54 = vadd.f32 %v2446_v28, %v630_v49  ;;  %v1119_v55 = vpop.f32.mrf.mxu3 }
 0x169   :  { %v2924_v56 = vadd.f32 %v1119_v55, %v956_v48  ;;  %v794_v59 = vpop.f32.mrf.mxu1 }
 0x16a   :  { %v795_v0 = vadd.f32 %v794_v59, %v631_v54  ;;  %677 = vmatmul.f32.gmra.mxu0 %v342_v52  ;;  %1005 = vmatmul.f32.gmra.mxu2 %v344_v53  ;;  %v366_v52 = vld [vmem:[%s3938_s0 + $0xb00] sm:$0xff]  ;;  %v368_v53 = vld [vmem:[%s3938_s0 + $0xb10] sm:$0xff] }
 0x16b   :  { %v2983_v54 = vld [vmem:[%s3939_s2] ss:$0 sm:$0xff] }
 0x16c   :  { %841 = vmatmul.f32.gmra.mxu1 %v343_v61 }
 0x16d   :  { %1169 = vmatmul.f32.gmra.mxu3 %v345_v1  ;;  %v958_v2 = vpop.f32.mrf.mxu2  ;;  %v367_v1 = vld [vmem:[%s3938_s0 + $0xb08] sm:$0xff] }
 0x16e   :  { %v959_v4 = vadd.f32 %v958_v2, %v795_v0 }
 0x16f   :  { %v633_v5 = vpop.f32.mrf.mxu0 }
 0x170   :  { %v634_v9 = vadd.f32 %v2446_v28, %v633_v5  ;;  %v1122_v10 = vpop.f32.mrf.mxu3 }
 0x171   :  { %v2939_v11 = vadd.f32 %v1122_v10, %v959_v4  ;;  %v797_v16 = vpop.f32.mrf.mxu1  ;;  %v369_v4 = vld [vmem:[%s3938_s0 + $0xb18] sm:$0xff]  ;;  %v376_v10 = vld [vmem:[%s3938_s0 + $0xb50] sm:$0xff] }
 0x172   :  { %v798_v18 = vadd.f32 %v797_v16, %v634_v9  ;;  %680 = vmatmul.f32.gmra.mxu0 %v350_v6  ;;  %1008 = vmatmul.f32.gmra.mxu2 %v352_v7  ;;  %v374_v9 = vld [vmem:[%s3938_s0 + $0xb40] sm:$0xff] }
 0x174   :  { %844 = vmatmul.f32.gmra.mxu1 %v351_v17 }
 0x175   :  { %1172 = vmatmul.f32.gmra.mxu3 %v353_v21  ;;  %v961_v23 = vpop.f32.mrf.mxu2 }
 0x176   :  { %v962_v27 = vadd.f32 %v961_v23, %v798_v18 }
 0x177   :  { %v636_v32 = vpop.f32.mrf.mxu0 }
 0x178   :  { %v637_v36 = vadd.f32 %v2446_v28, %v636_v32  ;;  %v1125_v37 = vpop.f32.mrf.mxu3  ;;  %v382_v32 = vld [vmem:[%s3938_s0 + $0xb80] sm:$0xff] }
 0x179   :  { %v2966_v39 = vadd.f32 %v1125_v37, %v962_v27  ;;  %v800_v40 = vpop.f32.mrf.mxu1 }
 0x17a   :  { %v801_v46 = vadd.f32 %v800_v40, %v637_v36  ;;  %683 = vmatmul.f32.gmra.mxu0 %v358_v33  ;;  %1011 = vmatmul.f32.gmra.mxu2 %v360_v35  ;;  %v384_v33 = vld [vmem:[%s3938_s0 + $0xb90] sm:$0xff] }
 0x17c   :  { %847 = vmatmul.f32.gmra.mxu1 %v359_v45  ;;  %v383_v45 = vld [vmem:[%s3938_s0 + $0xb88] sm:$0xff] }
 0x17d   :  { %1175 = vmatmul.f32.gmra.mxu3 %v361_v47  ;;  %v964_v48 = vpop.f32.mrf.mxu2  ;;  %v385_v47 = vld [vmem:[%s3938_s0 + $0xb98] sm:$0xff] }
 0x17e   :  { %v965_v49 = vadd.f32 %v964_v48, %v801_v46 }
 0x17f   :  { %v639_v28 = vpop.f32.mrf.mxu0 }
 0x180   :  { %v640_v55 = vadd.f32 %v2983_v54, %v639_v28  ;;  %v1128_v59 = vpop.f32.mrf.mxu3 }
 0x181   :  { %v2986_v61 = vadd.f32 %v1128_v59, %v965_v49  ;;  %v803_v0 = vpop.f32.mrf.mxu1 }
 0x182   :  { %v804_v2 = vadd.f32 %v803_v0, %v640_v55  ;;  %686 = vmatmul.f32.gmra.mxu0 %v366_v52  ;;  %1014 = vmatmul.f32.gmra.mxu2 %v368_v53  ;;  %v390_v52 = vld [vmem:[%s3938_s0 + $0xbc0] sm:$0xff]  ;;  %v392_v53 = vld [vmem:[%s3938_s0 + $0xbd0] sm:$0xff] }
 0x184   :  { %850 = vmatmul.f32.gmra.mxu1 %v367_v1 }
 0x185   :  { %1178 = vmatmul.f32.gmra.mxu3 %v369_v4  ;;  %v967_v5 = vpop.f32.mrf.mxu2 }
 0x186   :  { %v968_v6 = vadd.f32 %v967_v5, %v804_v2  ;;  %v391_v2 = vld [vmem:[%s3938_s0 + $0xbc8] sm:$0xff]  ;;  %v393_v5 = vld [vmem:[%s3938_s0 + $0xbd8] sm:$0xff] }
 0x187   :  { %v642_v7 = vpop.f32.mrf.mxu0 }
 0x188   :  { %v643_v16 = vadd.f32 %v2983_v54, %v642_v7  ;;  %v1131_v17 = vpop.f32.mrf.mxu3 }
 0x189   :  { %v3001_v18 = vadd.f32 %v1131_v17, %v968_v6  ;;  %v806_v21 = vpop.f32.mrf.mxu1 }
 0x18a   :  { %v807_v23 = vadd.f32 %v806_v21, %v643_v16  ;;  %689 = vmatmul.f32.gmra.mxu0 %v374_v9  ;;  %1017 = vmatmul.f32.gmra.mxu2 %v376_v10  ;;  %v398_v10 = vld [vmem:[%s3938_s0 + $0xc00] sm:$0xff]  ;;  %v400_v16 = vld [vmem:[%s3938_s0 + $0xc10] sm:$0xff] }
 0x18c   :  { %853 = vmatmul.f32.gmra.mxu1 %v375_v22 }
 0x18d   :  { %1181 = vmatmul.f32.gmra.mxu3 %v377_v24  ;;  %v970_v25 = vpop.f32.mrf.mxu2  ;;  %v399_v24 = vld [vmem:[%s3938_s0 + $0xc08] sm:$0xff] }
 0x18e   :  { %v971_v27 = vadd.f32 %v970_v25, %v807_v23 }
 0x18f   :  { %v645_v31 = vpop.f32.mrf.mxu0 }
 0x190   :  { %v646_v35 = vadd.f32 %v2983_v54, %v645_v31  ;;  %v1134_v36 = vpop.f32.mrf.mxu3 }
 0x191   :  { %v3016_v37 = vadd.f32 %v1134_v36, %v971_v27  ;;  %v809_v40 = vpop.f32.mrf.mxu1  ;;  %v401_v27 = vld [vmem:[%s3938_s0 + $0xc18] sm:$0xff]  ;;  %v20_v36 = vld [vmem:[%s3938_s0 + $0x30] sm:$0xff] }
 0x192   :  { %v810_v46 = vadd.f32 %v809_v40, %v646_v35  ;;  %692 = vmatmul.f32.gmra.mxu0 %v382_v32  ;;  %1020 = vmatmul.f32.gmra.mxu2 %v384_v33  ;;  %v18_v35 = vld [vmem:[%s3938_s0 + $0x20] sm:$0xff] }
 0x194   :  { %856 = vmatmul.f32.gmra.mxu1 %v383_v45 }
 0x195   :  { %1184 = vmatmul.f32.gmra.mxu3 %v385_v47  ;;  %v973_v48 = vpop.f32.mrf.mxu2 }
 0x196   :  { %v974_v49 = vadd.f32 %v973_v48, %v810_v46  ;;  %v19_v48 = vld [vmem:[%s3938_s0 + $0x28] sm:$0xff] }
 0x197   :  { %v648_v28 = vpop.f32.mrf.mxu0 }
 0x198   :  { %v649_v55 = vadd.f32 %v2983_v54, %v648_v28  ;;  %v1137_v59 = vpop.f32.mrf.mxu3  ;;  %v21_v28 = vld [vmem:[%s3938_s0 + $0x38] sm:$0xff] }
 0x199   :  { %v3031_v0 = vadd.f32 %v1137_v59, %v974_v49  ;;  %v812_v1 = vpop.f32.mrf.mxu1  ;;  %v26_v59 = vld [vmem:[%s3938_s0 + $0x60] sm:$0xff] }
 0x19a   :  { %v813_v4 = vadd.f32 %v812_v1, %v649_v55  ;;  %695 = vmatmul.f32.gmra.mxu0 %v390_v52  ;;  %1023 = vmatmul.f32.gmra.mxu2 %v392_v53  ;;  %v28_v1 = vld [vmem:[%s3938_s0 + $0x70] sm:$0xff] }
 0x19c   :  { %859 = vmatmul.f32.gmra.mxu1 %v391_v2 }
 0x19d   :  { %1187 = vmatmul.f32.gmra.mxu3 %v393_v5  ;;  %v976_v6 = vpop.f32.mrf.mxu2 }
 0x19e   :  { %v977_v7 = vadd.f32 %v976_v6, %v813_v4 }
 0x19f   :  { %v651_v9 = vpop.f32.mrf.mxu0 }
 0x1a0   :  { %v652_v17 = vadd.f32 %v2983_v54, %v651_v9  ;;  %v1140_v21 = vpop.f32.mrf.mxu3 }
 0x1a1   :  { %v3046_v22 = vadd.f32 %v1140_v21, %v977_v7  ;;  %v815_v23 = vpop.f32.mrf.mxu1  ;;  %v27_v7 = vld [vmem:[%s3938_s0 + $0x68] sm:$0xff] }
 0x1a2   :  { %v816_v25 = vadd.f32 %v815_v23, %v652_v17  ;;  %698 = vmatmul.f32.gmra.mxu0 %v398_v10  ;;  %1026 = vmatmul.f32.gmra.mxu2 %v400_v16  ;;  %v29_v10 = vld [vmem:[%s3938_s0 + $0x78] sm:$0xff]  ;;  %v34_v23 = vld [vmem:[%s3938_s0 + $0xa0] sm:$0xff] }
 0x1a4   :  { %862 = vmatmul.f32.gmra.mxu1 %v399_v24  ;;  %v36_v24 = vld [vmem:[%s3938_s0 + $0xb0] sm:$0xff] }
 0x1a5   :  { %1190 = vmatmul.f32.gmra.mxu3 %v401_v27  ;;  %v979_v31 = vpop.f32.mrf.mxu2 }
 0x1a6   :  { %v980_v32 = vadd.f32 %v979_v31, %v816_v25 }
 0x1a7   :  { %v654_v33 = vpop.f32.mrf.mxu0 }
 0x1a8   :  { %v655_v40 = vadd.f32 %v2983_v54, %v654_v33  ;;  %v1143_v45 = vpop.f32.mrf.mxu3  ;;  %v35_v33 = vld [vmem:[%s3938_s0 + $0xa8] sm:$0xff] }
 0x1a9   :  { %v3061_v46 = vadd.f32 %v1143_v45, %v980_v32  ;;  %v818_v47 = vpop.f32.mrf.mxu1 }
 0x1aa   :  { %v819_v49 = vadd.f32 %v818_v47, %v655_v40  ;;  %1210 = vmatmul.f32.vlgmr.msrb.gmra.mxu0 %v18_v35  ;;  %1538 = vmatmul.f32.vlgmr.msrb.gmra.mxu2 %v20_v36  ;;  %v37_v36 = vld [vmem:[%s3938_s0 + $0xb8] sm:$0xff] }
 0x1ac   :  { %1374 = vmatmul.f32.vlgmr.msrb.gmra.mxu1 %v19_v48  ;;  %v42_v48 = vld [vmem:[%s3938_s0 + $0xe0] sm:$0xff] }
 0x1ad   :  { %1702 = vmatmul.f32.vlgmr.msrb.gmra.mxu3 %v21_v28  ;;  %v982_v52 = vpop.f32.mrf.mxu2 }
 0x1ae   :  { %v983_v53 = vadd.f32 %v982_v52, %v819_v49  ;;  %v44_v49 = vld [vmem:[%s3938_s0 + $0xf0] sm:$0xff] }
 0x1af   :  { %v657_v55 = vpop.f32.mrf.mxu0 }
 0x1b0   :  { %v658_v2 = vadd.f32 %v2983_v54, %v657_v55  ;;  %v1146_v4 = vpop.f32.mrf.mxu3 }
 0x1b1   :  { %v3076_v5 = vadd.f32 %v1146_v4, %v983_v53  ;;  %v821_v6 = vpop.f32.mrf.mxu1 }
 0x1b2   :  { %v822_v9 = vadd.f32 %v821_v6, %v658_v2  ;;  %1213 = vmatmul.f32.gmra.mxu0 %v26_v59  ;;  %1541 = vmatmul.f32.gmra.mxu2 %v28_v1  ;;  %v43_v59 = vld [vmem:[%s3938_s0 + $0xe8] sm:$0xff]  ;;  %v45_v2 = vld [vmem:[%s3938_s0 + $0xf8] sm:$0xff] }
 0x1b4   :  { %1377 = vmatmul.f32.gmra.mxu1 %v27_v7 }
 0x1b5   :  { %1705 = vmatmul.f32.gmra.mxu3 %v29_v10  ;;  %v985_v16 = vpop.f32.mrf.mxu2  ;;  %v52_v10 = vld [vmem:[%s3938_s0 + $0x130] sm:$0xff] }
 0x1b6   :  { %v986_v17 = vadd.f32 %v985_v16, %v822_v9  ;;  %v50_v9 = vld [vmem:[%s3938_s0 + $0x120] sm:$0xff] }
 0x1b7   :  { %v660_v21 = vpop.f32.mrf.mxu0 }
 0x1b8   :  { %v661_v25 = vadd.f32 %v2983_v54, %v660_v21  ;;  %v1149_v27 = vpop.f32.mrf.mxu3 }
 0x1b9   :  { %v3091_v31 = vadd.f32 %v1149_v27, %v986_v17  ;;  %v824_v32 = vpop.f32.mrf.mxu1  ;;  %v53_v27 = vld [vmem:[%s3938_s0 + $0x138] sm:$0xff] }
 0x1ba   :  { %v825_v35 = vadd.f32 %v824_v32, %v661_v25  ;;  %1216 = vmatmul.f32.gmra.mxu0 %v34_v23  ;;  %1544 = vmatmul.f32.gmra.mxu2 %v36_v24  ;;  %v51_v24 = vld [vmem:[%s3938_s0 + $0x128] sm:$0xff] }
 0x1bc   :  { %1380 = vmatmul.f32.gmra.mxu1 %v35_v33 }
 0x1bd   :  { %1708 = vmatmul.f32.gmra.mxu3 %v37_v36  ;;  %v988_v40 = vpop.f32.mrf.mxu2  ;;  %v58_v36 = vld [vmem:[%s3938_s0 + $0x160] sm:$0xff] }
 0x1be   :  { %v989_v45 = vadd.f32 %v988_v40, %v825_v35  ;;  %v60_v40 = vld [vmem:[%s3938_s0 + $0x170] sm:$0xff] }
 0x1bf   :  { %v663_v47 = vpop.f32.mrf.mxu0 }
 0x1c0   :  { %v664_v28 = vadd.f32 %v2983_v54, %v663_v47  ;;  %v1152_v52 = vpop.f32.mrf.mxu3 }
 0x1c1   :  { %v3106_v53 = vadd.f32 %v1152_v52, %v989_v45  ;;  %v827_v55 = vpop.f32.mrf.mxu1 }
 0x1c2   :  { %v828_v1 = vadd.f32 %v827_v55, %v664_v28  ;;  %1219 = vmatmul.f32.gmra.mxu0 %v42_v48  ;;  %1547 = vmatmul.f32.gmra.mxu2 %v44_v49  ;;  %v59_v28 = vld [vmem:[%s3938_s0 + $0x168] sm:$0xff]  ;;  %v61_v55 = vld [vmem:[%s3938_s0 + $0x178] sm:$0xff] }
 0x1c4   :  { %1383 = vmatmul.f32.gmra.mxu1 %v43_v59 }
 0x1c5   :  { %1711 = vmatmul.f32.gmra.mxu3 %v45_v2  ;;  %v991_v4 = vpop.f32.mrf.mxu2 }
 0x1c6   :  { %v992_v6 = vadd.f32 %v991_v4, %v828_v1  ;;  %v66_v4 = vld [vmem:[%s3938_s0 + $0x1a0] sm:$0xff] }
 0x1c7   :  { %v666_v7 = vpop.f32.mrf.mxu0 }
 0x1c8   :  { %v667_v16 = vadd.f32 %v2983_v54, %v666_v7  ;;  %v1155_v17 = vpop.f32.mrf.mxu3 }
 0x1c9   :  { %v3121_v21 = vadd.f32 %v1155_v17, %v992_v6  ;;  %v830_v23 = vpop.f32.mrf.mxu1  ;;  %v68_v6 = vld [vmem:[%s3938_s0 + $0x1b0] sm:$0xff]  ;;  %v67_v17 = vld [vmem:[%s3938_s0 + $0x1a8] sm:$0xff] }
 0x1ca   :  { %v831_v25 = vadd.f32 %v830_v23, %v667_v16  ;;  %1222 = vmatmul.f32.gmra.mxu0 %v50_v9  ;;  %1550 = vmatmul.f32.gmra.mxu2 %v52_v10 }
 0x1cc   :  { %1386 = vmatmul.f32.gmra.mxu1 %v51_v24  ;;  %v69_v24 = vld [vmem:[%s3938_s0 + $0x1b8] sm:$0xff] }
 0x1cd   :  { %1714 = vmatmul.f32.gmra.mxu3 %v53_v27  ;;  %v994_v32 = vpop.f32.mrf.mxu2 }
 0x1ce   :  { %v995_v33 = vadd.f32 %v994_v32, %v831_v25 }
 0x1cf   :  { %v669_v35 = vpop.f32.mrf.mxu0 }
 0x1d0   :  { %v670_v45 = vadd.f32 %v2983_v54, %v669_v35  ;;  %v1158_v47 = vpop.f32.mrf.mxu3  ;;  %v76_v35 = vld [vmem:[%s3938_s0 + $0x1f0] sm:$0xff] }
 0x1d1   :  { %v3136_v48 = vadd.f32 %v1158_v47, %v995_v33  ;;  %v833_v49 = vpop.f32.mrf.mxu1  ;;  %v74_v33 = vld [vmem:[%s3938_s0 + $0x1e0] sm:$0xff] }
 0x1d2   :  { %v834_v52 = vadd.f32 %v833_v49, %v670_v45  ;;  %1225 = vmatmul.f32.gmra.mxu0 %v58_v36  ;;  %1553 = vmatmul.f32.gmra.mxu2 %v60_v40  ;;  %v75_v49 = vld [vmem:[%s3938_s0 + $0x1e8] sm:$0xff] }
 0x1d4   :  { %1389 = vmatmul.f32.gmra.mxu1 %v59_v28 }
 0x1d5   :  { %1717 = vmatmul.f32.gmra.mxu3 %v61_v55  ;;  %v997_v59 = vpop.f32.mrf.mxu2 }
 0x1d6   :  { %v998_v1 = vadd.f32 %v997_v59, %v834_v52  ;;  %v77_v52 = vld [vmem:[%s3938_s0 + $0x1f8] sm:$0xff] }
 0x1d7   :  { %v672_v2 = vpop.f32.mrf.mxu0 }
 0x1d8   :  { %v673_v7 = vadd.f32 %v2983_v54, %v672_v2  ;;  %v1161_v9 = vpop.f32.mrf.mxu3  ;;  %v82_v2 = vld [vmem:[%s3938_s0 + $0x220] sm:$0xff] }
 0x1d9   :  { %v3151_v10 = vadd.f32 %v1161_v9, %v998_v1  ;;  %v836_v16 = vpop.f32.mrf.mxu1 }
 0x1da   :  { %v837_v23 = vadd.f32 %v836_v16, %v673_v7  ;;  %1228 = vmatmul.f32.gmra.mxu0 %v66_v4  ;;  %1556 = vmatmul.f32.gmra.mxu2 %v68_v6  ;;  %v84_v4 = vld [vmem:[%s3938_s0 + $0x230] sm:$0xff] }
 0x1dc   :  { %1392 = vmatmul.f32.gmra.mxu1 %v67_v17  ;;  %v83_v17 = vld [vmem:[%s3938_s0 + $0x228] sm:$0xff] }
 0x1dd   :  { %1720 = vmatmul.f32.gmra.mxu3 %v69_v24  ;;  %v1000_v25 = vpop.f32.mrf.mxu2  ;;  %v85_v24 = vld [vmem:[%s3938_s0 + $0x238] sm:$0xff] }
 0x1de   :  { %v1001_v27 = vadd.f32 %v1000_v25, %v837_v23 }
 0x1df   :  { %v675_v32 = vpop.f32.mrf.mxu0 }
 0x1e0   :  { %v676_v36 = vadd.f32 %v2983_v54, %v675_v32  ;;  %v1164_v40 = vpop.f32.mrf.mxu3 }
 0x1e1   :  { %v3166_v45 = vadd.f32 %v1164_v40, %v1001_v27  ;;  %v839_v47 = vpop.f32.mrf.mxu1 }
 0x1e2   :  { %v840_v28 = vadd.f32 %v839_v47, %v676_v36  ;;  %1231 = vmatmul.f32.gmra.mxu0 %v74_v33  ;;  %1559 = vmatmul.f32.gmra.mxu2 %v76_v35  ;;  %v90_v33 = vld [vmem:[%s3938_s0 + $0x260] sm:$0xff]  ;;  %v92_v35 = vld [vmem:[%s3938_s0 + $0x270] sm:$0xff] }
 0x1e4   :  { %1395 = vmatmul.f32.gmra.mxu1 %v75_v49 }
 0x1e5   :  { %1723 = vmatmul.f32.gmra.mxu3 %v77_v52  ;;  %v1003_v55 = vpop.f32.mrf.mxu2 }
 0x1e6   :  { %v1004_v59 = vadd.f32 %v1003_v55, %v840_v28  ;;  %v91_v28 = vld [vmem:[%s3938_s0 + $0x268] sm:$0xff]  ;;  %v93_v55 = vld [vmem:[%s3938_s0 + $0x278] sm:$0xff] }
 0x1e7   :  { %v678_v1 = vpop.f32.mrf.mxu0 }
 0x1e8   :  { %v679_v6 = vadd.f32 %v2983_v54, %v678_v1  ;;  %v1167_v7 = vpop.f32.mrf.mxu3 }
 0x1e9   :  { %v3181_v9 = vadd.f32 %v1167_v7, %v1004_v59  ;;  %v842_v16 = vpop.f32.mrf.mxu1 }
 0x1ea   :  { %v843_v23 = vadd.f32 %v842_v16, %v679_v6  ;;  %1234 = vmatmul.f32.gmra.mxu0 %v82_v2  ;;  %1562 = vmatmul.f32.gmra.mxu2 %v84_v4  ;;  %v98_v4 = vld [vmem:[%s3938_s0 + $0x2a0] sm:$0xff]  ;;  %v100_v6 = vld [vmem:[%s3938_s0 + $0x2b0] sm:$0xff] }
 0x1ec   :  { %1398 = vmatmul.f32.gmra.mxu1 %v83_v17 }
 0x1ed   :  { %1726 = vmatmul.f32.gmra.mxu3 %v85_v24  ;;  %v1006_v25 = vpop.f32.mrf.mxu2  ;;  %v99_v24 = vld [vmem:[%s3938_s0 + $0x2a8] sm:$0xff] }
 0x1ee   :  { %v1007_v27 = vadd.f32 %v1006_v25, %v843_v23 }
 0x1ef   :  { %v681_v32 = vpop.f32.mrf.mxu0 }
 0x1f0   :  { %v682_v36 = vadd.f32 %v2983_v54, %v681_v32  ;;  %v1170_v40 = vpop.f32.mrf.mxu3 }
 0x1f1   :  { %v3196_v47 = vadd.f32 %v1170_v40, %v1007_v27  ;;  %v845_v49 = vpop.f32.mrf.mxu1  ;;  %v101_v27 = vld [vmem:[%s3938_s0 + $0x2b8] sm:$0xff]  ;;  %v108_v40 = vld [vmem:[%s3938_s0 + $0x2f0] sm:$0xff] }
 0x1f2   :  { %v846_v52 = vadd.f32 %v845_v49, %v682_v36  ;;  %1237 = vmatmul.f32.gmra.mxu0 %v90_v33  ;;  %1565 = vmatmul.f32.gmra.mxu2 %v92_v35  ;;  %v106_v36 = vld [vmem:[%s3938_s0 + $0x2e0] sm:$0xff] }
 0x1f4   :  { %1401 = vmatmul.f32.gmra.mxu1 %v91_v28 }
 0x1f5   :  { %1729 = vmatmul.f32.gmra.mxu3 %v93_v55  ;;  %v1009_v59 = vpop.f32.mrf.mxu2 }
 0x1f6   :  { %v1010_v1 = vadd.f32 %v1009_v59, %v846_v52  ;;  %v107_v59 = vld [vmem:[%s3938_s0 + $0x2e8] sm:$0xff] }
 0x1f7   :  { %v684_v2 = vpop.f32.mrf.mxu0 }
 0x1f8   :  { %v685_v7 = vadd.f32 %v2983_v54, %v684_v2  ;;  %v1173_v16 = vpop.f32.mrf.mxu3  ;;  %v109_v2 = vld [vmem:[%s3938_s0 + $0x2f8] sm:$0xff] }
 0x1f9   :  { %v3211_v17 = vadd.f32 %v1173_v16, %v1010_v1  ;;  %v848_v23 = vpop.f32.mrf.mxu1  ;;  %v114_v16 = vld [vmem:[%s3938_s0 + $0x320] sm:$0xff] }
 0x1fa   :  { %v849_v25 = vadd.f32 %v848_v23, %v685_v7  ;;  %1240 = vmatmul.f32.gmra.mxu0 %v98_v4  ;;  %1568 = vmatmul.f32.gmra.mxu2 %v100_v6  ;;  %v116_v23 = vld [vmem:[%s3938_s0 + $0x330] sm:$0xff] }
 0x1fc   :  { %1404 = vmatmul.f32.gmra.mxu1 %v99_v24 }
 0x1fd   :  { %1732 = vmatmul.f32.gmra.mxu3 %v101_v27  ;;  %v1012_v32 = vpop.f32.mrf.mxu2 }
 0x1fe   :  { %v1013_v33 = vadd.f32 %v1012_v32, %v849_v25 }
 0x1ff   :  { %v687_v35 = vpop.f32.mrf.mxu0 }
 0x200   :  { %v688_v49 = vadd.f32 %v2983_v54, %v687_v35  ;;  %v1176_v28 = vpop.f32.mrf.mxu3 }
 0x201   :  { %v3226_v52 = vadd.f32 %v1176_v28, %v1013_v33  ;;  %v851_v55 = vpop.f32.mrf.mxu1  ;;  %v115_v33 = vld [vmem:[%s3938_s0 + $0x328] sm:$0xff] }
 0x202   :  { %v852_v1 = vadd.f32 %v851_v55, %v688_v49  ;;  %1243 = vmatmul.f32.gmra.mxu0 %v106_v36  ;;  %1571 = vmatmul.f32.gmra.mxu2 %v108_v40  ;;  %v117_v36 = vld [vmem:[%s3938_s0 + $0x338] sm:$0xff]  ;;  %v122_v55 = vld [vmem:[%s3938_s0 + $0x360] sm:$0xff] }
 0x204   :  { %1407 = vmatmul.f32.gmra.mxu1 %v107_v59  ;;  %v124_v59 = vld [vmem:[%s3938_s0 + $0x370] sm:$0xff] }
 0x205   :  { %1735 = vmatmul.f32.gmra.mxu3 %v109_v2  ;;  %v1015_v4 = vpop.f32.mrf.mxu2 }
 0x206   :  { %v1016_v6 = vadd.f32 %v1015_v4, %v852_v1 }
 0x207   :  { %v690_v7 = vpop.f32.mrf.mxu0 }
 0x208   :  { %v691_v24 = vadd.f32 %v2983_v54, %v690_v7  ;;  %v1179_v25 = vpop.f32.mrf.mxu3  ;;  %v123_v7 = vld [vmem:[%s3938_s0 + $0x368] sm:$0xff] }
 0x209   :  { %v3241_v27 = vadd.f32 %v1179_v25, %v1016_v6  ;;  %v854_v32 = vpop.f32.mrf.mxu1 }
 0x20a   :  { %v855_v35 = vadd.f32 %v854_v32, %v691_v24  ;;  %1246 = vmatmul.f32.gmra.mxu0 %v114_v16  ;;  %1574 = vmatmul.f32.gmra.mxu2 %v116_v23  ;;  %v125_v23 = vld [vmem:[%s3938_s0 + $0x378] sm:$0xff] }
 0x20c   :  { %1410 = vmatmul.f32.gmra.mxu1 %v115_v33  ;;  %v130_v33 = vld [vmem:[%s3938_s0 + $0x3a0] sm:$0xff] }
 0x20d   :  { %1738 = vmatmul.f32.gmra.mxu3 %v117_v36  ;;  %v1018_v40 = vpop.f32.mrf.mxu2 }
 0x20e   :  { %v1019_v49 = vadd.f32 %v1018_v40, %v855_v35  ;;  %v132_v35 = vld [vmem:[%s3938_s0 + $0x3b0] sm:$0xff] }
 0x20f   :  { %v693_v28 = vpop.f32.mrf.mxu0 }
 0x210   :  { %v694_v1 = vadd.f32 %v2983_v54, %v693_v28  ;;  %v1182_v2 = vpop.f32.mrf.mxu3 }
 0x211   :  { %v3256_v4 = vadd.f32 %v1182_v2, %v1019_v49  ;;  %v857_v6 = vpop.f32.mrf.mxu1 }
 0x212   :  { %v858_v16 = vadd.f32 %v857_v6, %v694_v1  ;;  %1249 = vmatmul.f32.gmra.mxu0 %v122_v55  ;;  %1577 = vmatmul.f32.gmra.mxu2 %v124_v59  ;;  %v131_v55 = vld [vmem:[%s3938_s0 + $0x3a8] sm:$0xff]  ;;  %v133_v1 = vld [vmem:[%s3938_s0 + $0x3b8] sm:$0xff] }
 0x214   :  { %1413 = vmatmul.f32.gmra.mxu1 %v123_v7 }
 0x215   :  { %1741 = vmatmul.f32.gmra.mxu3 %v125_v23  ;;  %v1021_v24 = vpop.f32.mrf.mxu2  ;;  %v140_v23 = vld [vmem:[%s3938_s0 + $0x3f0] sm:$0xff] }
 0x216   :  { %v1022_v25 = vadd.f32 %v1021_v24, %v858_v16  ;;  %v138_v16 = vld [vmem:[%s3938_s0 + $0x3e0] sm:$0xff] }
 0x217   :  { %v696_v32 = vpop.f32.mrf.mxu0 }
 0x218   :  { %v697_v36 = vadd.f32 %v2983_v54, %v696_v32  ;;  %v1185_v40 = vpop.f32.mrf.mxu3 }
 0x219   :  { %v3271_v49 = vadd.f32 %v1185_v40, %v1022_v25  ;;  %v860_v28 = vpop.f32.mrf.mxu1  ;;  %v141_v40 = vld [vmem:[%s3938_s0 + $0x3f8] sm:$0xff] }
 0x21a   :  { %v861_v59 = vadd.f32 %v860_v28, %v697_v36  ;;  %1252 = vmatmul.f32.gmra.mxu0 %v130_v33  ;;  %1580 = vmatmul.f32.gmra.mxu2 %v132_v35  ;;  %v139_v35 = vld [vmem:[%s3938_s0 + $0x3e8] sm:$0xff] }
 0x21c   :  { %1416 = vmatmul.f32.gmra.mxu1 %v131_v55 }
 0x21d   :  { %1744 = vmatmul.f32.gmra.mxu3 %v133_v1  ;;  %v1024_v2 = vpop.f32.mrf.mxu2  ;;  %v148_v1 = vld [vmem:[%s3938_s0 + $0x430] sm:$0xff] }
 0x21e   :  { %v1025_v6 = vadd.f32 %v1024_v2, %v861_v59  ;;  %v146_v59 = vld [vmem:[%s3938_s0 + $0x420] sm:$0xff] }
 0x21f   :  { %v699_v7 = vpop.f32.mrf.mxu0 }
 0x220   :  { %v700_v24 = vadd.f32 %v2983_v54, %v699_v7  ;;  %v1188_v25 = vpop.f32.mrf.mxu3 }
 0x221   :  { %v3286_v32 = vadd.f32 %v1188_v25, %v1025_v6  ;;  %v863_v33 = vpop.f32.mrf.mxu1 }
 0x222   :  { %v864_v36 = vadd.f32 %v863_v33, %v700_v24  ;;  %1255 = vmatmul.f32.gmra.mxu0 %v138_v16  ;;  %1583 = vmatmul.f32.gmra.mxu2 %v140_v23  ;;  %v147_v23 = vld [vmem:[%s3938_s0 + $0x428] sm:$0xff]  ;;  %v149_v24 = vld [vmem:[%s3938_s0 + $0x438] sm:$0xff] }
 0x224   :  { %1419 = vmatmul.f32.gmra.mxu1 %v139_v35 }
 0x225   :  { %1747 = vmatmul.f32.gmra.mxu3 %v141_v40  ;;  %v1027_v28 = vpop.f32.mrf.mxu2  ;;  %v156_v40 = vld [vmem:[%s3938_s0 + $0x470] sm:$0xff] }
 0x226   :  { %v1028_v55 = vadd.f32 %v1027_v28, %v864_v36 }
 0x227   :  { %v1211_v54 = vpop.f32.mrf.mxu0 }
 0x228   :  { %v1191_v2 = vpop.f32.mrf.mxu3  ;;  %v1212_v6 = vadd.f32 %v1211_v54, %v2468_v44  ;;  %v154_v44 = vld [vmem:[%s3938_s0 + $0x460] sm:$0xff] }
 0x229   :  { %v3301_v7 = vadd.f32 %v1191_v2, %v1028_v55  ;;  %v1375_v16 = vpop.f32.mrf.mxu1  ;;  %v157_v2 = vld [vmem:[%s3938_s0 + $0x478] sm:$0xff] }
 0x22a   :  { %1258 = vmatmul.f32.gmra.mxu0 %v146_v59  ;;  %1586 = vmatmul.f32.gmra.mxu2 %v148_v1  ;;  %v1376_v25 = vadd.f32 %v1375_v16, %v1212_v6  ;;  %v155_v1 = vld [vmem:[%s3938_s0 + $0x468] sm:$0xff] }
 0x22c   :  { %1422 = vmatmul.f32.gmra.mxu1 %v147_v23 }
 0x22d   :  { %1750 = vmatmul.f32.gmra.mxu3 %v149_v24  ;;  %v1539_v33 = vpop.f32.mrf.mxu2 }
 0x22e   :  { %v1540_v35 = vadd.f32 %v1539_v33, %v1376_v25  ;;  %v162_v25 = vld [vmem:[%s3938_s0 + $0x4a0] sm:$0xff]  ;;  %v164_v33 = vld [vmem:[%s3938_s0 + $0x4b0] sm:$0xff] }
 0x22f   :  { %v1214_v36 = vpop.f32.mrf.mxu0 }
 0x230   :  { %v1215_v28 = vadd.f32 %v1214_v36, %v2486_v57  ;;  %v1703_v55 = vpop.f32.mrf.mxu3 }
 0x231   :  { %v1704_v54 = vadd.f32 %v1703_v55, %v1540_v35  ;;  %v1378_v59 = vpop.f32.mrf.mxu1  ;;  %v165_v55 = vld [vmem:[%s3938_s0 + $0x4b8] sm:$0xff] }
 0x232   :  { %1261 = vmatmul.f32.gmra.mxu0 %v154_v44  ;;  %1589 = vmatmul.f32.gmra.mxu2 %v156_v40  ;;  %v1379_v16 = vadd.f32 %v1378_v59, %v1215_v28  ;;  %v163_v28 = vld [vmem:[%s3938_s0 + $0x4a8] sm:$0xff] }
 0x233   :  { %v1850_v6 = vmax.f32 %v1704_v54, 0.0 }
 0x234   :  { %1425 = vmatmul.f32.gmra.mxu1 %v155_v1 }
 0x235   :  { %1900 = vst.msk [vmem:[%s3940_s3] sm:$0xff] %vm1899_vm0, %v1850_v6  ;;  %1753 = vmatmul.f32.gmra.mxu3 %v157_v2  ;;  %v1542_v57 = vpop.f32.mrf.mxu2  ;;  %v170_v6 = vld [vmem:[%s3938_s0 + $0x4e0] sm:$0xff] }
 0x236   :  { %v1543_v23 = vadd.f32 %v1542_v57, %v1379_v16  ;;  %v172_v16 = vld [vmem:[%s3938_s0 + $0x4f0] sm:$0xff] }
 0x237   :  { %v1217_v24 = vpop.f32.mrf.mxu0 }
 0x238   :  { %v1218_v35 = vadd.f32 %v1217_v24, %v2510_v8  ;;  %v1706_v36 = vpop.f32.mrf.mxu3 }
 0x239   :  { %v1707_v44 = vadd.f32 %v1706_v36, %v1543_v23  ;;  %v1381_v40 = vpop.f32.mrf.mxu1 }
 0x23a   :  { %1264 = vmatmul.f32.gmra.mxu0 %v162_v25  ;;  %1592 = vmatmul.f32.gmra.mxu2 %v164_v33  ;;  %v1382_v59 = vadd.f32 %v1381_v40, %v1218_v35  ;;  %v171_v33 = vld [vmem:[%s3938_s0 + $0x4e8] sm:$0xff]  ;;  %v173_v35 = vld [vmem:[%s3938_s0 + $0x4f8] sm:$0xff] }
 0x23b   :  { %v1851_v54 = vmax.f32 %v1707_v44, 0.0 }
 0x23c   :  { %1428 = vmatmul.f32.gmra.mxu1 %v163_v28 }
 0x23d   :  { %1901 = vst.msk [vmem:[%s3940_s3 + $0x8] sm:$0xff] %vm1899_vm0, %v1851_v54  ;;  %1756 = vmatmul.f32.gmra.mxu3 %v165_v55  ;;  %v1545_v8 = vpop.f32.mrf.mxu2  ;;  %v178_v55 = vld [vmem:[%s3938_s0 + $0x520] sm:$0xff]  ;;  %v180_v54 = vld [vmem:[%s3938_s0 + $0x530] sm:$0xff] }
 0x23e   :  { %v1546_v1 = vadd.f32 %v1545_v8, %v1382_v59 }
 0x23f   :  { %v1220_v2 = vpop.f32.mrf.mxu0 }
 0x240   :  { %v1221_v57 = vadd.f32 %v1220_v2, %v2525_v20  ;;  %v1709_v23 = vpop.f32.mrf.mxu3 }
 0x241   :  { %v1710_v24 = vadd.f32 %v1709_v23, %v1546_v1  ;;  %v1384_v25 = vpop.f32.mrf.mxu1 }
 0x242   :  { %1267 = vmatmul.f32.gmra.mxu0 %v170_v6  ;;  %1595 = vmatmul.f32.gmra.mxu2 %v172_v16  ;;  %v1385_v44 = vadd.f32 %v1384_v25, %v1221_v57  ;;  %v179_v6 = vld [vmem:[%s3938_s0 + $0x528] sm:$0xff]  ;;  %v181_v16 = vld [vmem:[%s3938_s0 + $0x538] sm:$0xff] }
 0x243   :  { %v1852_v36 = vmax.f32 %v1710_v24, 0.0 }
 0x244   :  { %1431 = vmatmul.f32.gmra.mxu1 %v171_v33  ;;  %v186_v33 = vld [vmem:[%s3938_s0 + $0x560] sm:$0xff] }
 0x245   :  { %1902 = vst.msk [vmem:[%s3940_s3 + $0x10] sm:$0xff] %vm1899_vm0, %v1852_v36  ;;  %1759 = vmatmul.f32.gmra.mxu3 %v173_v35  ;;  %v1548_v20 = vpop.f32.mrf.mxu2  ;;  %v188_v35 = vld [vmem:[%s3938_s0 + $0x570] sm:$0xff] }
 0x246   :  { %v1549_v40 = vadd.f32 %v1548_v20, %v1385_v44 }
 0x247   :  { %v1223_v28 = vpop.f32.mrf.mxu0 }
 0x248   :  { %v1224_v59 = vadd.f32 %v1223_v28, %v2543_v34  ;;  %v1712_v8 = vpop.f32.mrf.mxu3  ;;  %v187_v28 = vld [vmem:[%s3938_s0 + $0x568] sm:$0xff] }
 0x249   :  { %v1713_v1 = vadd.f32 %v1712_v8, %v1549_v40  ;;  %v1387_v2 = vpop.f32.mrf.mxu1 }
 0x24a   :  { %1270 = vmatmul.f32.gmra.mxu0 %v178_v55  ;;  %1598 = vmatmul.f32.gmra.mxu2 %v180_v54  ;;  %v1388_v23 = vadd.f32 %v1387_v2, %v1224_v59  ;;  %v189_v55 = vld [vmem:[%s3938_s0 + $0x578] sm:$0xff]  ;;  %v194_v2 = vld [vmem:[%s3938_s0 + $0x5a0] sm:$0xff] }
 0x24b   :  { %v1853_v57 = vmax.f32 %v1713_v1, 0.0 }
 0x24c   :  { %1434 = vmatmul.f32.gmra.mxu1 %v179_v6  ;;  %v196_v6 = vld [vmem:[%s3938_s0 + $0x5b0] sm:$0xff] }
 0x24d   :  { %1903 = vst.msk [vmem:[%s3940_s3 + $0x18] sm:$0xff] %vm1899_vm0, %v1853_v57  ;;  %1762 = vmatmul.f32.gmra.mxu3 %v181_v16  ;;  %v1551_v34 = vpop.f32.mrf.mxu2 }
 0x24e   :  { %v1552_v24 = vadd.f32 %v1551_v34, %v1388_v23 }
 0x24f   :  { %v1226_v25 = vpop.f32.mrf.mxu0 }
 0x250   :  { %v1227_v36 = vadd.f32 %v1226_v25, %v2567_v50  ;;  %v1715_v44 = vpop.f32.mrf.mxu3  ;;  %v197_v25 = vld [vmem:[%s3938_s0 + $0x5b8] sm:$0xff] }
 0x251   :  { %v1716_v20 = vadd.f32 %v1715_v44, %v1552_v24  ;;  %v1390_v40 = vpop.f32.mrf.mxu1  ;;  %v195_v24 = vld [vmem:[%s3938_s0 + $0x5a8] sm:$0xff] }
 0x252   :  { %1273 = vmatmul.f32.gmra.mxu0 %v186_v33  ;;  %1601 = vmatmul.f32.gmra.mxu2 %v188_v35  ;;  %v1391_v59 = vadd.f32 %v1390_v40, %v1227_v36  ;;  %v204_v40 = vld [vmem:[%s3938_s0 + $0x5f0] sm:$0xff] }
 0x253   :  { %v1854_v54 = vmax.f32 %v1716_v20, 0.0  ;;  %v202_v20 = vld [vmem:[%s3938_s0 + $0x5e0] sm:$0xff] }
 0x254   :  { %1437 = vmatmul.f32.gmra.mxu1 %v187_v28 }
 0x255   :  { %1904 = vst.msk [vmem:[%s3940_s3 + $0x20] sm:$0xff] %vm1899_vm0, %v1854_v54  ;;  %1765 = vmatmul.f32.gmra.mxu3 %v189_v55  ;;  %v1554_v50 = vpop.f32.mrf.mxu2 }
 0x256   :  { %v1555_v8 = vadd.f32 %v1554_v50, %v1391_v59  ;;  %v203_v50 = vld [vmem:[%s3938_s0 + $0x5e8] sm:$0xff] }
 0x257   :  { %v1229_v1 = vpop.f32.mrf.mxu0 }
 0x258   :  { %v1230_v16 = vadd.f32 %v1229_v1, %v2582_v63  ;;  %v1718_v57 = vpop.f32.mrf.mxu3 }
 0x259   :  { %v1719_v23 = vadd.f32 %v1718_v57, %v1555_v8  ;;  %v1393_v34 = vpop.f32.mrf.mxu1  ;;  %v205_v8 = vld [vmem:[%s3938_s0 + $0x5f8] sm:$0xff]  ;;  %v210_v57 = vld [vmem:[%s3938_s0 + $0x620] sm:$0xff] }
 0x25a   :  { %1276 = vmatmul.f32.gmra.mxu0 %v194_v2  ;;  %1604 = vmatmul.f32.gmra.mxu2 %v196_v6  ;;  %v1394_v35 = vadd.f32 %v1393_v34, %v1230_v16 }
 0x25b   :  { %v1855_v33 = vmax.f32 %v1719_v23, 0.0  ;;  %v212_v23 = vld [vmem:[%s3938_s0 + $0x630] sm:$0xff] }
 0x25c   :  { %1440 = vmatmul.f32.gmra.mxu1 %v195_v24 }
 0x25d   :  { %1905 = vst.msk [vmem:[%s3940_s3 + $0x28] sm:$0xff] %vm1899_vm0, %v1855_v33  ;;  %1768 = vmatmul.f32.gmra.mxu3 %v197_v25  ;;  %v1557_v63 = vpop.f32.mrf.mxu2 }
 0x25e   :  { %v1558_v36 = vadd.f32 %v1557_v63, %v1394_v35  ;;  %v211_v35 = vld [vmem:[%s3938_s0 + $0x628] sm:$0xff]  ;;  %v213_v63 = vld [vmem:[%s3938_s0 + $0x638] sm:$0xff] }
 0x25f   :  { %v1232_v44 = vpop.f32.mrf.mxu0 }
 0x260   :  { %v1233_v28 = vadd.f32 %v1232_v44, %v2597_v12  ;;  %v1721_v55 = vpop.f32.mrf.mxu3 }
 0x261   :  { %v1722_v54 = vadd.f32 %v1721_v55, %v1558_v36  ;;  %v1396_v59 = vpop.f32.mrf.mxu1  ;;  %v220_v55 = vld [vmem:[%s3938_s0 + $0x670] sm:$0xff] }
 0x262   :  { %1279 = vmatmul.f32.gmra.mxu0 %v202_v20  ;;  %1607 = vmatmul.f32.gmra.mxu2 %v204_v40  ;;  %v1397_v2 = vadd.f32 %v1396_v59, %v1233_v28  ;;  %v218_v28 = vld [vmem:[%s3938_s0 + $0x660] sm:$0xff] }
 0x263   :  { %v1856_v1 = vmax.f32 %v1722_v54, 0.0 }
 0x264   :  { %1443 = vmatmul.f32.gmra.mxu1 %v203_v50 }
 0x265   :  { %1906 = vst.msk [vmem:[%s3940_s3 + $0x30] sm:$0xff] %vm1899_vm0, %v1856_v1  ;;  %1771 = vmatmul.f32.gmra.mxu3 %v205_v8  ;;  %v1560_v12 = vpop.f32.mrf.mxu2  ;;  %v219_v1 = vld [vmem:[%s3938_s0 + $0x668] sm:$0xff] }
 0x266   :  { %v1561_v6 = vadd.f32 %v1560_v12, %v1397_v2  ;;  %v221_v2 = vld [vmem:[%s3938_s0 + $0x678] sm:$0xff] }
 0x267   :  { %v1235_v16 = vpop.f32.mrf.mxu0 }
 0x268   :  { %v1236_v34 = vadd.f32 %v1235_v16, %v2624_v30  ;;  %v1724_v24 = vpop.f32.mrf.mxu3 }
 0x269   :  { %v1725_v25 = vadd.f32 %v1724_v24, %v1561_v6  ;;  %v1399_v33 = vpop.f32.mrf.mxu1 }
 0x26a   :  { %1282 = vmatmul.f32.gmra.mxu0 %v210_v57  ;;  %1610 = vmatmul.f32.gmra.mxu2 %v212_v23  ;;  %v1400_v44 = vadd.f32 %v1399_v33, %v1236_v34  ;;  %v226_v23 = vld [vmem:[%s3938_s0 + $0x6a0] sm:$0xff]  ;;  %v228_v34 = vld [vmem:[%s3938_s0 + $0x6b0] sm:$0xff] }
 0x26b   :  { %v1857_v36 = vmax.f32 %v1725_v25, 0.0 }
 0x26c   :  { %1446 = vmatmul.f32.gmra.mxu1 %v211_v35 }
 0x26d   :  { %1907 = vst.msk [vmem:[%s3940_s3 + $0x38] sm:$0xff] %vm1899_vm0, %v1857_v36  ;;  %1774 = vmatmul.f32.gmra.mxu3 %v213_v63  ;;  %v1563_v30 = vpop.f32.mrf.mxu2  ;;  %v227_v63 = vld [vmem:[%s3938_s0 + $0x6a8] sm:$0xff]  ;;  %v229_v36 = vld [vmem:[%s3938_s0 + $0x6b8] sm:$0xff] }
 0x26e   :  { %v1564_v20 = vadd.f32 %v1563_v30, %v1400_v44 }
 0x26f   :  { %v1238_v40 = vpop.f32.mrf.mxu0 }
 0x270   :  { %v1239_v54 = vadd.f32 %v1238_v40, %v2639_v43  ;;  %v1727_v59 = vpop.f32.mrf.mxu3 }
 0x271   :  { %v1728_v50 = vadd.f32 %v1727_v59, %v1564_v20  ;;  %v1402_v8 = vpop.f32.mrf.mxu1 }
 0x272   :  { %1285 = vmatmul.f32.gmra.mxu0 %v218_v28  ;;  %1613 = vmatmul.f32.gmra.mxu2 %v220_v55  ;;  %v1403_v6 = vadd.f32 %v1402_v8, %v1239_v54  ;;  %v234_v28 = vld [vmem:[%s3938_s0 + $0x6e0] sm:$0xff]  ;;  %v236_v55 = vld [vmem:[%s3938_s0 + $0x6f0] sm:$0xff] }
 0x273   :  { %v1858_v12 = vmax.f32 %v1728_v50, 0.0 }
 0x274   :  { %1449 = vmatmul.f32.gmra.mxu1 %v219_v1  ;;  %v235_v1 = vld [vmem:[%s3938_s0 + $0x6e8] sm:$0xff] }
 0x275   :  { %1908 = vst.msk [vmem:[%s3940_s3 + $0x40] sm:$0xff] %vm1899_vm0, %v1858_v12  ;;  %1777 = vmatmul.f32.gmra.mxu3 %v221_v2  ;;  %v1566_v43 = vpop.f32.mrf.mxu2  ;;  %v237_v2 = vld [vmem:[%s3938_s0 + $0x6f8] sm:$0xff] }
 0x276   :  { %v1567_v16 = vadd.f32 %v1566_v43, %v1403_v6 }
 0x277   :  { %v1241_v57 = vpop.f32.mrf.mxu0 }
 0x278   :  { %v1242_v24 = vadd.f32 %v1241_v57, %v2654_v58  ;;  %v1730_v25 = vpop.f32.mrf.mxu3  ;;  %v242_v57 = vld [vmem:[%s3938_s0 + $0x720] sm:$0xff] }
 0x279   :  { %v1731_v33 = vadd.f32 %v1730_v25, %v1567_v16  ;;  %v1405_v35 = vpop.f32.mrf.mxu1 }
 0x27a   :  { %1288 = vmatmul.f32.gmra.mxu0 %v226_v23  ;;  %1616 = vmatmul.f32.gmra.mxu2 %v228_v34  ;;  %v1406_v30 = vadd.f32 %v1405_v35, %v1242_v24  ;;  %v244_v23 = vld [vmem:[%s3938_s0 + $0x730] sm:$0xff]  ;;  %v243_v35 = vld [vmem:[%s3938_s0 + $0x728] sm:$0xff] }
 0x27b   :  { %v1859_v44 = vmax.f32 %v1731_v33, 0.0 }
 0x27c   :  { %1452 = vmatmul.f32.gmra.mxu1 %v227_v63  ;;  %v245_v63 = vld [vmem:[%s3938_s0 + $0x738] sm:$0xff] }
 0x27d   :  { %1909 = vst.msk [vmem:[%s3940_s3 + $0x48] sm:$0xff] %vm1899_vm0, %v1859_v44  ;;  %1780 = vmatmul.f32.gmra.mxu3 %v229_v36  ;;  %v1569_v58 = vpop.f32.mrf.mxu2 }
 0x27e   :  { %v1570_v20 = vadd.f32 %v1569_v58, %v1406_v30 }
 0x27f   :  { %v1244_v40 = vpop.f32.mrf.mxu0 }
 0x280   :  { %v1245_v54 = vadd.f32 %v1244_v40, %v2681_v13  ;;  %v1733_v59 = vpop.f32.mrf.mxu3  ;;  %v252_v40 = vld [vmem:[%s3938_s0 + $0x770] sm:$0xff] }
 0x281   :  { %v1734_v50 = vadd.f32 %v1733_v59, %v1570_v20  ;;  %v1408_v8 = vpop.f32.mrf.mxu1  ;;  %v250_v20 = vld [vmem:[%s3938_s0 + $0x760] sm:$0xff] }
 0x282   :  { %1291 = vmatmul.f32.gmra.mxu0 %v234_v28  ;;  %1619 = vmatmul.f32.gmra.mxu2 %v236_v55  ;;  %v1409_v6 = vadd.f32 %v1408_v8, %v1245_v54  ;;  %v253_v8 = vld [vmem:[%s3938_s0 + $0x778] sm:$0xff] }
 0x283   :  { %v1860_v12 = vmax.f32 %v1734_v50, 0.0  ;;  %v251_v50 = vld [vmem:[%s3938_s0 + $0x768] sm:$0xff] }
 0x284   :  { %1455 = vmatmul.f32.gmra.mxu1 %v235_v1 }
 0x285   :  { %1910 = vst.msk [vmem:[%s3940_s3 + $0x50] sm:$0xff] %vm1899_vm0, %v1860_v12  ;;  %1783 = vmatmul.f32.gmra.mxu3 %v237_v2  ;;  %v1572_v13 = vpop.f32.mrf.mxu2 }
 0x286   :  { %v1573_v43 = vadd.f32 %v1572_v13, %v1409_v6  ;;  %v258_v13 = vld [vmem:[%s3938_s0 + $0x7a0] sm:$0xff] }
 0x287   :  { %v1247_v16 = vpop.f32.mrf.mxu0 }
 0x288   :  { %v1248_v34 = vadd.f32 %v1247_v16, %v2696_v26  ;;  %v1736_v24 = vpop.f32.mrf.mxu3 }
 0x289   :  { %v1737_v25 = vadd.f32 %v1736_v24, %v1573_v43  ;;  %v1411_v33 = vpop.f32.mrf.mxu1  ;;  %v260_v43 = vld [vmem:[%s3938_s0 + $0x7b0] sm:$0xff]  ;;  %v259_v24 = vld [vmem:[%s3938_s0 + $0x7a8] sm:$0xff] }
 0x28a   :  { %1294 = vmatmul.f32.gmra.mxu0 %v242_v57  ;;  %1622 = vmatmul.f32.gmra.mxu2 %v244_v23  ;;  %v1412_v44 = vadd.f32 %v1411_v33, %v1248_v34 }
 0x28b   :  { %v1861_v36 = vmax.f32 %v1737_v25, 0.0  ;;  %v261_v25 = vld [vmem:[%s3938_s0 + $0x7b8] sm:$0xff] }
 0x28c   :  { %1458 = vmatmul.f32.gmra.mxu1 %v243_v35 }
 0x28d   :  { %1911 = vst.msk [vmem:[%s3940_s3 + $0x58] sm:$0xff] %vm1899_vm0, %v1861_v36  ;;  %1786 = vmatmul.f32.gmra.mxu3 %v245_v63  ;;  %v1575_v26 = vpop.f32.mrf.mxu2 }
 0x28e   :  { %v1576_v30 = vadd.f32 %v1575_v26, %v1412_v44  ;;  %v266_v44 = vld [vmem:[%s3938_s0 + $0x7e0] sm:$0xff]  ;;  %v268_v26 = vld [vmem:[%s3938_s0 + $0x7f0] sm:$0xff] }
 0x28f   :  { %v1250_v58 = vpop.f32.mrf.mxu0 }
 0x290   :  { %v1251_v28 = vadd.f32 %v1250_v58, %v2711_v41  ;;  %v1739_v55 = vpop.f32.mrf.mxu3 }
 0x291   :  { %v1740_v54 = vadd.f32 %v1739_v55, %v1576_v30  ;;  %v1414_v59 = vpop.f32.mrf.mxu1  ;;  %v269_v55 = vld [vmem:[%s3938_s0 + $0x7f8] sm:$0xff] }
 0x292   :  { %1297 = vmatmul.f32.gmra.mxu0 %v250_v20  ;;  %1625 = vmatmul.f32.gmra.mxu2 %v252_v40  ;;  %v1415_v2 = vadd.f32 %v1414_v59, %v1251_v28  ;;  %v267_v28 = vld [vmem:[%s3938_s0 + $0x7e8] sm:$0xff] }
 0x293   :  { %v1862_v1 = vmax.f32 %v1740_v54, 0.0 }
 0x294   :  { %1461 = vmatmul.f32.gmra.mxu1 %v251_v50 }
 0x295   :  { %1912 = vst.msk [vmem:[%s3940_s3 + $0x60] sm:$0xff] %vm1899_vm0, %v1862_v1  ;;  %1789 = vmatmul.f32.gmra.mxu3 %v253_v8  ;;  %v1578_v41 = vpop.f32.mrf.mxu2  ;;  %v274_v1 = vld [vmem:[%s3938_s0 + $0x820] sm:$0xff] }
 0x296   :  { %v1579_v12 = vadd.f32 %v1578_v41, %v1415_v2  ;;  %v276_v2 = vld [vmem:[%s3938_s0 + $0x830] sm:$0xff] }
 0x297   :  { %v1253_v6 = vpop.f32.mrf.mxu0 }
 0x298   :  { %v1254_v16 = vadd.f32 %v1253_v6, %v2738_v62  ;;  %v1742_v57 = vpop.f32.mrf.mxu3 }
 0x299   :  { %v1743_v23 = vadd.f32 %v1742_v57, %v1579_v12  ;;  %v1417_v34 = vpop.f32.mrf.mxu1 }
 0x29a   :  { %1300 = vmatmul.f32.gmra.mxu0 %v258_v13  ;;  %1628 = vmatmul.f32.gmra.mxu2 %v260_v43  ;;  %v1418_v35 = vadd.f32 %v1417_v34, %v1254_v16  ;;  %v275_v43 = vld [vmem:[%s3938_s0 + $0x828] sm:$0xff]  ;;  %v277_v16 = vld [vmem:[%s3938_s0 + $0x838] sm:$0xff] }
 0x29b   :  { %v1863_v33 = vmax.f32 %v1743_v23, 0.0 }
 0x29c   :  { %1464 = vmatmul.f32.gmra.mxu1 %v259_v24 }
 0x29d   :  { %1913 = vst.msk [vmem:[%s3940_s3 + $0x68] sm:$0xff] %vm1899_vm0, %v1863_v33  ;;  %1792 = vmatmul.f32.gmra.mxu3 %v261_v25  ;;  %v1581_v62 = vpop.f32.mrf.mxu2  ;;  %v282_v25 = vld [vmem:[%s3938_s0 + $0x860] sm:$0xff]  ;;  %v284_v33 = vld [vmem:[%s3938_s0 + $0x870] sm:$0xff] }
 0x29e   :  { %v1582_v63 = vadd.f32 %v1581_v62, %v1418_v35 }
 0x29f   :  { %v1256_v36 = vpop.f32.mrf.mxu0 }
 0x2a0   :  { %v1257_v30 = vadd.f32 %v1256_v36, %v2753_v14  ;;  %v1745_v58 = vpop.f32.mrf.mxu3 }
 0x2a1   :  { %v1746_v20 = vadd.f32 %v1745_v58, %v1582_v63  ;;  %v1420_v40 = vpop.f32.mrf.mxu1 }
 0x2a2   :  { %1303 = vmatmul.f32.gmra.mxu0 %v266_v44  ;;  %1631 = vmatmul.f32.gmra.mxu2 %v268_v26  ;;  %v1421_v59 = vadd.f32 %v1420_v40, %v1257_v30  ;;  %v283_v44 = vld [vmem:[%s3938_s0 + $0x868] sm:$0xff]  ;;  %v285_v26 = vld [vmem:[%s3938_s0 + $0x878] sm:$0xff] }
 0x2a3   :  { %v1864_v54 = vmax.f32 %v1746_v20, 0.0 }
 0x2a4   :  { %1467 = vmatmul.f32.gmra.mxu1 %v267_v28  ;;  %v290_v28 = vld [vmem:[%s3938_s0 + $0x8a0] sm:$0xff] }
 0x2a5   :  { %1914 = vst.msk [vmem:[%s3940_s3 + $0x70] sm:$0xff] %vm1899_vm0, %v1864_v54  ;;  %1795 = vmatmul.f32.gmra.mxu3 %v269_v55  ;;  %v1584_v14 = vpop.f32.mrf.mxu2  ;;  %v292_v55 = vld [vmem:[%s3938_s0 + $0x8b0] sm:$0xff] }
 0x2a6   :  { %v1585_v50 = vadd.f32 %v1584_v14, %v1421_v59 }
 0x2a7   :  { %v1259_v8 = vpop.f32.mrf.mxu0 }
 0x2a8   :  { %v1260_v41 = vadd.f32 %v1259_v8, %v2768_v29  ;;  %v1748_v12 = vpop.f32.mrf.mxu3  ;;  %v291_v8 = vld [vmem:[%s3938_s0 + $0x8a8] sm:$0xff] }
 0x2a9   :  { %v1749_v6 = vadd.f32 %v1748_v12, %v1585_v50  ;;  %v1423_v13 = vpop.f32.mrf.mxu1 }
 0x2aa   :  { %1306 = vmatmul.f32.gmra.mxu0 %v274_v1  ;;  %1634 = vmatmul.f32.gmra.mxu2 %v276_v2  ;;  %v1424_v23 = vadd.f32 %v1423_v13, %v1260_v41  ;;  %v293_v1 = vld [vmem:[%s3938_s0 + $0x8b8] sm:$0xff]  ;;  %v298_v13 = vld [vmem:[%s3938_s0 + $0x8e0] sm:$0xff] }
 0x2ab   :  { %v1865_v57 = vmax.f32 %v1749_v6, 0.0 }
 0x2ac   :  { %1470 = vmatmul.f32.gmra.mxu1 %v275_v43  ;;  %v300_v43 = vld [vmem:[%s3938_s0 + $0x8f0] sm:$0xff] }
 0x2ad   :  { %1915 = vst.msk [vmem:[%s3940_s3 + $0x78] sm:$0xff] %vm1899_vm0, %v1865_v57  ;;  %1798 = vmatmul.f32.gmra.mxu3 %v277_v16  ;;  %v1587_v29 = vpop.f32.mrf.mxu2 }
 0x2ae   :  { %v1588_v34 = vadd.f32 %v1587_v29, %v1424_v23 }
 0x2af   :  { %v1262_v24 = vpop.f32.mrf.mxu0 }
 0x2b0   :  { %v1263_v35 = vadd.f32 %v1262_v24, %v2795_v51  ;;  %v1751_v62 = vpop.f32.mrf.mxu3  ;;  %v301_v24 = vld [vmem:[%s3938_s0 + $0x8f8] sm:$0xff] }
 0x2b1   :  { %v1752_v63 = vadd.f32 %v1751_v62, %v1588_v34  ;;  %v1426_v36 = vpop.f32.mrf.mxu1  ;;  %v299_v34 = vld [vmem:[%s3938_s0 + $0x8e8] sm:$0xff] }
 0x2b2   :  { %1309 = vmatmul.f32.gmra.mxu0 %v282_v25  ;;  %1637 = vmatmul.f32.gmra.mxu2 %v284_v33  ;;  %v1427_v58 = vadd.f32 %v1426_v36, %v1263_v35  ;;  %v308_v36 = vld [vmem:[%s3938_s0 + $0x930] sm:$0xff] }
 0x2b3   :  { %v1866_v30 = vmax.f32 %v1752_v63, 0.0  ;;  %v306_v63 = vld [vmem:[%s3938_s0 + $0x920] sm:$0xff] }
 0x2b4   :  { %1473 = vmatmul.f32.gmra.mxu1 %v283_v44 }
 0x2b5   :  { %1916 = vst.msk [vmem:[%s3940_s3 + $0x80] sm:$0xff] %vm1899_vm0, %v1866_v30  ;;  %1801 = vmatmul.f32.gmra.mxu3 %v285_v26  ;;  %v1590_v51 = vpop.f32.mrf.mxu2 }
 0x2b6   :  { %v1591_v20 = vadd.f32 %v1590_v51, %v1427_v58  ;;  %v307_v51 = vld [vmem:[%s3938_s0 + $0x928] sm:$0xff] }
 0x2b7   :  { %v1265_v40 = vpop.f32.mrf.mxu0 }
 0x2b8   :  { %v1266_v54 = vadd.f32 %v1265_v40, %v2810_v3  ;;  %v1754_v59 = vpop.f32.mrf.mxu3 }
 0x2b9   :  { %v1755_v14 = vadd.f32 %v1754_v59, %v1591_v20  ;;  %v1429_v50 = vpop.f32.mrf.mxu1  ;;  %v309_v20 = vld [vmem:[%s3938_s0 + $0x938] sm:$0xff]  ;;  %v314_v59 = vld [vmem:[%s3938_s0 + $0x960] sm:$0xff] }
 0x2ba   :  { %1312 = vmatmul.f32.gmra.mxu0 %v290_v28  ;;  %1640 = vmatmul.f32.gmra.mxu2 %v292_v55  ;;  %v1430_v41 = vadd.f32 %v1429_v50, %v1266_v54 }
 0x2bb   :  { %v1867_v2 = vmax.f32 %v1755_v14, 0.0  ;;  %v316_v14 = vld [vmem:[%s3938_s0 + $0x970] sm:$0xff] }
 0x2bc   :  { %1476 = vmatmul.f32.gmra.mxu1 %v291_v8 }
 0x2bd   :  { %1917 = vst.msk [vmem:[%s3940_s3 + $0x88] sm:$0xff] %vm1899_vm0, %v1867_v2  ;;  %1804 = vmatmul.f32.gmra.mxu3 %v293_v1  ;;  %v1593_v3 = vpop.f32.mrf.mxu2 }
 0x2be   :  { %v1594_v12 = vadd.f32 %v1593_v3, %v1430_v41  ;;  %v315_v41 = vld [vmem:[%s3938_s0 + $0x968] sm:$0xff]  ;;  %v317_v3 = vld [vmem:[%s3938_s0 + $0x978] sm:$0xff] }
 0x2bf   :  { %v1268_v6 = vpop.f32.mrf.mxu0 }
 0x2c0   :  { %v1269_v16 = vadd.f32 %v1268_v6, %v2825_v19  ;;  %v1757_v57 = vpop.f32.mrf.mxu3 }
 0x2c1   :  { %v1758_v23 = vadd.f32 %v1757_v57, %v1594_v12  ;;  %v1432_v29 = vpop.f32.mrf.mxu1  ;;  %v324_v57 = vld [vmem:[%s3938_s0 + $0x9b0] sm:$0xff] }
 0x2c2   :  { %1315 = vmatmul.f32.gmra.mxu0 %v298_v13  ;;  %1643 = vmatmul.f32.gmra.mxu2 %v300_v43  ;;  %v1433_v33 = vadd.f32 %v1432_v29, %v1269_v16  ;;  %v322_v16 = vld [vmem:[%s3938_s0 + $0x9a0] sm:$0xff] }
 0x2c3   :  { %v1868_v25 = vmax.f32 %v1758_v23, 0.0 }
 0x2c4   :  { %1479 = vmatmul.f32.gmra.mxu1 %v299_v34 }
 0x2c5   :  { %1918 = vst.msk [vmem:[%s3940_s3 + $0x90] sm:$0xff] %vm1899_vm0, %v1868_v25  ;;  %1807 = vmatmul.f32.gmra.mxu3 %v301_v24  ;;  %v1596_v19 = vpop.f32.mrf.mxu2  ;;  %v323_v25 = vld [vmem:[%s3938_s0 + $0x9a8] sm:$0xff] }
 0x2c6   :  { %v1597_v35 = vadd.f32 %v1596_v19, %v1433_v33  ;;  %v325_v33 = vld [vmem:[%s3938_s0 + $0x9b8] sm:$0xff] }
 0x2c7   :  { %v1271_v62 = vpop.f32.mrf.mxu0 }
 0x2c8   :  { %v1272_v44 = vadd.f32 %v1271_v62, %v2852_v42  ;;  %v1760_v26 = vpop.f32.mrf.mxu3 }
 0x2c9   :  { %v1761_v30 = vadd.f32 %v1760_v26, %v1597_v35  ;;  %v1435_v58 = vpop.f32.mrf.mxu1 }
 0x2ca   :  { %1318 = vmatmul.f32.gmra.mxu0 %v306_v63  ;;  %1646 = vmatmul.f32.gmra.mxu2 %v308_v36  ;;  %v1436_v28 = vadd.f32 %v1435_v58, %v1272_v44  ;;  %v330_v36 = vld [vmem:[%s3938_s0 + $0x9e0] sm:$0xff]  ;;  %v332_v44 = vld [vmem:[%s3938_s0 + $0x9f0] sm:$0xff] }
 0x2cb   :  { %v1869_v40 = vmax.f32 %v1761_v30, 0.0 }
 0x2cc   :  { %1482 = vmatmul.f32.gmra.mxu1 %v307_v51 }
 0x2cd   :  { %1919 = vst.msk [vmem:[%s3940_s3 + $0x98] sm:$0xff] %vm1899_vm0, %v1869_v40  ;;  %1810 = vmatmul.f32.gmra.mxu3 %v309_v20  ;;  %v1599_v42 = vpop.f32.mrf.mxu2  ;;  %v331_v20 = vld [vmem:[%s3938_s0 + $0x9e8] sm:$0xff]  ;;  %v333_v40 = vld [vmem:[%s3938_s0 + $0x9f8] sm:$0xff] }
 0x2ce   :  { %v1600_v55 = vadd.f32 %v1599_v42, %v1436_v28 }
 0x2cf   :  { %v1274_v54 = vpop.f32.mrf.mxu0 }
 0x2d0   :  { %v1275_v50 = vadd.f32 %v1274_v54, %v2867_v60  ;;  %v1763_v8 = vpop.f32.mrf.mxu3 }
 0x2d1   :  { %v1764_v1 = vadd.f32 %v1763_v8, %v1600_v55  ;;  %v1438_v2 = vpop.f32.mrf.mxu1 }
 0x2d2   :  { %1321 = vmatmul.f32.gmra.mxu0 %v314_v59  ;;  %1649 = vmatmul.f32.gmra.mxu2 %v316_v14  ;;  %v1439_v6 = vadd.f32 %v1438_v2, %v1275_v50  ;;  %v338_v59 = vld [vmem:[%s3938_s0 + $0xa20] sm:$0xff]  ;;  %v340_v14 = vld [vmem:[%s3938_s0 + $0xa30] sm:$0xff] }
 0x2d3   :  { %v1870_v12 = vmax.f32 %v1764_v1, 0.0 }
 0x2d4   :  { %1485 = vmatmul.f32.gmra.mxu1 %v315_v41  ;;  %v339_v41 = vld [vmem:[%s3938_s0 + $0xa28] sm:$0xff] }
 0x2d5   :  { %1920 = vst.msk [vmem:[%s3940_s3 + $0xa0] sm:$0xff] %vm1899_vm0, %v1870_v12  ;;  %1813 = vmatmul.f32.gmra.mxu3 %v317_v3  ;;  %v1602_v60 = vpop.f32.mrf.mxu2  ;;  %v341_v3 = vld [vmem:[%s3938_s0 + $0xa38] sm:$0xff] }
 0x2d6   :  { %v1603_v13 = vadd.f32 %v1602_v60, %v1439_v6 }
 0x2d7   :  { %v1277_v43 = vpop.f32.mrf.mxu0 }
 0x2d8   :  { %v1278_v23 = vadd.f32 %v1277_v43, %v2882_v15  ;;  %v1766_v29 = vpop.f32.mrf.mxu3  ;;  %v346_v43 = vld [vmem:[%s3938_s0 + $0xa60] sm:$0xff] }
 0x2d9   :  { %v1767_v34 = vadd.f32 %v1766_v29, %v1603_v13  ;;  %v1441_v24 = vpop.f32.mrf.mxu1 }
 0x2da   :  { %1324 = vmatmul.f32.gmra.mxu0 %v322_v16  ;;  %1652 = vmatmul.f32.gmra.mxu2 %v324_v57  ;;  %v1442_v35 = vadd.f32 %v1441_v24, %v1278_v23  ;;  %v348_v16 = vld [vmem:[%s3938_s0 + $0xa70] sm:$0xff]  ;;  %v347_v24 = vld [vmem:[%s3938_s0 + $0xa68] sm:$0xff] }
 0x2db   :  { %v1871_v19 = vmax.f32 %v1767_v34, 0.0 }
 0x2dc   :  { %1488 = vmatmul.f32.gmra.mxu1 %v323_v25  ;;  %v349_v25 = vld [vmem:[%s3938_s0 + $0xa78] sm:$0xff] }
 0x2dd   :  { %1921 = vst.msk [vmem:[%s3940_s3 + $0xa8] sm:$0xff] %vm1899_vm0, %v1871_v19  ;;  %1816 = vmatmul.f32.gmra.mxu3 %v325_v33  ;;  %v1605_v15 = vpop.f32.mrf.mxu2 }
 0x2de   :  { %v1606_v62 = vadd.f32 %v1605_v15, %v1442_v35 }
 0x2df   :  { %v1280_v63 = vpop.f32.mrf.mxu0 }
 0x2e0   :  { %v1281_v26 = vadd.f32 %v1280_v63, %v2909_v38  ;;  %v1769_v30 = vpop.f32.mrf.mxu3  ;;  %v356_v63 = vld [vmem:[%s3938_s0 + $0xab0] sm:$0xff] }
 0x2e1   :  { %v1770_v58 = vadd.f32 %v1769_v30, %v1606_v62  ;;  %v1444_v51 = vpop.f32.mrf.mxu1  ;;  %v354_v62 = vld [vmem:[%s3938_s0 + $0xaa0] sm:$0xff] }
 0x2e2   :  { %1327 = vmatmul.f32.gmra.mxu0 %v330_v36  ;;  %1655 = vmatmul.f32.gmra.mxu2 %v332_v44  ;;  %v1445_v42 = vadd.f32 %v1444_v51, %v1281_v26  ;;  %v357_v51 = vld [vmem:[%s3938_s0 + $0xab8] sm:$0xff] }
 0x2e3   :  { %v1872_v28 = vmax.f32 %v1770_v58, 0.0  ;;  %v355_v58 = vld [vmem:[%s3938_s0 + $0xaa8] sm:$0xff] }
 0x2e4   :  { %1491 = vmatmul.f32.gmra.mxu1 %v331_v20 }
 0x2e5   :  { %1922 = vst.msk [vmem:[%s3940_s3 + $0xb0] sm:$0xff] %vm1899_vm0, %v1872_v28  ;;  %1819 = vmatmul.f32.gmra.mxu3 %v333_v40  ;;  %v1608_v38 = vpop.f32.mrf.mxu2 }
 0x2e6   :  { %v1609_v55 = vadd.f32 %v1608_v38, %v1445_v42  ;;  %v362_v38 = vld [vmem:[%s3938_s0 + $0xae0] sm:$0xff] }
 0x2e7   :  { %v1283_v54 = vpop.f32.mrf.mxu0 }
 0x2e8   :  { %v1284_v50 = vadd.f32 %v1283_v54, %v2924_v56  ;;  %v1772_v8 = vpop.f32.mrf.mxu3 }
 0x2e9   :  { %v1773_v1 = vadd.f32 %v1772_v8, %v1609_v55  ;;  %v1447_v2 = vpop.f32.mrf.mxu1  ;;  %v364_v55 = vld [vmem:[%s3938_s0 + $0xaf0] sm:$0xff]  ;;  %v363_v8 = vld [vmem:[%s3938_s0 + $0xae8] sm:$0xff] }
 0x2ea   :  { %1330 = vmatmul.f32.gmra.mxu0 %v338_v59  ;;  %1658 = vmatmul.f32.gmra.mxu2 %v340_v14  ;;  %v1448_v6 = vadd.f32 %v1447_v2, %v1284_v50 }
 0x2eb   :  { %v1873_v12 = vmax.f32 %v1773_v1, 0.0  ;;  %v365_v1 = vld [vmem:[%s3938_s0 + $0xaf8] sm:$0xff] }
 0x2ec   :  { %1494 = vmatmul.f32.gmra.mxu1 %v339_v41 }
 0x2ed   :  { %1923 = vst.msk [vmem:[%s3940_s3 + $0xb8] sm:$0xff] %vm1899_vm0, %v1873_v12  ;;  %1822 = vmatmul.f32.gmra.mxu3 %v341_v3  ;;  %v1611_v56 = vpop.f32.mrf.mxu2 }
 0x2ee   :  { %v1612_v60 = vadd.f32 %v1611_v56, %v1448_v6  ;;  %v370_v6 = vld [vmem:[%s3938_s0 + $0xb20] sm:$0xff]  ;;  %v372_v56 = vld [vmem:[%s3938_s0 + $0xb30] sm:$0xff] }
 0x2ef   :  { %v1286_v13 = vpop.f32.mrf.mxu0 }
 0x2f0   :  { %v1287_v57 = vadd.f32 %v1286_v13, %v2939_v11  ;;  %v1775_v23 = vpop.f32.mrf.mxu3 }
 0x2f1   :  { %v1776_v29 = vadd.f32 %v1775_v23, %v1612_v60  ;;  %v1450_v34 = vpop.f32.mrf.mxu1  ;;  %v373_v23 = vld [vmem:[%s3938_s0 + $0xb38] sm:$0xff] }
 0x2f2   :  { %1333 = vmatmul.f32.gmra.mxu0 %v346_v43  ;;  %1661 = vmatmul.f32.gmra.mxu2 %v348_v16  ;;  %v1451_v19 = vadd.f32 %v1450_v34, %v1287_v57  ;;  %v371_v57 = vld [vmem:[%s3938_s0 + $0xb28] sm:$0xff] }
 0x2f3   :  { %v1874_v33 = vmax.f32 %v1776_v29, 0.0 }
 0x2f4   :  { %1497 = vmatmul.f32.gmra.mxu1 %v347_v24 }
 0x2f5   :  { %1924 = vst.msk [vmem:[%s3940_s3 + $0xc0] sm:$0xff] %vm1899_vm0, %v1874_v33  ;;  %1825 = vmatmul.f32.gmra.mxu3 %v349_v25  ;;  %v1614_v11 = vpop.f32.mrf.mxu2  ;;  %v378_v33 = vld [vmem:[%s3938_s0 + $0xb60] sm:$0xff] }
 0x2f6   :  { %v1615_v35 = vadd.f32 %v1614_v11, %v1451_v19  ;;  %v380_v19 = vld [vmem:[%s3938_s0 + $0xb70] sm:$0xff] }
 0x2f7   :  { %v1289_v15 = vpop.f32.mrf.mxu0 }
 0x2f8   :  { %v1290_v36 = vadd.f32 %v1289_v15, %v2966_v39  ;;  %v1778_v44 = vpop.f32.mrf.mxu3 }
 0x2f9   :  { %v1779_v26 = vadd.f32 %v1778_v44, %v1615_v35  ;;  %v1453_v30 = vpop.f32.mrf.mxu1 }
 0x2fa   :  { %1336 = vmatmul.f32.gmra.mxu0 %v354_v62  ;;  %1664 = vmatmul.f32.gmra.mxu2 %v356_v63  ;;  %v1454_v40 = vadd.f32 %v1453_v30, %v1290_v36  ;;  %v379_v63 = vld [vmem:[%s3938_s0 + $0xb68] sm:$0xff]  ;;  %v381_v36 = vld [vmem:[%s3938_s0 + $0xb78] sm:$0xff] }
 0x2fb   :  { %v1875_v20 = vmax.f32 %v1779_v26, 0.0 }
 0x2fc   :  { %1500 = vmatmul.f32.gmra.mxu1 %v355_v58 }
 0x2fd   :  { %1925 = vst.msk [vmem:[%s3940_s3 + $0xc8] sm:$0xff] %vm1899_vm0, %v1875_v20  ;;  %1828 = vmatmul.f32.gmra.mxu3 %v357_v51  ;;  %v1617_v39 = vpop.f32.mrf.mxu2  ;;  %v386_v51 = vld [vmem:[%s3938_s0 + $0xba0] sm:$0xff]  ;;  %v388_v20 = vld [vmem:[%s3938_s0 + $0xbb0] sm:$0xff] }
 0x2fe   :  { %v1618_v28 = vadd.f32 %v1617_v39, %v1454_v40 }
 0x2ff   :  { %v1292_v42 = vpop.f32.mrf.mxu0 }
 0x300   :  { %v1293_v54 = vadd.f32 %v1292_v42, %v2986_v61  ;;  %v1781_v59 = vpop.f32.mrf.mxu3 }
 0x301   :  { %v1782_v14 = vadd.f32 %v1781_v59, %v1618_v28  ;;  %v1456_v50 = vpop.f32.mrf.mxu1 }
 0x302   :  { %1339 = vmatmul.f32.gmra.mxu0 %v362_v38  ;;  %1667 = vmatmul.f32.gmra.mxu2 %v364_v55  ;;  %v1457_v41 = vadd.f32 %v1456_v50, %v1293_v54  ;;  %v387_v38 = vld [vmem:[%s3938_s0 + $0xba8] sm:$0xff]  ;;  %v389_v55 = vld [vmem:[%s3938_s0 + $0xbb8] sm:$0xff] }
 0x303   :  { %v1876_v2 = vmax.f32 %v1782_v14, 0.0 }
 0x304   :  { %1503 = vmatmul.f32.gmra.mxu1 %v363_v8  ;;  %v394_v8 = vld [vmem:[%s3938_s0 + $0xbe0] sm:$0xff] }
 0x305   :  { %1926 = vst.msk [vmem:[%s3940_s3 + $0xd0] sm:$0xff] %vm1899_vm0, %v1876_v2  ;;  %1831 = vmatmul.f32.gmra.mxu3 %v365_v1  ;;  %v1620_v61 = vpop.f32.mrf.mxu2  ;;  %v396_v1 = vld [vmem:[%s3938_s0 + $0xbf0] sm:$0xff] }
 0x306   :  { %v1621_v3 = vadd.f32 %v1620_v61, %v1457_v41 }
 0x307   :  { %v1295_v12 = vpop.f32.mrf.mxu0 }
 0x308   :  { %v1296_v60 = vadd.f32 %v1295_v12, %v3001_v18  ;;  %v1784_v13 = vpop.f32.mrf.mxu3  ;;  %v395_v12 = vld [vmem:[%s3938_s0 + $0xbe8] sm:$0xff] }
 0x309   :  { %v1785_v43 = vadd.f32 %v1784_v13, %v1621_v3  ;;  %v1459_v16 = vpop.f32.mrf.mxu1 }
 0x30a   :  { %1342 = vmatmul.f32.gmra.mxu0 %v370_v6  ;;  %1670 = vmatmul.f32.gmra.mxu2 %v372_v56  ;;  %v1460_v34 = vadd.f32 %v1459_v16, %v1296_v60  ;;  %v397_v6 = vld [vmem:[%s3938_s0 + $0xbf8] sm:$0xff]  ;;  %v402_v16 = vld [vmem:[%s3938_s0 + $0xc20] sm:$0xff] }
 0x30b   :  { %v1877_v29 = vmax.f32 %v1785_v43, 0.0 }
 0x30c   :  { %1506 = vmatmul.f32.gmra.mxu1 %v371_v57  ;;  %v404_v57 = vld [vmem:[%s3938_s0 + $0xc30] sm:$0xff] }
 0x30d   :  { %1927 = vst.msk [vmem:[%s3940_s3 + $0xd8] sm:$0xff] %vm1899_vm0, %v1877_v29  ;;  %1834 = vmatmul.f32.gmra.mxu3 %v373_v23  ;;  %v1623_v18 = vpop.f32.mrf.mxu2 }
 0x30e   :  { %v1624_v24 = vadd.f32 %v1623_v18, %v1460_v34 }
 0x30f   :  { %v1298_v25 = vpop.f32.mrf.mxu0 }
 0x310   :  { %v1299_v11 = vadd.f32 %v1298_v25, %v3016_v37  ;;  %v1787_v35 = vpop.f32.mrf.mxu3  ;;  %v405_v25 = vld [vmem:[%s3938_s0 + $0xc38] sm:$0xff] }
 0x311   :  { %v1788_v15 = vadd.f32 %v1787_v35, %v1624_v24  ;;  %v1462_v62 = vpop.f32.mrf.mxu1  ;;  %v403_v24 = vld [vmem:[%s3938_s0 + $0xc28] sm:$0xff] }
 0x312   :  { %1345 = vmatmul.f32.gmra.mxu0 %v378_v33  ;;  %1673 = vmatmul.f32.gmra.mxu2 %v380_v19  ;;  %v1463_v26 = vadd.f32 %v1462_v62, %v1299_v11 }
 0x313   :  { %v1878_v44 = vmax.f32 %v1788_v15, 0.0 }
 0x314   :  { %1509 = vmatmul.f32.gmra.mxu1 %v379_v63 }
 0x315   :  { %1928 = vst.msk [vmem:[%s3940_s3 + $0xe0] sm:$0xff] %vm1899_vm0, %v1878_v44  ;;  %1837 = vmatmul.f32.gmra.mxu3 %v381_v36  ;;  %v1626_v37 = vpop.f32.mrf.mxu2 }
 0x316   :  { %v1627_v30 = vadd.f32 %v1626_v37, %v1463_v26 }
 0x317   :  { %v1301_v58 = vpop.f32.mrf.mxu0 }
 0x318   :  { %v1302_v40 = vadd.f32 %v1301_v58, %v3031_v0  ;;  %v1790_v39 = vpop.f32.mrf.mxu3 }
 0x319   :  { %v1791_v28 = vadd.f32 %v1790_v39, %v1627_v30  ;;  %v1465_v42 = vpop.f32.mrf.mxu1 }
 0x31a   :  { %1348 = vmatmul.f32.gmra.mxu0 %v386_v51  ;;  %1676 = vmatmul.f32.gmra.mxu2 %v388_v20  ;;  %v1466_v59 = vadd.f32 %v1465_v42, %v1302_v40 }
 0x31b   :  { %v1879_v54 = vmax.f32 %v1791_v28, 0.0 }
 0x31c   :  { %1512 = vmatmul.f32.gmra.mxu1 %v387_v38 }
 0x31d   :  { %1929 = vst.msk [vmem:[%s3940_s3 + $0xe8] sm:$0xff] %vm1899_vm0, %v1879_v54  ;;  %1840 = vmatmul.f32.gmra.mxu3 %v389_v55  ;;  %v1629_v0 = vpop.f32.mrf.mxu2 }
 0x31e   :  { %v1630_v14 = vadd.f32 %v1629_v0, %v1466_v59 }
 0x31f   :  { %v1304_v50 = vpop.f32.mrf.mxu0 }
 0x320   :  { %v1305_v2 = vadd.f32 %v1304_v50, %v3046_v22  ;;  %v1793_v41 = vpop.f32.mrf.mxu3 }
 0x321   :  { %v1794_v61 = vadd.f32 %v1793_v41, %v1630_v14  ;;  %v1468_v3 = vpop.f32.mrf.mxu1 }
 0x322   :  { %1351 = vmatmul.f32.gmra.mxu0 %v394_v8  ;;  %1679 = vmatmul.f32.gmra.mxu2 %v396_v1  ;;  %v1469_v60 = vadd.f32 %v1468_v3, %v1305_v2 }
 0x323   :  { %v1880_v56 = vmax.f32 %v1794_v61, 0.0 }
 0x324   :  { %1515 = vmatmul.f32.gmra.mxu1 %v395_v12 }
 0x325   :  { %1930 = vst.msk [vmem:[%s3940_s3 + $0xf0] sm:$0xff] %vm1899_vm0, %v1880_v56  ;;  %1843 = vmatmul.f32.gmra.mxu3 %v397_v6  ;;  %v1632_v22 = vpop.f32.mrf.mxu2 }
 0x326   :  { %v1633_v13 = vadd.f32 %v1632_v22, %v1469_v60 }
 0x327   :  { %v1307_v43 = vpop.f32.mrf.mxu0 }
 0x328   :  { %v1308_v23 = vadd.f32 %v1307_v43, %v3061_v46  ;;  %v1796_v29 = vpop.f32.mrf.mxu3 }
 0x329   :  { %v1797_v34 = vadd.f32 %v1796_v29, %v1633_v13  ;;  %v1471_v18 = vpop.f32.mrf.mxu1 }
 0x32a   :  { %1354 = vmatmul.f32.gmra.mxu0 %v402_v16  ;;  %1682 = vmatmul.f32.gmra.mxu2 %v404_v57  ;;  %v1472_v19 = vadd.f32 %v1471_v18, %v1308_v23 }
 0x32b   :  { %v1881_v33 = vmax.f32 %v1797_v34, 0.0 }
 0x32c   :  { %1518 = vmatmul.f32.gmra.mxu1 %v403_v24 }
 0x32d   :  { %1931 = vst.msk [vmem:[%s3940_s3 + $0xf8] sm:$0xff] %vm1899_vm0, %v1881_v33  ;;  %1846 = vmatmul.f32.gmra.mxu3 %v405_v25  ;;  %v1635_v46 = vpop.f32.mrf.mxu2 }
 0x32e   :  { %v1636_v11 = vadd.f32 %v1635_v46, %v1472_v19 }
 0x32f   :  { %v1310_v35 = vpop.f32.mrf.mxu0 }
 0x330   :  { %v1311_v15 = vadd.f32 %v1310_v35, %v3076_v5  ;;  %v1799_v62 = vpop.f32.mrf.mxu3 }
 0x331   :  { %v1800_v63 = vadd.f32 %v1799_v62, %v1636_v11  ;;  %v1474_v36 = vpop.f32.mrf.mxu1 }
 0x332   :  { %v1475_v26 = vadd.f32 %v1474_v36, %v1311_v15 }
 0x333   :  { %v1882_v44 = vmax.f32 %v1800_v63, 0.0 }
 0x335   :  { %1932 = vst.msk [vmem:[%s3940_s3 + $0x100] sm:$0xff] %vm1899_vm0, %v1882_v44  ;;  %v1638_v37 = vpop.f32.mrf.mxu2 }
 0x336   :  { %v1639_v30 = vadd.f32 %v1638_v37, %v1475_v26 }
 0x337   :  { %v1313_v58 = vpop.f32.mrf.mxu0 }
 0x338   :  { %v1314_v51 = vadd.f32 %v1313_v58, %v3091_v31  ;;  %v1802_v20 = vpop.f32.mrf.mxu3 }
 0x339   :  { %v1803_v40 = vadd.f32 %v1802_v20, %v1639_v30  ;;  %v1477_v39 = vpop.f32.mrf.mxu1 }
 0x33a   :  { %v1478_v5 = vadd.f32 %v1477_v39, %v1314_v51 }
 0x33b   :  { %v1883_v28 = vmax.f32 %v1803_v40, 0.0 }
 0x33d   :  { %1933 = vst.msk [vmem:[%s3940_s3 + $0x108] sm:$0xff] %vm1899_vm0, %v1883_v28  ;;  %v1641_v42 = vpop.f32.mrf.mxu2 }
 0x33e   :  { %v1642_v38 = vadd.f32 %v1641_v42, %v1478_v5 }
 0x33f   :  { %v1316_v55 = vpop.f32.mrf.mxu0 }
 0x340   :  { %v1317_v54 = vadd.f32 %v1316_v55, %v3106_v53  ;;  %v1805_v59 = vpop.f32.mrf.mxu3 }
 0x341   :  { %v1806_v0 = vadd.f32 %v1805_v59, %v1642_v38  ;;  %v1480_v14 = vpop.f32.mrf.mxu1 }
 0x342   :  { %v1481_v31 = vadd.f32 %v1480_v14, %v1317_v54 }
 0x343   :  { %v1884_v50 = vmax.f32 %v1806_v0, 0.0 }
 0x345   :  { %1934 = vst.msk [vmem:[%s3940_s3 + $0x110] sm:$0xff] %vm1899_vm0, %v1884_v50  ;;  %v1644_v8 = vpop.f32.mrf.mxu2 }
 0x346   :  { %v1645_v1 = vadd.f32 %v1644_v8, %v1481_v31 }
 0x347   :  { %v1319_v2 = vpop.f32.mrf.mxu0 }
 0x348   :  { %v1320_v41 = vadd.f32 %v1319_v2, %v3121_v21  ;;  %v1808_v61 = vpop.f32.mrf.mxu3 }
 0x349   :  { %v1809_v3 = vadd.f32 %v1808_v61, %v1645_v1  ;;  %v1483_v12 = vpop.f32.mrf.mxu1 }
 0x34a   :  { %v1484_v53 = vadd.f32 %v1483_v12, %v1320_v41 }
 0x34b   :  { %v1885_v6 = vmax.f32 %v1809_v3, 0.0 }
 0x34d   :  { %1935 = vst.msk [vmem:[%s3940_s3 + $0x118] sm:$0xff] %vm1899_vm0, %v1885_v6  ;;  %v1647_v56 = vpop.f32.mrf.mxu2 }
 0x34e   :  { %v1648_v60 = vadd.f32 %v1647_v56, %v1484_v53 }
 0x34f   :  { %v1322_v22 = vpop.f32.mrf.mxu0 }
 0x350   :  { %v1323_v13 = vadd.f32 %v1322_v22, %v3136_v48  ;;  %v1811_v43 = vpop.f32.mrf.mxu3 }
 0x351   :  { %v1812_v16 = vadd.f32 %v1811_v43, %v1648_v60  ;;  %v1486_v57 = vpop.f32.mrf.mxu1 }
 0x352   :  { %v1487_v21 = vadd.f32 %v1486_v57, %v1323_v13 }
 0x353   :  { %v1886_v23 = vmax.f32 %v1812_v16, 0.0 }
 0x355   :  { %1936 = vst.msk [vmem:[%s3940_s3 + $0x120] sm:$0xff] %vm1899_vm0, %v1886_v23  ;;  %v1650_v29 = vpop.f32.mrf.mxu2 }
 0x356   :  { %v1651_v34 = vadd.f32 %v1650_v29, %v1487_v21 }
 0x357   :  { %v1325_v18 = vpop.f32.mrf.mxu0 }
 0x358   :  { %v1326_v24 = vadd.f32 %v1325_v18, %v3151_v10  ;;  %v1814_v25 = vpop.f32.mrf.mxu3 }
 0x359   :  { %v1815_v33 = vadd.f32 %v1814_v25, %v1651_v34  ;;  %v1489_v19 = vpop.f32.mrf.mxu1 }
 0x35a   :  { %v1490_v48 = vadd.f32 %v1489_v19, %v1326_v24 }
 0x35b   :  { %v1887_v46 = vmax.f32 %v1815_v33, 0.0 }
 0x35d   :  { %1937 = vst.msk [vmem:[%s3940_s3 + $0x128] sm:$0xff] %vm1899_vm0, %v1887_v46  ;;  %v1653_v11 = vpop.f32.mrf.mxu2 }
 0x35e   :  { %v1654_v35 = vadd.f32 %v1653_v11, %v1490_v48 }
 0x35f   :  { %v1328_v15 = vpop.f32.mrf.mxu0 }
 0x360   :  { %v1329_v62 = vadd.f32 %v1328_v15, %v3166_v45  ;;  %v1817_v63 = vpop.f32.mrf.mxu3 }
 0x361   :  { %v1818_v36 = vadd.f32 %v1817_v63, %v1654_v35  ;;  %v1492_v44 = vpop.f32.mrf.mxu1 }
 0x362   :  { %v1493_v10 = vadd.f32 %v1492_v44, %v1329_v62 }
 0x363   :  { %v1888_v26 = vmax.f32 %v1818_v36, 0.0 }
 0x365   :  { %1938 = vst.msk [vmem:[%s3940_s3 + $0x130] sm:$0xff] %vm1899_vm0, %v1888_v26  ;;  %v1656_v37 = vpop.f32.mrf.mxu2 }
 0x366   :  { %v1657_v30 = vadd.f32 %v1656_v37, %v1493_v10 }
 0x367   :  { %v1331_v58 = vpop.f32.mrf.mxu0 }
 0x368   :  { %v1332_v51 = vadd.f32 %v1331_v58, %v3181_v9  ;;  %v1820_v20 = vpop.f32.mrf.mxu3 }
 0x369   :  { %v1821_v40 = vadd.f32 %v1820_v20, %v1657_v30  ;;  %v1495_v39 = vpop.f32.mrf.mxu1 }
 0x36a   :  { %v1496_v45 = vadd.f32 %v1495_v39, %v1332_v51 }
 0x36b   :  { %v1889_v28 = vmax.f32 %v1821_v40, 0.0 }
 0x36d   :  { %1939 = vst.msk [vmem:[%s3940_s3 + $0x138] sm:$0xff] %vm1899_vm0, %v1889_v28  ;;  %v1659_v5 = vpop.f32.mrf.mxu2 }
 0x36e   :  { %v1660_v42 = vadd.f32 %v1659_v5, %v1496_v45 }
 0x36f   :  { %v1334_v38 = vpop.f32.mrf.mxu0 }
 0x370   :  { %v1335_v55 = vadd.f32 %v1334_v38, %v3196_v47  ;;  %v1823_v54 = vpop.f32.mrf.mxu3 }
 0x371   :  { %v1824_v59 = vadd.f32 %v1823_v54, %v1660_v42  ;;  %v1498_v0 = vpop.f32.mrf.mxu1 }
 0x372   :  { %v1499_v9 = vadd.f32 %v1498_v0, %v1335_v55 }
 0x373   :  { %v1890_v14 = vmax.f32 %v1824_v59, 0.0 }
 0x375   :  { %1940 = vst.msk [vmem:[%s3940_s3 + $0x140] sm:$0xff] %vm1899_vm0, %v1890_v14  ;;  %v1662_v50 = vpop.f32.mrf.mxu2 }
 0x376   :  { %v1663_v31 = vadd.f32 %v1662_v50, %v1499_v9 }
 0x377   :  { %v1337_v8 = vpop.f32.mrf.mxu0 }
 0x378   :  { %v1338_v1 = vadd.f32 %v1337_v8, %v3211_v17  ;;  %v1826_v2 = vpop.f32.mrf.mxu3 }
 0x379   :  { %v1827_v41 = vadd.f32 %v1826_v2, %v1663_v31  ;;  %v1501_v61 = vpop.f32.mrf.mxu1 }
 0x37a   :  { %v1502_v47 = vadd.f32 %v1501_v61, %v1338_v1 }
 0x37b   :  { %v1891_v3 = vmax.f32 %v1827_v41, 0.0 }
 0x37d   :  { %1941 = vst.msk [vmem:[%s3940_s3 + $0x148] sm:$0xff] %vm1899_vm0, %v1891_v3  ;;  %v1665_v12 = vpop.f32.mrf.mxu2 }
 0x37e   :  { %v1666_v6 = vadd.f32 %v1665_v12, %v1502_v47 }
 0x37f   :  { %v1340_v53 = vpop.f32.mrf.mxu0 }
 0x380   :  { %v1341_v56 = vadd.f32 %v1340_v53, %v3226_v52  ;;  %v1829_v60 = vpop.f32.mrf.mxu3 }
 0x381   :  { %v1830_v22 = vadd.f32 %v1829_v60, %v1666_v6  ;;  %v1504_v13 = vpop.f32.mrf.mxu1 }
 0x382   :  { %v1505_v17 = vadd.f32 %v1504_v13, %v1341_v56 }
 0x383   :  { %v1892_v43 = vmax.f32 %v1830_v22, 0.0 }
 0x385   :  { %1942 = vst.msk [vmem:[%s3940_s3 + $0x150] sm:$0xff] %vm1899_vm0, %v1892_v43  ;;  %v1668_v16 = vpop.f32.mrf.mxu2 }
 0x386   :  { %v1669_v57 = vadd.f32 %v1668_v16, %v1505_v17 }
 0x387   :  { %v1343_v23 = vpop.f32.mrf.mxu0 }
 0x388   :  { %v1344_v21 = vadd.f32 %v1343_v23, %v3241_v27  ;;  %v1832_v29 = vpop.f32.mrf.mxu3 }
 0x389   :  { %v1833_v34 = vadd.f32 %v1832_v29, %v1669_v57  ;;  %v1507_v18 = vpop.f32.mrf.mxu1 }
 0x38a   :  { %v1508_v52 = vadd.f32 %v1507_v18, %v1344_v21 }
 0x38b   :  { %v1893_v24 = vmax.f32 %v1833_v34, 0.0 }
 0x38d   :  { %1943 = vst.msk [vmem:[%s3940_s3 + $0x158] sm:$0xff] %vm1899_vm0, %v1893_v24  ;;  %v1671_v25 = vpop.f32.mrf.mxu2 }
 0x38e   :  { %v1672_v33 = vadd.f32 %v1671_v25, %v1508_v52 }
 0x38f   :  { %v1346_v19 = vpop.f32.mrf.mxu0 }
 0x390   :  { %v1347_v46 = vadd.f32 %v1346_v19, %v3256_v4  ;;  %v1835_v48 = vpop.f32.mrf.mxu3 }
 0x391   :  { %v1836_v11 = vadd.f32 %v1835_v48, %v1672_v33  ;;  %v1510_v35 = vpop.f32.mrf.mxu1 }
 0x392   :  { %v1511_v27 = vadd.f32 %v1510_v35, %v1347_v46 }
 0x393   :  { %v1894_v15 = vmax.f32 %v1836_v11, 0.0 }
 0x395   :  { %1944 = vst.msk [vmem:[%s3940_s3 + $0x160] sm:$0xff] %vm1899_vm0, %v1894_v15  ;;  %v1674_v62 = vpop.f32.mrf.mxu2 }
 0x396   :  { %v1675_v63 = vadd.f32 %v1674_v62, %v1511_v27 }
 0x397   :  { %v1349_v36 = vpop.f32.mrf.mxu0 }
 0x398   :  { %v1350_v44 = vadd.f32 %v1349_v36, %v3271_v49  ;;  %v1838_v26 = vpop.f32.mrf.mxu3 }
 0x399   :  { %v1839_v10 = vadd.f32 %v1838_v26, %v1675_v63  ;;  %v1513_v37 = vpop.f32.mrf.mxu1 }
 0x39a   :  { %v1514_v4 = vadd.f32 %v1513_v37, %v1350_v44 }
 0x39b   :  { %v1895_v30 = vmax.f32 %v1839_v10, 0.0 }
 0x39d   :  { %1945 = vst.msk [vmem:[%s3940_s3 + $0x168] sm:$0xff] %vm1899_vm0, %v1895_v30  ;;  %v1677_v58 = vpop.f32.mrf.mxu2 }
 0x39e   :  { %v1678_v51 = vadd.f32 %v1677_v58, %v1514_v4 }
 0x39f   :  { %v1352_v20 = vpop.f32.mrf.mxu0 }
 0x3a0   :  { %v1353_v40 = vadd.f32 %v1352_v20, %v3286_v32  ;;  %v1841_v39 = vpop.f32.mrf.mxu3 }
 0x3a1   :  { %v1842_v28 = vadd.f32 %v1841_v39, %v1678_v51  ;;  %v1516_v45 = vpop.f32.mrf.mxu1 }
 0x3a2   :  { %v1517_v49 = vadd.f32 %v1516_v45, %v1353_v40 }
 0x3a3   :  { %v1896_v5 = vmax.f32 %v1842_v28, 0.0 }
 0x3a5   :  { %1946 = vst.msk [vmem:[%s3940_s3 + $0x170] sm:$0xff] %vm1899_vm0, %v1896_v5  ;;  %v1680_v42 = vpop.f32.mrf.mxu2 }
 0x3a6   :  { %v1681_v38 = vadd.f32 %v1680_v42, %v1517_v49 }
 0x3a7   :  { %v1355_v55 = vpop.f32.mrf.mxu0 }
 0x3a8   :  { %v1356_v54 = vadd.f32 %v1355_v55, %v3301_v7  ;;  %v1844_v59 = vpop.f32.mrf.mxu3 }
 0x3a9   :  { %v1845_v0 = vadd.f32 %v1844_v59, %v1681_v38  ;;  %v1519_v14 = vpop.f32.mrf.mxu1 }
 0x3aa   :  { %v1520_v32 = vadd.f32 %v1519_v14, %v1356_v54 }
 0x3ab   :  { %v1897_v9 = vmax.f32 %v1845_v0, 0.0 }
 0x3ad   :  { %1947 = vst.msk [vmem:[%s3940_s3 + $0x178] sm:$0xff] %vm1899_vm0, %v1897_v9  ;;  %v1683_v50 = vpop.f32.mrf.mxu2 }
 0x3ae   :  { %v1684_v31 = vadd.f32 %v1683_v50, %v1520_v32 }
 0x3b0   :  { %v1847_v8 = vpop.f32.mrf.mxu3 }
 0x3b1   :  { %v1848_v1 = vadd.f32 %v1847_v8, %v1684_v31 }
 0x3b3   :  { %v1898_v2 = vmax.f32 %v1848_v1, 0.0 }
 0x3b5   :  { %1948 = vst.msk [vmem:[%s3940_s3 + $0x180] sm:$0xff] %vm1899_vm0, %v1898_v2 }

// kernel: vae_nelbo_pallas.10
= control target key start
LH: loop header
LB: loop body
LE: loop exit
PB: predicated region body
PF: predicated region fallthrough
CT: control target
= control target key end

     0   :  { %s1332_s14 = smov 0   ;;  %s1845_s0 = inlined_call_operand.vmem [shape: f32[2,512,784], index: 0, kind: input, shape index: {}]   ;;  %s1846_s1 = inlined_call_operand.vmem [shape: f32[1,512], index: 1, kind: input, shape index: {}]   ;;  %s1847_s2 = inlined_call_operand.<no memory space> [shape: f32[1,1], index: 2, kind: input, shape index: {}]   ;;  %s1848_s3 = inlined_call_operand.vmem [shape: f32[2,1,784], index: 3, kind: output, shape index: {}]  }
   0x1   :  { %v8_v0 = vstv %s1847_s2 }
   0x2   :  { %9 = vst [vmem:[#allocation2] sm:$0x1] %v8_v0 }
   0x3 LB: > { %s1280_s15 = sadd.s32 4294967295, %s1306_s14   ;;  %p1284_p0 = scmp.ge.s32.totalorder %s1306_s14, 1  ;;  %s1306_s14 = sphi %s1332_s14, %s15_s14  }
   0x4   : > { %p139_p1 = scmp.lt.s32.totalorder %s1306_s14, 3 }
   0x6   : > { %p140_p2 = pnand %p1284_p0, %p139_p1 }
   0x7   : > { %p162_p3 = scmp.lt.s32.totalorder (!%p140_p2), %s1280_s15, 1 }
   0x8   : > { %143 = sbr.rel (%p140_p2) target bundleno = 396 (0x18c), region = 32 }
   0xd   : > { %s1850_s15 = smov (!%p162_p3, %s1280_s15), 1  ;;  %vm1211_vm0 = vcmask 1042434   ;;  %vm1209_vm1 = vcmask 1040384   ;;  %vm1215_vm2 = vcmask 1044484   ;;  %vm1213_vm3 = vcmask 1041408  }
   0xe   : > { %s1288_s2 = smul.u32 3584, %s1850_s15  ;;  %vm1217_vm4 = vcmask 1045508   ;;  %vm1219_vm5 = vcmask 1043456  }
   0xf   : > { %s1289_s21 = smul.u32 7, %s1850_s15 }
  0x10   : > { %s1346_s18 = scalar_lea.vmem %s1845_s0, %s1288_s2 }
  0x11   : > { %v500_v1 = vld [vmem:[%s1346_s18 + $0xa48] sm:$0xff]  ;;  %v493_v3 = vld [vmem:[%s1346_s18 + $0xa10] sm:$0xff]  ;;  %v486_v7 = vld [vmem:[%s1346_s18 + $0x9d8] sm:$0xff]  ;;  %s170_s24 = scalar_lea.vmem %s1848_s3, %s1289_s21 }
  0x12   : > { %v276_v2 = vld [vmem:[%s1346_s18 + $0x348] sm:$0xff]  ;;  %676 = vmatpush.msra.mxu2 %v500_v1  ;;  %v269_v5 = vld [vmem:[%s1346_s18 + $0x310] sm:$0xff]  ;;  %v262_v9 = vld [vmem:[%s1346_s18 + $0x2d8] sm:$0xff] }
  0x13   : > { %636 = vmatpush.msra.mxu0 %v276_v2  ;;  %v612_v4 = vld [vmem:[%s1346_s18 + $0xdc8] sm:$0xff]  ;;  %v605_v8 = vld [vmem:[%s1346_s18 + $0xd90] sm:$0xff]  ;;  %v598_v11 = vld [vmem:[%s1346_s18 + $0xd58] sm:$0xff] }
  0x14   : > { %v388_v6 = vld [vmem:[%s1346_s18 + $0x6c8] sm:$0xff]  ;;  %696 = vmatpush.msra.mxu3 %v612_v4  ;;  %677 = vmatpush.msra.mxu2 %v493_v3  ;;  %v381_v10 = vld [vmem:[%s1346_s18 + $0x690] sm:$0xff]  ;;  %v479_v12 = vld [vmem:[%s1346_s18 + $0x9a0] sm:$0xff] }
  0x15   : > { %656 = vmatpush.msra.mxu1 %v388_v6  ;;  %637 = vmatpush.msra.mxu0 %v269_v5  ;;  %v255_v13 = vld [vmem:[%s1346_s18 + $0x2a0] sm:$0xff]  ;;  %v374_v14 = vld [vmem:[%s1346_s18 + $0x658] sm:$0xff]  ;;  %v472_v17 = vld [vmem:[%s1346_s18 + $0x968] sm:$0xff] }
  0x16   : > { %697 = vmatpush.msra.mxu3 %v605_v8  ;;  %678 = vmatpush.msra.mxu2 %v486_v7  ;;  %v591_v15 = vld [vmem:[%s1346_s18 + $0xd20] sm:$0xff]  ;;  %v248_v18 = vld [vmem:[%s1346_s18 + $0x268] sm:$0xff]  ;;  %v465_v21 = vld [vmem:[%s1346_s18 + $0x930] sm:$0xff] }
  0x17   : > { %657 = vmatpush.msra.mxu1 %v381_v10  ;;  %638 = vmatpush.msra.mxu0 %v262_v9  ;;  %v367_v16 = vld [vmem:[%s1346_s18 + $0x620] sm:$0xff]  ;;  %v584_v19 = vld [vmem:[%s1346_s18 + $0xce8] sm:$0xff]  ;;  %v241_v22 = vld [vmem:[%s1346_s18 + $0x230] sm:$0xff] }
  0x18   : > { %698 = vmatpush.msra.mxu3 %v598_v11  ;;  %679 = vmatpush.msra.mxu2 %v479_v12  ;;  %v360_v20 = vld [vmem:[%s1346_s18 + $0x5e8] sm:$0xff]  ;;  %v577_v23 = vld [vmem:[%s1346_s18 + $0xcb0] sm:$0xff]  ;;  %v458_v25 = vld [vmem:[%s1346_s18 + $0x8f8] sm:$0xff] }
  0x19   : > { %658 = vmatpush.msra.mxu1 %v374_v14  ;;  %639 = vmatpush.msra.mxu0 %v255_v13  ;;  %v353_v24 = vld [vmem:[%s1346_s18 + $0x5b0] sm:$0xff]  ;;  %v234_v26 = vld [vmem:[%s1346_s18 + $0x1f8] sm:$0xff]  ;;  %v451_v29 = vld [vmem:[%s1346_s18 + $0x8c0] sm:$0xff] }
  0x1a   : > { %699 = vmatpush.msra.mxu3 %v591_v15  ;;  %680 = vmatpush.msra.mxu2 %v472_v17  ;;  %v570_v27 = vld [vmem:[%s1346_s18 + $0xc78] sm:$0xff]  ;;  %v227_v30 = vld [vmem:[%s1346_s18 + $0x1c0] sm:$0xff]  ;;  %v444_v33 = vld [vmem:[%s1346_s18 + $0x888] sm:$0xff] }
  0x1b   : > { %659 = vmatpush.msra.mxu1 %v367_v16  ;;  %640 = vmatpush.msra.mxu0 %v248_v18  ;;  %v346_v28 = vld [vmem:[%s1346_s18 + $0x578] sm:$0xff]  ;;  %v563_v31 = vld [vmem:[%s1346_s18 + $0xc40] sm:$0xff]  ;;  %v220_v34 = vld [vmem:[%s1346_s18 + $0x188] sm:$0xff] }
  0x1c   : > { %700 = vmatpush.msra.mxu3 %v584_v19  ;;  %681 = vmatpush.msra.mxu2 %v465_v21  ;;  %v339_v32 = vld [vmem:[%s1346_s18 + $0x540] sm:$0xff]  ;;  %v556_v35 = vld [vmem:[%s1346_s18 + $0xc08] sm:$0xff]  ;;  %v437_v37 = vld [vmem:[%s1346_s18 + $0x850] sm:$0xff] }
  0x1d   : > { %660 = vmatpush.msra.mxu1 %v360_v20  ;;  %641 = vmatpush.msra.mxu0 %v241_v22  ;;  %v332_v36 = vld [vmem:[%s1346_s18 + $0x508] sm:$0xff]  ;;  %v213_v38 = vld [vmem:[%s1346_s18 + $0x150] sm:$0xff]  ;;  %v430_v41 = vld [vmem:[%s1346_s18 + $0x818] sm:$0xff] }
  0x1e   : > { %701 = vmatpush.msra.mxu3 %v577_v23  ;;  %682 = vmatpush.msra.mxu2 %v458_v25  ;;  %v549_v39 = vld [vmem:[%s1346_s18 + $0xbd0] sm:$0xff]  ;;  %v206_v42 = vld [vmem:[%s1346_s18 + $0x118] sm:$0xff]  ;;  %v423_v45 = vld [vmem:[%s1346_s18 + $0x7e0] sm:$0xff] }
  0x1f   : > { %661 = vmatpush.msra.mxu1 %v353_v24  ;;  %642 = vmatpush.msra.mxu0 %v234_v26  ;;  %v325_v40 = vld [vmem:[%s1346_s18 + $0x4d0] sm:$0xff]  ;;  %v542_v43 = vld [vmem:[%s1346_s18 + $0xb98] sm:$0xff]  ;;  %v199_v46 = vld [vmem:[%s1346_s18 + $0xe0] sm:$0xff] }
  0x20   : > { %702 = vmatpush.msra.mxu3 %v570_v27  ;;  %683 = vmatpush.msra.mxu2 %v451_v29  ;;  %v318_v44 = vld [vmem:[%s1346_s18 + $0x498] sm:$0xff]  ;;  %v535_v47 = vld [vmem:[%s1346_s18 + $0xb60] sm:$0xff]  ;;  %v416_v49 = vld [vmem:[%s1346_s18 + $0x7a8] sm:$0xff] }
  0x21   : > { %662 = vmatpush.msra.mxu1 %v346_v28  ;;  %643 = vmatpush.msra.mxu0 %v227_v30  ;;  %v311_v48 = vld [vmem:[%s1346_s18 + $0x460] sm:$0xff]  ;;  %v192_v50 = vld [vmem:[%s1346_s18 + $0xa8] sm:$0xff]  ;;  %v409_v53 = vld [vmem:[%s1346_s18 + $0x770] sm:$0xff] }
  0x22   : > { %703 = vmatpush.msra.mxu3 %v563_v31  ;;  %684 = vmatpush.msra.mxu2 %v444_v33  ;;  %v528_v51 = vld [vmem:[%s1346_s18 + $0xb28] sm:$0xff]  ;;  %v185_v54 = vld [vmem:[%s1346_s18 + $0x70] sm:$0xff]  ;;  %v402_v57 = vld [vmem:[%s1346_s18 + $0x738] sm:$0xff] }
  0x23   : > { %663 = vmatpush.msra.mxu1 %v339_v32  ;;  %644 = vmatpush.msra.mxu0 %v220_v34  ;;  %v304_v52 = vld [vmem:[%s1346_s18 + $0x428] sm:$0xff]  ;;  %v521_v55 = vld [vmem:[%s1346_s18 + $0xaf0] sm:$0xff]  ;;  %v178_v58 = vld [vmem:[%s1346_s18 + $0x38] sm:$0xff] }
  0x24   : > { %704 = vmatpush.msra.mxu3 %v556_v35  ;;  %685 = vmatpush.msra.mxu2 %v437_v37  ;;  %v297_v56 = vld [vmem:[%s1346_s18 + $0x3f0] sm:$0xff]  ;;  %v514_v59 = vld [vmem:[%s1346_s18 + $0xab8] sm:$0xff]  ;;  %v395_v61 = vld [vmem:[%s1346_s18 + $0x700] sm:$0xff] }
  0x25   : > { %664 = vmatpush.msra.mxu1 %v332_v36  ;;  %645 = vmatpush.msra.mxu0 %v213_v38  ;;  %v290_v60 = vld [vmem:[%s1346_s18 + $0x3b8] sm:$0xff]  ;;  %v171_v62 = vld [vmem:[%s1346_s18] sm:$0xff]  ;;  %v501_v63 = vld [vmem:[%s1346_s18 + $0xa50] sm:$0xff] }
  0x26   : > { %705 = vmatpush.msra.mxu3 %v549_v39  ;;  %686 = vmatpush.msra.mxu2 %v430_v41  ;;  %v507_v0 = vld [vmem:[%s1346_s18 + $0xa80] sm:$0xff]  ;;  %v277_v1 = vld [vmem:[%s1346_s18 + $0x350] sm:$0xff]  ;;  %v494_v3 = vld [vmem:[%s1346_s18 + $0xa18] sm:$0xff] }
  0x27   : > { %665 = vmatpush.msra.mxu1 %v325_v40  ;;  %646 = vmatpush.msra.mxu0 %v206_v42  ;;  %v283_v2 = vld [vmem:[%s1346_s18 + $0x380] sm:$0xff]  ;;  %v613_v4 = vld [vmem:[%s1346_s18 + $0xdd0] sm:$0xff]  ;;  %v270_v5 = vld [vmem:[%s1346_s18 + $0x318] sm:$0xff] }
  0x28   : > { %706 = vmatpush.msra.mxu3 %v542_v43  ;;  %687 = vmatpush.msra.mxu2 %v423_v45  ;;  %v389_v6 = vld [vmem:[%s1346_s18 + $0x6d0] sm:$0xff]  ;;  %v487_v7 = vld [vmem:[%s1346_s18 + $0x9e0] sm:$0xff]  ;;  %v606_v8 = vld [vmem:[%s1346_s18 + $0xd98] sm:$0xff] }
  0x29   : > { %666 = vmatpush.msra.mxu1 %v318_v44  ;;  %647 = vmatpush.msra.mxu0 %v199_v46  ;;  %v263_v9 = vld [vmem:[%s1346_s18 + $0x2e0] sm:$0xff]  ;;  %v382_v10 = vld [vmem:[%s1346_s18 + $0x698] sm:$0xff]  ;;  %v480_v11 = vld [vmem:[%s1346_s18 + $0x9a8] sm:$0xff] }
  0x2a   : > { %707 = vmatpush.msra.mxu3 %v535_v47  ;;  %688 = vmatpush.msra.mxu2 %v416_v49  ;;  %v599_v12 = vld [vmem:[%s1346_s18 + $0xd60] sm:$0xff]  ;;  %v256_v13 = vld [vmem:[%s1346_s18 + $0x2a8] sm:$0xff]  ;;  %v473_v15 = vld [vmem:[%s1346_s18 + $0x970] sm:$0xff] }
  0x2b   : > { %667 = vmatpush.msra.mxu1 %v311_v48  ;;  %648 = vmatpush.msra.mxu0 %v192_v50  ;;  %v375_v14 = vld [vmem:[%s1346_s18 + $0x660] sm:$0xff]  ;;  %v592_v16 = vld [vmem:[%s1346_s18 + $0xd28] sm:$0xff]  ;;  %v249_v17 = vld [vmem:[%s1346_s18 + $0x270] sm:$0xff] }
  0x2c   : > { %708 = vmatpush.msra.mxu3 %v528_v51  ;;  %689 = vmatpush.msra.mxu2 %v409_v53  ;;  %v368_v18 = vld [vmem:[%s1346_s18 + $0x628] sm:$0xff]  ;;  %v466_v19 = vld [vmem:[%s1346_s18 + $0x938] sm:$0xff]  ;;  %v585_v20 = vld [vmem:[%s1346_s18 + $0xcf0] sm:$0xff] }
  0x2d   : > { %668 = vmatpush.msra.mxu1 %v304_v52  ;;  %649 = vmatpush.msra.mxu0 %v185_v54  ;;  %v242_v21 = vld [vmem:[%s1346_s18 + $0x238] sm:$0xff]  ;;  %v361_v22 = vld [vmem:[%s1346_s18 + $0x5f0] sm:$0xff]  ;;  %v459_v23 = vld [vmem:[%s1346_s18 + $0x900] sm:$0xff] }
  0x2e   : > { %709 = vmatpush.msra.mxu3 %v521_v55  ;;  %690 = vmatpush.msra.mxu2 %v402_v57  ;;  %v578_v24 = vld [vmem:[%s1346_s18 + $0xcb8] sm:$0xff]  ;;  %v235_v25 = vld [vmem:[%s1346_s18 + $0x200] sm:$0xff]  ;;  %v452_v27 = vld [vmem:[%s1346_s18 + $0x8c8] sm:$0xff] }
  0x2f   : > { %669 = vmatpush.msra.mxu1 %v297_v56  ;;  %650 = vmatpush.msra.mxu0 %v178_v58  ;;  %v354_v26 = vld [vmem:[%s1346_s18 + $0x5b8] sm:$0xff]  ;;  %v571_v28 = vld [vmem:[%s1346_s18 + $0xc80] sm:$0xff]  ;;  %v228_v29 = vld [vmem:[%s1346_s18 + $0x1c8] sm:$0xff] }
  0x30   : > { %710 = vmatpush.msra.mxu3 %v514_v59  ;;  %691 = vmatpush.msra.mxu2 %v395_v61  ;;  %v347_v30 = vld [vmem:[%s1346_s18 + $0x580] sm:$0xff]  ;;  %v445_v31 = vld [vmem:[%s1346_s18 + $0x890] sm:$0xff]  ;;  %v564_v32 = vld [vmem:[%s1346_s18 + $0xc48] sm:$0xff] }
  0x31   : > { %670 = vmatpush.msra.mxu1 %v290_v60  ;;  %651 = vmatpush.msra.mxu0 %v171_v62  ;;  %v221_v33 = vld [vmem:[%s1346_s18 + $0x190] sm:$0xff]  ;;  %v340_v34 = vld [vmem:[%s1346_s18 + $0x548] sm:$0xff]  ;;  %v438_v35 = vld [vmem:[%s1346_s18 + $0x858] sm:$0xff] }
  0x32   : > { %756 = vmatpush.msrb.mxu2 %v501_v63  ;;  %711 = vmatpush.msra.mxu3 %v507_v0  ;;  %v557_v36 = vld [vmem:[%s1346_s18 + $0xc10] sm:$0xff]  ;;  %v214_v37 = vld [vmem:[%s1346_s18 + $0x158] sm:$0xff]  ;;  %v619_v39 = vld [vmem:[%s1846_s1] sm:$0xf] }
  0x33   : > { %716 = vmatpush.msrb.mxu0 %v277_v1  ;;  %671 = vmatpush.msra.mxu1 %v283_v2  ;;  %v333_v38 = vld [vmem:[%s1346_s18 + $0x510] sm:$0xff]  ;;  %v431_v40 = vld [vmem:[%s1346_s18 + $0x820] sm:$0xff]  ;;  %v550_v41 = vld [vmem:[%s1346_s18 + $0xbd8] sm:$0xff]  ;;  %v1459_v46 = vperm.slane %v619_v39, 2  ;;  %v1464_v50 = vperm.slane %v619_v39, 0  ;;  %v1467_v52 = vperm.slane %v619_v39, 3 }
  0x34   : > { %757 = vmatpush.msrb.mxu2 %v494_v3  ;;  %776 = vmatpush.msrb.mxu3 %v613_v4  ;;  %v207_v42 = vld [vmem:[%s1346_s18 + $0x120] sm:$0xff]  ;;  %v326_v43 = vld [vmem:[%s1346_s18 + $0x4d8] sm:$0xff]  ;;  %v424_v44 = vld [vmem:[%s1346_s18 + $0x7e8] sm:$0xff]  ;;  %v1473_v56 = vperm.slane %v619_v39, 1 }
  0x35   : > { %717 = vmatpush.msrb.mxu0 %v270_v5  ;;  %736 = vmatpush.msrb.mxu1 %v389_v6  ;;  %v543_v45 = vld [vmem:[%s1346_s18 + $0xba0] sm:$0xff]  ;;  %v200_v47 = vld [vmem:[%s1346_s18 + $0xe8] sm:$0xff]  ;;  %v417_v49 = vld [vmem:[%s1346_s18 + $0x7b0] sm:$0xff] }
  0x36   : > { %758 = vmatpush.msrb.mxu2 %v487_v7  ;;  %777 = vmatpush.msrb.mxu3 %v606_v8  ;;  %v319_v48 = vld [vmem:[%s1346_s18 + $0x4a0] sm:$0xff]  ;;  %v536_v51 = vld [vmem:[%s1346_s18 + $0xb68] sm:$0xff]  ;;  %v193_v53 = vld [vmem:[%s1346_s18 + $0xb0] sm:$0xff] }
  0x37   : > { %718 = vmatpush.msrb.mxu0 %v263_v9  ;;  %737 = vmatpush.msrb.mxu1 %v382_v10  ;;  %v312_v54 = vld [vmem:[%s1346_s18 + $0x468] sm:$0xff]  ;;  %v410_v55 = vld [vmem:[%s1346_s18 + $0x778] sm:$0xff]  ;;  %v529_v57 = vld [vmem:[%s1346_s18 + $0xb30] sm:$0xff] }
  0x38   : > { %759 = vmatpush.msrb.mxu2 %v480_v11  ;;  %778 = vmatpush.msrb.mxu3 %v599_v12  ;;  %v186_v58 = vld [vmem:[%s1346_s18 + $0x78] sm:$0xff]  ;;  %v305_v59 = vld [vmem:[%s1346_s18 + $0x430] sm:$0xff]  ;;  %v403_v60 = vld [vmem:[%s1346_s18 + $0x740] sm:$0xff] }
  0x39   : > { %719 = vmatpush.msrb.mxu0 %v256_v13  ;;  %738 = vmatpush.msrb.mxu1 %v375_v14  ;;  %v522_v61 = vld [vmem:[%s1346_s18 + $0xaf8] sm:$0xff]  ;;  %v179_v62 = vld [vmem:[%s1346_s18 + $0x40] sm:$0xff]  ;;  %v396_v0 = vld [vmem:[%s1346_s18 + $0x708] sm:$0xff] }
  0x3a   : > { %760 = vmatpush.msrb.mxu2 %v473_v15  ;;  %779 = vmatpush.msrb.mxu3 %v592_v16  ;;  %v298_v63 = vld [vmem:[%s1346_s18 + $0x3f8] sm:$0xff]  ;;  %v515_v1 = vld [vmem:[%s1346_s18 + $0xac0] sm:$0xff]  ;;  %v172_v2 = vld [vmem:[%s1346_s18 + $0x8] sm:$0xff] }
  0x3b   : > { %720 = vmatpush.msrb.mxu0 %v249_v17  ;;  %739 = vmatpush.msrb.mxu1 %v368_v18  ;;  %v291_v3 = vld [vmem:[%s1346_s18 + $0x3c0] sm:$0xff]  ;;  %v508_v4 = vld [vmem:[%s1346_s18 + $0xa88] sm:$0xff]  ;;  %v502_v5 = vld [vmem:[%s1346_s18 + $0xa58] sm:$0xff] }
  0x3c   : > { %761 = vmatpush.msrb.mxu2 %v466_v19  ;;  %780 = vmatpush.msrb.mxu3 %v585_v20  ;;  %v278_v6 = vld [vmem:[%s1346_s18 + $0x358] sm:$0xff]  ;;  %v284_v7 = vld [vmem:[%s1346_s18 + $0x388] sm:$0xff]  ;;  %v495_v8 = vld [vmem:[%s1346_s18 + $0xa20] sm:$0xff] }
  0x3d   : > { %721 = vmatpush.msrb.mxu0 %v242_v21  ;;  %740 = vmatpush.msrb.mxu1 %v361_v22  ;;  %v614_v9 = vld [vmem:[%s1346_s18 + $0xdd8] sm:$0xff]  ;;  %v271_v10 = vld [vmem:[%s1346_s18 + $0x320] sm:$0xff]  ;;  %v488_v12 = vld [vmem:[%s1346_s18 + $0x9e8] sm:$0xff] }
  0x3e   : > { %762 = vmatpush.msrb.mxu2 %v459_v23  ;;  %781 = vmatpush.msrb.mxu3 %v578_v24  ;;  %v390_v11 = vld [vmem:[%s1346_s18 + $0x6d8] sm:$0xff]  ;;  %v607_v13 = vld [vmem:[%s1346_s18 + $0xda0] sm:$0xff]  ;;  %v264_v14 = vld [vmem:[%s1346_s18 + $0x2e8] sm:$0xff] }
  0x3f   : > { %722 = vmatpush.msrb.mxu0 %v235_v25  ;;  %741 = vmatpush.msrb.mxu1 %v354_v26  ;;  %v383_v15 = vld [vmem:[%s1346_s18 + $0x6a0] sm:$0xff]  ;;  %v481_v16 = vld [vmem:[%s1346_s18 + $0x9b0] sm:$0xff]  ;;  %v600_v17 = vld [vmem:[%s1346_s18 + $0xd68] sm:$0xff] }
  0x40   : > { %763 = vmatpush.msrb.mxu2 %v452_v27  ;;  %782 = vmatpush.msrb.mxu3 %v571_v28  ;;  %v257_v18 = vld [vmem:[%s1346_s18 + $0x2b0] sm:$0xff]  ;;  %v376_v19 = vld [vmem:[%s1346_s18 + $0x668] sm:$0xff]  ;;  %v474_v20 = vld [vmem:[%s1346_s18 + $0x978] sm:$0xff] }
  0x41   : > { %723 = vmatpush.msrb.mxu0 %v228_v29  ;;  %742 = vmatpush.msrb.mxu1 %v347_v30  ;;  %v593_v21 = vld [vmem:[%s1346_s18 + $0xd30] sm:$0xff]  ;;  %v250_v22 = vld [vmem:[%s1346_s18 + $0x278] sm:$0xff]  ;;  %v467_v24 = vld [vmem:[%s1346_s18 + $0x940] sm:$0xff]  ;;  %v1308_v29 = vmov 0  }
  0x42   : > { %764 = vmatpush.msrb.mxu2 %v445_v31  ;;  %783 = vmatpush.msrb.mxu3 %v564_v32  ;;  %v369_v23 = vld [vmem:[%s1346_s18 + $0x630] sm:$0xff]  ;;  %v586_v25 = vld [vmem:[%s1346_s18 + $0xcf8] sm:$0xff]  ;;  %v620_v26 = vld [vmem:[#allocation2] sm:$0x1] }
  0x43   : > { %724 = vmatpush.msrb.mxu0 %v221_v33  ;;  %743 = vmatpush.msrb.mxu1 %v340_v34  ;;  %v243_v27 = vld [vmem:[%s1346_s18 + $0x240] sm:$0xff]  ;;  %v362_v28 = vld [vmem:[%s1346_s18 + $0x5f8] sm:$0xff]  ;;  %v460_v30 = vld [vmem:[%s1346_s18 + $0x908] sm:$0xff] }
  0x44   : > { %765 = vmatpush.msrb.mxu2 %v438_v35  ;;  %784 = vmatpush.msrb.mxu3 %v557_v36  ;;  %v579_v31 = vld [vmem:[%s1346_s18 + $0xcc0] sm:$0xff]  ;;  %v236_v32 = vld [vmem:[%s1346_s18 + $0x208] sm:$0xff]  ;;  %v453_v34 = vld [vmem:[%s1346_s18 + $0x8d0] sm:$0xff] }
  0x45   : > { %725 = vmatpush.msrb.mxu0 %v214_v37  ;;  %744 = vmatpush.msrb.mxu1 %v333_v38  ;;  %v355_v33 = vld [vmem:[%s1346_s18 + $0x5c0] sm:$0xff]  ;;  %v572_v35 = vld [vmem:[%s1346_s18 + $0xc88] sm:$0xff]  ;;  %v229_v36 = vld [vmem:[%s1346_s18 + $0x1d0] sm:$0xff] }
  0x46   : > { %766 = vmatpush.msrb.mxu2 %v431_v40  ;;  %785 = vmatpush.msrb.mxu3 %v550_v41  ;;  %v348_v37 = vld [vmem:[%s1346_s18 + $0x588] sm:$0xff]  ;;  %v446_v38 = vld [vmem:[%s1346_s18 + $0x898] sm:$0xff]  ;;  %v565_v39 = vld [vmem:[%s1346_s18 + $0xc50] sm:$0xff] }
  0x47   : > { %726 = vmatpush.msrb.mxu0 %v207_v42  ;;  %745 = vmatpush.msrb.mxu1 %v326_v43  ;;  %v222_v40 = vld [vmem:[%s1346_s18 + $0x198] sm:$0xff]  ;;  %v341_v41 = vld [vmem:[%s1346_s18 + $0x550] sm:$0xff]  ;;  %v439_v42 = vld [vmem:[%s1346_s18 + $0x860] sm:$0xff] }
  0x48   : > { %767 = vmatpush.msrb.mxu2 %v424_v44  ;;  %786 = vmatpush.msrb.mxu3 %v543_v45  ;;  %v558_v43 = vld [vmem:[%s1346_s18 + $0xc18] sm:$0xff]  ;;  %v215_v44 = vld [vmem:[%s1346_s18 + $0x160] sm:$0xff] }
  0x49   : > { %692 = vmatmul.f32.vlgmr.msra.gmra.mxu2 %v1459_v46  ;;  %727 = vmatpush.msrb.mxu0 %v200_v47  ;;  %v334_v45 = vld [vmem:[%s1346_s18 + $0x518] sm:$0xff]  ;;  %v432_v47 = vld [vmem:[%s1346_s18 + $0x828] sm:$0xff] }
  0x4a   : > { %746 = vmatpush.msrb.mxu1 %v319_v48  ;;  %768 = vmatpush.msrb.mxu2 %v417_v49  ;;  %v551_v48 = vld [vmem:[%s1346_s18 + $0xbe0] sm:$0xff]  ;;  %v208_v49 = vld [vmem:[%s1346_s18 + $0x128] sm:$0xff] }
  0x4b   : > { %787 = vmatpush.msrb.mxu3 %v536_v51  ;;  %652 = vmatmul.f32.vlgmr.msra.gmra.mxu0 %v1464_v50  ;;  %v327_v51 = vld [vmem:[%s1346_s18 + $0x4e0] sm:$0xff] }
  0x4c   : > { %712 = vmatmul.f32.vlgmr.msra.gmra.mxu3 %v1467_v52  ;;  %728 = vmatpush.msrb.mxu0 %v193_v53  ;;  %v425_v53 = vld [vmem:[%s1346_s18 + $0x7f0] sm:$0xff] }
  0x4d   : > { %747 = vmatpush.msrb.mxu1 %v312_v54  ;;  %769 = vmatpush.msrb.mxu2 %v410_v55  ;;  %v544_v54 = vld [vmem:[%s1346_s18 + $0xba8] sm:$0xff]  ;;  %v201_v55 = vld [vmem:[%s1346_s18 + $0xf0] sm:$0xff] }
  0x4e   : > { %788 = vmatpush.msrb.mxu3 %v529_v57  ;;  %672 = vmatmul.f32.vlgmr.msra.gmra.mxu1 %v1473_v56  ;;  %v320_v57 = vld [vmem:[%s1346_s18 + $0x4a8] sm:$0xff] }
  0x4f   : > { %729 = vmatpush.msrb.mxu0 %v186_v58  ;;  %748 = vmatpush.msrb.mxu1 %v305_v59  ;;  %v418_v58 = vld [vmem:[%s1346_s18 + $0x7b8] sm:$0xff]  ;;  %v537_v59 = vld [vmem:[%s1346_s18 + $0xb70] sm:$0xff] }
  0x50   : > { %770 = vmatpush.msrb.mxu2 %v403_v60  ;;  %789 = vmatpush.msrb.mxu3 %v522_v61  ;;  %v194_v60 = vld [vmem:[%s1346_s18 + $0xb8] sm:$0xff]  ;;  %v313_v61 = vld [vmem:[%s1346_s18 + $0x470] sm:$0xff] }
  0x51   : > { %730 = vmatpush.msrb.mxu0 %v179_v62  ;;  %749 = vmatpush.msrb.mxu1 %v298_v63  ;;  %v411_v62 = vld [vmem:[%s1346_s18 + $0x780] sm:$0xff]  ;;  %v530_v63 = vld [vmem:[%s1346_s18 + $0xb38] sm:$0xff] }
  0x52   : > { %771 = vmatpush.msrb.mxu2 %v396_v0  ;;  %790 = vmatpush.msrb.mxu3 %v515_v1  ;;  %v187_v0 = vld [vmem:[%s1346_s18 + $0x80] sm:$0xff]  ;;  %v306_v1 = vld [vmem:[%s1346_s18 + $0x438] sm:$0xff] }
  0x53   : > { %731 = vmatpush.msrb.mxu0 %v172_v2  ;;  %750 = vmatpush.msrb.mxu1 %v291_v3  ;;  %v404_v2 = vld [vmem:[%s1346_s18 + $0x748] sm:$0xff]  ;;  %v523_v3 = vld [vmem:[%s1346_s18 + $0xb00] sm:$0xff] }
  0x54   : > { %772 = vmatmul.f32.vlgmr.msrb.gmra.mxu2 %v1459_v46  ;;  %791 = vmatpush.msrb.mxu3 %v508_v4  ;;  %v180_v4 = vld [vmem:[%s1346_s18 + $0x48] sm:$0xff] }
  0x55   : > { %836 = vmatpush.msra.mxu2 %v502_v5  ;;  %796 = vmatpush.msra.mxu0 %v278_v6  ;;  %v299_v5 = vld [vmem:[%s1346_s18 + $0x400] sm:$0xff]  ;;  %v397_v6 = vld [vmem:[%s1346_s18 + $0x710] sm:$0xff] }
  0x56   : > { %732 = vmatmul.f32.vlgmr.msrb.gmra.mxu0 %v1464_v50  ;;  %751 = vmatpush.msrb.mxu1 %v284_v7  ;;  %v516_v7 = vld [vmem:[%s1346_s18 + $0xac8] sm:$0xff] }
  0x57   : > { %792 = vmatmul.f32.vlgmr.msrb.gmra.mxu3 %v1467_v52  ;;  %837 = vmatpush.msra.mxu2 %v495_v8  ;;  %v173_v8 = vld [vmem:[%s1346_s18 + $0x10] sm:$0xff] }
  0x58   : > { %856 = vmatpush.msra.mxu3 %v614_v9  ;;  %797 = vmatpush.msra.mxu0 %v271_v10  ;;  %v292_v9 = vld [vmem:[%s1346_s18 + $0x3c8] sm:$0xff]  ;;  %v503_v10 = vld [vmem:[%s1346_s18 + $0xa60] sm:$0xff] }
  0x59   : > { %816 = vmatpush.msra.mxu1 %v390_v11  ;;  %838 = vmatpush.msra.mxu2 %v488_v12  ;;  %v509_v11 = vld [vmem:[%s1346_s18 + $0xa90] sm:$0xff]  ;;  %v279_v12 = vld [vmem:[%s1346_s18 + $0x360] sm:$0xff] }
  0x5a   : > { %752 = vmatmul.f32.vlgmr.msrb.gmra.mxu1 %v1473_v56  ;;  %857 = vmatpush.msra.mxu3 %v607_v13  ;;  %v285_v13 = vld [vmem:[%s1346_s18 + $0x390] sm:$0xff] }
  0x5b   : > { %798 = vmatpush.msra.mxu0 %v264_v14  ;;  %817 = vmatpush.msra.mxu1 %v383_v15  ;;  %v496_v14 = vld [vmem:[%s1346_s18 + $0xa28] sm:$0xff]  ;;  %v615_v15 = vld [vmem:[%s1346_s18 + $0xde0] sm:$0xff] }
  0x5c   : > { %839 = vmatpush.msra.mxu2 %v481_v16  ;;  %858 = vmatpush.msra.mxu3 %v600_v17  ;;  %v272_v16 = vld [vmem:[%s1346_s18 + $0x328] sm:$0xff]  ;;  %v391_v17 = vld [vmem:[%s1346_s18 + $0x6e0] sm:$0xff] }
  0x5d   : > { %799 = vmatpush.msra.mxu0 %v257_v18  ;;  %818 = vmatpush.msra.mxu1 %v376_v19  ;;  %v489_v18 = vld [vmem:[%s1346_s18 + $0x9f0] sm:$0xff]  ;;  %v608_v19 = vld [vmem:[%s1346_s18 + $0xda8] sm:$0xff] }
  0x5e   : > { %840 = vmatpush.msra.mxu2 %v474_v20  ;;  %859 = vmatpush.msra.mxu3 %v593_v21  ;;  %v265_v20 = vld [vmem:[%s1346_s18 + $0x2f0] sm:$0xff]  ;;  %v384_v21 = vld [vmem:[%s1346_s18 + $0x6a8] sm:$0xff] }
  0x5f   : > { %800 = vmatpush.msra.mxu0 %v250_v22  ;;  %819 = vmatpush.msra.mxu1 %v369_v23  ;;  %v482_v22 = vld [vmem:[%s1346_s18 + $0x9b8] sm:$0xff]  ;;  %v601_v23 = vld [vmem:[%s1346_s18 + $0xd70] sm:$0xff] }
  0x60   : > { %1299 = vset.pattern.permute.xlu0 %v1308_v29  ;;  %841 = vmatpush.msra.mxu2 %v467_v24  ;;  %v258_v24 = vld [vmem:[%s1346_s18 + $0x2b8] sm:$0xff] }
  0x61   : > { %860 = vmatpush.msra.mxu3 %v586_v25  ;;  %623 = vperm.xlu0 %1299, %v620_v26   ;;  %v377_v25 = vld [vmem:[%s1346_s18 + $0x670] sm:$0xff]  ;;  %v475_v26 = vld [vmem:[%s1346_s18 + $0x980] sm:$0xff]  ;;  %v370_v29 = vld [vmem:[%s1346_s18 + $0x638] sm:$0xff] }
  0x62   : > { %801 = vmatpush.msra.mxu0 %v243_v27  ;;  %820 = vmatpush.msra.mxu1 %v362_v28  ;;  %v594_v27 = vld [vmem:[%s1346_s18 + $0xd38] sm:$0xff]  ;;  %v251_v28 = vld [vmem:[%s1346_s18 + $0x280] sm:$0xff] }
  0x63   : > { %842 = vmatpush.msra.mxu2 %v460_v30  ;;  %861 = vmatpush.msra.mxu3 %v579_v31  ;;  %v468_v30 = vld [vmem:[%s1346_s18 + $0x948] sm:$0xff]  ;;  %v587_v31 = vld [vmem:[%s1346_s18 + $0xd00] sm:$0xff] }
  0x64   : > { %802 = vmatpush.msra.mxu0 %v236_v32  ;;  %821 = vmatpush.msra.mxu1 %v355_v33  ;;  %v244_v32 = vld [vmem:[%s1346_s18 + $0x248] sm:$0xff]  ;;  %v363_v33 = vld [vmem:[%s1346_s18 + $0x600] sm:$0xff] }
  0x65   : > { %843 = vmatpush.msra.mxu2 %v453_v34  ;;  %862 = vmatpush.msra.mxu3 %v572_v35  ;;  %v461_v34 = vld [vmem:[%s1346_s18 + $0x910] sm:$0xff]  ;;  %v580_v35 = vld [vmem:[%s1346_s18 + $0xcc8] sm:$0xff] }
  0x66   : > { %803 = vmatpush.msra.mxu0 %v229_v36  ;;  %822 = vmatpush.msra.mxu1 %v348_v37  ;;  %v237_v36 = vld [vmem:[%s1346_s18 + $0x210] sm:$0xff]  ;;  %v356_v37 = vld [vmem:[%s1346_s18 + $0x5c8] sm:$0xff] }
  0x67   : > { %844 = vmatpush.msra.mxu2 %v446_v38  ;;  %863 = vmatpush.msra.mxu3 %v565_v39  ;;  %v454_v38 = vld [vmem:[%s1346_s18 + $0x8d8] sm:$0xff]  ;;  %v573_v39 = vld [vmem:[%s1346_s18 + $0xc90] sm:$0xff] }
  0x68   : > { %804 = vmatpush.msra.mxu0 %v222_v40  ;;  %823 = vmatpush.msra.mxu1 %v341_v41  ;;  %v230_v40 = vld [vmem:[%s1346_s18 + $0x1d8] sm:$0xff]  ;;  %v349_v41 = vld [vmem:[%s1346_s18 + $0x590] sm:$0xff] }
  0x69   : > { %845 = vmatpush.msra.mxu2 %v439_v42  ;;  %864 = vmatpush.msra.mxu3 %v558_v43  ;;  %v447_v42 = vld [vmem:[%s1346_s18 + $0x8a0] sm:$0xff]  ;;  %v566_v43 = vld [vmem:[%s1346_s18 + $0xc58] sm:$0xff] }
  0x6a   : > { %805 = vmatpush.msra.mxu0 %v215_v44  ;;  %824 = vmatpush.msra.mxu1 %v334_v45  ;;  %v223_v44 = vld [vmem:[%s1346_s18 + $0x1a0] sm:$0xff]  ;;  %v342_v45 = vld [vmem:[%s1346_s18 + $0x558] sm:$0xff] }
  0x6b   : > { %846 = vmatpush.msra.mxu2 %v432_v47  ;;  %865 = vmatpush.msra.mxu3 %v551_v48  ;;  %v440_v47 = vld [vmem:[%s1346_s18 + $0x868] sm:$0xff]  ;;  %v559_v48 = vld [vmem:[%s1346_s18 + $0xc20] sm:$0xff] }
  0x6c   : > { %806 = vmatpush.msra.mxu0 %v208_v49  ;;  %825 = vmatpush.msra.mxu1 %v327_v51  ;;  %v216_v49 = vld [vmem:[%s1346_s18 + $0x168] sm:$0xff]  ;;  %v335_v51 = vld [vmem:[%s1346_s18 + $0x520] sm:$0xff] }
  0x6d   : > { %847 = vmatpush.msra.mxu2 %v425_v53  ;;  %866 = vmatpush.msra.mxu3 %v544_v54  ;;  %v433_v53 = vld [vmem:[%s1346_s18 + $0x830] sm:$0xff]  ;;  %v552_v54 = vld [vmem:[%s1346_s18 + $0xbe8] sm:$0xff] }
  0x6e   : > { %807 = vmatpush.msra.mxu0 %v201_v55  ;;  %826 = vmatpush.msra.mxu1 %v320_v57  ;;  %v209_v55 = vld [vmem:[%s1346_s18 + $0x130] sm:$0xff]  ;;  %v328_v57 = vld [vmem:[%s1346_s18 + $0x4e8] sm:$0xff] }
  0x6f   : > { %848 = vmatpush.msra.mxu2 %v418_v58  ;;  %867 = vmatpush.msra.mxu3 %v537_v59  ;;  %v426_v58 = vld [vmem:[%s1346_s18 + $0x7f8] sm:$0xff]  ;;  %v545_v59 = vld [vmem:[%s1346_s18 + $0xbb0] sm:$0xff] }
  0x70   : > { %808 = vmatpush.msra.mxu0 %v194_v60  ;;  %827 = vmatpush.msra.mxu1 %v313_v61  ;;  %v202_v60 = vld [vmem:[%s1346_s18 + $0xf8] sm:$0xff]  ;;  %v321_v61 = vld [vmem:[%s1346_s18 + $0x4b0] sm:$0xff] }
  0x71   : > { %849 = vmatpush.msra.mxu2 %v411_v62  ;;  %868 = vmatpush.msra.mxu3 %v530_v63  ;;  %v419_v62 = vld [vmem:[%s1346_s18 + $0x7c0] sm:$0xff]  ;;  %v538_v63 = vld [vmem:[%s1346_s18 + $0xb78] sm:$0xff] }
  0x72   : > { %809 = vmatpush.msra.mxu0 %v187_v0  ;;  %828 = vmatpush.msra.mxu1 %v306_v1  ;;  %v195_v0 = vld [vmem:[%s1346_s18 + $0xc0] sm:$0xff]  ;;  %v314_v1 = vld [vmem:[%s1346_s18 + $0x478] sm:$0xff] }
  0x73   : > { %850 = vmatpush.msra.mxu2 %v404_v2  ;;  %869 = vmatpush.msra.mxu3 %v523_v3  ;;  %v412_v2 = vld [vmem:[%s1346_s18 + $0x788] sm:$0xff]  ;;  %v531_v3 = vld [vmem:[%s1346_s18 + $0xb40] sm:$0xff] }
  0x74   : > { %810 = vmatpush.msra.mxu0 %v180_v4  ;;  %829 = vmatpush.msra.mxu1 %v299_v5  ;;  %v188_v4 = vld [vmem:[%s1346_s18 + $0x88] sm:$0xff]  ;;  %v307_v5 = vld [vmem:[%s1346_s18 + $0x440] sm:$0xff] }
  0x75   : > { %851 = vmatpush.msra.mxu2 %v397_v6  ;;  %870 = vmatpush.msra.mxu3 %v516_v7  ;;  %v405_v6 = vld [vmem:[%s1346_s18 + $0x750] sm:$0xff]  ;;  %v524_v7 = vld [vmem:[%s1346_s18 + $0xb08] sm:$0xff] }
  0x76   : > { %811 = vmatpush.msra.mxu0 %v173_v8  ;;  %830 = vmatpush.msra.mxu1 %v292_v9  ;;  %v181_v8 = vld [vmem:[%s1346_s18 + $0x50] sm:$0xff]  ;;  %v300_v9 = vld [vmem:[%s1346_s18 + $0x408] sm:$0xff] }
  0x77   : > { %916 = vmatpush.msrb.mxu2 %v503_v10  ;;  %871 = vmatpush.msra.mxu3 %v509_v11  ;;  %v398_v10 = vld [vmem:[%s1346_s18 + $0x718] sm:$0xff]  ;;  %v517_v11 = vld [vmem:[%s1346_s18 + $0xad0] sm:$0xff] }
  0x78   : > { %876 = vmatpush.msrb.mxu0 %v279_v12  ;;  %831 = vmatpush.msra.mxu1 %v285_v13  ;;  %v174_v12 = vld [vmem:[%s1346_s18 + $0x18] sm:$0xff]  ;;  %v293_v13 = vld [vmem:[%s1346_s18 + $0x3d0] sm:$0xff] }
  0x79   : > { %917 = vmatpush.msrb.mxu2 %v496_v14  ;;  %936 = vmatpush.msrb.mxu3 %v615_v15  ;;  %v510_v14 = vld [vmem:[%s1346_s18 + $0xa98] sm:$0xff]  ;;  %v504_v15 = vld [vmem:[%s1346_s18 + $0xa68] sm:$0xff] }
  0x7a   : > { %877 = vmatpush.msrb.mxu0 %v272_v16  ;;  %896 = vmatpush.msrb.mxu1 %v391_v17  ;;  %v280_v16 = vld [vmem:[%s1346_s18 + $0x368] sm:$0xff]  ;;  %v286_v17 = vld [vmem:[%s1346_s18 + $0x398] sm:$0xff] }
  0x7b   : > { %918 = vmatpush.msrb.mxu2 %v489_v18  ;;  %937 = vmatpush.msrb.mxu3 %v608_v19  ;;  %v497_v18 = vld [vmem:[%s1346_s18 + $0xa30] sm:$0xff]  ;;  %v616_v19 = vld [vmem:[%s1346_s18 + $0xde8] sm:$0xff] }
  0x7c   : > { %878 = vmatpush.msrb.mxu0 %v265_v20  ;;  %897 = vmatpush.msrb.mxu1 %v384_v21  ;;  %v273_v20 = vld [vmem:[%s1346_s18 + $0x330] sm:$0xff]  ;;  %v392_v21 = vld [vmem:[%s1346_s18 + $0x6e8] sm:$0xff] }
  0x7d   : > { %919 = vmatpush.msrb.mxu2 %v482_v22  ;;  %938 = vmatpush.msrb.mxu3 %v601_v23  ;;  %v490_v22 = vld [vmem:[%s1346_s18 + $0x9f8] sm:$0xff]  ;;  %v609_v23 = vld [vmem:[%s1346_s18 + $0xdb0] sm:$0xff] }
  0x7e   : > { %879 = vmatpush.msrb.mxu0 %v258_v24  ;;  %898 = vmatpush.msrb.mxu1 %v377_v25  ;;  %v266_v24 = vld [vmem:[%s1346_s18 + $0x2f8] sm:$0xff]  ;;  %v385_v25 = vld [vmem:[%s1346_s18 + $0x6b0] sm:$0xff] }
  0x7f   : > { %920 = vmatpush.msrb.mxu2 %v475_v26  ;;  %939 = vmatpush.msrb.mxu3 %v594_v27  ;;  %v483_v26 = vld [vmem:[%s1346_s18 + $0x9c0] sm:$0xff]  ;;  %v602_v27 = vld [vmem:[%s1346_s18 + $0xd78] sm:$0xff] }
  0x80   : > { %880 = vmatpush.msrb.mxu0 %v251_v28  ;;  %899 = vmatpush.msrb.mxu1 %v370_v29  ;;  %v259_v28 = vld [vmem:[%s1346_s18 + $0x2c0] sm:$0xff]  ;;  %v378_v29 = vld [vmem:[%s1346_s18 + $0x678] sm:$0xff] }
  0x81   : > { %921 = vmatpush.msrb.mxu2 %v468_v30  ;;  %940 = vmatpush.msrb.mxu3 %v587_v31  ;;  %v476_v30 = vld [vmem:[%s1346_s18 + $0x988] sm:$0xff]  ;;  %v595_v31 = vld [vmem:[%s1346_s18 + $0xd40] sm:$0xff] }
  0x82   : > { %881 = vmatpush.msrb.mxu0 %v244_v32  ;;  %900 = vmatpush.msrb.mxu1 %v363_v33  ;;  %v252_v32 = vld [vmem:[%s1346_s18 + $0x288] sm:$0xff]  ;;  %v371_v33 = vld [vmem:[%s1346_s18 + $0x640] sm:$0xff] }
  0x83   : > { %922 = vmatpush.msrb.mxu2 %v461_v34  ;;  %941 = vmatpush.msrb.mxu3 %v580_v35  ;;  %v469_v34 = vld [vmem:[%s1346_s18 + $0x950] sm:$0xff]  ;;  %v588_v35 = vld [vmem:[%s1346_s18 + $0xd08] sm:$0xff] }
  0x84   : > { %882 = vmatpush.msrb.mxu0 %v237_v36  ;;  %901 = vmatpush.msrb.mxu1 %v356_v37  ;;  %v245_v36 = vld [vmem:[%s1346_s18 + $0x250] sm:$0xff]  ;;  %v364_v37 = vld [vmem:[%s1346_s18 + $0x608] sm:$0xff] }
  0x85   : > { %923 = vmatpush.msrb.mxu2 %v454_v38  ;;  %942 = vmatpush.msrb.mxu3 %v573_v39  ;;  %v462_v38 = vld [vmem:[%s1346_s18 + $0x918] sm:$0xff]  ;;  %v581_v39 = vld [vmem:[%s1346_s18 + $0xcd0] sm:$0xff] }
  0x86   : > { %883 = vmatpush.msrb.mxu0 %v230_v40  ;;  %902 = vmatpush.msrb.mxu1 %v349_v41  ;;  %v238_v40 = vld [vmem:[%s1346_s18 + $0x218] sm:$0xff]  ;;  %v357_v41 = vld [vmem:[%s1346_s18 + $0x5d0] sm:$0xff] }
  0x87   : > { %924 = vmatpush.msrb.mxu2 %v447_v42  ;;  %943 = vmatpush.msrb.mxu3 %v566_v43  ;;  %v455_v42 = vld [vmem:[%s1346_s18 + $0x8e0] sm:$0xff]  ;;  %v574_v43 = vld [vmem:[%s1346_s18 + $0xc98] sm:$0xff] }
  0x88   : > { %884 = vmatpush.msrb.mxu0 %v223_v44  ;;  %903 = vmatpush.msrb.mxu1 %v342_v45  ;;  %v231_v44 = vld [vmem:[%s1346_s18 + $0x1e0] sm:$0xff]  ;;  %v350_v45 = vld [vmem:[%s1346_s18 + $0x598] sm:$0xff] }
  0x89   : > { %925 = vmatpush.msrb.mxu2 %v440_v47  ;;  %944 = vmatpush.msrb.mxu3 %v559_v48  ;;  %v448_v47 = vld [vmem:[%s1346_s18 + $0x8a8] sm:$0xff]  ;;  %v567_v48 = vld [vmem:[%s1346_s18 + $0xc60] sm:$0xff] }
  0x8a   : > { %885 = vmatpush.msrb.mxu0 %v216_v49  ;;  %904 = vmatpush.msrb.mxu1 %v335_v51  ;;  %v224_v49 = vld [vmem:[%s1346_s18 + $0x1a8] sm:$0xff]  ;;  %v343_v51 = vld [vmem:[%s1346_s18 + $0x560] sm:$0xff] }
  0x8b   : > { %926 = vmatpush.msrb.mxu2 %v433_v53  ;;  %945 = vmatpush.msrb.mxu3 %v552_v54  ;;  %v441_v53 = vld [vmem:[%s1346_s18 + $0x870] sm:$0xff]  ;;  %v560_v54 = vld [vmem:[%s1346_s18 + $0xc28] sm:$0xff] }
  0x8c   : > { %886 = vmatpush.msrb.mxu0 %v209_v55  ;;  %905 = vmatpush.msrb.mxu1 %v328_v57  ;;  %v217_v55 = vld [vmem:[%s1346_s18 + $0x170] sm:$0xff]  ;;  %v336_v57 = vld [vmem:[%s1346_s18 + $0x528] sm:$0xff] }
  0x8d   : > { %927 = vmatpush.msrb.mxu2 %v426_v58  ;;  %946 = vmatpush.msrb.mxu3 %v545_v59  ;;  %v434_v58 = vld [vmem:[%s1346_s18 + $0x838] sm:$0xff]  ;;  %v553_v59 = vld [vmem:[%s1346_s18 + $0xbf0] sm:$0xff] }
  0x8e   : > { %852 = vmatmul.f32.vlgmr.msra.gmra.mxu2 %v1459_v46  ;;  %887 = vmatpush.msrb.mxu0 %v202_v60  ;;  %v210_v60 = vld [vmem:[%s1346_s18 + $0x138] sm:$0xff] }
  0x8f   : > { %906 = vmatpush.msrb.mxu1 %v321_v61  ;;  %928 = vmatpush.msrb.mxu2 %v419_v62  ;;  %v329_v61 = vld [vmem:[%s1346_s18 + $0x4f0] sm:$0xff]  ;;  %v427_v62 = vld [vmem:[%s1346_s18 + $0x800] sm:$0xff] }
  0x90   : > { %947 = vmatpush.msrb.mxu3 %v538_v63  ;;  %812 = vmatmul.f32.vlgmr.msra.gmra.mxu0 %v1464_v50  ;;  %v546_v63 = vld [vmem:[%s1346_s18 + $0xbb8] sm:$0xff] }
  0x91   : > { %872 = vmatmul.f32.vlgmr.msra.gmra.mxu3 %v1467_v52  ;;  %888 = vmatpush.msrb.mxu0 %v195_v0  ;;  %v203_v0 = vld [vmem:[%s1346_s18 + $0x100] sm:$0xff] }
  0x92   : > { %907 = vmatpush.msrb.mxu1 %v314_v1  ;;  %929 = vmatpush.msrb.mxu2 %v412_v2  ;;  %v322_v1 = vld [vmem:[%s1346_s18 + $0x4b8] sm:$0xff]  ;;  %v420_v2 = vld [vmem:[%s1346_s18 + $0x7c8] sm:$0xff] }
  0x93   : > { %948 = vmatpush.msrb.mxu3 %v531_v3  ;;  %832 = vmatmul.f32.vlgmr.msra.gmra.mxu1 %v1473_v56  ;;  %v539_v3 = vld [vmem:[%s1346_s18 + $0xb80] sm:$0xff] }
  0x94   : > { %889 = vmatpush.msrb.mxu0 %v188_v4  ;;  %908 = vmatpush.msrb.mxu1 %v307_v5  ;;  %v196_v4 = vld [vmem:[%s1346_s18 + $0xc8] sm:$0xff]  ;;  %v315_v5 = vld [vmem:[%s1346_s18 + $0x480] sm:$0xff] }
  0x95   : > { %930 = vmatpush.msrb.mxu2 %v405_v6  ;;  %949 = vmatpush.msrb.mxu3 %v524_v7  ;;  %v413_v6 = vld [vmem:[%s1346_s18 + $0x790] sm:$0xff]  ;;  %v532_v7 = vld [vmem:[%s1346_s18 + $0xb48] sm:$0xff] }
  0x96   : > { %890 = vmatpush.msrb.mxu0 %v181_v8  ;;  %909 = vmatpush.msrb.mxu1 %v300_v9  ;;  %v189_v8 = vld [vmem:[%s1346_s18 + $0x90] sm:$0xff]  ;;  %v308_v9 = vld [vmem:[%s1346_s18 + $0x448] sm:$0xff] }
  0x97   : > { %931 = vmatpush.msrb.mxu2 %v398_v10  ;;  %950 = vmatpush.msrb.mxu3 %v517_v11  ;;  %v406_v10 = vld [vmem:[%s1346_s18 + $0x758] sm:$0xff]  ;;  %v525_v11 = vld [vmem:[%s1346_s18 + $0xb10] sm:$0xff] }
  0x98   : > { %891 = vmatpush.msrb.mxu0 %v174_v12  ;;  %910 = vmatpush.msrb.mxu1 %v293_v13  ;;  %v182_v12 = vld [vmem:[%s1346_s18 + $0x58] sm:$0xff]  ;;  %v301_v13 = vld [vmem:[%s1346_s18 + $0x410] sm:$0xff] }
  0x99   : > { %932 = vmatmul.f32.vlgmr.msrb.gmra.mxu2 %v1459_v46  ;;  %951 = vmatpush.msrb.mxu3 %v510_v14  ;;  %v399_v14 = vld [vmem:[%s1346_s18 + $0x720] sm:$0xff] }
  0x9a   : > { %996 = vmatpush.msra.mxu2 %v504_v15  ;;  %956 = vmatpush.msra.mxu0 %v280_v16  ;;  %v518_v15 = vld [vmem:[%s1346_s18 + $0xad8] sm:$0xff]  ;;  %v175_v16 = vld [vmem:[%s1346_s18 + $0x20] sm:$0xff] }
  0x9b   : > { %892 = vmatmul.f32.vlgmr.msrb.gmra.mxu0 %v1464_v50  ;;  %911 = vmatpush.msrb.mxu1 %v286_v17  ;;  %v294_v17 = vld [vmem:[%s1346_s18 + $0x3d8] sm:$0xff] }
  0x9c   : > { %952 = vmatmul.f32.vlgmr.msrb.gmra.mxu3 %v1467_v52  ;;  %997 = vmatpush.msra.mxu2 %v497_v18  ;;  %v505_v18 = vld [vmem:[%s1346_s18 + $0xa70] sm:$0xff] }
  0x9d   : > { %1016 = vmatpush.msra.mxu3 %v616_v19  ;;  %957 = vmatpush.msra.mxu0 %v273_v20  ;;  %v511_v19 = vld [vmem:[%s1346_s18 + $0xaa0] sm:$0xff]  ;;  %v281_v20 = vld [vmem:[%s1346_s18 + $0x370] sm:$0xff] }
  0x9e   : > { %976 = vmatpush.msra.mxu1 %v392_v21  ;;  %998 = vmatpush.msra.mxu2 %v490_v22  ;;  %v287_v21 = vld [vmem:[%s1346_s18 + $0x3a0] sm:$0xff]  ;;  %v498_v22 = vld [vmem:[%s1346_s18 + $0xa38] sm:$0xff] }
  0x9f   : > { %912 = vmatmul.f32.vlgmr.msrb.gmra.mxu1 %v1473_v56  ;;  %1017 = vmatpush.msra.mxu3 %v609_v23  ;;  %v617_v23 = vld [vmem:[%s1346_s18 + $0xdf0] sm:$0xff] }
  0xa0   : > { %958 = vmatpush.msra.mxu0 %v266_v24  ;;  %977 = vmatpush.msra.mxu1 %v385_v25  ;;  %v274_v24 = vld [vmem:[%s1346_s18 + $0x338] sm:$0xff]  ;;  %v393_v25 = vld [vmem:[%s1346_s18 + $0x6f0] sm:$0xff] }
  0xa1   : > { %999 = vmatpush.msra.mxu2 %v483_v26  ;;  %1018 = vmatpush.msra.mxu3 %v602_v27  ;;  %v491_v26 = vld [vmem:[%s1346_s18 + $0xa00] sm:$0xff]  ;;  %v610_v27 = vld [vmem:[%s1346_s18 + $0xdb8] sm:$0xff] }
  0xa2   : > { %959 = vmatpush.msra.mxu0 %v259_v28  ;;  %978 = vmatpush.msra.mxu1 %v378_v29  ;;  %v267_v28 = vld [vmem:[%s1346_s18 + $0x300] sm:$0xff]  ;;  %v386_v29 = vld [vmem:[%s1346_s18 + $0x6b8] sm:$0xff] }
  0xa3   : > { %1000 = vmatpush.msra.mxu2 %v476_v30  ;;  %1019 = vmatpush.msra.mxu3 %v595_v31  ;;  %v484_v30 = vld [vmem:[%s1346_s18 + $0x9c8] sm:$0xff]  ;;  %v603_v31 = vld [vmem:[%s1346_s18 + $0xd80] sm:$0xff] }
  0xa4   : > { %960 = vmatpush.msra.mxu0 %v252_v32  ;;  %979 = vmatpush.msra.mxu1 %v371_v33  ;;  %v260_v32 = vld [vmem:[%s1346_s18 + $0x2c8] sm:$0xff]  ;;  %v379_v33 = vld [vmem:[%s1346_s18 + $0x680] sm:$0xff] }
  0xa5   : > { %1001 = vmatpush.msra.mxu2 %v469_v34  ;;  %1020 = vmatpush.msra.mxu3 %v588_v35  ;;  %v477_v34 = vld [vmem:[%s1346_s18 + $0x990] sm:$0xff]  ;;  %v596_v35 = vld [vmem:[%s1346_s18 + $0xd48] sm:$0xff] }
  0xa6   : > { %961 = vmatpush.msra.mxu0 %v245_v36  ;;  %980 = vmatpush.msra.mxu1 %v364_v37  ;;  %v253_v36 = vld [vmem:[%s1346_s18 + $0x290] sm:$0xff]  ;;  %v372_v37 = vld [vmem:[%s1346_s18 + $0x648] sm:$0xff] }
  0xa7   : > { %1002 = vmatpush.msra.mxu2 %v462_v38  ;;  %1021 = vmatpush.msra.mxu3 %v581_v39  ;;  %v470_v38 = vld [vmem:[%s1346_s18 + $0x958] sm:$0xff]  ;;  %v589_v39 = vld [vmem:[%s1346_s18 + $0xd10] sm:$0xff] }
  0xa8   : > { %962 = vmatpush.msra.mxu0 %v238_v40  ;;  %981 = vmatpush.msra.mxu1 %v357_v41  ;;  %v246_v40 = vld [vmem:[%s1346_s18 + $0x258] sm:$0xff]  ;;  %v365_v41 = vld [vmem:[%s1346_s18 + $0x610] sm:$0xff] }
  0xa9   : > { %1003 = vmatpush.msra.mxu2 %v455_v42  ;;  %1022 = vmatpush.msra.mxu3 %v574_v43  ;;  %v463_v42 = vld [vmem:[%s1346_s18 + $0x920] sm:$0xff]  ;;  %v582_v43 = vld [vmem:[%s1346_s18 + $0xcd8] sm:$0xff] }
  0xaa   : > { %963 = vmatpush.msra.mxu0 %v231_v44  ;;  %982 = vmatpush.msra.mxu1 %v350_v45  ;;  %v239_v44 = vld [vmem:[%s1346_s18 + $0x220] sm:$0xff]  ;;  %v358_v45 = vld [vmem:[%s1346_s18 + $0x5d8] sm:$0xff] }
  0xab   : > { %1004 = vmatpush.msra.mxu2 %v448_v47  ;;  %1023 = vmatpush.msra.mxu3 %v567_v48  ;;  %v456_v47 = vld [vmem:[%s1346_s18 + $0x8e8] sm:$0xff]  ;;  %v575_v48 = vld [vmem:[%s1346_s18 + $0xca0] sm:$0xff] }
  0xac   : > { %964 = vmatpush.msra.mxu0 %v224_v49  ;;  %983 = vmatpush.msra.mxu1 %v343_v51  ;;  %v232_v49 = vld [vmem:[%s1346_s18 + $0x1e8] sm:$0xff]  ;;  %v351_v51 = vld [vmem:[%s1346_s18 + $0x5a0] sm:$0xff] }
  0xad   : > { %1005 = vmatpush.msra.mxu2 %v441_v53  ;;  %1024 = vmatpush.msra.mxu3 %v560_v54  ;;  %v449_v53 = vld [vmem:[%s1346_s18 + $0x8b0] sm:$0xff]  ;;  %v568_v54 = vld [vmem:[%s1346_s18 + $0xc68] sm:$0xff] }
  0xae   : > { %965 = vmatpush.msra.mxu0 %v217_v55  ;;  %984 = vmatpush.msra.mxu1 %v336_v57  ;;  %v225_v55 = vld [vmem:[%s1346_s18 + $0x1b0] sm:$0xff]  ;;  %v344_v57 = vld [vmem:[%s1346_s18 + $0x568] sm:$0xff] }
  0xaf   : > { %1006 = vmatpush.msra.mxu2 %v434_v58  ;;  %1025 = vmatpush.msra.mxu3 %v553_v59  ;;  %v442_v58 = vld [vmem:[%s1346_s18 + $0x878] sm:$0xff]  ;;  %v561_v59 = vld [vmem:[%s1346_s18 + $0xc30] sm:$0xff] }
  0xb0   : > { %966 = vmatpush.msra.mxu0 %v210_v60  ;;  %985 = vmatpush.msra.mxu1 %v329_v61  ;;  %v218_v60 = vld [vmem:[%s1346_s18 + $0x178] sm:$0xff]  ;;  %v337_v61 = vld [vmem:[%s1346_s18 + $0x530] sm:$0xff] }
  0xb1   : > { %1007 = vmatpush.msra.mxu2 %v427_v62  ;;  %1026 = vmatpush.msra.mxu3 %v546_v63  ;;  %v435_v62 = vld [vmem:[%s1346_s18 + $0x840] sm:$0xff]  ;;  %v554_v63 = vld [vmem:[%s1346_s18 + $0xbf8] sm:$0xff] }
  0xb2   : > { %967 = vmatpush.msra.mxu0 %v203_v0  ;;  %986 = vmatpush.msra.mxu1 %v322_v1  ;;  %v211_v0 = vld [vmem:[%s1346_s18 + $0x140] sm:$0xff]  ;;  %v330_v1 = vld [vmem:[%s1346_s18 + $0x4f8] sm:$0xff] }
  0xb3   : > { %1008 = vmatpush.msra.mxu2 %v420_v2  ;;  %1027 = vmatpush.msra.mxu3 %v539_v3  ;;  %v428_v2 = vld [vmem:[%s1346_s18 + $0x808] sm:$0xff]  ;;  %v547_v3 = vld [vmem:[%s1346_s18 + $0xbc0] sm:$0xff] }
  0xb4   : > { %968 = vmatpush.msra.mxu0 %v196_v4  ;;  %987 = vmatpush.msra.mxu1 %v315_v5  ;;  %v204_v4 = vld [vmem:[%s1346_s18 + $0x108] sm:$0xff]  ;;  %v323_v5 = vld [vmem:[%s1346_s18 + $0x4c0] sm:$0xff] }
  0xb5   : > { %1009 = vmatpush.msra.mxu2 %v413_v6  ;;  %1028 = vmatpush.msra.mxu3 %v532_v7  ;;  %v421_v6 = vld [vmem:[%s1346_s18 + $0x7d0] sm:$0xff]  ;;  %v540_v7 = vld [vmem:[%s1346_s18 + $0xb88] sm:$0xff] }
  0xb6   : > { %969 = vmatpush.msra.mxu0 %v189_v8  ;;  %988 = vmatpush.msra.mxu1 %v308_v9  ;;  %v197_v8 = vld [vmem:[%s1346_s18 + $0xd0] sm:$0xff]  ;;  %v316_v9 = vld [vmem:[%s1346_s18 + $0x488] sm:$0xff] }
  0xb7   : > { %1010 = vmatpush.msra.mxu2 %v406_v10  ;;  %1029 = vmatpush.msra.mxu3 %v525_v11  ;;  %v414_v10 = vld [vmem:[%s1346_s18 + $0x798] sm:$0xff]  ;;  %v533_v11 = vld [vmem:[%s1346_s18 + $0xb50] sm:$0xff] }
  0xb8   : > { %970 = vmatpush.msra.mxu0 %v182_v12  ;;  %989 = vmatpush.msra.mxu1 %v301_v13  ;;  %v190_v12 = vld [vmem:[%s1346_s18 + $0x98] sm:$0xff]  ;;  %v309_v13 = vld [vmem:[%s1346_s18 + $0x450] sm:$0xff] }
  0xb9   : > { %1011 = vmatpush.msra.mxu2 %v399_v14  ;;  %1030 = vmatpush.msra.mxu3 %v518_v15  ;;  %v407_v14 = vld [vmem:[%s1346_s18 + $0x760] sm:$0xff]  ;;  %v526_v15 = vld [vmem:[%s1346_s18 + $0xb18] sm:$0xff] }
  0xba   : > { %971 = vmatpush.msra.mxu0 %v175_v16  ;;  %990 = vmatpush.msra.mxu1 %v294_v17  ;;  %v183_v16 = vld [vmem:[%s1346_s18 + $0x60] sm:$0xff]  ;;  %v302_v17 = vld [vmem:[%s1346_s18 + $0x418] sm:$0xff] }
  0xbb   : > { %1076 = vmatpush.msrb.mxu2 %v505_v18  ;;  %1031 = vmatpush.msra.mxu3 %v511_v19  ;;  %v400_v18 = vld [vmem:[%s1346_s18 + $0x728] sm:$0xff]  ;;  %v519_v19 = vld [vmem:[%s1346_s18 + $0xae0] sm:$0xff] }
  0xbc   : > { %1036 = vmatpush.msrb.mxu0 %v281_v20  ;;  %991 = vmatpush.msra.mxu1 %v287_v21  ;;  %v176_v20 = vld [vmem:[%s1346_s18 + $0x28] sm:$0xff]  ;;  %v295_v21 = vld [vmem:[%s1346_s18 + $0x3e0] sm:$0xff] }
  0xbd   : > { %1077 = vmatpush.msrb.mxu2 %v498_v22  ;;  %1096 = vmatpush.msrb.mxu3 %v617_v23  ;;  %v512_v22 = vld [vmem:[%s1346_s18 + $0xaa8] sm:$0xff]  ;;  %v506_v23 = vld [vmem:[%s1346_s18 + $0xa78] sm:$0xff] }
  0xbe   : > { %1037 = vmatpush.msrb.mxu0 %v274_v24  ;;  %1056 = vmatpush.msrb.mxu1 %v393_v25  ;;  %v282_v24 = vld [vmem:[%s1346_s18 + $0x378] sm:$0xff]  ;;  %v288_v25 = vld [vmem:[%s1346_s18 + $0x3a8] sm:$0xff] }
  0xbf   : > { %1078 = vmatpush.msrb.mxu2 %v491_v26  ;;  %1097 = vmatpush.msrb.mxu3 %v610_v27  ;;  %v499_v26 = vld [vmem:[%s1346_s18 + $0xa40] sm:$0xff]  ;;  %v618_v27 = vld [vmem:[%s1346_s18 + $0xdf8] sm:$0xff] }
  0xc0   : > { %1038 = vmatpush.msrb.mxu0 %v267_v28  ;;  %1057 = vmatpush.msrb.mxu1 %v386_v29  ;;  %v275_v28 = vld [vmem:[%s1346_s18 + $0x340] sm:$0xff]  ;;  %v394_v29 = vld [vmem:[%s1346_s18 + $0x6f8] sm:$0xff] }
  0xc1   : > { %1079 = vmatpush.msrb.mxu2 %v484_v30  ;;  %1098 = vmatpush.msrb.mxu3 %v603_v31  ;;  %v492_v30 = vld [vmem:[%s1346_s18 + $0xa08] sm:$0xff]  ;;  %v611_v31 = vld [vmem:[%s1346_s18 + $0xdc0] sm:$0xff] }
  0xc2   : > { %1039 = vmatpush.msrb.mxu0 %v260_v32  ;;  %1058 = vmatpush.msrb.mxu1 %v379_v33  ;;  %v268_v32 = vld [vmem:[%s1346_s18 + $0x308] sm:$0xff]  ;;  %v387_v33 = vld [vmem:[%s1346_s18 + $0x6c0] sm:$0xff] }
  0xc3   : > { %1080 = vmatpush.msrb.mxu2 %v477_v34  ;;  %1099 = vmatpush.msrb.mxu3 %v596_v35  ;;  %v485_v34 = vld [vmem:[%s1346_s18 + $0x9d0] sm:$0xff]  ;;  %v604_v35 = vld [vmem:[%s1346_s18 + $0xd88] sm:$0xff] }
  0xc4   : > { %1040 = vmatpush.msrb.mxu0 %v253_v36  ;;  %1059 = vmatpush.msrb.mxu1 %v372_v37  ;;  %v261_v36 = vld [vmem:[%s1346_s18 + $0x2d0] sm:$0xff]  ;;  %v380_v37 = vld [vmem:[%s1346_s18 + $0x688] sm:$0xff] }
  0xc5   : > { %1081 = vmatpush.msrb.mxu2 %v470_v38  ;;  %1100 = vmatpush.msrb.mxu3 %v589_v39  ;;  %v478_v38 = vld [vmem:[%s1346_s18 + $0x998] sm:$0xff]  ;;  %v597_v39 = vld [vmem:[%s1346_s18 + $0xd50] sm:$0xff] }
  0xc6   : > { %1041 = vmatpush.msrb.mxu0 %v246_v40  ;;  %1060 = vmatpush.msrb.mxu1 %v365_v41  ;;  %v254_v40 = vld [vmem:[%s1346_s18 + $0x298] sm:$0xff]  ;;  %v373_v41 = vld [vmem:[%s1346_s18 + $0x650] sm:$0xff] }
  0xc7   : > { %1082 = vmatpush.msrb.mxu2 %v463_v42  ;;  %1101 = vmatpush.msrb.mxu3 %v582_v43  ;;  %v471_v42 = vld [vmem:[%s1346_s18 + $0x960] sm:$0xff]  ;;  %v590_v43 = vld [vmem:[%s1346_s18 + $0xd18] sm:$0xff] }
  0xc8   : > { %1042 = vmatpush.msrb.mxu0 %v239_v44  ;;  %1061 = vmatpush.msrb.mxu1 %v358_v45  ;;  %v247_v44 = vld [vmem:[%s1346_s18 + $0x260] sm:$0xff]  ;;  %v366_v45 = vld [vmem:[%s1346_s18 + $0x618] sm:$0xff] }
  0xc9   : > { %1083 = vmatpush.msrb.mxu2 %v456_v47  ;;  %1102 = vmatpush.msrb.mxu3 %v575_v48  ;;  %v464_v47 = vld [vmem:[%s1346_s18 + $0x928] sm:$0xff]  ;;  %v583_v48 = vld [vmem:[%s1346_s18 + $0xce0] sm:$0xff] }
  0xca   : > { %1043 = vmatpush.msrb.mxu0 %v232_v49  ;;  %1062 = vmatpush.msrb.mxu1 %v351_v51  ;;  %v240_v49 = vld [vmem:[%s1346_s18 + $0x228] sm:$0xff]  ;;  %v359_v51 = vld [vmem:[%s1346_s18 + $0x5e0] sm:$0xff] }
  0xcb   : > { %1084 = vmatpush.msrb.mxu2 %v449_v53  ;;  %1103 = vmatpush.msrb.mxu3 %v568_v54  ;;  %v457_v53 = vld [vmem:[%s1346_s18 + $0x8f0] sm:$0xff]  ;;  %v576_v54 = vld [vmem:[%s1346_s18 + $0xca8] sm:$0xff] }
  0xcc   : > { %1044 = vmatpush.msrb.mxu0 %v225_v55  ;;  %1063 = vmatpush.msrb.mxu1 %v344_v57  ;;  %v233_v55 = vld [vmem:[%s1346_s18 + $0x1f0] sm:$0xff]  ;;  %v352_v57 = vld [vmem:[%s1346_s18 + $0x5a8] sm:$0xff] }
  0xcd   : > { %1085 = vmatpush.msrb.mxu2 %v442_v58  ;;  %1104 = vmatpush.msrb.mxu3 %v561_v59  ;;  %v450_v58 = vld [vmem:[%s1346_s18 + $0x8b8] sm:$0xff]  ;;  %v569_v59 = vld [vmem:[%s1346_s18 + $0xc70] sm:$0xff] }
  0xce   : > { %1045 = vmatpush.msrb.mxu0 %v218_v60  ;;  %1064 = vmatpush.msrb.mxu1 %v337_v61  ;;  %v226_v60 = vld [vmem:[%s1346_s18 + $0x1b8] sm:$0xff]  ;;  %v345_v61 = vld [vmem:[%s1346_s18 + $0x570] sm:$0xff] }
  0xcf   : > { %1086 = vmatpush.msrb.mxu2 %v435_v62  ;;  %1105 = vmatpush.msrb.mxu3 %v554_v63  ;;  %v443_v62 = vld [vmem:[%s1346_s18 + $0x880] sm:$0xff]  ;;  %v562_v63 = vld [vmem:[%s1346_s18 + $0xc38] sm:$0xff] }
  0xd0   : > { %1046 = vmatpush.msrb.mxu0 %v211_v0  ;;  %1065 = vmatpush.msrb.mxu1 %v330_v1  ;;  %v219_v0 = vld [vmem:[%s1346_s18 + $0x180] sm:$0xff]  ;;  %v338_v1 = vld [vmem:[%s1346_s18 + $0x538] sm:$0xff] }
  0xd1   : > { %1087 = vmatpush.msrb.mxu2 %v428_v2  ;;  %1106 = vmatpush.msrb.mxu3 %v547_v3  ;;  %v436_v2 = vld [vmem:[%s1346_s18 + $0x848] sm:$0xff]  ;;  %v555_v3 = vld [vmem:[%s1346_s18 + $0xc00] sm:$0xff] }
  0xd2   : > { %1012 = vmatmul.f32.vlgmr.msra.gmra.mxu2 %v1459_v46  ;;  %1047 = vmatpush.msrb.mxu0 %v204_v4  ;;  %v212_v4 = vld [vmem:[%s1346_s18 + $0x148] sm:$0xff] }
  0xd3   : > { %1066 = vmatpush.msrb.mxu1 %v323_v5  ;;  %1088 = vmatpush.msrb.mxu2 %v421_v6  ;;  %v331_v5 = vld [vmem:[%s1346_s18 + $0x500] sm:$0xff]  ;;  %v429_v6 = vld [vmem:[%s1346_s18 + $0x810] sm:$0xff] }
  0xd4   : > { %1107 = vmatpush.msrb.mxu3 %v540_v7  ;;  %972 = vmatmul.f32.vlgmr.msra.gmra.mxu0 %v1464_v50  ;;  %v548_v7 = vld [vmem:[%s1346_s18 + $0xbc8] sm:$0xff] }
  0xd5   : > { %1032 = vmatmul.f32.vlgmr.msra.gmra.mxu3 %v1467_v52  ;;  %1048 = vmatpush.msrb.mxu0 %v197_v8  ;;  %v205_v8 = vld [vmem:[%s1346_s18 + $0x110] sm:$0xff] }
  0xd6   : > { %1067 = vmatpush.msrb.mxu1 %v316_v9  ;;  %1089 = vmatpush.msrb.mxu2 %v414_v10  ;;  %v324_v9 = vld [vmem:[%s1346_s18 + $0x4c8] sm:$0xff]  ;;  %v422_v10 = vld [vmem:[%s1346_s18 + $0x7d8] sm:$0xff] }
  0xd7   : > { %1108 = vmatpush.msrb.mxu3 %v533_v11  ;;  %992 = vmatmul.f32.vlgmr.msra.gmra.mxu1 %v1473_v56  ;;  %v541_v11 = vld [vmem:[%s1346_s18 + $0xb90] sm:$0xff] }
  0xd8   : > { %1049 = vmatpush.msrb.mxu0 %v190_v12  ;;  %1068 = vmatpush.msrb.mxu1 %v309_v13  ;;  %v198_v12 = vld [vmem:[%s1346_s18 + $0xd8] sm:$0xff]  ;;  %v317_v13 = vld [vmem:[%s1346_s18 + $0x490] sm:$0xff] }
  0xd9   : > { %1090 = vmatpush.msrb.mxu2 %v407_v14  ;;  %1109 = vmatpush.msrb.mxu3 %v526_v15  ;;  %v415_v14 = vld [vmem:[%s1346_s18 + $0x7a0] sm:$0xff]  ;;  %v534_v15 = vld [vmem:[%s1346_s18 + $0xb58] sm:$0xff] }
  0xda   : > { %1050 = vmatpush.msrb.mxu0 %v183_v16  ;;  %1069 = vmatpush.msrb.mxu1 %v302_v17  ;;  %v191_v16 = vld [vmem:[%s1346_s18 + $0xa0] sm:$0xff]  ;;  %v310_v17 = vld [vmem:[%s1346_s18 + $0x458] sm:$0xff] }
  0xdb   : > { %1091 = vmatpush.msrb.mxu2 %v400_v18  ;;  %1110 = vmatpush.msrb.mxu3 %v519_v19  ;;  %v408_v18 = vld [vmem:[%s1346_s18 + $0x768] sm:$0xff]  ;;  %v527_v19 = vld [vmem:[%s1346_s18 + $0xb20] sm:$0xff] }
  0xdc   : > { %1051 = vmatpush.msrb.mxu0 %v176_v20  ;;  %1070 = vmatpush.msrb.mxu1 %v295_v21  ;;  %v184_v20 = vld [vmem:[%s1346_s18 + $0x68] sm:$0xff]  ;;  %v303_v21 = vld [vmem:[%s1346_s18 + $0x420] sm:$0xff] }
  0xdd   : > { %1092 = vmatmul.f32.vlgmr.msrb.gmra.mxu2 %v1459_v46  ;;  %1111 = vmatpush.msrb.mxu3 %v512_v22  ;;  %v401_v22 = vld [vmem:[%s1346_s18 + $0x730] sm:$0xff] }
  0xde   : > { %1156 = vmatpush.msra.mxu2 %v506_v23  ;;  %1116 = vmatpush.msra.mxu0 %v282_v24  ;;  %v520_v23 = vld [vmem:[%s1346_s18 + $0xae8] sm:$0xff]  ;;  %v177_v24 = vld [vmem:[%s1346_s18 + $0x30] sm:$0xff] }
  0xdf   : > { %1052 = vmatmul.f32.vlgmr.msrb.gmra.mxu0 %v1464_v50  ;;  %1071 = vmatpush.msrb.mxu1 %v288_v25  ;;  %v296_v25 = vld [vmem:[%s1346_s18 + $0x3e8] sm:$0xff] }
  0xe0   : > { %1112 = vmatmul.f32.vlgmr.msrb.gmra.mxu3 %v1467_v52  ;;  %1157 = vmatpush.msra.mxu2 %v499_v26  ;;  %v513_v26 = vld [vmem:[%s1346_s18 + $0xab0] sm:$0xff] }
  0xe1   : > { %1176 = vmatpush.msra.mxu3 %v618_v27  ;;  %1117 = vmatpush.msra.mxu0 %v275_v28  ;;  %v289_v27 = vld [vmem:[%s1346_s18 + $0x3b0] sm:$0xff]  ;;  %v653_v28 = vpop.f32.mrf.mxu0 }
  0xe2   : > { %1136 = vmatpush.msra.mxu1 %v394_v29  ;;  %1158 = vmatpush.msra.mxu2 %v492_v30  ;;  %v673_v29 = vpop.f32.mrf.mxu1  ;;  %v693_v30 = vpop.f32.mrf.mxu2 }
  0xe3   : > { %1072 = vmatmul.f32.vlgmr.msrb.gmra.mxu1 %v1473_v56  ;;  %1177 = vmatpush.msra.mxu3 %v611_v31 }
  0xe4   : > { %1118 = vmatpush.msra.mxu0 %v268_v32  ;;  %1137 = vmatpush.msra.mxu1 %v387_v33  ;;  %v1835_v32 = vpop.f32.mrf.mxu3 }
  0xe5   : > { %1159 = vmatpush.msra.mxu2 %v485_v34  ;;  %1178 = vmatpush.msra.mxu3 %v604_v35 }
  0xe6   : > { %1119 = vmatpush.msra.mxu0 %v261_v36  ;;  %1138 = vmatpush.msra.mxu1 %v380_v37 }
  0xe7   : > { %1160 = vmatpush.msra.mxu2 %v478_v38  ;;  %1179 = vmatpush.msra.mxu3 %v597_v39 }
  0xe8   : > { %1120 = vmatpush.msra.mxu0 %v254_v40  ;;  %1139 = vmatpush.msra.mxu1 %v373_v41 }
  0xe9   : > { %1161 = vmatpush.msra.mxu2 %v471_v42  ;;  %1180 = vmatpush.msra.mxu3 %v590_v43  ;;  %v733_v31 = vpop.f32.mrf.mxu0 }
  0xea   : > { %1121 = vmatpush.msra.mxu0 %v247_v44  ;;  %1140 = vmatpush.msra.mxu1 %v366_v45  ;;  %v753_v33 = vpop.f32.mrf.mxu1  ;;  %v773_v34 = vpop.f32.mrf.mxu2 }
  0xeb   : > { %1162 = vmatpush.msra.mxu2 %v464_v47  ;;  %1181 = vmatpush.msra.mxu3 %v583_v48 }
  0xec   : > { %1122 = vmatpush.msra.mxu0 %v240_v49  ;;  %1141 = vmatpush.msra.mxu1 %v359_v51  ;;  %v793_v36 = vpop.f32.mrf.mxu3 }
  0xed   : > { %1163 = vmatpush.msra.mxu2 %v457_v53  ;;  %1182 = vmatpush.msra.mxu3 %v576_v54 }
  0xee   : > { %1123 = vmatpush.msra.mxu0 %v233_v55  ;;  %1142 = vmatpush.msra.mxu1 %v352_v57 }
  0xef   : > { %1164 = vmatpush.msra.mxu2 %v450_v58  ;;  %1183 = vmatpush.msra.mxu3 %v569_v59 }
  0xf0   : > { %1124 = vmatpush.msra.mxu0 %v226_v60  ;;  %1143 = vmatpush.msra.mxu1 %v345_v61 }
  0xf1   : > { %1165 = vmatpush.msra.mxu2 %v443_v62  ;;  %1184 = vmatpush.msra.mxu3 %v562_v63 }
  0xf2   : > { %1125 = vmatpush.msra.mxu0 %v219_v0  ;;  %1144 = vmatpush.msra.mxu1 %v338_v1 }
  0xf3   : > { %1166 = vmatpush.msra.mxu2 %v436_v2  ;;  %1185 = vmatpush.msra.mxu3 %v555_v3 }
  0xf4   : > { %1126 = vmatpush.msra.mxu0 %v212_v4  ;;  %1145 = vmatpush.msra.mxu1 %v331_v5 }
  0xf5   : > { %1167 = vmatpush.msra.mxu2 %v429_v6  ;;  %1186 = vmatpush.msra.mxu3 %v548_v7 }
  0xf6   : > { %1127 = vmatpush.msra.mxu0 %v205_v8  ;;  %1146 = vmatpush.msra.mxu1 %v324_v9 }
  0xf7   : > { %1168 = vmatpush.msra.mxu2 %v422_v10  ;;  %1187 = vmatpush.msra.mxu3 %v541_v11 }
  0xf8   : > { %1128 = vmatpush.msra.mxu0 %v198_v12  ;;  %1147 = vmatpush.msra.mxu1 %v317_v13 }
  0xf9   : > { %1169 = vmatpush.msra.mxu2 %v415_v14  ;;  %1188 = vmatpush.msra.mxu3 %v534_v15 }
  0xfa   : > { %1129 = vmatpush.msra.mxu0 %v191_v16  ;;  %1148 = vmatpush.msra.mxu1 %v310_v17 }
  0xfb   : > { %1170 = vmatpush.msra.mxu2 %v408_v18  ;;  %1189 = vmatpush.msra.mxu3 %v527_v19 }
  0xfc   : > { %1130 = vmatpush.msra.mxu0 %v184_v20  ;;  %1149 = vmatpush.msra.mxu1 %v303_v21 }
  0xfd   : > { %1171 = vmatpush.msra.mxu2 %v401_v22  ;;  %1190 = vmatpush.msra.mxu3 %v520_v23 }
  0xfe   : > { %1131 = vmatpush.msra.mxu0 %v177_v24  ;;  %1150 = vmatpush.msra.mxu1 %v296_v25  ;;  %v1222_v25 = vlaneseq }
  0xff   : > { %1172 = vmatmul.f32.vlgmr.msra.gmra.mxu2 %v1459_v46  ;;  %1132 = vmatmul.f32.vlgmr.msra.gmra.mxu0 %v1464_v50 }
 0x100   : > { %1191 = vmatpush.msra.mxu3 %v513_v26  ;;  %1151 = vmatpush.msra.mxu1 %v289_v27  ;;  %vm1224_vm6 = vcmp.lt.s32.totalorder %v1222_v25, 784 }
 0x101   : > { %1192 = vmatmul.f32.vlgmr.msra.gmra.mxu3 %v1467_v52  ;;  %1152 = vmatmul.f32.vlgmr.msra.gmra.mxu1 %v1473_v56  ;;  %v624_v56 = vpop.permute.xlu0 %623 }
 0x102   : > { %v626_v44 = vperm.slane %v624_v56, 0 }
 0x104   : > { %v734_v51 = vadd.f32 %v733_v31, %v626_v44  ;;  %v654_v63 = vadd.f32 %v653_v28, %v626_v44 }
 0x106   : > { %v754_v59 = vadd.f32 %v753_v33, %v734_v51  ;;  %v674_v8 = vadd.f32 %v673_v29, %v654_v63 }
 0x108   : > { %v774_v2 = vadd.f32 %v773_v34, %v754_v59  ;;  %v694_v16 = vadd.f32 %v693_v30, %v674_v8 }
 0x10a   : > { %v794_v13 = vadd.f32 %v793_v36, %v774_v2  ;;  %v714_v27 = vadd.f32 %v1835_v32, %v694_v16 }
 0x10c   : > { %v1203_v21 = vrot.slane %v794_v13, 7 }
 0x10d   : > { %v813_v35 = vpop.f32.mrf.mxu0 }
 0x10e   : > { %v814_v47 = vadd.f32 %v813_v35, %v626_v44  ;;  %v1210_v30 = vsel %vm1209_vm1, %v714_v27, %v1203_v21 }
 0x110   : > { %v833_v37 = vpop.f32.mrf.mxu1 }
 0x111   : > { %v853_v46 = vpop.f32.mrf.mxu2  ;;  %v834_v57 = vadd.f32 %v833_v37, %v814_v47 }
 0x113   : > { %v854_v0 = vadd.f32 %v853_v46, %v834_v57 }
 0x114   : > { %v873_v50 = vpop.f32.mrf.mxu3 }
 0x115   : > { %v874_v9 = vadd.f32 %v873_v50, %v854_v0 }
 0x117   : > { %v1204_v17 = vrot.slane %v874_v9, 6 }
 0x118   : > { %v893_v38 = vpop.f32.mrf.mxu0 }
 0x119   : > { %v894_v48 = vadd.f32 %v893_v38, %v626_v44 }
 0x11c   : > { %v913_v39 = vpop.f32.mrf.mxu1  ;;  %v933_v40 = vpop.f32.mrf.mxu2 }
 0x11d   : > { %v914_v58 = vadd.f32 %v913_v39, %v894_v48 }
 0x11f   : > { %v953_v52 = vpop.f32.mrf.mxu3  ;;  %v934_v1 = vadd.f32 %v933_v40, %v914_v58 }
 0x121   : > { %v954_v10 = vadd.f32 %v953_v52, %v934_v1 }
 0x123   : > { %v1205_v18 = vrot.slane %v954_v10, 5 }
 0x125   : > { %v1212_v28 = vsel %vm1211_vm0, %v1204_v17, %v1205_v18 }
 0x126   : > { %v1214_v33 = vsel %vm1213_vm3, %v1210_v30, %v1212_v28 }
 0x151   : > { %v973_v41 = vpop.f32.mrf.mxu0 }
 0x152   : > { %v974_v53 = vadd.f32 %v973_v41, %v626_v44 }
 0x154   : > { %v993_v42 = vpop.f32.mrf.mxu1 }
 0x155   : > { %v1013_v43 = vpop.f32.mrf.mxu2  ;;  %v994_v60 = vadd.f32 %v993_v42, %v974_v53 }
 0x157   : > { %v1014_v3 = vadd.f32 %v1013_v43, %v994_v60 }
 0x158   : > { %v1033_v49 = vpop.f32.mrf.mxu3 }
 0x159   : > { %v1034_v14 = vadd.f32 %v1033_v49, %v1014_v3 }
 0x15b   : > { %v1206_v22 = vrot.slane %v1034_v14, 4 }
 0x15c   : > { %v1053_v45 = vpop.f32.mrf.mxu0 }
 0x15d   : > { %v1054_v54 = vadd.f32 %v1053_v45, %v626_v44 }
 0x160   : > { %v1073_v55 = vpop.f32.mrf.mxu1  ;;  %v1093_v62 = vpop.f32.mrf.mxu2 }
 0x161   : > { %v1074_v61 = vadd.f32 %v1073_v55, %v1054_v54 }
 0x163   : > { %v1094_v4 = vadd.f32 %v1093_v62, %v1074_v61  ;;  %v1113_v5 = vpop.f32.mrf.mxu3 }
 0x165   : > { %v1114_v15 = vadd.f32 %v1113_v5, %v1094_v4 }
 0x167   : > { %v1207_v23 = vrot.slane %v1114_v15, 3 }
 0x169   : > { %v1216_v31 = vsel %vm1215_vm2, %v1206_v22, %v1207_v23 }
 0x17c   : > { %v1133_v6 = vpop.f32.mrf.mxu0 }
 0x17d   : > { %v1134_v7 = vadd.f32 %v1133_v6, %v626_v44 }
 0x17e   : > { %v1153_v11 = vpop.f32.mrf.mxu1 }
 0x17f   : > { %v1154_v12 = vadd.f32 %v1153_v11, %v1134_v7 }
 0x182   : > { %v1173_v19 = vpop.f32.mrf.mxu2 }
 0x183   : > { %v1174_v20 = vadd.f32 %v1173_v19, %v1154_v12 }
 0x184   : > { %v1193_v24 = vpop.f32.mrf.mxu3 }
 0x185   : > { %v1194_v26 = vadd.f32 %v1193_v24, %v1174_v20 }
 0x187   : > { %v1208_v29 = vrot.slane %v1194_v26, 2 }
 0x189   : > { %v1218_v34 = vsel %vm1217_vm4, %v1216_v31, %v1208_v29 }
 0x18a   : > { %v1220_v35 = vsel %vm1219_vm5, %v1214_v33, %v1218_v34 }
 0x18b   : > { %1226 = vst.msk [vmem:[%s170_s24] sm:$0x7f] %vm1224_vm6, %v1220_v35 }
 0x18c PF: > { %s15_s14 = sadd.s32 1, %s1306_s14  }
 0x18d   : > { %p12_p4 = scmp.ge.s32.totalorder %s15_s14, 4  }
 0x18f   :  { %14 = sbr.rel (!%p12_p4) target bundleno = 3 (0x3), region = 62 }

// kernel: vae_nelbo_pallas.11
= control target key start
LH: loop header
LB: loop body
LE: loop exit
PB: predicated region body
PF: predicated region fallthrough
CT: control target
= control target key end

     0   :  { %s319_s0 = inlined_call_operand.vmem [shape: f32[2,784], index: 0, kind: input, shape index: {}]   ;;  %s320_s1 = inlined_call_operand.vmem [shape: f32[2,784], index: 1, kind: input, shape index: {}]   ;;  %s321_s2 = inlined_call_operand.vmem [shape: f32[1,2], index: 2, kind: input, shape index: {}]   ;;  %s322_s3 = inlined_call_operand.vmem [shape: f32[1,2], index: 3, kind: input, shape index: {}]   ;;  %s323_s4 = inlined_call_operand.hbm [shape: f32[1,2], index: 4, kind: output, shape index: {}]  }
   0x1   :  { %v18_v0 = vld [vmem:[%s319_s0] sm:$0xff]  ;;  %v19_v1 = vld [vmem:[%s319_s0 + $0x8] sm:$0x3f] }
   0x2   :  { %v28_v2 = vand.u32 2147483647, %v18_v0  ;;  %v29_v3 = vand.u32 2147483647, %v19_v1 }
   0x3   :  { %9 = vsyncpa [#allocation3], 0  ;;  %v20_v10 = vld [vmem:[%s320_s1] sm:$0xff]  ;;  %v21_v12 = vld [vmem:[%s320_s1 + $0x8] sm:$0x3f]  ;;  %v22_v14 = vmax.f32 %v18_v0, 0.0 }
   0x4   :  { %v30_v4 = vsub.f32 0.0, %v28_v2  ;;  %v31_v5 = vsub.f32 0.0, %v29_v3  ;;  %v24_v15 = vmul.f32 %v20_v10, %v18_v0  ;;  %v23_v16 = vmax.f32 %v19_v1, 0.0  ;;  %v209_v44 = vld [vmem:[%s321_s2] sm:$0x1]  ;;  %s270_s25 = smov [#allocation2]  }
   0x5   :  { %v25_v17 = vmul.f32 %v21_v12, %v19_v1  ;;  %vm62_vm0 = vcmask 130048   ;;  %v269_v33 = vmov 1.0   ;;  %v210_v45 = vld [vmem:[%s322_s3] sm:$0x1]  ;;  %s220_s26 = sshll.u32 %s270_s25, 4  ;;  %s222_s29 = sshll.u32 %s323_s4, 4  ;;  %s221_s26 = int_to_ptr.vmem [resolvable:$true] %s220_s26  ;;  %s223_s29 = int_to_ptr.hbm [resolvable:$true] %s222_s29 }
   0x6   :  { %v32_v6 = vmul.f32 1.442695, %v30_v4  ;;  %v34_v7 = vmul.f32 1.442695, %v31_v5  ;;  %v26_v18 = vsub.f32 %v22_v14, %v24_v15  ;;  %v211_v49 = vsub.f32 %v209_v44, %v210_v45 }
   0x7   :  { %v27_v20 = vsub.f32 %v23_v16, %v25_v17  ;;  %vm213_vm1 = vcmask 8192  }
   0x8   :  { %235 = vpow2.f32 %v32_v6 }
   0x9   :  { %237 = vpow2.f32 %v34_v7 }
   0xe   :  { %v236_v8 = vpop.eup %235 }
   0xf   :  { %v238_v9 = vpop.eup %237  ;;  %v36_v11 = vadd.f32 1.0, %v236_v8 }
  0x10   :  { %v37_v13 = vadd.f32 1.0, %v238_v9 }
  0x11   :  { %239 = vlog2.f32 %v36_v11 }
  0x12   :  { %241 = vlog2.f32 %v37_v13 }
  0x17   :  { %v240_v19 = vpop.eup %239 }
  0x18   :  { %v242_v21 = vpop.eup %241  ;;  %v39_v22 = vmul.f32 0.6931472, %v240_v19 }
  0x19   :  { %v41_v23 = vmul.f32 0.6931472, %v242_v21 }
  0x1a   :  { %v42_v24 = vadd.f32 %v39_v22, %v26_v18 }
  0x1b   :  { %v43_v25 = vadd.f32 %v41_v23, %v27_v20 }
  0x1c   :  { %46 = vst [vmem:[#allocation1] ss:$4 sm:$0xff] %v42_v24 }
  0x1d   :  { %48 = vst [vmem:[#allocation1 + $0x20] ss:$4 sm:$0xff] %v43_v25 }
  0x23   :  { %v51_v26 = vld.sshfl [vmem:[#allocation1 + $0x10] sm:$0xff pattern:$0x73625140]  ;;  %v49_v27 = vld.sshfl [vmem:[#allocation1] sm:$0xff pattern:$0x73625140] }
  0x24   :  { %123 = vmatpush.xpose.msra.mxu2 %v51_v26  ;;  %83 = vmatpush.xpose.msra.mxu0 %v49_v27  ;;  %v50_v28 = vld.sshfl [vmem:[#allocation1 + $0x8] sm:$0xff pattern:$0x73625140]  ;;  %v52_v29 = vld.sshfl [vmem:[#allocation1 + $0x18] sm:$0xff pattern:$0x73625140] }
  0x25   :  { %103 = vmatpush.xpose.msra.mxu1 %v50_v28  ;;  %143 = vmatpush.xpose.msra.mxu3 %v52_v29  ;;  %v55_v30 = vld.sshfl [vmem:[#allocation1 + $0x30] sm:$0xff pattern:$0x73625140]  ;;  %v53_v31 = vld.sshfl [vmem:[#allocation1 + $0x20] sm:$0xff pattern:$0x73625140] }
  0x26   :  { %v54_v32 = vld.sshfl [vmem:[#allocation1 + $0x28] sm:$0xff pattern:$0x73625140] }
  0x27   :  { %124 = vmatmul.f32.vlgmr.msra.gmra.mxu2 %v269_v33  ;;  %84 = vmatmul.f32.vlgmr.msra.gmra.mxu0 %v269_v33 }
  0x28   :  { %231 = vmatpush.xpose.msk.msrb.mxu2 %vm62_vm0, %v55_v30  ;;  %163 = vmatpush.xpose.msrb.mxu0 %v53_v31 }
  0x29   :  { %104 = vmatmul.f32.vlgmr.msra.gmra.mxu1 %v269_v33  ;;  %144 = vmatmul.f32.vlgmr.msra.gmra.mxu3 %v269_v33 }
  0x2a   :  { %183 = vmatpush.xpose.msrb.mxu1 %v54_v32 }
  0x2f   :  { %232 = vmatmul.msk.f32.vlgmr.msrb.gmra.mxu2 %vm62_vm0, %v269_v33  ;;  %164 = vmatmul.f32.vlgmr.msrb.gmra.mxu0 %v269_v33 }
  0x31   :  { %184 = vmatmul.f32.vlgmr.msrb.gmra.mxu1 %v269_v33 }
  0xa4   :  { %v85_v34 = vpop.f32.mrf.mxu0 }
  0xa6   :  { %v105_v35 = vpop.f32.mrf.mxu1 }
  0xa7   :  { %v106_v36 = vadd.f32 %v105_v35, %v85_v34 }
  0xaa   :  { %v125_v37 = vpop.f32.mrf.mxu2 }
  0xab   :  { %v126_v38 = vadd.f32 %v125_v37, %v106_v36 }
  0xac   :  { %v145_v39 = vpop.f32.mrf.mxu3  ;;  %v165_v40 = vpop.f32.mrf.mxu0 }
  0xad   :  { %v146_v41 = vadd.f32 %v145_v39, %v126_v38 }
  0xae   :  { %v185_v42 = vpop.f32.mrf.mxu1 }
  0xaf   :  { %v166_v43 = vadd.f32 %v165_v40, %v146_v41 }
  0xb1   :  { %v186_v46 = vadd.f32 %v185_v42, %v166_v43 }
  0xb2   :  { %v205_v47 = vpop.f32.mrf.mxu2 }
  0xb3   :  { %v206_v48 = vadd.f32 %v205_v47, %v186_v46 }
  0xb5   :  { %v208_v50 = vsub.f32 0.0, %v206_v48 }
  0xb7   :  { %v212_v51 = vsub.f32 %v211_v49, %v208_v50 }
  0xb9   :  { %214 = vst.msk [vmem:[#allocation2] sm:$0x1] %vm213_vm1, %v212_v51 }
  0xba   :  { %225 = dma.vmem_to_hbm [thread:$0]  %s221_s26, 16, %s223_s29, [#allocation3]  }
  0xbb   :  { %267 = dma.done.wait [#allocation3], 16  }
  0xbc   :  { %268 = vsyncadd [#allocation3], 4294967280 }
  0xbd   :  { %230 = vsyncpa [#allocation3], 1 }

</bundles_post_ra>
